<compile_context>
chip_gen: v7x
topology: tpu7x:2x2x1
jax: 0.10.0
libtpu: 0.0.40
codegen_flags: <defaults>
</compile_context>

<pallas_src>
import jax
import jax.numpy as jnp
import numpy as np
from jax import lax
from jax.experimental import pallas as pl
from jax.experimental.pallas import tpu as pltpu


_TAPS9 = [(dy, dx) for dy in (-1, 0, 1) for dx in (-1, 0, 1)]
_TAPS8 = [t for t in _TAPS9 if t != (0, 0)]          # MRF taps (centre dropped: zero weights)
_T8_IDX = {t: i for i, t in enumerate(_TAPS8)}


def _make_kernel(H, Wd, Cin, K, F, L, num_iter, w_mix, leaky_slope):
    """Per-grid-step kernel. L = batch_tile * H * W (batch folded into the lane axis)."""
    f32 = jnp.float32
    shifts8 = [dy * Wd + dx for dy, dx in _TAPS8]

    def roll_lanes(x, s):
        # y[:, i] = x[:, (i + s) mod L]; out-of-image wraps are killed by the edge masks.
        return x if s == 0 else pltpu.roll(x, (-s) % L, axis=1)

    def kernel(img_ref, mask_ref, wu_ref, bu_ref, w1_ref, b1_ref, w2t_ref, b2_ref,
               out_ref, col_ref):
        img = img_ref[0].astype(f32)        # (Cin, L)   spatial(+batch) on lanes
        mask = mask_ref[...]                # (8K, L)    precomputed edge-mask slab
        wu = wu_ref[...]                    # (K, 9*Cin) UNet stand-in conv, tap-major
        bu = bu_ref[...]                    # (K, 1)
        w1 = w1_ref[...]                    # (F, 8*K)   MRF 3x3 conv, centre tap dropped
        b1 = b1_ref[...]                    # (F, 1)
        w2t = w2t_ref[...]                  # (K, F)     final 1x1 conv (transposed)
        b2 = b2_ref[...]                    # (K, 1)

        # ---- UNet stand-in: 3x3 conv (Cin -> K) as VPU broadcast FMAs (Cin is tiny; the
        # MXU would be ~0% utilised on a rank-Cin outer product).  Runs once, off the loop.
        logits = jnp.broadcast_to(bu, (K, L))
        for t9, (dy, dx) in enumerate(_TAPS9):
            sh = roll_lanes(img, dy * Wd + dx)
            if (dy, dx) != (0, 0):
                r = _T8_IDX[(dy, dx)] * K
                sh = sh * mask[r:r + 1, :]  # reuse one row of the mask slab for this tap
            for c in range(Cin):
                j = t9 * Cin + c
                logits = logits + wu[:, j:j + 1] * sh[c:c + 1, :]

        # log-softmax over the (small, sublane) class axis
        m = jnp.max(logits, axis=0, keepdims=True)
        lse = m + jnp.log(jnp.sum(jnp.exp(logits - m), axis=0, keepdims=True))
        ll = logits - lse                   # (K, L)

        # Hoisted bias broadcasts, reused by every mean-field iteration.
        b1_b = jnp.broadcast_to(b1, (F, L))
        b2_b = jnp.broadcast_to(b2, (K, L))

        p = jnp.full((K, L), 1.0 / K, f32)

        # num_iter is a compile-time constant: fully unrolled (carried value + ref writes).
        for _ in range(num_iter):
            # im2col into the persistent VMEM scratch: 8 lane-rolls of p stored at static
            # sublane offsets, one fused mask multiply, one MXU contraction over 8*K = 32.
            for t8, s in enumerate(shifts8):
                col_ref[t8 * K:(t8 + 1) * K, :] = roll_lanes(p, s)
            col = col_ref[...] * mask                                           # (8K, L)
            # TODO(synk): cast w1/w2t/col to bf16 (preferred_element_type=f32) on v6e/v7x
            # to halve MXU operand bytes once accuracy budget allows.
            h = jnp.dot(w1, col, preferred_element_type=f32) + b1_b             # (F, L)
            h = jnp.maximum(h, leaky_slope * h)                                 # LeakyReLU
            mrf = jnp.dot(w2t, h, preferred_element_type=f32) + b2_b            # (K, L)
            z = ll + mrf
            zm = jnp.max(z, axis=0, keepdims=True)
            e = jnp.exp(z - zm)
            inv = pl.reciprocal(jnp.sum(e, axis=0, keepdims=True), approx=True)
            pnew = e * inv                                                      # softmax
            p = pnew if w_mix == 1.0 else w_mix * pnew + (1.0 - w_mix) * p

        # Exact renormalisation of the final probabilities (approx-reciprocal drift fix).
        p = p / jnp.sum(p, axis=0, keepdims=True)
        out_ref[0] = p                      # lane-dense (K, L) output block

    return kernel


def segmrf_forward(image_nchw, params, *, num_iter=10, w=1.0, batch_tile=None):
    """SegMRFNet forward (inference). image_nchw: (B, Cin, H, W) -> (B, K, H, W) probs."""
    wu, bu, w1, b1, w2, b2 = params
    B, Cin, H, Wd = image_nchw.shape
    F, K = w2.shape
    HW = H * Wd

    if batch_tile is None:
        # Single-TC chips (v5e/v6e): fold the whole batch into lanes when images are small,
        # so one wide grid step replaces a serial batch loop.  On v7x with B >= 2 and large
        # images, pass batch_tile=1 so the "parallel" batch axis feeds both TensorCores.
        batch_tile = B if HW < 512 else 1
    assert B % batch_tile == 0, "batch must be divisible by batch_tile"
    G = B // batch_tile
    L = batch_tile * HW
    assert L % 128 == 0, "flattened lane width must be a multiple of 128"

    # Lane-dense input: channels on sublanes, (batch_tile * spatial) on lanes.
    img = (image_nchw.reshape(G, batch_tile, Cin, HW)
           .transpose(0, 2, 1, 3).reshape(G, Cin, L).astype(jnp.float32))

    # Pre-flattened, matmul-ready weights (done once, outside the kernel).
    wu2 = jnp.transpose(wu, (3, 0, 1, 2)).reshape(K, 9 * Cin)     # (K, tap*Cin)
    bu2 = bu.reshape(K, 1)
    w1t = jnp.transpose(w1, (3, 0, 1, 2)).reshape(F, 9, K)        # (F, tap, K)
    # Drop the centre tap: its weights are structurally zero under the MRF constraint.
    w1f = jnp.concatenate([w1t[:, :4, :], w1t[:, 5:, :]], axis=1).reshape(F, 8 * K)
    b1c = b1.reshape(F, 1)
    w2t = jnp.transpose(w2, (1, 0))                               # (K, F)
    b2c = b2.reshape(K, 1)

    # Precomputed edge-mask slab (K identical rows per tap, matching col's row order);
    # hoisted out of the kernel entirely (no per-step iota/compare/select work).
    lane = np.arange(L)
    pos = lane % HW
    hrow, wcol = pos // Wd, pos % Wd
    mask8 = np.stack([((hrow + dy >= 0) & (hrow + dy < H)
                       & (wcol + dx >= 0) & (wcol + dx < Wd)).astype(np.float32)
                      for dy, dx in _TAPS8], axis=0)              # (8, L)
    mask = jnp.asarray(np.repeat(mask8, K, axis=0))               # (8K, L)

    kernel = _make_kernel(H, Wd, Cin, K, F, L, int(num_iter), float(w), 0.2)

    out = pl.pallas_call(
        kernel,
        out_shape=jax.ShapeDtypeStruct((G, K, L), jnp.float32),
        grid=(G,),
        in_specs=[
            pl.BlockSpec((1, Cin, L), lambda g: (g, 0, 0)),
            pl.BlockSpec(mask.shape, lambda g: (0, 0)),
            pl.BlockSpec(wu2.shape, lambda g: (0, 0)),
            pl.BlockSpec(bu2.shape, lambda g: (0, 0)),
            pl.BlockSpec(w1f.shape, lambda g: (0, 0)),
            pl.BlockSpec(b1c.shape, lambda g: (0, 0)),
            pl.BlockSpec(w2t.shape, lambda g: (0, 0)),
            pl.BlockSpec(b2c.shape, lambda g: (0, 0)),
        ],
        out_specs=pl.BlockSpec((1, K, L), lambda g: (g, 0, 0)),
        scratch_shapes=[pltpu.VMEM((8 * K, L), jnp.float32)],     # persistent im2col slab
        compiler_params=pltpu.CompilerParams(
            dimension_semantics=("parallel",),
            # Tiny footprint at these shapes; re-derive (spatial tiling / lower unroll)
            # before raising this for large H*W on v7x (64 MiB physical VMEM).
            vmem_limit_bytes=32 * 1024 * 1024,
        ),
    )(img, mask, wu2, bu2, w1f, b1c, w2t, b2c)

    # Unpack lanes back to (B, K, H, W).
    out = out.reshape(G, K, batch_tile, H, Wd).transpose(0, 2, 1, 3, 4)
    return out.reshape(B, K, H, Wd)


def ref_forward(image_nchw, params, *, num_iter=10, w=1.0):
    """Pure-JAX reference (NCHW, mirrors the PyTorch semantics)."""
    wu, bu, w1, b1, w2, b2 = params
    K = w2.shape[1]

    def conv(x, wk, bk):
        wt = jnp.transpose(wk, (3, 2, 0, 1))  # (Cout, Cin, 3, 3)
        y = lax.conv_general_dilated(x, wt, (1, 1), 'SAME',
                                     dimension_numbers=('NCHW', 'OIHW', 'NCHW'))
        return y + bk[0].reshape(1, -1, 1, 1)

    logits = conv(image_nchw.astype(jnp.float32), wu, bu)
    ll = logits - jax.nn.logsumexp(logits, axis=1, keepdims=True)
    p = jnp.full_like(ll, 1.0 / K)
    for _ in range(num_iter):
        h = conv(p, w1, b1)
        h = jnp.where(h > 0, h, 0.2 * h)
        mrf = jnp.einsum('bfhw,fk->bkhw', h, w2) + b2[0].reshape(1, -1, 1, 1)
        pnew = jax.nn.softmax(ll + mrf, axis=1)
        p = w * pnew + (1 - w) * p
    return p


if __name__ == "__main__":
    # Small deterministic config: dim=2, output_classes K=4, input_channels=1
    B, Cin, H, Wd = 2, 1, 16, 16
    K = 4
    F = min(K * K, 64)                 # MRFNet.get_num_filters()
    NUM_ITER = 10                      # num_iter (inference mode -> fixed count)
    W_MIX = 1.0                        # w

    key = jax.random.PRNGKey(0)
    ks = jax.random.split(key, 7)
    image = jax.random.normal(ks[0], (B, Cin, H, Wd), jnp.float32)

    wu = 0.1 * jax.random.normal(ks[1], (3, 3, Cin, K), jnp.float32)   # UNet stand-in
    bu = 0.1 * jax.random.normal(ks[2], (1, K), jnp.float32)
    w1 = 0.1 * jax.random.normal(ks[3], (3, 3, K, F), jnp.float32)     # MRF 3x3 conv
    w1 = w1.at[1, 1, :, :].set(0.0)    # MRF constraint: central filter weights are zero
    b1 = 0.1 * jax.random.normal(ks[4], (1, F), jnp.float32)
    w2 = 0.1 * jax.random.normal(ks[5], (F, K), jnp.float32)           # final 1x1 conv
    b2 = 0.1 * jax.random.normal(ks[6], (1, K), jnp.float32)
    params = (wu, bu, w1, b1, w2, b2)

    out = segmrf_forward(image, params, num_iter=NUM_ITER, w=W_MIX)
    out = jax.block_until_ready(out)
    assert out.shape == (B, K, H, Wd)

    ref = ref_forward(image, params, num_iter=NUM_ITER, w=W_MIX)
    np.testing.assert_allclose(np.asarray(out), np.asarray(ref), atol=3e-3, rtol=2e-2)

    print("KERNEL_OK")
</pallas_src>

<mosaic_0001>
module attributes {stable_mosaic.version = 11 : i64} {
  func.func @kernel(%arg0: i32, %arg1: memref<1x1x512xf32, #tpu.memory_space<vmem>>, %arg2: memref<32x512xf32, #tpu.memory_space<vmem>>, %arg3: memref<4x9xf32, #tpu.memory_space<vmem>>, %arg4: memref<4x1xf32, #tpu.memory_space<vmem>>, %arg5: memref<16x32xf32, #tpu.memory_space<vmem>>, %arg6: memref<16x1xf32, #tpu.memory_space<vmem>>, %arg7: memref<4x16xf32, #tpu.memory_space<vmem>>, %arg8: memref<4x1xf32, #tpu.memory_space<vmem>>, %arg9: memref<1x4x512xf32, #tpu.memory_space<vmem>>, %arg10: memref<32x512xf32, #tpu.memory_space<vmem>>) attributes {dimension_semantics = [#tpu.dimension_semantics<parallel>], iteration_bounds = array<i64: 1>, scalar_prefetch = 0 : i64, scratch_operands = 1 : i64, tpu.core_type = #tpu.core_type<tc>, window_params = [{transform_indices = @transform_0, window_bounds = array<i64: 1, 1, 512>}, {pipeline_mode = #tpu.pipeline_mode<synchronous>, transform_indices = @transform_1, window_bounds = array<i64: 32, 512>}, {pipeline_mode = #tpu.pipeline_mode<synchronous>, transform_indices = @transform_2, window_bounds = array<i64: 4, 9>}, {pipeline_mode = #tpu.pipeline_mode<synchronous>, transform_indices = @transform_3, window_bounds = array<i64: 4, 1>}, {pipeline_mode = #tpu.pipeline_mode<synchronous>, transform_indices = @transform_4, window_bounds = array<i64: 16, 32>}, {pipeline_mode = #tpu.pipeline_mode<synchronous>, transform_indices = @transform_5, window_bounds = array<i64: 16, 1>}, {pipeline_mode = #tpu.pipeline_mode<synchronous>, transform_indices = @transform_6, window_bounds = array<i64: 4, 16>}, {pipeline_mode = #tpu.pipeline_mode<synchronous>, transform_indices = @transform_7, window_bounds = array<i64: 4, 1>}, {transform_indices = @transform_8, window_bounds = array<i64: 1, 4, 512>}]} {
    %c0 = arith.constant 0 : index
    %c0_0 = arith.constant 0 : index
    %c0_1 = arith.constant 0 : index
    %0 = vector.load %arg1[%c0, %c0_0, %c0_1] : memref<1x1x512xf32, #tpu.memory_space<vmem>>, vector<1x1x512xf32>
    %1 = vector.shape_cast %0 : vector<1x1x512xf32> to vector<1x512xf32>
    %c0_2 = arith.constant 0 : index
    %c0_3 = arith.constant 0 : index
    %2 = vector.load %arg2[%c0_2, %c0_3] : memref<32x512xf32, #tpu.memory_space<vmem>>, vector<32x512xf32>
    %c0_4 = arith.constant 0 : index
    %c0_5 = arith.constant 0 : index
    %3 = vector.load %arg3[%c0_4, %c0_5] : memref<4x9xf32, #tpu.memory_space<vmem>>, vector<4x9xf32>
    %c0_6 = arith.constant 0 : index
    %c0_7 = arith.constant 0 : index
    %4 = vector.load %arg4[%c0_6, %c0_7] : memref<4x1xf32, #tpu.memory_space<vmem>>, vector<4x1xf32>
    %c0_8 = arith.constant 0 : index
    %c0_9 = arith.constant 0 : index
    %5 = vector.load %arg5[%c0_8, %c0_9] : memref<16x32xf32, #tpu.memory_space<vmem>>, vector<16x32xf32>
    %c0_10 = arith.constant 0 : index
    %c0_11 = arith.constant 0 : index
    %6 = vector.load %arg6[%c0_10, %c0_11] : memref<16x1xf32, #tpu.memory_space<vmem>>, vector<16x1xf32>
    %c0_12 = arith.constant 0 : index
    %c0_13 = arith.constant 0 : index
    %7 = vector.load %arg7[%c0_12, %c0_13] : memref<4x16xf32, #tpu.memory_space<vmem>>, vector<4x16xf32>
    %c0_14 = arith.constant 0 : index
    %c0_15 = arith.constant 0 : index
    %8 = vector.load %arg8[%c0_14, %c0_15] : memref<4x1xf32, #tpu.memory_space<vmem>>, vector<4x1xf32>
    %9 = vector.shape_cast %4 : vector<4x1xf32> to vector<4x1xf32>
    %10 = vector.broadcast %9 : vector<4x1xf32> to vector<4x512xf32>
    %c17_i32 = arith.constant 17 : i32
    %11 = tpu.dynamic_rotate %1 by %c17_i32 dim 1 : vector<1x512xf32>, i32 -> vector<1x512xf32>
    %12 = vector.extract_strided_slice %2 {offsets = [0, 0], sizes = [1, 512], strides = [1, 1]} : vector<32x512xf32> to vector<1x512xf32>
    %13 = arith.mulf %11, %12 : vector<1x512xf32>
    %14 = vector.extract_strided_slice %3 {offsets = [0, 0], sizes = [4, 1], strides = [1, 1]} : vector<4x9xf32> to vector<4x1xf32>
    %15 = vector.broadcast %14 : vector<4x1xf32> to vector<4x512xf32>
    %16 = vector.broadcast %13 : vector<1x512xf32> to vector<4x512xf32>
    %17 = arith.mulf %15, %16 : vector<4x512xf32>
    %18 = arith.addf %10, %17 : vector<4x512xf32>
    %c16_i32 = arith.constant 16 : i32
    %19 = tpu.dynamic_rotate %1 by %c16_i32 dim 1 : vector<1x512xf32>, i32 -> vector<1x512xf32>
    %20 = vector.extract_strided_slice %2 {offsets = [4, 0], sizes = [1, 512], strides = [1, 1]} : vector<32x512xf32> to vector<1x512xf32>
    %21 = arith.mulf %19, %20 : vector<1x512xf32>
    %22 = vector.extract_strided_slice %3 {offsets = [0, 1], sizes = [4, 1], strides = [1, 1]} : vector<4x9xf32> to vector<4x1xf32>
    %23 = vector.broadcast %22 : vector<4x1xf32> to vector<4x512xf32>
    %24 = vector.broadcast %21 : vector<1x512xf32> to vector<4x512xf32>
    %25 = arith.mulf %23, %24 : vector<4x512xf32>
    %26 = arith.addf %18, %25 : vector<4x512xf32>
    %c15_i32 = arith.constant 15 : i32
    %27 = tpu.dynamic_rotate %1 by %c15_i32 dim 1 : vector<1x512xf32>, i32 -> vector<1x512xf32>
    %28 = vector.extract_strided_slice %2 {offsets = [8, 0], sizes = [1, 512], strides = [1, 1]} : vector<32x512xf32> to vector<1x512xf32>
    %29 = arith.mulf %27, %28 : vector<1x512xf32>
    %30 = vector.extract_strided_slice %3 {offsets = [0, 2], sizes = [4, 1], strides = [1, 1]} : vector<4x9xf32> to vector<4x1xf32>
    %31 = vector.broadcast %30 : vector<4x1xf32> to vector<4x512xf32>
    %32 = vector.broadcast %29 : vector<1x512xf32> to vector<4x512xf32>
    %33 = arith.mulf %31, %32 : vector<4x512xf32>
    %34 = arith.addf %26, %33 : vector<4x512xf32>
    %c1_i32 = arith.constant 1 : i32
    %35 = tpu.dynamic_rotate %1 by %c1_i32 dim 1 : vector<1x512xf32>, i32 -> vector<1x512xf32>
    %36 = vector.extract_strided_slice %2 {offsets = [12, 0], sizes = [1, 512], strides = [1, 1]} : vector<32x512xf32> to vector<1x512xf32>
    %37 = arith.mulf %35, %36 : vector<1x512xf32>
    %38 = vector.extract_strided_slice %3 {offsets = [0, 3], sizes = [4, 1], strides = [1, 1]} : vector<4x9xf32> to vector<4x1xf32>
    %39 = vector.broadcast %38 : vector<4x1xf32> to vector<4x512xf32>
    %40 = vector.broadcast %37 : vector<1x512xf32> to vector<4x512xf32>
    %41 = arith.mulf %39, %40 : vector<4x512xf32>
    %42 = arith.addf %34, %41 : vector<4x512xf32>
    %43 = vector.extract_strided_slice %3 {offsets = [0, 4], sizes = [4, 1], strides = [1, 1]} : vector<4x9xf32> to vector<4x1xf32>
    %44 = vector.broadcast %43 : vector<4x1xf32> to vector<4x512xf32>
    %45 = vector.broadcast %1 : vector<1x512xf32> to vector<4x512xf32>
    %46 = arith.mulf %44, %45 : vector<4x512xf32>
    %47 = arith.addf %42, %46 : vector<4x512xf32>
    %c511_i32 = arith.constant 511 : i32
    %48 = tpu.dynamic_rotate %1 by %c511_i32 dim 1 : vector<1x512xf32>, i32 -> vector<1x512xf32>
    %49 = vector.extract_strided_slice %2 {offsets = [16, 0], sizes = [1, 512], strides = [1, 1]} : vector<32x512xf32> to vector<1x512xf32>
    %50 = arith.mulf %48, %49 : vector<1x512xf32>
    %51 = vector.extract_strided_slice %3 {offsets = [0, 5], sizes = [4, 1], strides = [1, 1]} : vector<4x9xf32> to vector<4x1xf32>
    %52 = vector.broadcast %51 : vector<4x1xf32> to vector<4x512xf32>
    %53 = vector.broadcast %50 : vector<1x512xf32> to vector<4x512xf32>
    %54 = arith.mulf %52, %53 : vector<4x512xf32>
    %55 = arith.addf %47, %54 : vector<4x512xf32>
    %c497_i32 = arith.constant 497 : i32
    %56 = tpu.dynamic_rotate %1 by %c497_i32 dim 1 : vector<1x512xf32>, i32 -> vector<1x512xf32>
    %57 = vector.extract_strided_slice %2 {offsets = [20, 0], sizes = [1, 512], strides = [1, 1]} : vector<32x512xf32> to vector<1x512xf32>
    %58 = arith.mulf %56, %57 : vector<1x512xf32>
    %59 = vector.extract_strided_slice %3 {offsets = [0, 6], sizes = [4, 1], strides = [1, 1]} : vector<4x9xf32> to vector<4x1xf32>
    %60 = vector.broadcast %59 : vector<4x1xf32> to vector<4x512xf32>
    %61 = vector.broadcast %58 : vector<1x512xf32> to vector<4x512xf32>
    %62 = arith.mulf %60, %61 : vector<4x512xf32>
    %63 = arith.addf %55, %62 : vector<4x512xf32>
    %c496_i32 = arith.constant 496 : i32
    %64 = tpu.dynamic_rotate %1 by %c496_i32 dim 1 : vector<1x512xf32>, i32 -> vector<1x512xf32>
    %65 = vector.extract_strided_slice %2 {offsets = [24, 0], sizes = [1, 512], strides = [1, 1]} : vector<32x512xf32> to vector<1x512xf32>
    %66 = arith.mulf %64, %65 : vector<1x512xf32>
    %67 = vector.extract_strided_slice %3 {offsets = [0, 7], sizes = [4, 1], strides = [1, 1]} : vector<4x9xf32> to vector<4x1xf32>
    %68 = vector.broadcast %67 : vector<4x1xf32> to vector<4x512xf32>
    %69 = vector.broadcast %66 : vector<1x512xf32> to vector<4x512xf32>
    %70 = arith.mulf %68, %69 : vector<4x512xf32>
    %71 = arith.addf %63, %70 : vector<4x512xf32>
    %c495_i32 = arith.constant 495 : i32
    %72 = tpu.dynamic_rotate %1 by %c495_i32 dim 1 : vector<1x512xf32>, i32 -> vector<1x512xf32>
    %73 = vector.extract_strided_slice %2 {offsets = [28, 0], sizes = [1, 512], strides = [1, 1]} : vector<32x512xf32> to vector<1x512xf32>
    %74 = arith.mulf %72, %73 : vector<1x512xf32>
    %75 = vector.extract_strided_slice %3 {offsets = [0, 8], sizes = [4, 1], strides = [1, 1]} : vector<4x9xf32> to vector<4x1xf32>
    %76 = vector.broadcast %75 : vector<4x1xf32> to vector<4x512xf32>
    %77 = vector.broadcast %74 : vector<1x512xf32> to vector<4x512xf32>
    %78 = arith.mulf %76, %77 : vector<4x512xf32>
    %79 = arith.addf %71, %78 : vector<4x512xf32>
    %cst = arith.constant dense<0xFF800000> : vector<512xf32>
    %80 = vector.multi_reduction <maximumf>, %79, %cst [0] : vector<4x512xf32> to vector<512xf32>
    %81 = vector.shape_cast %80 : vector<512xf32> to vector<1x512xf32>
    %82 = vector.broadcast %81 : vector<1x512xf32> to vector<4x512xf32>
    %83 = arith.subf %79, %82 : vector<4x512xf32>
    %84 = math.exp %83 : vector<4x512xf32>
    %cst_16 = arith.constant dense<0.000000e+00> : vector<512xf32>
    %85 = vector.multi_reduction <add>, %84, %cst_16 [0] : vector<4x512xf32> to vector<512xf32>
    %86 = vector.shape_cast %85 : vector<512xf32> to vector<1x512xf32>
    %87 = math.log %86 : vector<1x512xf32>
    %88 = arith.addf %81, %87 : vector<1x512xf32>
    %89 = vector.broadcast %88 : vector<1x512xf32> to vector<4x512xf32>
    %90 = arith.subf %79, %89 : vector<4x512xf32>
    %91 = vector.shape_cast %6 : vector<16x1xf32> to vector<16x1xf32>
    %92 = vector.broadcast %91 : vector<16x1xf32> to vector<16x512xf32>
    %93 = vector.shape_cast %8 : vector<4x1xf32> to vector<4x1xf32>
    %94 = vector.broadcast %93 : vector<4x1xf32> to vector<4x512xf32>
    %cst_17 = arith.constant 2.500000e-01 : f32
    %95 = vector.broadcast %cst_17 : f32 to vector<4x512xf32>
    %c17_i32_18 = arith.constant 17 : i32
    %96 = tpu.dynamic_rotate %95 by %c17_i32_18 dim 1 : vector<4x512xf32>, i32 -> vector<4x512xf32>
    %c0_19 = arith.constant 0 : index
    %c0_20 = arith.constant 0 : index
    %97 = vector.load %arg10[%c0_19, %c0_20] : memref<32x512xf32, #tpu.memory_space<vmem>>, vector<4x512xf32>
    tpu.vector_store %arg10[%c0_19, %c0_20], %96 {strides = array<i32>} : memref<32x512xf32, #tpu.memory_space<vmem>>, vector<4x512xf32>,
    %c16_i32_21 = arith.constant 16 : i32
    %98 = tpu.dynamic_rotate %95 by %c16_i32_21 dim 1 : vector<4x512xf32>, i32 -> vector<4x512xf32>
    %c4 = arith.constant 4 : index
    %c0_22 = arith.constant 0 : index
    %99 = vector.load %arg10[%c4, %c0_22] : memref<32x512xf32, #tpu.memory_space<vmem>>, vector<4x512xf32>
    tpu.vector_store %arg10[%c4, %c0_22], %98 {strides = array<i32>} : memref<32x512xf32, #tpu.memory_space<vmem>>, vector<4x512xf32>,
    %c15_i32_23 = arith.constant 15 : i32
    %100 = tpu.dynamic_rotate %95 by %c15_i32_23 dim 1 : vector<4x512xf32>, i32 -> vector<4x512xf32>
    %c8 = arith.constant 8 : index
    %c0_24 = arith.constant 0 : index
    %101 = vector.load %arg10[%c8, %c0_24] : memref<32x512xf32, #tpu.memory_space<vmem>>, vector<4x512xf32>
    tpu.vector_store %arg10[%c8, %c0_24], %100 {strides = array<i32>} : memref<32x512xf32, #tpu.memory_space<vmem>>, vector<4x512xf32>,
    %c1_i32_25 = arith.constant 1 : i32
    %102 = tpu.dynamic_rotate %95 by %c1_i32_25 dim 1 : vector<4x512xf32>, i32 -> vector<4x512xf32>
    %c12 = arith.constant 12 : index
    %c0_26 = arith.constant 0 : index
    %103 = vector.load %arg10[%c12, %c0_26] : memref<32x512xf32, #tpu.memory_space<vmem>>, vector<4x512xf32>
    tpu.vector_store %arg10[%c12, %c0_26], %102 {strides = array<i32>} : memref<32x512xf32, #tpu.memory_space<vmem>>, vector<4x512xf32>,
    %c511_i32_27 = arith.constant 511 : i32
    %104 = tpu.dynamic_rotate %95 by %c511_i32_27 dim 1 : vector<4x512xf32>, i32 -> vector<4x512xf32>
    %c16 = arith.constant 16 : index
    %c0_28 = arith.constant 0 : index
    %105 = vector.load %arg10[%c16, %c0_28] : memref<32x512xf32, #tpu.memory_space<vmem>>, vector<4x512xf32>
    tpu.vector_store %arg10[%c16, %c0_28], %104 {strides = array<i32>} : memref<32x512xf32, #tpu.memory_space<vmem>>, vector<4x512xf32>,
    %c497_i32_29 = arith.constant 497 : i32
    %106 = tpu.dynamic_rotate %95 by %c497_i32_29 dim 1 : vector<4x512xf32>, i32 -> vector<4x512xf32>
    %c20 = arith.constant 20 : index
    %c0_30 = arith.constant 0 : index
    %107 = vector.load %arg10[%c20, %c0_30] : memref<32x512xf32, #tpu.memory_space<vmem>>, vector<4x512xf32>
    tpu.vector_store %arg10[%c20, %c0_30], %106 {strides = array<i32>} : memref<32x512xf32, #tpu.memory_space<vmem>>, vector<4x512xf32>,
    %c496_i32_31 = arith.constant 496 : i32
    %108 = tpu.dynamic_rotate %95 by %c496_i32_31 dim 1 : vector<4x512xf32>, i32 -> vector<4x512xf32>
    %c24 = arith.constant 24 : index
    %c0_32 = arith.constant 0 : index
    %109 = vector.load %arg10[%c24, %c0_32] : memref<32x512xf32, #tpu.memory_space<vmem>>, vector<4x512xf32>
    tpu.vector_store %arg10[%c24, %c0_32], %108 {strides = array<i32>} : memref<32x512xf32, #tpu.memory_space<vmem>>, vector<4x512xf32>,
    %c495_i32_33 = arith.constant 495 : i32
    %110 = tpu.dynamic_rotate %95 by %c495_i32_33 dim 1 : vector<4x512xf32>, i32 -> vector<4x512xf32>
    %c28 = arith.constant 28 : index
    %c0_34 = arith.constant 0 : index
    %111 = vector.load %arg10[%c28, %c0_34] : memref<32x512xf32, #tpu.memory_space<vmem>>, vector<4x512xf32>
    tpu.vector_store %arg10[%c28, %c0_34], %110 {strides = array<i32>} : memref<32x512xf32, #tpu.memory_space<vmem>>, vector<4x512xf32>,
    %c0_35 = arith.constant 0 : index
    %c0_36 = arith.constant 0 : index
    %112 = vector.load %arg10[%c0_35, %c0_36] : memref<32x512xf32, #tpu.memory_space<vmem>>, vector<32x512xf32>
    %113 = arith.mulf %112, %2 : vector<32x512xf32>
    %cst_37 = arith.constant dense<0.000000e+00> : vector<16x512xf32>
    %114 = tpu.matmul %5, %113, %cst_37 {dimension_numbers = #tpu.dot_dimension_numbers<[1], [0], [0], [1], [0, 0, 1, 1], [], []>} : vector<16x32xf32>, vector<32x512xf32>, vector<16x512xf32> -> vector<16x512xf32>
    %115 = arith.addf %114, %92 : vector<16x512xf32>
    %cst_38 = arith.constant 2.000000e-01 : f32
    %116 = vector.broadcast %cst_38 : f32 to vector<16x512xf32>
    %117 = arith.mulf %116, %115 : vector<16x512xf32>
    %118 = arith.maximumf %115, %117 : vector<16x512xf32>
    %cst_39 = arith.constant dense<0.000000e+00> : vector<4x512xf32>
    %119 = tpu.matmul %7, %118, %cst_39 {dimension_numbers = #tpu.dot_dimension_numbers<[1], [0], [0], [1], [0, 0, 1, 1], [], []>} : vector<4x16xf32>, vector<16x512xf32>, vector<4x512xf32> -> vector<4x512xf32>
    %120 = arith.addf %119, %94 : vector<4x512xf32>
    %121 = arith.addf %90, %120 : vector<4x512xf32>
    %cst_40 = arith.constant dense<0xFF800000> : vector<512xf32>
    %122 = vector.multi_reduction <maximumf>, %121, %cst_40 [0] : vector<4x512xf32> to vector<512xf32>
    %123 = vector.shape_cast %122 : vector<512xf32> to vector<1x512xf32>
    %124 = vector.broadcast %123 : vector<1x512xf32> to vector<4x512xf32>
    %125 = arith.subf %121, %124 : vector<4x512xf32>
    %126 = math.exp %125 : vector<4x512xf32>
    %cst_41 = arith.constant dense<0.000000e+00> : vector<512xf32>
    %127 = vector.multi_reduction <add>, %126, %cst_41 [0] : vector<4x512xf32> to vector<512xf32>
    %128 = vector.shape_cast %127 : vector<512xf32> to vector<1x512xf32>
    %129 = tpu.reciprocal %128 {approx = true} : vector<1x512xf32> -> vector<1x512xf32>
    %130 = vector.broadcast %129 : vector<1x512xf32> to vector<4x512xf32>
    %131 = arith.mulf %126, %130 : vector<4x512xf32>
    %c17_i32_42 = arith.constant 17 : i32
    %132 = tpu.dynamic_rotate %131 by %c17_i32_42 dim 1 : vector<4x512xf32>, i32 -> vector<4x512xf32>
    %c0_43 = arith.constant 0 : index
    %c0_44 = arith.constant 0 : index
    %133 = vector.load %arg10[%c0_43, %c0_44] : memref<32x512xf32, #tpu.memory_space<vmem>>, vector<4x512xf32>
    tpu.vector_store %arg10[%c0_43, %c0_44], %132 {strides = array<i32>} : memref<32x512xf32, #tpu.memory_space<vmem>>, vector<4x512xf32>,
    %c16_i32_45 = arith.constant 16 : i32
    %134 = tpu.dynamic_rotate %131 by %c16_i32_45 dim 1 : vector<4x512xf32>, i32 -> vector<4x512xf32>
    %c4_46 = arith.constant 4 : index
    %c0_47 = arith.constant 0 : index
    %135 = vector.load %arg10[%c4_46, %c0_47] : memref<32x512xf32, #tpu.memory_space<vmem>>, vector<4x512xf32>
    tpu.vector_store %arg10[%c4_46, %c0_47], %134 {strides = array<i32>} : memref<32x512xf32, #tpu.memory_space<vmem>>, vector<4x512xf32>,
    %c15_i32_48 = arith.constant 15 : i32
    %136 = tpu.dynamic_rotate %131 by %c15_i32_48 dim 1 : vector<4x512xf32>, i32 -> vector<4x512xf32>
    %c8_49 = arith.constant 8 : index
    %c0_50 = arith.constant 0 : index
    %137 = vector.load %arg10[%c8_49, %c0_50] : memref<32x512xf32, #tpu.memory_space<vmem>>, vector<4x512xf32>
    tpu.vector_store %arg10[%c8_49, %c0_50], %136 {strides = array<i32>} : memref<32x512xf32, #tpu.memory_space<vmem>>, vector<4x512xf32>,
    %c1_i32_51 = arith.constant 1 : i32
    %138 = tpu.dynamic_rotate %131 by %c1_i32_51 dim 1 : vector<4x512xf32>, i32 -> vector<4x512xf32>
    %c12_52 = arith.constant 12 : index
    %c0_53 = arith.constant 0 : index
    %139 = vector.load %arg10[%c12_52, %c0_53] : memref<32x512xf32, #tpu.memory_space<vmem>>, vector<4x512xf32>
    tpu.vector_store %arg10[%c12_52, %c0_53], %138 {strides = array<i32>} : memref<32x512xf32, #tpu.memory_space<vmem>>, vector<4x512xf32>,
    %c511_i32_54 = arith.constant 511 : i32
    %140 = tpu.dynamic_rotate %131 by %c511_i32_54 dim 1 : vector<4x512xf32>, i32 -> vector<4x512xf32>
    %c16_55 = arith.constant 16 : index
    %c0_56 = arith.constant 0 : index
    %141 = vector.load %arg10[%c16_55, %c0_56] : memref<32x512xf32, #tpu.memory_space<vmem>>, vector<4x512xf32>
    tpu.vector_store %arg10[%c16_55, %c0_56], %140 {strides = array<i32>} : memref<32x512xf32, #tpu.memory_space<vmem>>, vector<4x512xf32>,
    %c497_i32_57 = arith.constant 497 : i32
    %142 = tpu.dynamic_rotate %131 by %c497_i32_57 dim 1 : vector<4x512xf32>, i32 -> vector<4x512xf32>
    %c20_58 = arith.constant 20 : index
    %c0_59 = arith.constant 0 : index
    %143 = vector.load %arg10[%c20_58, %c0_59] : memref<32x512xf32, #tpu.memory_space<vmem>>, vector<4x512xf32>
    tpu.vector_store %arg10[%c20_58, %c0_59], %142 {strides = array<i32>} : memref<32x512xf32, #tpu.memory_space<vmem>>, vector<4x512xf32>,
    %c496_i32_60 = arith.constant 496 : i32
    %144 = tpu.dynamic_rotate %131 by %c496_i32_60 dim 1 : vector<4x512xf32>, i32 -> vector<4x512xf32>
    %c24_61 = arith.constant 24 : index
    %c0_62 = arith.constant 0 : index
    %145 = vector.load %arg10[%c24_61, %c0_62] : memref<32x512xf32, #tpu.memory_space<vmem>>, vector<4x512xf32>
    tpu.vector_store %arg10[%c24_61, %c0_62], %144 {strides = array<i32>} : memref<32x512xf32, #tpu.memory_space<vmem>>, vector<4x512xf32>,
    %c495_i32_63 = arith.constant 495 : i32
    %146 = tpu.dynamic_rotate %131 by %c495_i32_63 dim 1 : vector<4x512xf32>, i32 -> vector<4x512xf32>
    %c28_64 = arith.constant 28 : index
    %c0_65 = arith.constant 0 : index
    %147 = vector.load %arg10[%c28_64, %c0_65] : memref<32x512xf32, #tpu.memory_space<vmem>>, vector<4x512xf32>
    tpu.vector_store %arg10[%c28_64, %c0_65], %146 {strides = array<i32>} : memref<32x512xf32, #tpu.memory_space<vmem>>, vector<4x512xf32>,
    %c0_66 = arith.constant 0 : index
    %c0_67 = arith.constant 0 : index
    %148 = vector.load %arg10[%c0_66, %c0_67] : memref<32x512xf32, #tpu.memory_space<vmem>>, vector<32x512xf32>
    %149 = arith.mulf %148, %2 : vector<32x512xf32>
    %cst_68 = arith.constant dense<0.000000e+00> : vector<16x512xf32>
    %150 = tpu.matmul %5, %149, %cst_68 {dimension_numbers = #tpu.dot_dimension_numbers<[1], [0], [0], [1], [0, 0, 1, 1], [], []>} : vector<16x32xf32>, vector<32x512xf32>, vector<16x512xf32> -> vector<16x512xf32>
    %151 = arith.addf %150, %92 : vector<16x512xf32>
    %cst_69 = arith.constant 2.000000e-01 : f32
    %152 = vector.broadcast %cst_69 : f32 to vector<16x512xf32>
    %153 = arith.mulf %152, %151 : vector<16x512xf32>
    %154 = arith.maximumf %151, %153 : vector<16x512xf32>
    %cst_70 = arith.constant dense<0.000000e+00> : vector<4x512xf32>
    %155 = tpu.matmul %7, %154, %cst_70 {dimension_numbers = #tpu.dot_dimension_numbers<[1], [0], [0], [1], [0, 0, 1, 1], [], []>} : vector<4x16xf32>, vector<16x512xf32>, vector<4x512xf32> -> vector<4x512xf32>
    %156 = arith.addf %155, %94 : vector<4x512xf32>
    %157 = arith.addf %90, %156 : vector<4x512xf32>
    %cst_71 = arith.constant dense<0xFF800000> : vector<512xf32>
    %158 = vector.multi_reduction <maximumf>, %157, %cst_71 [0] : vector<4x512xf32> to vector<512xf32>
    %159 = vector.shape_cast %158 : vector<512xf32> to vector<1x512xf32>
    %160 = vector.broadcast %159 : vector<1x512xf32> to vector<4x512xf32>
    %161 = arith.subf %157, %160 : vector<4x512xf32>
    %162 = math.exp %161 : vector<4x512xf32>
    %cst_72 = arith.constant dense<0.000000e+00> : vector<512xf32>
    %163 = vector.multi_reduction <add>, %162, %cst_72 [0] : vector<4x512xf32> to vector<512xf32>
    %164 = vector.shape_cast %163 : vector<512xf32> to vector<1x512xf32>
    %165 = tpu.reciprocal %164 {approx = true} : vector<1x512xf32> -> vector<1x512xf32>
    %166 = vector.broadcast %165 : vector<1x512xf32> to vector<4x512xf32>
    %167 = arith.mulf %162, %166 : vector<4x512xf32>
    %c17_i32_73 = arith.constant 17 : i32
    %168 = tpu.dynamic_rotate %167 by %c17_i32_73 dim 1 : vector<4x512xf32>, i32 -> vector<4x512xf32>
    %c0_74 = arith.constant 0 : index
    %c0_75 = arith.constant 0 : index
    %169 = vector.load %arg10[%c0_74, %c0_75] : memref<32x512xf32, #tpu.memory_space<vmem>>, vector<4x512xf32>
    tpu.vector_store %arg10[%c0_74, %c0_75], %168 {strides = array<i32>} : memref<32x512xf32, #tpu.memory_space<vmem>>, vector<4x512xf32>,
    %c16_i32_76 = arith.constant 16 : i32
    %170 = tpu.dynamic_rotate %167 by %c16_i32_76 dim 1 : vector<4x512xf32>, i32 -> vector<4x512xf32>
    %c4_77 = arith.constant 4 : index
    %c0_78 = arith.constant 0 : index
    %171 = vector.load %arg10[%c4_77, %c0_78] : memref<32x512xf32, #tpu.memory_space<vmem>>, vector<4x512xf32>
    tpu.vector_store %arg10[%c4_77, %c0_78], %170 {strides = array<i32>} : memref<32x512xf32, #tpu.memory_space<vmem>>, vector<4x512xf32>,
    %c15_i32_79 = arith.constant 15 : i32
    %172 = tpu.dynamic_rotate %167 by %c15_i32_79 dim 1 : vector<4x512xf32>, i32 -> vector<4x512xf32>
    %c8_80 = arith.constant 8 : index
    %c0_81 = arith.constant 0 : index
    %173 = vector.load %arg10[%c8_80, %c0_81] : memref<32x512xf32, #tpu.memory_space<vmem>>, vector<4x512xf32>
    tpu.vector_store %arg10[%c8_80, %c0_81], %172 {strides = array<i32>} : memref<32x512xf32, #tpu.memory_space<vmem>>, vector<4x512xf32>,
    %c1_i32_82 = arith.constant 1 : i32
    %174 = tpu.dynamic_rotate %167 by %c1_i32_82 dim 1 : vector<4x512xf32>, i32 -> vector<4x512xf32>
    %c12_83 = arith.constant 12 : index
    %c0_84 = arith.constant 0 : index
    %175 = vector.load %arg10[%c12_83, %c0_84] : memref<32x512xf32, #tpu.memory_space<vmem>>, vector<4x512xf32>
    tpu.vector_store %arg10[%c12_83, %c0_84], %174 {strides = array<i32>} : memref<32x512xf32, #tpu.memory_space<vmem>>, vector<4x512xf32>,
    %c511_i32_85 = arith.constant 511 : i32
    %176 = tpu.dynamic_rotate %167 by %c511_i32_85 dim 1 : vector<4x512xf32>, i32 -> vector<4x512xf32>
    %c16_86 = arith.constant 16 : index
    %c0_87 = arith.constant 0 : index
    %177 = vector.load %arg10[%c16_86, %c0_87] : memref<32x512xf32, #tpu.memory_space<vmem>>, vector<4x512xf32>
    tpu.vector_store %arg10[%c16_86, %c0_87], %176 {strides = array<i32>} : memref<32x512xf32, #tpu.memory_space<vmem>>, vector<4x512xf32>,
    %c497_i32_88 = arith.constant 497 : i32
    %178 = tpu.dynamic_rotate %167 by %c497_i32_88 dim 1 : vector<4x512xf32>, i32 -> vector<4x512xf32>
    %c20_89 = arith.constant 20 : index
    %c0_90 = arith.constant 0 : index
    %179 = vector.load %arg10[%c20_89, %c0_90] : memref<32x512xf32, #tpu.memory_space<vmem>>, vector<4x512xf32>
    tpu.vector_store %arg10[%c20_89, %c0_90], %178 {strides = array<i32>} : memref<32x512xf32, #tpu.memory_space<vmem>>, vector<4x512xf32>,
    %c496_i32_91 = arith.constant 496 : i32
    %180 = tpu.dynamic_rotate %167 by %c496_i32_91 dim 1 : vector<4x512xf32>, i32 -> vector<4x512xf32>
    %c24_92 = arith.constant 24 : index
    %c0_93 = arith.constant 0 : index
    %181 = vector.load %arg10[%c24_92, %c0_93] : memref<32x512xf32, #tpu.memory_space<vmem>>, vector<4x512xf32>
    tpu.vector_store %arg10[%c24_92, %c0_93], %180 {strides = array<i32>} : memref<32x512xf32, #tpu.memory_space<vmem>>, vector<4x512xf32>,
    %c495_i32_94 = arith.constant 495 : i32
    %182 = tpu.dynamic_rotate %167 by %c495_i32_94 dim 1 : vector<4x512xf32>, i32 -> vector<4x512xf32>
    %c28_95 = arith.constant 28 : index
    %c0_96 = arith.constant 0 : index
    %183 = vector.load %arg10[%c28_95, %c0_96] : memref<32x512xf32, #tpu.memory_space<vmem>>, vector<4x512xf32>
    tpu.vector_store %arg10[%c28_95, %c0_96], %182 {strides = array<i32>} : memref<32x512xf32, #tpu.memory_space<vmem>>, vector<4x512xf32>,
    %c0_97 = arith.constant 0 : index
    %c0_98 = arith.constant 0 : index
    %184 = vector.load %arg10[%c0_97, %c0_98] : memref<32x512xf32, #tpu.memory_space<vmem>>, vector<32x512xf32>
    %185 = arith.mulf %184, %2 : vector<32x512xf32>
    %cst_99 = arith.constant dense<0.000000e+00> : vector<16x512xf32>
    %186 = tpu.matmul %5, %185, %cst_99 {dimension_numbers = #tpu.dot_dimension_numbers<[1], [0], [0], [1], [0, 0, 1, 1], [], []>} : vector<16x32xf32>, vector<32x512xf32>, vector<16x512xf32> -> vector<16x512xf32>
    %187 = arith.addf %186, %92 : vector<16x512xf32>
    %cst_100 = arith.constant 2.000000e-01 : f32
    %188 = vector.broadcast %cst_100 : f32 to vector<16x512xf32>
    %189 = arith.mulf %188, %187 : vector<16x512xf32>
    %190 = arith.maximumf %187, %189 : vector<16x512xf32>
    %cst_101 = arith.constant dense<0.000000e+00> : vector<4x512xf32>
    %191 = tpu.matmul %7, %190, %cst_101 {dimension_numbers = #tpu.dot_dimension_numbers<[1], [0], [0], [1], [0, 0, 1, 1], [], []>} : vector<4x16xf32>, vector<16x512xf32>, vector<4x512xf32> -> vector<4x512xf32>
    %192 = arith.addf %191, %94 : vector<4x512xf32>
    %193 = arith.addf %90, %192 : vector<4x512xf32>
    %cst_102 = arith.constant dense<0xFF800000> : vector<512xf32>
    %194 = vector.multi_reduction <maximumf>, %193, %cst_102 [0] : vector<4x512xf32> to vector<512xf32>
    %195 = vector.shape_cast %194 : vector<512xf32> to vector<1x512xf32>
    %196 = vector.broadcast %195 : vector<1x512xf32> to vector<4x512xf32>
    %197 = arith.subf %193, %196 : vector<4x512xf32>
    %198 = math.exp %197 : vector<4x512xf32>
    %cst_103 = arith.constant dense<0.000000e+00> : vector<512xf32>
    %199 = vector.multi_reduction <add>, %198, %cst_103 [0] : vector<4x512xf32> to vector<512xf32>
    %200 = vector.shape_cast %199 : vector<512xf32> to vector<1x512xf32>
    %201 = tpu.reciprocal %200 {approx = true} : vector<1x512xf32> -> vector<1x512xf32>
    %202 = vector.broadcast %201 : vector<1x512xf32> to vector<4x512xf32>
    %203 = arith.mulf %198, %202 : vector<4x512xf32>
    %c17_i32_104 = arith.constant 17 : i32
    %204 = tpu.dynamic_rotate %203 by %c17_i32_104 dim 1 : vector<4x512xf32>, i32 -> vector<4x512xf32>
    %c0_105 = arith.constant 0 : index
    %c0_106 = arith.constant 0 : index
    %205 = vector.load %arg10[%c0_105, %c0_106] : memref<32x512xf32, #tpu.memory_space<vmem>>, vector<4x512xf32>
    tpu.vector_store %arg10[%c0_105, %c0_106], %204 {strides = array<i32>} : memref<32x512xf32, #tpu.memory_space<vmem>>, vector<4x512xf32>,
    %c16_i32_107 = arith.constant 16 : i32
    %206 = tpu.dynamic_rotate %203 by %c16_i32_107 dim 1 : vector<4x512xf32>, i32 -> vector<4x512xf32>
    %c4_108 = arith.constant 4 : index
    %c0_109 = arith.constant 0 : index
    %207 = vector.load %arg10[%c4_108, %c0_109] : memref<32x512xf32, #tpu.memory_space<vmem>>, vector<4x512xf32>
    tpu.vector_store %arg10[%c4_108, %c0_109], %206 {strides = array<i32>} : memref<32x512xf32, #tpu.memory_space<vmem>>, vector<4x512xf32>,
    %c15_i32_110 = arith.constant 15 : i32
    %208 = tpu.dynamic_rotate %203 by %c15_i32_110 dim 1 : vector<4x512xf32>, i32 -> vector<4x512xf32>
    %c8_111 = arith.constant 8 : index
    %c0_112 = arith.constant 0 : index
    %209 = vector.load %arg10[%c8_111, %c0_112] : memref<32x512xf32, #tpu.memory_space<vmem>>, vector<4x512xf32>
    tpu.vector_store %arg10[%c8_111, %c0_112], %208 {strides = array<i32>} : memref<32x512xf32, #tpu.memory_space<vmem>>, vector<4x512xf32>,
    %c1_i32_113 = arith.constant 1 : i32
    %210 = tpu.dynamic_rotate %203 by %c1_i32_113 dim 1 : vector<4x512xf32>, i32 -> vector<4x512xf32>
    %c12_114 = arith.constant 12 : index
    %c0_115 = arith.constant 0 : index
    %211 = vector.load %arg10[%c12_114, %c0_115] : memref<32x512xf32, #tpu.memory_space<vmem>>, vector<4x512xf32>
    tpu.vector_store %arg10[%c12_114, %c0_115], %210 {strides = array<i32>} : memref<32x512xf32, #tpu.memory_space<vmem>>, vector<4x512xf32>,
    %c511_i32_116 = arith.constant 511 : i32
    %212 = tpu.dynamic_rotate %203 by %c511_i32_116 dim 1 : vector<4x512xf32>, i32 -> vector<4x512xf32>
    %c16_117 = arith.constant 16 : index
    %c0_118 = arith.constant 0 : index
    %213 = vector.load %arg10[%c16_117, %c0_118] : memref<32x512xf32, #tpu.memory_space<vmem>>, vector<4x512xf32>
    tpu.vector_store %arg10[%c16_117, %c0_118], %212 {strides = array<i32>} : memref<32x512xf32, #tpu.memory_space<vmem>>, vector<4x512xf32>,
    %c497_i32_119 = arith.constant 497 : i32
    %214 = tpu.dynamic_rotate %203 by %c497_i32_119 dim 1 : vector<4x512xf32>, i32 -> vector<4x512xf32>
    %c20_120 = arith.constant 20 : index
    %c0_121 = arith.constant 0 : index
    %215 = vector.load %arg10[%c20_120, %c0_121] : memref<32x512xf32, #tpu.memory_space<vmem>>, vector<4x512xf32>
    tpu.vector_store %arg10[%c20_120, %c0_121], %214 {strides = array<i32>} : memref<32x512xf32, #tpu.memory_space<vmem>>, vector<4x512xf32>,
    %c496_i32_122 = arith.constant 496 : i32
    %216 = tpu.dynamic_rotate %203 by %c496_i32_122 dim 1 : vector<4x512xf32>, i32 -> vector<4x512xf32>
    %c24_123 = arith.constant 24 : index
    %c0_124 = arith.constant 0 : index
    %217 = vector.load %arg10[%c24_123, %c0_124] : memref<32x512xf32, #tpu.memory_space<vmem>>, vector<4x512xf32>
    tpu.vector_store %arg10[%c24_123, %c0_124], %216 {strides = array<i32>} : memref<32x512xf32, #tpu.memory_space<vmem>>, vector<4x512xf32>,
    %c495_i32_125 = arith.constant 495 : i32
    %218 = tpu.dynamic_rotate %203 by %c495_i32_125 dim 1 : vector<4x512xf32>, i32 -> vector<4x512xf32>
    %c28_126 = arith.constant 28 : index
    %c0_127 = arith.constant 0 : index
    %219 = vector.load %arg10[%c28_126, %c0_127] : memref<32x512xf32, #tpu.memory_space<vmem>>, vector<4x512xf32>
    tpu.vector_store %arg10[%c28_126, %c0_127], %218 {strides = array<i32>} : memref<32x512xf32, #tpu.memory_space<vmem>>, vector<4x512xf32>,
    %c0_128 = arith.constant 0 : index
    %c0_129 = arith.constant 0 : index
    %220 = vector.load %arg10[%c0_128, %c0_129] : memref<32x512xf32, #tpu.memory_space<vmem>>, vector<32x512xf32>
    %221 = arith.mulf %220, %2 : vector<32x512xf32>
    %cst_130 = arith.constant dense<0.000000e+00> : vector<16x512xf32>
    %222 = tpu.matmul %5, %221, %cst_130 {dimension_numbers = #tpu.dot_dimension_numbers<[1], [0], [0], [1], [0, 0, 1, 1], [], []>} : vector<16x32xf32>, vector<32x512xf32>, vector<16x512xf32> -> vector<16x512xf32>
    %223 = arith.addf %222, %92 : vector<16x512xf32>
    %cst_131 = arith.constant 2.000000e-01 : f32
    %224 = vector.broadcast %cst_131 : f32 to vector<16x512xf32>
    %225 = arith.mulf %224, %223 : vector<16x512xf32>
    %226 = arith.maximumf %223, %225 : vector<16x512xf32>
    %cst_132 = arith.constant dense<0.000000e+00> : vector<4x512xf32>
    %227 = tpu.matmul %7, %226, %cst_132 {dimension_numbers = #tpu.dot_dimension_numbers<[1], [0], [0], [1], [0, 0, 1, 1], [], []>} : vector<4x16xf32>, vector<16x512xf32>, vector<4x512xf32> -> vector<4x512xf32>
    %228 = arith.addf %227, %94 : vector<4x512xf32>
    %229 = arith.addf %90, %228 : vector<4x512xf32>
    %cst_133 = arith.constant dense<0xFF800000> : vector<512xf32>
    %230 = vector.multi_reduction <maximumf>, %229, %cst_133 [0] : vector<4x512xf32> to vector<512xf32>
    %231 = vector.shape_cast %230 : vector<512xf32> to vector<1x512xf32>
    %232 = vector.broadcast %231 : vector<1x512xf32> to vector<4x512xf32>
    %233 = arith.subf %229, %232 : vector<4x512xf32>
    %234 = math.exp %233 : vector<4x512xf32>
    %cst_134 = arith.constant dense<0.000000e+00> : vector<512xf32>
    %235 = vector.multi_reduction <add>, %234, %cst_134 [0] : vector<4x512xf32> to vector<512xf32>
    %236 = vector.shape_cast %235 : vector<512xf32> to vector<1x512xf32>
    %237 = tpu.reciprocal %236 {approx = true} : vector<1x512xf32> -> vector<1x512xf32>
    %238 = vector.broadcast %237 : vector<1x512xf32> to vector<4x512xf32>
    %239 = arith.mulf %234, %238 : vector<4x512xf32>
    %c17_i32_135 = arith.constant 17 : i32
    %240 = tpu.dynamic_rotate %239 by %c17_i32_135 dim 1 : vector<4x512xf32>, i32 -> vector<4x512xf32>
    %c0_136 = arith.constant 0 : index
    %c0_137 = arith.constant 0 : index
    %241 = vector.load %arg10[%c0_136, %c0_137] : memref<32x512xf32, #tpu.memory_space<vmem>>, vector<4x512xf32>
    tpu.vector_store %arg10[%c0_136, %c0_137], %240 {strides = array<i32>} : memref<32x512xf32, #tpu.memory_space<vmem>>, vector<4x512xf32>,
    %c16_i32_138 = arith.constant 16 : i32
    %242 = tpu.dynamic_rotate %239 by %c16_i32_138 dim 1 : vector<4x512xf32>, i32 -> vector<4x512xf32>
    %c4_139 = arith.constant 4 : index
    %c0_140 = arith.constant 0 : index
    %243 = vector.load %arg10[%c4_139, %c0_140] : memref<32x512xf32, #tpu.memory_space<vmem>>, vector<4x512xf32>
    tpu.vector_store %arg10[%c4_139, %c0_140], %242 {strides = array<i32>} : memref<32x512xf32, #tpu.memory_space<vmem>>, vector<4x512xf32>,
    %c15_i32_141 = arith.constant 15 : i32
    %244 = tpu.dynamic_rotate %239 by %c15_i32_141 dim 1 : vector<4x512xf32>, i32 -> vector<4x512xf32>
    %c8_142 = arith.constant 8 : index
    %c0_143 = arith.constant 0 : index
    %245 = vector.load %arg10[%c8_142, %c0_143] : memref<32x512xf32, #tpu.memory_space<vmem>>, vector<4x512xf32>
    tpu.vector_store %arg10[%c8_142, %c0_143], %244 {strides = array<i32>} : memref<32x512xf32, #tpu.memory_space<vmem>>, vector<4x512xf32>,
    %c1_i32_144 = arith.constant 1 : i32
    %246 = tpu.dynamic_rotate %239 by %c1_i32_144 dim 1 : vector<4x512xf32>, i32 -> vector<4x512xf32>
    %c12_145 = arith.constant 12 : index
    %c0_146 = arith.constant 0 : index
    %247 = vector.load %arg10[%c12_145, %c0_146] : memref<32x512xf32, #tpu.memory_space<vmem>>, vector<4x512xf32>
    tpu.vector_store %arg10[%c12_145, %c0_146], %246 {strides = array<i32>} : memref<32x512xf32, #tpu.memory_space<vmem>>, vector<4x512xf32>,
    %c511_i32_147 = arith.constant 511 : i32
    %248 = tpu.dynamic_rotate %239 by %c511_i32_147 dim 1 : vector<4x512xf32>, i32 -> vector<4x512xf32>
    %c16_148 = arith.constant 16 : index
    %c0_149 = arith.constant 0 : index
    %249 = vector.load %arg10[%c16_148, %c0_149] : memref<32x512xf32, #tpu.memory_space<vmem>>, vector<4x512xf32>
    tpu.vector_store %arg10[%c16_148, %c0_149], %248 {strides = array<i32>} : memref<32x512xf32, #tpu.memory_space<vmem>>, vector<4x512xf32>,
    %c497_i32_150 = arith.constant 497 : i32
    %250 = tpu.dynamic_rotate %239 by %c497_i32_150 dim 1 : vector<4x512xf32>, i32 -> vector<4x512xf32>
    %c20_151 = arith.constant 20 : index
    %c0_152 = arith.constant 0 : index
    %251 = vector.load %arg10[%c20_151, %c0_152] : memref<32x512xf32, #tpu.memory_space<vmem>>, vector<4x512xf32>
    tpu.vector_store %arg10[%c20_151, %c0_152], %250 {strides = array<i32>} : memref<32x512xf32, #tpu.memory_space<vmem>>, vector<4x512xf32>,
    %c496_i32_153 = arith.constant 496 : i32
    %252 = tpu.dynamic_rotate %239 by %c496_i32_153 dim 1 : vector<4x512xf32>, i32 -> vector<4x512xf32>
    %c24_154 = arith.constant 24 : index
    %c0_155 = arith.constant 0 : index
    %253 = vector.load %arg10[%c24_154, %c0_155] : memref<32x512xf32, #tpu.memory_space<vmem>>, vector<4x512xf32>
    tpu.vector_store %arg10[%c24_154, %c0_155], %252 {strides = array<i32>} : memref<32x512xf32, #tpu.memory_space<vmem>>, vector<4x512xf32>,
    %c495_i32_156 = arith.constant 495 : i32
    %254 = tpu.dynamic_rotate %239 by %c495_i32_156 dim 1 : vector<4x512xf32>, i32 -> vector<4x512xf32>
    %c28_157 = arith.constant 28 : index
    %c0_158 = arith.constant 0 : index
    %255 = vector.load %arg10[%c28_157, %c0_158] : memref<32x512xf32, #tpu.memory_space<vmem>>, vector<4x512xf32>
    tpu.vector_store %arg10[%c28_157, %c0_158], %254 {strides = array<i32>} : memref<32x512xf32, #tpu.memory_space<vmem>>, vector<4x512xf32>,
    %c0_159 = arith.constant 0 : index
    %c0_160 = arith.constant 0 : index
    %256 = vector.load %arg10[%c0_159, %c0_160] : memref<32x512xf32, #tpu.memory_space<vmem>>, vector<32x512xf32>
    %257 = arith.mulf %256, %2 : vector<32x512xf32>
    %cst_161 = arith.constant dense<0.000000e+00> : vector<16x512xf32>
    %258 = tpu.matmul %5, %257, %cst_161 {dimension_numbers = #tpu.dot_dimension_numbers<[1], [0], [0], [1], [0, 0, 1, 1], [], []>} : vector<16x32xf32>, vector<32x512xf32>, vector<16x512xf32> -> vector<16x512xf32>
    %259 = arith.addf %258, %92 : vector<16x512xf32>
    %cst_162 = arith.constant 2.000000e-01 : f32
    %260 = vector.broadcast %cst_162 : f32 to vector<16x512xf32>
    %261 = arith.mulf %260, %259 : vector<16x512xf32>
    %262 = arith.maximumf %259, %261 : vector<16x512xf32>
    %cst_163 = arith.constant dense<0.000000e+00> : vector<4x512xf32>
    %263 = tpu.matmul %7, %262, %cst_163 {dimension_numbers = #tpu.dot_dimension_numbers<[1], [0], [0], [1], [0, 0, 1, 1], [], []>} : vector<4x16xf32>, vector<16x512xf32>, vector<4x512xf32> -> vector<4x512xf32>
    %264 = arith.addf %263, %94 : vector<4x512xf32>
    %265 = arith.addf %90, %264 : vector<4x512xf32>
    %cst_164 = arith.constant dense<0xFF800000> : vector<512xf32>
    %266 = vector.multi_reduction <maximumf>, %265, %cst_164 [0] : vector<4x512xf32> to vector<512xf32>
    %267 = vector.shape_cast %266 : vector<512xf32> to vector<1x512xf32>
    %268 = vector.broadcast %267 : vector<1x512xf32> to vector<4x512xf32>
    %269 = arith.subf %265, %268 : vector<4x512xf32>
    %270 = math.exp %269 : vector<4x512xf32>
    %cst_165 = arith.constant dense<0.000000e+00> : vector<512xf32>
    %271 = vector.multi_reduction <add>, %270, %cst_165 [0] : vector<4x512xf32> to vector<512xf32>
    %272 = vector.shape_cast %271 : vector<512xf32> to vector<1x512xf32>
    %273 = tpu.reciprocal %272 {approx = true} : vector<1x512xf32> -> vector<1x512xf32>
    %274 = vector.broadcast %273 : vector<1x512xf32> to vector<4x512xf32>
    %275 = arith.mulf %270, %274 : vector<4x512xf32>
    %c17_i32_166 = arith.constant 17 : i32
    %276 = tpu.dynamic_rotate %275 by %c17_i32_166 dim 1 : vector<4x512xf32>, i32 -> vector<4x512xf32>
    %c0_167 = arith.constant 0 : index
    %c0_168 = arith.constant 0 : index
    %277 = vector.load %arg10[%c0_167, %c0_168] : memref<32x512xf32, #tpu.memory_space<vmem>>, vector<4x512xf32>
    tpu.vector_store %arg10[%c0_167, %c0_168], %276 {strides = array<i32>} : memref<32x512xf32, #tpu.memory_space<vmem>>, vector<4x512xf32>,
    %c16_i32_169 = arith.constant 16 : i32
    %278 = tpu.dynamic_rotate %275 by %c16_i32_169 dim 1 : vector<4x512xf32>, i32 -> vector<4x512xf32>
    %c4_170 = arith.constant 4 : index
    %c0_171 = arith.constant 0 : index
    %279 = vector.load %arg10[%c4_170, %c0_171] : memref<32x512xf32, #tpu.memory_space<vmem>>, vector<4x512xf32>
    tpu.vector_store %arg10[%c4_170, %c0_171], %278 {strides = array<i32>} : memref<32x512xf32, #tpu.memory_space<vmem>>, vector<4x512xf32>,
    %c15_i32_172 = arith.constant 15 : i32
    %280 = tpu.dynamic_rotate %275 by %c15_i32_172 dim 1 : vector<4x512xf32>, i32 -> vector<4x512xf32>
    %c8_173 = arith.constant 8 : index
    %c0_174 = arith.constant 0 : index
    %281 = vector.load %arg10[%c8_173, %c0_174] : memref<32x512xf32, #tpu.memory_space<vmem>>, vector<4x512xf32>
    tpu.vector_store %arg10[%c8_173, %c0_174], %280 {strides = array<i32>} : memref<32x512xf32, #tpu.memory_space<vmem>>, vector<4x512xf32>,
    %c1_i32_175 = arith.constant 1 : i32
    %282 = tpu.dynamic_rotate %275 by %c1_i32_175 dim 1 : vector<4x512xf32>, i32 -> vector<4x512xf32>
    %c12_176 = arith.constant 12 : index
    %c0_177 = arith.constant 0 : index
    %283 = vector.load %arg10[%c12_176, %c0_177] : memref<32x512xf32, #tpu.memory_space<vmem>>, vector<4x512xf32>
    tpu.vector_store %arg10[%c12_176, %c0_177], %282 {strides = array<i32>} : memref<32x512xf32, #tpu.memory_space<vmem>>, vector<4x512xf32>,
    %c511_i32_178 = arith.constant 511 : i32
    %284 = tpu.dynamic_rotate %275 by %c511_i32_178 dim 1 : vector<4x512xf32>, i32 -> vector<4x512xf32>
    %c16_179 = arith.constant 16 : index
    %c0_180 = arith.constant 0 : index
    %285 = vector.load %arg10[%c16_179, %c0_180] : memref<32x512xf32, #tpu.memory_space<vmem>>, vector<4x512xf32>
    tpu.vector_store %arg10[%c16_179, %c0_180], %284 {strides = array<i32>} : memref<32x512xf32, #tpu.memory_space<vmem>>, vector<4x512xf32>,
    %c497_i32_181 = arith.constant 497 : i32
    %286 = tpu.dynamic_rotate %275 by %c497_i32_181 dim 1 : vector<4x512xf32>, i32 -> vector<4x512xf32>
    %c20_182 = arith.constant 20 : index
    %c0_183 = arith.constant 0 : index
    %287 = vector.load %arg10[%c20_182, %c0_183] : memref<32x512xf32, #tpu.memory_space<vmem>>, vector<4x512xf32>
    tpu.vector_store %arg10[%c20_182, %c0_183], %286 {strides = array<i32>} : memref<32x512xf32, #tpu.memory_space<vmem>>, vector<4x512xf32>,
    %c496_i32_184 = arith.constant 496 : i32
    %288 = tpu.dynamic_rotate %275 by %c496_i32_184 dim 1 : vector<4x512xf32>, i32 -> vector<4x512xf32>
    %c24_185 = arith.constant 24 : index
    %c0_186 = arith.constant 0 : index
    %289 = vector.load %arg10[%c24_185, %c0_186] : memref<32x512xf32, #tpu.memory_space<vmem>>, vector<4x512xf32>
    tpu.vector_store %arg10[%c24_185, %c0_186], %288 {strides = array<i32>} : memref<32x512xf32, #tpu.memory_space<vmem>>, vector<4x512xf32>,
    %c495_i32_187 = arith.constant 495 : i32
    %290 = tpu.dynamic_rotate %275 by %c495_i32_187 dim 1 : vector<4x512xf32>, i32 -> vector<4x512xf32>
    %c28_188 = arith.constant 28 : index
    %c0_189 = arith.constant 0 : index
    %291 = vector.load %arg10[%c28_188, %c0_189] : memref<32x512xf32, #tpu.memory_space<vmem>>, vector<4x512xf32>
    tpu.vector_store %arg10[%c28_188, %c0_189], %290 {strides = array<i32>} : memref<32x512xf32, #tpu.memory_space<vmem>>, vector<4x512xf32>,
    %c0_190 = arith.constant 0 : index
    %c0_191 = arith.constant 0 : index
    %292 = vector.load %arg10[%c0_190, %c0_191] : memref<32x512xf32, #tpu.memory_space<vmem>>, vector<32x512xf32>
    %293 = arith.mulf %292, %2 : vector<32x512xf32>
    %cst_192 = arith.constant dense<0.000000e+00> : vector<16x512xf32>
    %294 = tpu.matmul %5, %293, %cst_192 {dimension_numbers = #tpu.dot_dimension_numbers<[1], [0], [0], [1], [0, 0, 1, 1], [], []>} : vector<16x32xf32>, vector<32x512xf32>, vector<16x512xf32> -> vector<16x512xf32>
    %295 = arith.addf %294, %92 : vector<16x512xf32>
    %cst_193 = arith.constant 2.000000e-01 : f32
    %296 = vector.broadcast %cst_193 : f32 to vector<16x512xf32>
    %297 = arith.mulf %296, %295 : vector<16x512xf32>
    %298 = arith.maximumf %295, %297 : vector<16x512xf32>
    %cst_194 = arith.constant dense<0.000000e+00> : vector<4x512xf32>
    %299 = tpu.matmul %7, %298, %cst_194 {dimension_numbers = #tpu.dot_dimension_numbers<[1], [0], [0], [1], [0, 0, 1, 1], [], []>} : vector<4x16xf32>, vector<16x512xf32>, vector<4x512xf32> -> vector<4x512xf32>
    %300 = arith.addf %299, %94 : vector<4x512xf32>
    %301 = arith.addf %90, %300 : vector<4x512xf32>
    %cst_195 = arith.constant dense<0xFF800000> : vector<512xf32>
    %302 = vector.multi_reduction <maximumf>, %301, %cst_195 [0] : vector<4x512xf32> to vector<512xf32>
    %303 = vector.shape_cast %302 : vector<512xf32> to vector<1x512xf32>
    %304 = vector.broadcast %303 : vector<1x512xf32> to vector<4x512xf32>
    %305 = arith.subf %301, %304 : vector<4x512xf32>
    %306 = math.exp %305 : vector<4x512xf32>
    %cst_196 = arith.constant dense<0.000000e+00> : vector<512xf32>
    %307 = vector.multi_reduction <add>, %306, %cst_196 [0] : vector<4x512xf32> to vector<512xf32>
    %308 = vector.shape_cast %307 : vector<512xf32> to vector<1x512xf32>
    %309 = tpu.reciprocal %308 {approx = true} : vector<1x512xf32> -> vector<1x512xf32>
    %310 = vector.broadcast %309 : vector<1x512xf32> to vector<4x512xf32>
    %311 = arith.mulf %306, %310 : vector<4x512xf32>
    %c17_i32_197 = arith.constant 17 : i32
    %312 = tpu.dynamic_rotate %311 by %c17_i32_197 dim 1 : vector<4x512xf32>, i32 -> vector<4x512xf32>
    %c0_198 = arith.constant 0 : index
    %c0_199 = arith.constant 0 : index
    %313 = vector.load %arg10[%c0_198, %c0_199] : memref<32x512xf32, #tpu.memory_space<vmem>>, vector<4x512xf32>
    tpu.vector_store %arg10[%c0_198, %c0_199], %312 {strides = array<i32>} : memref<32x512xf32, #tpu.memory_space<vmem>>, vector<4x512xf32>,
    %c16_i32_200 = arith.constant 16 : i32
    %314 = tpu.dynamic_rotate %311 by %c16_i32_200 dim 1 : vector<4x512xf32>, i32 -> vector<4x512xf32>
    %c4_201 = arith.constant 4 : index
    %c0_202 = arith.constant 0 : index
    %315 = vector.load %arg10[%c4_201, %c0_202] : memref<32x512xf32, #tpu.memory_space<vmem>>, vector<4x512xf32>
    tpu.vector_store %arg10[%c4_201, %c0_202], %314 {strides = array<i32>} : memref<32x512xf32, #tpu.memory_space<vmem>>, vector<4x512xf32>,
    %c15_i32_203 = arith.constant 15 : i32
    %316 = tpu.dynamic_rotate %311 by %c15_i32_203 dim 1 : vector<4x512xf32>, i32 -> vector<4x512xf32>
    %c8_204 = arith.constant 8 : index
    %c0_205 = arith.constant 0 : index
    %317 = vector.load %arg10[%c8_204, %c0_205] : memref<32x512xf32, #tpu.memory_space<vmem>>, vector<4x512xf32>
    tpu.vector_store %arg10[%c8_204, %c0_205], %316 {strides = array<i32>} : memref<32x512xf32, #tpu.memory_space<vmem>>, vector<4x512xf32>,
    %c1_i32_206 = arith.constant 1 : i32
    %318 = tpu.dynamic_rotate %311 by %c1_i32_206 dim 1 : vector<4x512xf32>, i32 -> vector<4x512xf32>
    %c12_207 = arith.constant 12 : index
    %c0_208 = arith.constant 0 : index
    %319 = vector.load %arg10[%c12_207, %c0_208] : memref<32x512xf32, #tpu.memory_space<vmem>>, vector<4x512xf32>
    tpu.vector_store %arg10[%c12_207, %c0_208], %318 {strides = array<i32>} : memref<32x512xf32, #tpu.memory_space<vmem>>, vector<4x512xf32>,
    %c511_i32_209 = arith.constant 511 : i32
    %320 = tpu.dynamic_rotate %311 by %c511_i32_209 dim 1 : vector<4x512xf32>, i32 -> vector<4x512xf32>
    %c16_210 = arith.constant 16 : index
    %c0_211 = arith.constant 0 : index
    %321 = vector.load %arg10[%c16_210, %c0_211] : memref<32x512xf32, #tpu.memory_space<vmem>>, vector<4x512xf32>
    tpu.vector_store %arg10[%c16_210, %c0_211], %320 {strides = array<i32>} : memref<32x512xf32, #tpu.memory_space<vmem>>, vector<4x512xf32>,
    %c497_i32_212 = arith.constant 497 : i32
    %322 = tpu.dynamic_rotate %311 by %c497_i32_212 dim 1 : vector<4x512xf32>, i32 -> vector<4x512xf32>
    %c20_213 = arith.constant 20 : index
    %c0_214 = arith.constant 0 : index
    %323 = vector.load %arg10[%c20_213, %c0_214] : memref<32x512xf32, #tpu.memory_space<vmem>>, vector<4x512xf32>
    tpu.vector_store %arg10[%c20_213, %c0_214], %322 {strides = array<i32>} : memref<32x512xf32, #tpu.memory_space<vmem>>, vector<4x512xf32>,
    %c496_i32_215 = arith.constant 496 : i32
    %324 = tpu.dynamic_rotate %311 by %c496_i32_215 dim 1 : vector<4x512xf32>, i32 -> vector<4x512xf32>
    %c24_216 = arith.constant 24 : index
    %c0_217 = arith.constant 0 : index
    %325 = vector.load %arg10[%c24_216, %c0_217] : memref<32x512xf32, #tpu.memory_space<vmem>>, vector<4x512xf32>
    tpu.vector_store %arg10[%c24_216, %c0_217], %324 {strides = array<i32>} : memref<32x512xf32, #tpu.memory_space<vmem>>, vector<4x512xf32>,
    %c495_i32_218 = arith.constant 495 : i32
    %326 = tpu.dynamic_rotate %311 by %c495_i32_218 dim 1 : vector<4x512xf32>, i32 -> vector<4x512xf32>
    %c28_219 = arith.constant 28 : index
    %c0_220 = arith.constant 0 : index
    %327 = vector.load %arg10[%c28_219, %c0_220] : memref<32x512xf32, #tpu.memory_space<vmem>>, vector<4x512xf32>
    tpu.vector_store %arg10[%c28_219, %c0_220], %326 {strides = array<i32>} : memref<32x512xf32, #tpu.memory_space<vmem>>, vector<4x512xf32>,
    %c0_221 = arith.constant 0 : index
    %c0_222 = arith.constant 0 : index
    %328 = vector.load %arg10[%c0_221, %c0_222] : memref<32x512xf32, #tpu.memory_space<vmem>>, vector<32x512xf32>
    %329 = arith.mulf %328, %2 : vector<32x512xf32>
    %cst_223 = arith.constant dense<0.000000e+00> : vector<16x512xf32>
    %330 = tpu.matmul %5, %329, %cst_223 {dimension_numbers = #tpu.dot_dimension_numbers<[1], [0], [0], [1], [0, 0, 1, 1], [], []>} : vector<16x32xf32>, vector<32x512xf32>, vector<16x512xf32> -> vector<16x512xf32>
    %331 = arith.addf %330, %92 : vector<16x512xf32>
    %cst_224 = arith.constant 2.000000e-01 : f32
    %332 = vector.broadcast %cst_224 : f32 to vector<16x512xf32>
    %333 = arith.mulf %332, %331 : vector<16x512xf32>
    %334 = arith.maximumf %331, %333 : vector<16x512xf32>
    %cst_225 = arith.constant dense<0.000000e+00> : vector<4x512xf32>
    %335 = tpu.matmul %7, %334, %cst_225 {dimension_numbers = #tpu.dot_dimension_numbers<[1], [0], [0], [1], [0, 0, 1, 1], [], []>} : vector<4x16xf32>, vector<16x512xf32>, vector<4x512xf32> -> vector<4x512xf32>
    %336 = arith.addf %335, %94 : vector<4x512xf32>
    %337 = arith.addf %90, %336 : vector<4x512xf32>
    %cst_226 = arith.constant dense<0xFF800000> : vector<512xf32>
    %338 = vector.multi_reduction <maximumf>, %337, %cst_226 [0] : vector<4x512xf32> to vector<512xf32>
    %339 = vector.shape_cast %338 : vector<512xf32> to vector<1x512xf32>
    %340 = vector.broadcast %339 : vector<1x512xf32> to vector<4x512xf32>
    %341 = arith.subf %337, %340 : vector<4x512xf32>
    %342 = math.exp %341 : vector<4x512xf32>
    %cst_227 = arith.constant dense<0.000000e+00> : vector<512xf32>
    %343 = vector.multi_reduction <add>, %342, %cst_227 [0] : vector<4x512xf32> to vector<512xf32>
    %344 = vector.shape_cast %343 : vector<512xf32> to vector<1x512xf32>
    %345 = tpu.reciprocal %344 {approx = true} : vector<1x512xf32> -> vector<1x512xf32>
    %346 = vector.broadcast %345 : vector<1x512xf32> to vector<4x512xf32>
    %347 = arith.mulf %342, %346 : vector<4x512xf32>
    %c17_i32_228 = arith.constant 17 : i32
    %348 = tpu.dynamic_rotate %347 by %c17_i32_228 dim 1 : vector<4x512xf32>, i32 -> vector<4x512xf32>
    %c0_229 = arith.constant 0 : index
    %c0_230 = arith.constant 0 : index
    %349 = vector.load %arg10[%c0_229, %c0_230] : memref<32x512xf32, #tpu.memory_space<vmem>>, vector<4x512xf32>
    tpu.vector_store %arg10[%c0_229, %c0_230], %348 {strides = array<i32>} : memref<32x512xf32, #tpu.memory_space<vmem>>, vector<4x512xf32>,
    %c16_i32_231 = arith.constant 16 : i32
    %350 = tpu.dynamic_rotate %347 by %c16_i32_231 dim 1 : vector<4x512xf32>, i32 -> vector<4x512xf32>
    %c4_232 = arith.constant 4 : index
    %c0_233 = arith.constant 0 : index
    %351 = vector.load %arg10[%c4_232, %c0_233] : memref<32x512xf32, #tpu.memory_space<vmem>>, vector<4x512xf32>
    tpu.vector_store %arg10[%c4_232, %c0_233], %350 {strides = array<i32>} : memref<32x512xf32, #tpu.memory_space<vmem>>, vector<4x512xf32>,
    %c15_i32_234 = arith.constant 15 : i32
    %352 = tpu.dynamic_rotate %347 by %c15_i32_234 dim 1 : vector<4x512xf32>, i32 -> vector<4x512xf32>
    %c8_235 = arith.constant 8 : index
    %c0_236 = arith.constant 0 : index
    %353 = vector.load %arg10[%c8_235, %c0_236] : memref<32x512xf32, #tpu.memory_space<vmem>>, vector<4x512xf32>
    tpu.vector_store %arg10[%c8_235, %c0_236], %352 {strides = array<i32>} : memref<32x512xf32, #tpu.memory_space<vmem>>, vector<4x512xf32>,
    %c1_i32_237 = arith.constant 1 : i32
    %354 = tpu.dynamic_rotate %347 by %c1_i32_237 dim 1 : vector<4x512xf32>, i32 -> vector<4x512xf32>
    %c12_238 = arith.constant 12 : index
    %c0_239 = arith.constant 0 : index
    %355 = vector.load %arg10[%c12_238, %c0_239] : memref<32x512xf32, #tpu.memory_space<vmem>>, vector<4x512xf32>
    tpu.vector_store %arg10[%c12_238, %c0_239], %354 {strides = array<i32>} : memref<32x512xf32, #tpu.memory_space<vmem>>, vector<4x512xf32>,
    %c511_i32_240 = arith.constant 511 : i32
    %356 = tpu.dynamic_rotate %347 by %c511_i32_240 dim 1 : vector<4x512xf32>, i32 -> vector<4x512xf32>
    %c16_241 = arith.constant 16 : index
    %c0_242 = arith.constant 0 : index
    %357 = vector.load %arg10[%c16_241, %c0_242] : memref<32x512xf32, #tpu.memory_space<vmem>>, vector<4x512xf32>
    tpu.vector_store %arg10[%c16_241, %c0_242], %356 {strides = array<i32>} : memref<32x512xf32, #tpu.memory_space<vmem>>, vector<4x512xf32>,
    %c497_i32_243 = arith.constant 497 : i32
    %358 = tpu.dynamic_rotate %347 by %c497_i32_243 dim 1 : vector<4x512xf32>, i32 -> vector<4x512xf32>
    %c20_244 = arith.constant 20 : index
    %c0_245 = arith.constant 0 : index
    %359 = vector.load %arg10[%c20_244, %c0_245] : memref<32x512xf32, #tpu.memory_space<vmem>>, vector<4x512xf32>
    tpu.vector_store %arg10[%c20_244, %c0_245], %358 {strides = array<i32>} : memref<32x512xf32, #tpu.memory_space<vmem>>, vector<4x512xf32>,
    %c496_i32_246 = arith.constant 496 : i32
    %360 = tpu.dynamic_rotate %347 by %c496_i32_246 dim 1 : vector<4x512xf32>, i32 -> vector<4x512xf32>
    %c24_247 = arith.constant 24 : index
    %c0_248 = arith.constant 0 : index
    %361 = vector.load %arg10[%c24_247, %c0_248] : memref<32x512xf32, #tpu.memory_space<vmem>>, vector<4x512xf32>
    tpu.vector_store %arg10[%c24_247, %c0_248], %360 {strides = array<i32>} : memref<32x512xf32, #tpu.memory_space<vmem>>, vector<4x512xf32>,
    %c495_i32_249 = arith.constant 495 : i32
    %362 = tpu.dynamic_rotate %347 by %c495_i32_249 dim 1 : vector<4x512xf32>, i32 -> vector<4x512xf32>
    %c28_250 = arith.constant 28 : index
    %c0_251 = arith.constant 0 : index
    %363 = vector.load %arg10[%c28_250, %c0_251] : memref<32x512xf32, #tpu.memory_space<vmem>>, vector<4x512xf32>
    tpu.vector_store %arg10[%c28_250, %c0_251], %362 {strides = array<i32>} : memref<32x512xf32, #tpu.memory_space<vmem>>, vector<4x512xf32>,
    %c0_252 = arith.constant 0 : index
    %c0_253 = arith.constant 0 : index
    %364 = vector.load %arg10[%c0_252, %c0_253] : memref<32x512xf32, #tpu.memory_space<vmem>>, vector<32x512xf32>
    %365 = arith.mulf %364, %2 : vector<32x512xf32>
    %cst_254 = arith.constant dense<0.000000e+00> : vector<16x512xf32>
    %366 = tpu.matmul %5, %365, %cst_254 {dimension_numbers = #tpu.dot_dimension_numbers<[1], [0], [0], [1], [0, 0, 1, 1], [], []>} : vector<16x32xf32>, vector<32x512xf32>, vector<16x512xf32> -> vector<16x512xf32>
    %367 = arith.addf %366, %92 : vector<16x512xf32>
    %cst_255 = arith.constant 2.000000e-01 : f32
    %368 = vector.broadcast %cst_255 : f32 to vector<16x512xf32>
    %369 = arith.mulf %368, %367 : vector<16x512xf32>
    %370 = arith.maximumf %367, %369 : vector<16x512xf32>
    %cst_256 = arith.constant dense<0.000000e+00> : vector<4x512xf32>
    %371 = tpu.matmul %7, %370, %cst_256 {dimension_numbers = #tpu.dot_dimension_numbers<[1], [0], [0], [1], [0, 0, 1, 1], [], []>} : vector<4x16xf32>, vector<16x512xf32>, vector<4x512xf32> -> vector<4x512xf32>
    %372 = arith.addf %371, %94 : vector<4x512xf32>
    %373 = arith.addf %90, %372 : vector<4x512xf32>
    %cst_257 = arith.constant dense<0xFF800000> : vector<512xf32>
    %374 = vector.multi_reduction <maximumf>, %373, %cst_257 [0] : vector<4x512xf32> to vector<512xf32>
    %375 = vector.shape_cast %374 : vector<512xf32> to vector<1x512xf32>
    %376 = vector.broadcast %375 : vector<1x512xf32> to vector<4x512xf32>
    %377 = arith.subf %373, %376 : vector<4x512xf32>
    %378 = math.exp %377 : vector<4x512xf32>
    %cst_258 = arith.constant dense<0.000000e+00> : vector<512xf32>
    %379 = vector.multi_reduction <add>, %378, %cst_258 [0] : vector<4x512xf32> to vector<512xf32>
    %380 = vector.shape_cast %379 : vector<512xf32> to vector<1x512xf32>
    %381 = tpu.reciprocal %380 {approx = true} : vector<1x512xf32> -> vector<1x512xf32>
    %382 = vector.broadcast %381 : vector<1x512xf32> to vector<4x512xf32>
    %383 = arith.mulf %378, %382 : vector<4x512xf32>
    %c17_i32_259 = arith.constant 17 : i32
    %384 = tpu.dynamic_rotate %383 by %c17_i32_259 dim 1 : vector<4x512xf32>, i32 -> vector<4x512xf32>
    %c0_260 = arith.constant 0 : index
    %c0_261 = arith.constant 0 : index
    %385 = vector.load %arg10[%c0_260, %c0_261] : memref<32x512xf32, #tpu.memory_space<vmem>>, vector<4x512xf32>
    tpu.vector_store %arg10[%c0_260, %c0_261], %384 {strides = array<i32>} : memref<32x512xf32, #tpu.memory_space<vmem>>, vector<4x512xf32>,
    %c16_i32_262 = arith.constant 16 : i32
    %386 = tpu.dynamic_rotate %383 by %c16_i32_262 dim 1 : vector<4x512xf32>, i32 -> vector<4x512xf32>
    %c4_263 = arith.constant 4 : index
    %c0_264 = arith.constant 0 : index
    %387 = vector.load %arg10[%c4_263, %c0_264] : memref<32x512xf32, #tpu.memory_space<vmem>>, vector<4x512xf32>
    tpu.vector_store %arg10[%c4_263, %c0_264], %386 {strides = array<i32>} : memref<32x512xf32, #tpu.memory_space<vmem>>, vector<4x512xf32>,
    %c15_i32_265 = arith.constant 15 : i32
    %388 = tpu.dynamic_rotate %383 by %c15_i32_265 dim 1 : vector<4x512xf32>, i32 -> vector<4x512xf32>
    %c8_266 = arith.constant 8 : index
    %c0_267 = arith.constant 0 : index
    %389 = vector.load %arg10[%c8_266, %c0_267] : memref<32x512xf32, #tpu.memory_space<vmem>>, vector<4x512xf32>
    tpu.vector_store %arg10[%c8_266, %c0_267], %388 {strides = array<i32>} : memref<32x512xf32, #tpu.memory_space<vmem>>, vector<4x512xf32>,
    %c1_i32_268 = arith.constant 1 : i32
    %390 = tpu.dynamic_rotate %383 by %c1_i32_268 dim 1 : vector<4x512xf32>, i32 -> vector<4x512xf32>
    %c12_269 = arith.constant 12 : index
    %c0_270 = arith.constant 0 : index
    %391 = vector.load %arg10[%c12_269, %c0_270] : memref<32x512xf32, #tpu.memory_space<vmem>>, vector<4x512xf32>
    tpu.vector_store %arg10[%c12_269, %c0_270], %390 {strides = array<i32>} : memref<32x512xf32, #tpu.memory_space<vmem>>, vector<4x512xf32>,
    %c511_i32_271 = arith.constant 511 : i32
    %392 = tpu.dynamic_rotate %383 by %c511_i32_271 dim 1 : vector<4x512xf32>, i32 -> vector<4x512xf32>
    %c16_272 = arith.constant 16 : index
    %c0_273 = arith.constant 0 : index
    %393 = vector.load %arg10[%c16_272, %c0_273] : memref<32x512xf32, #tpu.memory_space<vmem>>, vector<4x512xf32>
    tpu.vector_store %arg10[%c16_272, %c0_273], %392 {strides = array<i32>} : memref<32x512xf32, #tpu.memory_space<vmem>>, vector<4x512xf32>,
    %c497_i32_274 = arith.constant 497 : i32
    %394 = tpu.dynamic_rotate %383 by %c497_i32_274 dim 1 : vector<4x512xf32>, i32 -> vector<4x512xf32>
    %c20_275 = arith.constant 20 : index
    %c0_276 = arith.constant 0 : index
    %395 = vector.load %arg10[%c20_275, %c0_276] : memref<32x512xf32, #tpu.memory_space<vmem>>, vector<4x512xf32>
    tpu.vector_store %arg10[%c20_275, %c0_276], %394 {strides = array<i32>} : memref<32x512xf32, #tpu.memory_space<vmem>>, vector<4x512xf32>,
    %c496_i32_277 = arith.constant 496 : i32
    %396 = tpu.dynamic_rotate %383 by %c496_i32_277 dim 1 : vector<4x512xf32>, i32 -> vector<4x512xf32>
    %c24_278 = arith.constant 24 : index
    %c0_279 = arith.constant 0 : index
    %397 = vector.load %arg10[%c24_278, %c0_279] : memref<32x512xf32, #tpu.memory_space<vmem>>, vector<4x512xf32>
    tpu.vector_store %arg10[%c24_278, %c0_279], %396 {strides = array<i32>} : memref<32x512xf32, #tpu.memory_space<vmem>>, vector<4x512xf32>,
    %c495_i32_280 = arith.constant 495 : i32
    %398 = tpu.dynamic_rotate %383 by %c495_i32_280 dim 1 : vector<4x512xf32>, i32 -> vector<4x512xf32>
    %c28_281 = arith.constant 28 : index
    %c0_282 = arith.constant 0 : index
    %399 = vector.load %arg10[%c28_281, %c0_282] : memref<32x512xf32, #tpu.memory_space<vmem>>, vector<4x512xf32>
    tpu.vector_store %arg10[%c28_281, %c0_282], %398 {strides = array<i32>} : memref<32x512xf32, #tpu.memory_space<vmem>>, vector<4x512xf32>,
    %c0_283 = arith.constant 0 : index
    %c0_284 = arith.constant 0 : index
    %400 = vector.load %arg10[%c0_283, %c0_284] : memref<32x512xf32, #tpu.memory_space<vmem>>, vector<32x512xf32>
    %401 = arith.mulf %400, %2 : vector<32x512xf32>
    %cst_285 = arith.constant dense<0.000000e+00> : vector<16x512xf32>
    %402 = tpu.matmul %5, %401, %cst_285 {dimension_numbers = #tpu.dot_dimension_numbers<[1], [0], [0], [1], [0, 0, 1, 1], [], []>} : vector<16x32xf32>, vector<32x512xf32>, vector<16x512xf32> -> vector<16x512xf32>
    %403 = arith.addf %402, %92 : vector<16x512xf32>
    %cst_286 = arith.constant 2.000000e-01 : f32
    %404 = vector.broadcast %cst_286 : f32 to vector<16x512xf32>
    %405 = arith.mulf %404, %403 : vector<16x512xf32>
    %406 = arith.maximumf %403, %405 : vector<16x512xf32>
    %cst_287 = arith.constant dense<0.000000e+00> : vector<4x512xf32>
    %407 = tpu.matmul %7, %406, %cst_287 {dimension_numbers = #tpu.dot_dimension_numbers<[1], [0], [0], [1], [0, 0, 1, 1], [], []>} : vector<4x16xf32>, vector<16x512xf32>, vector<4x512xf32> -> vector<4x512xf32>
    %408 = arith.addf %407, %94 : vector<4x512xf32>
    %409 = arith.addf %90, %408 : vector<4x512xf32>
    %cst_288 = arith.constant dense<0xFF800000> : vector<512xf32>
    %410 = vector.multi_reduction <maximumf>, %409, %cst_288 [0] : vector<4x512xf32> to vector<512xf32>
    %411 = vector.shape_cast %410 : vector<512xf32> to vector<1x512xf32>
    %412 = vector.broadcast %411 : vector<1x512xf32> to vector<4x512xf32>
    %413 = arith.subf %409, %412 : vector<4x512xf32>
    %414 = math.exp %413 : vector<4x512xf32>
    %cst_289 = arith.constant dense<0.000000e+00> : vector<512xf32>
    %415 = vector.multi_reduction <add>, %414, %cst_289 [0] : vector<4x512xf32> to vector<512xf32>
    %416 = vector.shape_cast %415 : vector<512xf32> to vector<1x512xf32>
    %417 = tpu.reciprocal %416 {approx = true} : vector<1x512xf32> -> vector<1x512xf32>
    %418 = vector.broadcast %417 : vector<1x512xf32> to vector<4x512xf32>
    %419 = arith.mulf %414, %418 : vector<4x512xf32>
    %c17_i32_290 = arith.constant 17 : i32
    %420 = tpu.dynamic_rotate %419 by %c17_i32_290 dim 1 : vector<4x512xf32>, i32 -> vector<4x512xf32>
    %c0_291 = arith.constant 0 : index
    %c0_292 = arith.constant 0 : index
    %421 = vector.load %arg10[%c0_291, %c0_292] : memref<32x512xf32, #tpu.memory_space<vmem>>, vector<4x512xf32>
    tpu.vector_store %arg10[%c0_291, %c0_292], %420 {strides = array<i32>} : memref<32x512xf32, #tpu.memory_space<vmem>>, vector<4x512xf32>,
    %c16_i32_293 = arith.constant 16 : i32
    %422 = tpu.dynamic_rotate %419 by %c16_i32_293 dim 1 : vector<4x512xf32>, i32 -> vector<4x512xf32>
    %c4_294 = arith.constant 4 : index
    %c0_295 = arith.constant 0 : index
    %423 = vector.load %arg10[%c4_294, %c0_295] : memref<32x512xf32, #tpu.memory_space<vmem>>, vector<4x512xf32>
    tpu.vector_store %arg10[%c4_294, %c0_295], %422 {strides = array<i32>} : memref<32x512xf32, #tpu.memory_space<vmem>>, vector<4x512xf32>,
    %c15_i32_296 = arith.constant 15 : i32
    %424 = tpu.dynamic_rotate %419 by %c15_i32_296 dim 1 : vector<4x512xf32>, i32 -> vector<4x512xf32>
    %c8_297 = arith.constant 8 : index
    %c0_298 = arith.constant 0 : index
    %425 = vector.load %arg10[%c8_297, %c0_298] : memref<32x512xf32, #tpu.memory_space<vmem>>, vector<4x512xf32>
    tpu.vector_store %arg10[%c8_297, %c0_298], %424 {strides = array<i32>} : memref<32x512xf32, #tpu.memory_space<vmem>>, vector<4x512xf32>,
    %c1_i32_299 = arith.constant 1 : i32
    %426 = tpu.dynamic_rotate %419 by %c1_i32_299 dim 1 : vector<4x512xf32>, i32 -> vector<4x512xf32>
    %c12_300 = arith.constant 12 : index
    %c0_301 = arith.constant 0 : index
    %427 = vector.load %arg10[%c12_300, %c0_301] : memref<32x512xf32, #tpu.memory_space<vmem>>, vector<4x512xf32>
    tpu.vector_store %arg10[%c12_300, %c0_301], %426 {strides = array<i32>} : memref<32x512xf32, #tpu.memory_space<vmem>>, vector<4x512xf32>,
    %c511_i32_302 = arith.constant 511 : i32
    %428 = tpu.dynamic_rotate %419 by %c511_i32_302 dim 1 : vector<4x512xf32>, i32 -> vector<4x512xf32>
    %c16_303 = arith.constant 16 : index
    %c0_304 = arith.constant 0 : index
    %429 = vector.load %arg10[%c16_303, %c0_304] : memref<32x512xf32, #tpu.memory_space<vmem>>, vector<4x512xf32>
    tpu.vector_store %arg10[%c16_303, %c0_304], %428 {strides = array<i32>} : memref<32x512xf32, #tpu.memory_space<vmem>>, vector<4x512xf32>,
    %c497_i32_305 = arith.constant 497 : i32
    %430 = tpu.dynamic_rotate %419 by %c497_i32_305 dim 1 : vector<4x512xf32>, i32 -> vector<4x512xf32>
    %c20_306 = arith.constant 20 : index
    %c0_307 = arith.constant 0 : index
    %431 = vector.load %arg10[%c20_306, %c0_307] : memref<32x512xf32, #tpu.memory_space<vmem>>, vector<4x512xf32>
    tpu.vector_store %arg10[%c20_306, %c0_307], %430 {strides = array<i32>} : memref<32x512xf32, #tpu.memory_space<vmem>>, vector<4x512xf32>,
    %c496_i32_308 = arith.constant 496 : i32
    %432 = tpu.dynamic_rotate %419 by %c496_i32_308 dim 1 : vector<4x512xf32>, i32 -> vector<4x512xf32>
    %c24_309 = arith.constant 24 : index
    %c0_310 = arith.constant 0 : index
    %433 = vector.load %arg10[%c24_309, %c0_310] : memref<32x512xf32, #tpu.memory_space<vmem>>, vector<4x512xf32>
    tpu.vector_store %arg10[%c24_309, %c0_310], %432 {strides = array<i32>} : memref<32x512xf32, #tpu.memory_space<vmem>>, vector<4x512xf32>,
    %c495_i32_311 = arith.constant 495 : i32
    %434 = tpu.dynamic_rotate %419 by %c495_i32_311 dim 1 : vector<4x512xf32>, i32 -> vector<4x512xf32>
    %c28_312 = arith.constant 28 : index
    %c0_313 = arith.constant 0 : index
    %435 = vector.load %arg10[%c28_312, %c0_313] : memref<32x512xf32, #tpu.memory_space<vmem>>, vector<4x512xf32>
    tpu.vector_store %arg10[%c28_312, %c0_313], %434 {strides = array<i32>} : memref<32x512xf32, #tpu.memory_space<vmem>>, vector<4x512xf32>,
    %c0_314 = arith.constant 0 : index
    %c0_315 = arith.constant 0 : index
    %436 = vector.load %arg10[%c0_314, %c0_315] : memref<32x512xf32, #tpu.memory_space<vmem>>, vector<32x512xf32>
    %437 = arith.mulf %436, %2 : vector<32x512xf32>
    %cst_316 = arith.constant dense<0.000000e+00> : vector<16x512xf32>
    %438 = tpu.matmul %5, %437, %cst_316 {dimension_numbers = #tpu.dot_dimension_numbers<[1], [0], [0], [1], [0, 0, 1, 1], [], []>} : vector<16x32xf32>, vector<32x512xf32>, vector<16x512xf32> -> vector<16x512xf32>
    %439 = arith.addf %438, %92 : vector<16x512xf32>
    %cst_317 = arith.constant 2.000000e-01 : f32
    %440 = vector.broadcast %cst_317 : f32 to vector<16x512xf32>
    %441 = arith.mulf %440, %439 : vector<16x512xf32>
    %442 = arith.maximumf %439, %441 : vector<16x512xf32>
    %cst_318 = arith.constant dense<0.000000e+00> : vector<4x512xf32>
    %443 = tpu.matmul %7, %442, %cst_318 {dimension_numbers = #tpu.dot_dimension_numbers<[1], [0], [0], [1], [0, 0, 1, 1], [], []>} : vector<4x16xf32>, vector<16x512xf32>, vector<4x512xf32> -> vector<4x512xf32>
    %444 = arith.addf %443, %94 : vector<4x512xf32>
    %445 = arith.addf %90, %444 : vector<4x512xf32>
    %cst_319 = arith.constant dense<0xFF800000> : vector<512xf32>
    %446 = vector.multi_reduction <maximumf>, %445, %cst_319 [0] : vector<4x512xf32> to vector<512xf32>
    %447 = vector.shape_cast %446 : vector<512xf32> to vector<1x512xf32>
    %448 = vector.broadcast %447 : vector<1x512xf32> to vector<4x512xf32>
    %449 = arith.subf %445, %448 : vector<4x512xf32>
    %450 = math.exp %449 : vector<4x512xf32>
    %cst_320 = arith.constant dense<0.000000e+00> : vector<512xf32>
    %451 = vector.multi_reduction <add>, %450, %cst_320 [0] : vector<4x512xf32> to vector<512xf32>
    %452 = vector.shape_cast %451 : vector<512xf32> to vector<1x512xf32>
    %453 = tpu.reciprocal %452 {approx = true} : vector<1x512xf32> -> vector<1x512xf32>
    %454 = vector.broadcast %453 : vector<1x512xf32> to vector<4x512xf32>
    %455 = arith.mulf %450, %454 : vector<4x512xf32>
    %cst_321 = arith.constant dense<0.000000e+00> : vector<512xf32>
    %456 = vector.multi_reduction <add>, %455, %cst_321 [0] : vector<4x512xf32> to vector<512xf32>
    %457 = vector.shape_cast %456 : vector<512xf32> to vector<1x512xf32>
    %458 = vector.broadcast %457 : vector<1x512xf32> to vector<4x512xf32>
    %459 = arith.divf %455, %458 : vector<4x512xf32>
    %c0_322 = arith.constant 0 : index
    %c0_323 = arith.constant 0 : index
    %c0_324 = arith.constant 0 : index
    %460 = vector.load %arg9[%c0_322, %c0_323, %c0_324] : memref<1x4x512xf32, #tpu.memory_space<vmem>>, vector<1x4x512xf32>
    %461 = vector.shape_cast %460 : vector<1x4x512xf32> to vector<4x512xf32>
    %462 = vector.shape_cast %459 : vector<4x512xf32> to vector<1x4x512xf32>
    tpu.vector_store %arg9[%c0_322, %c0_323, %c0_324], %462 {strides = array<i32>} : memref<1x4x512xf32, #tpu.memory_space<vmem>>, vector<1x4x512xf32>,
    return
  }
  func.func @transform_0(%arg0: i32) -> (i32, i32, i32) {
    %c0_i32 = arith.constant 0 : i32
    %c0_i32_0 = arith.constant 0 : i32
    %c0_i32_1 = arith.constant 0 : i32
    return %arg0, %c0_i32, %c0_i32_0 : i32, i32, i32
  }
  func.func @transform_1(%arg0: i32) -> (i32, i32) {
    %c0_i32 = arith.constant 0 : i32
    %c0_i32_0 = arith.constant 0 : i32
    %c0_i32_1 = arith.constant 0 : i32
    return %c0_i32, %c0_i32_0 : i32, i32
  }
  func.func @transform_2(%arg0: i32) -> (i32, i32) {
    %c0_i32 = arith.constant 0 : i32
    %c0_i32_0 = arith.constant 0 : i32
    %c0_i32_1 = arith.constant 0 : i32
    return %c0_i32, %c0_i32_0 : i32, i32
  }
  func.func @transform_3(%arg0: i32) -> (i32, i32) {
    %c0_i32 = arith.constant 0 : i32
    %c0_i32_0 = arith.constant 0 : i32
    %c0_i32_1 = arith.constant 0 : i32
    return %c0_i32, %c0_i32_0 : i32, i32
  }
  func.func @transform_4(%arg0: i32) -> (i32, i32) {
    %c0_i32 = arith.constant 0 : i32
    %c0_i32_0 = arith.constant 0 : i32
    %c0_i32_1 = arith.constant 0 : i32
    return %c0_i32, %c0_i32_0 : i32, i32
  }
  func.func @transform_5(%arg0: i32) -> (i32, i32) {
    %c0_i32 = arith.constant 0 : i32
    %c0_i32_0 = arith.constant 0 : i32
    %c0_i32_1 = arith.constant 0 : i32
    return %c0_i32, %c0_i32_0 : i32, i32
  }
  func.func @transform_6(%arg0: i32) -> (i32, i32) {
    %c0_i32 = arith.constant 0 : i32
    %c0_i32_0 = arith.constant 0 : i32
    %c0_i32_1 = arith.constant 0 : i32
    return %c0_i32, %c0_i32_0 : i32, i32
  }
  func.func @transform_7(%arg0: i32) -> (i32, i32) {
    %c0_i32 = arith.constant 0 : i32
    %c0_i32_0 = arith.constant 0 : i32
    %c0_i32_1 = arith.constant 0 : i32
    return %c0_i32, %c0_i32_0 : i32, i32
  }
  func.func @transform_8(%arg0: i32) -> (i32, i32, i32) {
    %c0_i32 = arith.constant 0 : i32
    %c0_i32_0 = arith.constant 0 : i32
    %c0_i32_1 = arith.constant 0 : i32
    return %arg0, %c0_i32, %c0_i32_0 : i32, i32, i32
  }
}

</mosaic_0001>

<bundles_post_ra>
// kernel: tpu_custom_call.1
= control target key start
LH: loop header
LB: loop body
LE: loop exit
PB: predicated region body
PF: predicated region fallthrough
CT: control target
= control target key end

     0   :  { %13 = vsyncpa [#allocation4], 0  ;;  %s9435_s0 = inlined_call_operand.vmem [shape: f32[1,1,512], index: 0, kind: input, shape index: {}]   ;;  %s9436_s1 = inlined_call_operand.hbm [shape: f32[32,512], index: 1, kind: input, shape index: {}]   ;;  %s9437_s2 = inlined_call_operand.vmem [shape: f32[4,9], index: 2, kind: input, shape index: {}]   ;;  %s9438_s3 = inlined_call_operand.vmem [shape: f32[4,1], index: 3, kind: input, shape index: {}]   ;;  %s9439_s4 = inlined_call_operand.vmem [shape: f32[16,32], index: 4, kind: input, shape index: {}]   ;;  %s9440_s5 = inlined_call_operand.vmem [shape: f32[16,1], index: 5, kind: input, shape index: {}]   ;;  %s9441_s6 = inlined_call_operand.vmem [shape: f32[4,16], index: 6, kind: input, shape index: {}]   ;;  %s9442_s7 = inlined_call_operand.vmem [shape: f32[4,1], index: 7, kind: input, shape index: {}]   ;;  %s9443_s8 = inlined_call_operand.hbm [shape: f32[1,4,512], index: 8, kind: output, shape index: {}]  }
   0x1   :  { %14 = vsyncpa [#allocation5], 0  ;;  %s7235_s27 = smov [#allocation3]   ;;  %s7187_s9 = scalar_lea.hbm %s9436_s1, 2048 }
   0x2   :  { %s22_s28 = sshll.u32 %s7235_s27, 4  ;;  %p7188_p0 = scmp.ne.s32.totalorder %s9436_s1, %s7187_s9  ;;  %s23_s28 = int_to_ptr.vmem [resolvable:$true] %s22_s28 }
   0x3   :  { %p7191_p1 = scmp.lt.u32.totalorder %s7187_s9, %s9436_s1 }
   0x5   :  { %p7193_p2 = pnand %p7191_p1, %p7188_p0 }
   0x7   :  { %7196 = shalt.err (!%p7193_p2)
}
   0x8   :  { %s7197_s14 = scalar_lea.vmem %s23_s28, 2048  ;;  %p7202_p4 = scmp.lt.s32.totalorder %s23_s28, %s23_s28 }
   0x9   :  { %p7198_p3 = scmp.ne.s32.totalorder %s23_s28, %s7197_s14  ;;  %p7203_p5 = scmp.lt.s32.totalorder %s7197_s14, %s7197_s14 }
   0xb   :  { %p7204_p6 = por %p7203_p5, %p7202_p4 }
   0xd   :  { %p7205_p7 = pnand %p7204_p6, %p7198_p3 }
   0xf   :  { %7208 = shalt.err (!%p7205_p7)
}
  0x10   :  { %s7236_s15 = smov 512   ;;  %s7237_s16 = smov 32  }
  0x11   :  { %28 = dma.hbm_to_vmem [thread:$0]  %s9436_s1, 2048, %s23_s28, [#allocation4], %s7236_s15, %s7236_s15, %s7237_s16  }
  0x12   :  { %7231 = dma.done.wait [#allocation4], 2048  }
  0x13   :  { %7232 = vsyncadd [#allocation4], 4294965248  ;;  %v7238_v0 = vmov 0.25   ;;  %s7239_s19 = smov 16   ;;  %s7240_s20 = smov 17   ;;  %v7241_v1 = vmov 0   ;;  %v75_v2 = vlaneseq }
  0x14   :  { %624 = vrot.lane.b32.xlu0 %v7238_v0, %s7239_s19  ;;  %618 = vrot.lane.b32.xlu1 %v7238_v0, %s7240_s20  ;;  %s7242_s21 = smov 1   ;;  %s7243_s22 = smov 15   ;;  %v66_v4 = vld [vmem:[%s9440_s5 + $0x8] sm:$0xff]  ;;  %v65_v5 = vld [vmem:[%s9440_s5] sm:$0xff]  ;;  %v9444_v6 = vmov 0.0   ;;  %v7249_v17 = vmov 1  }
  0x15   :  { %6898 = vset.pattern.permute.xlu1 %v7241_v1  ;;  %6897 = vset.pattern.permute.xlu0 %v7241_v1  ;;  %s7244_s1 = smov 113   ;;  %s7245_s23 = smov 111   ;;  %v76_v3 = vshrl.u32 %v75_v2, 7  ;;  %v61_v8 = vld [vmem:[%s9437_s2] sm:$0xf]  ;;  %v7250_v18 = vmov 2  }
  0x16   :  { %s7246_s24 = smov 127   ;;  %s7247_s25 = smov 112   ;;  %781 = vmatprep.mubr.f32.mxu0 %v9444_v6  ;;  %858 = vmatprep.mubr.f32.mxu1 %v9444_v6  ;;  %v44_v9 = vld [vmem:[%s9435_s0] sm:$0xf]  ;;  %v7251_v20 = vmov 5   ;;  %v7252_v21 = vmov 3  }
  0x17   :  { %v7334_v7 = vsub.s32 0, %v76_v3  ;;  %v62_v10 = vld [vmem:[%s9438_s3] sm:$0xf]  ;;  %v81_v11 = vsub.s32 1, %v76_v3  ;;  %v85_v13 = vsub.s32 2, %v76_v3  ;;  %v89_v15 = vsub.s32 3, %v76_v3 }
  0x18   :  { %639 = vrot.lane.b32.xlu0 %v7238_v0, %s7242_s21  ;;  %633 = vrot.lane.b32.xlu1 %v7238_v0, %s7243_s22  ;;  %v7253_v22 = vmov 4   ;;  %v7254_v23 = vmov 7   ;;  %v7255_v24 = vmov 6   ;;  %v7256_v25 = vmov 8   ;;  %v7419_v36 = vld [vmem:[#allocation3 + $0x8] sm:$0xff]  ;;  %v7423_v38 = vld [vmem:[#allocation3] sm:$0xff] }
  0x19   :  { %v7346_v12 = vrot.slane %v44_v9, %v7334_v7  ;;  %v7348_v14 = vrot.slane %v44_v9, %v81_v11  ;;  %v7352_v16 = vrot.slane %v44_v9, %v85_v13  ;;  %v7356_v19 = vrot.slane %v44_v9, %v89_v15  ;;  %v7421_v37 = vld [vmem:[#allocation3 + $0x28] sm:$0xff]  ;;  %v7425_v41 = vld [vmem:[#allocation3 + $0x20] sm:$0xff]  ;;  %v7427_v45 = vld [vmem:[#allocation3 + $0x10] sm:$0xff] }
  0x1a   :  { %v7429_v46 = vld [vmem:[#allocation3 + $0x30] sm:$0xff]  ;;  %v7431_v48 = vld [vmem:[#allocation3 + $0x18] sm:$0xff]  ;;  %v7445_v3 = vld [vmem:[#allocation3 + $0x68] sm:$0xff]  ;;  %vm710_vm0 = vcmask 261120   ;;  %vm887_vm1 = vcmask 130048   ;;  %vm518_vm10 = vcmask 1043456  }
  0x1b   :  { %v7433_v49 = vld [vmem:[#allocation3 + $0x38] sm:$0xff]  ;;  %v7451_v9 = vld [vmem:[#allocation3 + $0x50] sm:$0xff]  ;;  %v7455_v11 = vld [vmem:[#allocation3 + $0x60] sm:$0xff] }
  0x1c   :  { %654 = vrot.lane.b32.xlu0 %v7238_v0, %s7244_s1  ;;  %669 = vrot.lane.b32.xlu1 %v7238_v0, %s7245_s23  ;;  %v7457_v13 = vld [vmem:[#allocation3 + $0x70] sm:$0xff] }
  0x20   :  { %648 = vrot.lane.b32.xlu0 %v7238_v0, %s7246_s24  ;;  %663 = vrot.lane.b32.xlu1 %v7238_v0, %s7247_s25 }
  0x24   :  { %610 = vperm.xlu1 %6898, %v66_v4   ;;  %605 = vperm.xlu0 %6897, %v65_v5   ;;  %v7447_v5 = vld [vmem:[#allocation3 + $0x58] sm:$0xff] }
  0x28   :  { %116 = vperm.xlu1 %6898, %v61_v8   ;;  %71 = vperm.xlu0 %6897, %v62_v10   ;;  %v7453_v10 = vld [vmem:[#allocation3 + $0x78] sm:$0xff] }
  0x2c   :  { %95 = vrot.lane.b32.xlu1 %v7346_v12, %s7240_s20  ;;  %97 = vrot.lane.b32.xlu0 %v7348_v14, %s7240_s20 }
  0x2d   :  { %6899 = vset.pattern.permute.xlu1 %v7249_v17  ;;  %6900 = vset.pattern.permute.xlu0 %v7250_v18 }
  0x30   :  { %99 = vrot.lane.b32.xlu1 %v7352_v16, %s7240_s20  ;;  %101 = vrot.lane.b32.xlu0 %v7356_v19, %s7240_s20 }
  0x34   :  { %173 = vperm.xlu1 %6899, %v61_v8   ;;  %143 = vrot.lane.b32.xlu0 %v7346_v12, %s7239_s19 }
  0x38   :  { %145 = vrot.lane.b32.xlu1 %v7348_v14, %s7239_s19  ;;  %147 = vrot.lane.b32.xlu0 %v7352_v16, %s7239_s19 }
  0x39   :  { %6903 = vset.pattern.permute.xlu1 %v7251_v20 }
  0x3c   :  { %149 = vrot.lane.b32.xlu1 %v7356_v19, %s7239_s19  ;;  %218 = vperm.xlu0 %6900, %v61_v8  }
  0x40   :  { %200 = vrot.lane.b32.xlu1 %v7346_v12, %s7243_s22  ;;  %204 = vrot.lane.b32.xlu0 %v7352_v16, %s7243_s22 }
  0x41   :  { %6901 = vset.pattern.permute.xlu0 %v7252_v21 }
  0x44   :  { %202 = vrot.lane.b32.xlu1 %v7348_v14, %s7243_s22  ;;  %275 = vperm.xlu0 %6901, %v61_v8  }
  0x48   :  { %206 = vrot.lane.b32.xlu1 %v7356_v19, %s7243_s22  ;;  %249 = vrot.lane.b32.xlu0 %v7352_v16, %s7242_s21 }
  0x49   :  { %6902 = vset.pattern.permute.xlu0 %v7253_v22 }
  0x4c   :  { %245 = vrot.lane.b32.xlu1 %v7346_v12, %s7242_s21  ;;  %303 = vperm.xlu0 %6902, %v61_v8  }
  0x50   :  { %247 = vrot.lane.b32.xlu1 %v7348_v14, %s7242_s21  ;;  %316 = vrot.lane.b32.xlu0 %v7348_v14, %s7246_s24 }
  0x51   :  { %6905 = vset.pattern.permute.xlu0 %v7254_v23 }
  0x54   :  { %251 = vrot.lane.b32.xlu1 %v7356_v19, %s7242_s21  ;;  %320 = vrot.lane.b32.xlu0 %v7356_v19, %s7246_s24 }
  0x58   :  { %332 = vperm.xlu1 %6903, %v61_v8   ;;  %359 = vrot.lane.b32.xlu0 %v7346_v12, %s7244_s1 }
  0x5c   :  { %314 = vrot.lane.b32.xlu1 %v7346_v12, %s7246_s24  ;;  %363 = vrot.lane.b32.xlu0 %v7352_v16, %s7244_s1 }
  0x5d   :  { %6904 = vset.pattern.permute.xlu1 %v7255_v24 }
  0x60   :  { %318 = vrot.lane.b32.xlu1 %v7352_v16, %s7246_s24  ;;  %434 = vperm.xlu0 %6905, %v61_v8  }
  0x64   :  { %389 = vperm.xlu1 %6904, %v61_v8   ;;  %420 = vrot.lane.b32.xlu0 %v7352_v16, %s7247_s25 }
  0x65   :  { %6906 = vset.pattern.permute.xlu0 %v7256_v25 }
  0x68   :  { %361 = vrot.lane.b32.xlu1 %v7348_v14, %s7244_s1  ;;  %491 = vperm.xlu0 %6906, %v61_v8   ;;  %v7449_v8 = vld [vmem:[#allocation3 + $0x40] sm:$0xff] }
  0x6c   :  { %365 = vrot.lane.b32.xlu1 %v7356_v19, %s7244_s1  ;;  %465 = vrot.lane.b32.xlu0 %v7352_v16, %s7245_s23 }
  0x6d   :  { %6907 = vset.pattern.permute.xlu0 %v7241_v1  ;;  %v7443_v1 = vld [vmem:[#allocation3 + $0x48] sm:$0xff] }
  0x70   :  { %416 = vrot.lane.b32.xlu1 %v7346_v12, %s7247_s25 }
  0x74   :  { %418 = vrot.lane.b32.xlu1 %v7348_v14, %s7247_s25 }
  0x78   :  { %422 = vrot.lane.b32.xlu1 %v7356_v19, %s7247_s25 }
  0x7c   :  { %461 = vrot.lane.b32.xlu1 %v7346_v12, %s7245_s23 }
  0x80   :  { %463 = vrot.lane.b32.xlu1 %v7348_v14, %s7245_s23 }
  0x84   :  { %467 = vrot.lane.b32.xlu1 %v7356_v19, %s7245_s23 }
  0x86   :  { %v625_v26 = vpop.permute.xlu0 %624  ;;  %v619_v27 = vpop.permute.xlu1 %618 }
  0x87   :  { %v627_v28 = vrot.slane %v625_v26, 4  ;;  %620 = vst [vmem:[#allocation2] sm:$0xf] %v619_v27  ;;  %621 = vst [vmem:[#allocation2 + $0x8] sm:$0xf] %v619_v27 }
  0x88   :  { %622 = vst [vmem:[#allocation2 + $0x10] sm:$0xf] %v619_v27  ;;  %623 = vst [vmem:[#allocation2 + $0x18] sm:$0xf] %v619_v27 }
  0x89   :  { %629 = vst [vmem:[#allocation2] sm:$0xf0] %v627_v28  ;;  %630 = vst [vmem:[#allocation2 + $0x8] sm:$0xf0] %v627_v28 }
  0x8a   :  { %631 = vst [vmem:[#allocation2 + $0x10] sm:$0xf0] %v627_v28  ;;  %632 = vst [vmem:[#allocation2 + $0x18] sm:$0xf0] %v627_v28  ;;  %v640_v29 = vpop.permute.xlu0 %639  ;;  %v634_v30 = vpop.permute.xlu1 %633 }
  0x8b   :  { %v642_v31 = vrot.slane %v640_v29, 4  ;;  %635 = vst [vmem:[#allocation2 + $0x20] sm:$0xf] %v634_v30  ;;  %636 = vst [vmem:[#allocation2 + $0x28] sm:$0xf] %v634_v30 }
  0x8c   :  { %637 = vst [vmem:[#allocation2 + $0x30] sm:$0xf] %v634_v30  ;;  %638 = vst [vmem:[#allocation2 + $0x38] sm:$0xf] %v634_v30 }
  0x8d   :  { %644 = vst [vmem:[#allocation2 + $0x20] sm:$0xf0] %v642_v31  ;;  %645 = vst [vmem:[#allocation2 + $0x28] sm:$0xf0] %v642_v31 }
  0x8e   :  { %646 = vst [vmem:[#allocation2 + $0x30] sm:$0xf0] %v642_v31  ;;  %647 = vst [vmem:[#allocation2 + $0x38] sm:$0xf0] %v642_v31  ;;  %v655_v32 = vpop.permute.xlu0 %654  ;;  %v670_v33 = vpop.permute.xlu1 %669 }
  0x8f   :  { %v657_v34 = vrot.slane %v655_v32, 4  ;;  %v672_v35 = vrot.slane %v670_v33, 4 }
  0x90   :  { %v678_v39 = vld [vmem:[#allocation2] sm:$0xff]  ;;  %v679_v40 = vld [vmem:[#allocation2 + $0x8] sm:$0xff] }
  0x91   :  { %659 = vst [vmem:[#allocation2 + $0x40] sm:$0xf0] %v657_v34  ;;  %660 = vst [vmem:[#allocation2 + $0x48] sm:$0xf0] %v657_v34  ;;  %v680_v42 = vld [vmem:[#allocation2 + $0x10] sm:$0xff]  ;;  %v681_v47 = vld [vmem:[#allocation2 + $0x18] sm:$0xff]  ;;  %v695_v53 = vmul.f32 %v679_v40, %v7419_v36  ;;  %v694_v54 = vmul.f32 %v678_v39, %v7423_v38 }
  0x92   :  { %661 = vst [vmem:[#allocation2 + $0x50] sm:$0xf0] %v657_v34  ;;  %662 = vst [vmem:[#allocation2 + $0x58] sm:$0xf0] %v657_v34  ;;  %v649_v43 = vpop.permute.xlu0 %648  ;;  %v664_v44 = vpop.permute.xlu1 %663  ;;  %v696_v58 = vmul.f32 %v680_v42, %v7427_v45  ;;  %v697_v60 = vmul.f32 %v681_v47, %v7431_v48  ;;  %v63_v40 = vld [vmem:[%s9439_s4] sm:$0xff]  ;;  %v64_v42 = vld [vmem:[%s9439_s4 + $0x8] sm:$0xff] }
  0x93   :  { %674 = vst [vmem:[#allocation2 + $0x60] sm:$0xf0] %v672_v35  ;;  %675 = vst [vmem:[#allocation2 + $0x68] sm:$0xf0] %v672_v35 }
  0x94   :  { %676 = vst [vmem:[#allocation2 + $0x70] sm:$0xf0] %v672_v35  ;;  %677 = vst [vmem:[#allocation2 + $0x78] sm:$0xf0] %v672_v35  ;;  %v682_v50 = vld [vmem:[#allocation2 + $0x20] sm:$0xff]  ;;  %v683_v51 = vld [vmem:[#allocation2 + $0x28] sm:$0xff] }
  0x95   :  { %650 = vst [vmem:[#allocation2 + $0x40] sm:$0xf] %v649_v43  ;;  %651 = vst [vmem:[#allocation2 + $0x48] sm:$0xf] %v649_v43  ;;  %v684_v52 = vld [vmem:[#allocation2 + $0x30] sm:$0xff]  ;;  %v685_v55 = vld [vmem:[#allocation2 + $0x38] sm:$0xff]  ;;  %v699_v56 = vmul.f32 %v683_v51, %v7421_v37  ;;  %v698_v57 = vmul.f32 %v682_v50, %v7425_v41 }
  0x96   :  { %652 = vst [vmem:[#allocation2 + $0x50] sm:$0xf] %v649_v43  ;;  %653 = vst [vmem:[#allocation2 + $0x58] sm:$0xf] %v649_v43  ;;  %v700_v59 = vmul.f32 %v684_v52, %v7429_v46  ;;  %v701_v61 = vmul.f32 %v685_v55, %v7433_v49  ;;  %v68_v43 = vld [vmem:[%s9442_s7] sm:$0xf] }
  0x97   :  { %665 = vst [vmem:[#allocation2 + $0x60] sm:$0xf] %v664_v44  ;;  %666 = vst [vmem:[#allocation2 + $0x68] sm:$0xf] %v664_v44  ;;  %v6634_v62 = vpack.c.bf16 %v699_v56, %v695_v53  ;;  %v6636_v63 = vpack.c.bf16 %v698_v57, %v694_v54  ;;  %615 = vperm.xlu0 %6907, %v68_v43  }
  0x98   :  { %667 = vst [vmem:[#allocation2 + $0x70] sm:$0xf] %v664_v44  ;;  %668 = vst [vmem:[#allocation2 + $0x78] sm:$0xf] %v664_v44  ;;  %v6644_v0 = vpack.c.bf16 %v700_v59, %v696_v58  ;;  %v6642_v4 = vpack.c.bf16 %v701_v61, %v697_v60 }
  0x99   :  { %6635 = vmatprep.subr.bf16.mxu0 %v6634_v62 }
  0x9a   :  { %6643 = vmatprep.subr.bf16.mxu1 %v6642_v4  ;;  %6637 = vmatpush1.bf16.msra.mxu0 %v6636_v63 }
  0x9b   :  { %6645 = vmatpush1.bf16.msra.mxu1 %v6644_v0 }
  0x9c   :  { %v686_v15 = vld [vmem:[#allocation2 + $0x40] sm:$0xff]  ;;  %v687_v17 = vld [vmem:[#allocation2 + $0x48] sm:$0xff] }
  0x9d   :  { %v688_v18 = vld [vmem:[#allocation2 + $0x50] sm:$0xff]  ;;  %v689_v20 = vld [vmem:[#allocation2 + $0x58] sm:$0xff]  ;;  %v703_v23 = vmul.f32 %v687_v17, %v7443_v1  ;;  %v702_v24 = vmul.f32 %v686_v15, %v7449_v8 }
  0x9e   :  { %v690_v21 = vld [vmem:[#allocation2 + $0x60] sm:$0xff]  ;;  %v691_v22 = vld [vmem:[#allocation2 + $0x68] sm:$0xff]  ;;  %v704_v25 = vmul.f32 %v688_v18, %v7451_v9  ;;  %v705_v29 = vmul.f32 %v689_v20, %v7447_v5 }
  0x9f   :  { %v692_v26 = vld [vmem:[#allocation2 + $0x70] sm:$0xff]  ;;  %v693_v27 = vld [vmem:[#allocation2 + $0x78] sm:$0xff]  ;;  %v707_v28 = vmul.f32 %v691_v22, %v7445_v3  ;;  %v706_v30 = vmul.f32 %v690_v21, %v7455_v11 }
  0xa0   :  { %v709_v31 = vmul.f32 %v693_v27, %v7453_v10  ;;  %v708_v32 = vmul.f32 %v692_v26, %v7457_v13 }
  0xa1   :  { %v6638_v33 = vpack.c.bf16 %v707_v28, %v703_v23  ;;  %v6640_v34 = vpack.c.bf16 %v706_v30, %v702_v24 }
  0xa2   :  { %v6646_v35 = vpack.c.bf16 %v709_v31, %v705_v29  ;;  %v6648_v39 = vpack.c.bf16 %v708_v32, %v704_v25 }
  0xa3   :  { %6639 = vmatprep.subr.bf16.mxu0 %v6638_v33  ;;  %v7484_v44 = vpop.permute.xlu1 %610  ;;  %v7496_v54 = vpop.permute.xlu0 %605 }
  0xa4   :  { %6647 = vmatprep.subr.bf16.mxu1 %v6646_v35  ;;  %6641 = vmatpush1.bf16.msra.mxu0 %v6640_v34  ;;  %9452 = vst [vmem:[#allocation9_spill] sm:$0xff] %v7484_v44  ;;  %9453 = vst [vmem:[#allocation10_spill] sm:$0xff] %v7496_v54 }
  0xa5   :  { %6649 = vmatpush1.bf16.msra.mxu1 %v6648_v39 }
  0xa7   :  { %6574 = vmatmul.mubr.msk.f32.vlgmr.msra.gmra.mrb[0].mxu0 %vm710_vm0, %v63_v40  ;;  %v7486_v47 = vpop.permute.xlu1 %116  ;;  %v7508_v33 = vpop.permute.xlu0 %71 }
  0xa8   :  { %6576 = vmatmul.mubr.msk.f32.vlgmr.msra.gmra.mrb[0].mxu1 %vm710_vm0, %v63_v40  ;;  %787 = vmatprep.mubr.f32.mxu0 %v9444_v6 }
  0xa9   :  { %864 = vmatprep.mubr.f32.mxu1 %v9444_v6 }
  0xab   :  { %6575 = vmatmul.mubr.msk.f32.gmra.mrb[2].mxu0 %vm710_vm0, %v64_v42  ;;  %v7488_v50 = vpop.permute.xlu1 %95 }
  0xac   :  { %6577 = vmatmul.mubr.msk.f32.gmra.mrb[2].mxu1 %vm710_vm0, %v64_v42  ;;  %955 = vmatprep.mubr.f32.mxu0 %v9444_v6 }
  0xad   :  { %1026 = vmatprep.mubr.f32.mxu1 %v9444_v6 }
  0xaf   :  { %v7490_v51 = vpop.permute.xlu1 %99 }
  0xb3   :  { %v7492_v52 = vpop.permute.xlu1 %173 }
  0xb7   :  { %v7494_v53 = vpop.permute.xlu1 %145 }
  0xbb   :  { %v7502_v63 = vpop.permute.xlu1 %149 }
  0xbf   :  { %v7510_v42 = vpop.permute.xlu1 %200 }
 0x17a   :  { %v783_v55 = vpop.f32.mrb[0].mxu0 }
 0x17b   :  { %v784_v56 = vadd.f32 %v783_v55, %v7496_v54  ;;  %v785_v57 = vpop.f32.mrb[1].mxu0  ;;  %v860_v58 = vpop.f32.mrb[0].mxu1 }
 0x17c   :  { %v786_v59 = vadd.f32 %v785_v57, %v7496_v54  ;;  %v861_v60 = vadd.f32 %v860_v58, %v7496_v54  ;;  %v862_v61 = vpop.f32.mrb[1].mxu1 }
 0x17d   :  { %v863_v62 = vadd.f32 %v862_v61, %v7496_v54  ;;  %v871_v4 = vmul.f32 0.2, %v784_v56 }
 0x17e   :  { %v789_v0 = vpop.f32.mrb[2].mxu0  ;;  %v872_v20 = vmul.f32 0.2, %v786_v59  ;;  %v873_v21 = vmul.f32 0.2, %v861_v60 }
 0x17f   :  { %v790_v15 = vadd.f32 %v789_v0, %v7484_v44  ;;  %v866_v17 = vpop.f32.mrb[2].mxu1  ;;  %v791_v18 = vpop.f32.mrb[3].mxu0  ;;  %v874_v25 = vmul.f32 0.2, %v863_v62  ;;  %v879_v30 = vmax.f32 %v784_v56, %v871_v4  ;;  %v67_v56 = vld [vmem:[%s9441_s6] sm:$0xf] }
 0x180   :  { %v867_v22 = vadd.f32 %v866_v17, %v7484_v44  ;;  %v792_v23 = vadd.f32 %v791_v18, %v7484_v44  ;;  %v868_v24 = vpop.f32.mrb[3].mxu1  ;;  %v880_v34 = vmax.f32 %v786_v59, %v872_v20  ;;  %v881_v35 = vmax.f32 %v861_v60, %v873_v21  ;;  %v98_v59 = vpop.permute.xlu0 %97 }
 0x181   :  { %v875_v26 = vmul.f32 0.2, %v790_v15  ;;  %v869_v27 = vadd.f32 %v868_v24, %v7484_v44  ;;  %v882_v43 = vmax.f32 %v863_v62, %v874_v25  ;;  %v203_v60 = vpop.permute.xlu1 %202 }
 0x182   :  { %v877_v28 = vmul.f32 0.2, %v867_v22  ;;  %v876_v29 = vmul.f32 0.2, %v792_v23 }
 0x183   :  { %v883_v31 = vmax.f32 %v790_v15, %v875_v26  ;;  %v878_v32 = vmul.f32 0.2, %v869_v27 }
 0x184   :  { %v885_v39 = vmax.f32 %v867_v22, %v877_v28  ;;  %v884_v40 = vmax.f32 %v792_v23, %v876_v29  ;;  %v102_v62 = vpop.permute.xlu0 %101 }
 0x185   :  { %v6652_v55 = vpack.c.bf16 %v883_v31, %v879_v30  ;;  %v886_v57 = vmax.f32 %v869_v27, %v878_v32  ;;  %v7519_v4 = vpop.permute.xlu1 %206  ;;  %v7544_v31 = vand.u32 127, %v75_v2 }
 0x186   :  { %v6656_v58 = vpack.c.bf16 %v885_v39, %v881_v35  ;;  %v6650_v61 = vpack.c.bf16 %v884_v40, %v880_v34 }
 0x187   :  { %v6654_v0 = vpack.c.bf16 %v886_v57, %v882_v43  ;;  %vm105_vm2 = vcmp.lt.s32.totalorder %v7544_v31, 17  ;;  %vm151_vm3 = vcmp.lt.s32.totalorder %v7544_v31, 16  ;;  %vm208_vm4 = vcmp.lt.s32.totalorder %v7544_v31, 15 }
 0x188   :  { %6651 = vmatprep.subr.bf16.mxu0 %v6650_v61  ;;  %v144_v15 = vpop.permute.xlu0 %143  ;;  %v108_v35 = vsel %vm105_vm2, %v7488_v50, %v98_v59  ;;  %v107_v2 = vsel %vm105_vm2, %v98_v59, %v7490_v51  ;;  %v161_v61 = vrot.slane %v7419_v36, 4  ;;  %v162_v59 = vrot.slane %v7427_v45, 4 }
 0x189   :  { %6655 = vmatprep.subr.bf16.mxu1 %v6654_v0  ;;  %6653 = vmatpush1.bf16.msra.mxu0 %v6652_v55  ;;  %v7521_v17 = vpop.permute.xlu1 %245  ;;  %v111_v40 = vmul.f32 %v108_v35, %v7419_v36  ;;  %v109_v55 = vsel %vm105_vm2, %v102_v62, %v7488_v50  ;;  %v112_v0 = vmul.f32 %v107_v2, %v7427_v45  ;;  %vm253_vm5 = vcmp.lt.s32.totalorder %v7544_v31, 1 }
 0x18a   :  { %6657 = vmatpush1.bf16.msra.mxu1 %v6656_v58  ;;  %v106_v58 = vsel %vm105_vm2, %v7490_v51, %v102_v62  ;;  %v110_v50 = vmul.f32 %v109_v55, %v7423_v38  ;;  %v163_v51 = vrot.slane %v7431_v48, 4  ;;  %v155_v45 = vsel %vm151_vm3, %v7502_v63, %v144_v15 }
 0x18b   :  { %v126_v57 = vrot.slane %v111_v40, %v7334_v7  ;;  %v160_v40 = vrot.slane %v7423_v38, 4  ;;  %v113_v2 = vmul.f32 %v106_v58, %v7431_v48  ;;  %v263_v55 = vrot.slane %v7421_v37, 4 }
 0x18c   :  { %6578 = vmatmul.mubr.msk.f32.vlgmr.msra.gmra.mrb[4].mxu0 %vm887_vm1, %v67_v56  ;;  %v148_v18 = vpop.permute.xlu0 %147  ;;  %v130_v54 = vrot.slane %v112_v0, %v7334_v7  ;;  %v211_v48 = vsel %vm208_vm4, %v7510_v42, %v203_v60  ;;  %v264_v58 = vrot.slane %v7429_v46, 4  ;;  %vm322_vm6 = vcmp.lt.s32.totalorder %v7544_v31, 127 }
 0x18d   :  { %6579 = vmatmul.mubr.msk.f32.vlgmr.msra.gmra.mrb[4].mxu1 %vm887_vm1, %v67_v56  ;;  %1385 = vmatprep.mubr.f32.mxu0 %v9444_v6  ;;  %v7523_v20 = vpop.permute.xlu1 %247  ;;  %v154_v56 = vsel %vm151_vm3, %v144_v15, %v7494_v53  ;;  %v153_v36 = vsel %vm151_vm3, %v7494_v53, %v148_v18  ;;  %v136_v38 = vmul.f32 %v126_v57, %v7486_v47  ;;  %v262_v53 = vrot.slane %v7425_v41, 4 }
 0x18e   :  { %1462 = vmatprep.mubr.f32.mxu1 %v9444_v6  ;;  %v169_v6 = vmul.f32 %v161_v61, %v154_v56  ;;  %v152_v44 = vsel %vm151_vm3, %v148_v18, %v7502_v63  ;;  %v170_v15 = vmul.f32 %v162_v59, %v153_v36  ;;  %v265_v61 = vrot.slane %v7433_v49, 4 }
 0x18f   :  { %v134_v63 = vrot.slane %v113_v2, %v7334_v7  ;;  %v212_v18 = vsel %vm208_vm4, %v7519_v4, %v7510_v42  ;;  %v171_v0 = vmul.f32 %v163_v51, %v152_v44  ;;  %v376_v56 = vrot.slane %v7449_v8, 4 }
 0x190   :  { %v7525_v21 = vpop.permute.xlu0 %218  ;;  %v187_v44 = vrot.slane %v170_v15, %v7334_v7  ;;  %v256_v42 = vsel %vm253_vm5, %v7521_v17, %v7523_v20  ;;  %vm367_vm7 = vcmp.lt.s32.totalorder %v7544_v31, 113  ;;  %vm424_vm8 = vcmp.lt.s32.totalorder %v7544_v31, 112 }
 0x191   :  { %v7527_v22 = vpop.permute.xlu1 %251  ;;  %vm469_vm9 = vcmp.lt.s32.totalorder %v7544_v31, 111  ;;  %v7180_v31 = vld [vmem:[#allocation3 + $0x58] sm:$0xff] }
 0x192   :  { %v194_v15 = vmul.f32 %v187_v44, %v7492_v52 }
 0x194   :  { %v205_v23 = vpop.permute.xlu0 %204 }
 0x195   :  { %v7529_v24 = vpop.permute.xlu1 %332  ;;  %v210_v57 = vsel %vm208_vm4, %v203_v60, %v205_v23  ;;  %v183_v60 = vrot.slane %v169_v6, %v7334_v7  ;;  %v209_v36 = vsel %vm208_vm4, %v205_v23, %v7519_v4  ;;  %v138_v23 = vmul.f32 %v134_v63, %v7486_v47 }
 0x196   :  { %9454 = vst [vmem:[#allocation11_spill] sm:$0xff] %v7529_v24  ;;  %v168_v24 = vmul.f32 %v160_v40, %v155_v45  ;;  %v214_v40 = vmul.f32 %v211_v48, %v7421_v37  ;;  %v137_v45 = vmul.f32 %v130_v54, %v7486_v47  ;;  %v215_v51 = vmul.f32 %v210_v57, %v7429_v46 }
 0x197   :  { %v213_v37 = vmul.f32 %v212_v18, %v7425_v41  ;;  %v257_v46 = vsel %vm253_vm5, %v7527_v22, %v7521_v17  ;;  %v271_v48 = vmul.f32 %v263_v55, %v256_v42  ;;  %v379_v42 = vrot.slane %v7447_v5, 4 }
 0x198   :  { %v7531_v25 = vpop.permute.xlu0 %275  ;;  %v179_v4 = vrot.slane %v168_v24, %v7334_v7  ;;  %v228_v41 = vrot.slane %v214_v40, %v7334_v7  ;;  %v193_v24 = vmul.f32 %v183_v60, %v7492_v52  ;;  %v232_v57 = vrot.slane %v215_v51, %v7334_v7 }
 0x199   :  { %v7533_v26 = vpop.permute.xlu1 %314  ;;  %v224_v18 = vrot.slane %v213_v37, %v7334_v7  ;;  %v377_v37 = vrot.slane %v7443_v1, 4 }
 0x19a   :  { %v192_v55 = vmul.f32 %v179_v4, %v7492_v52  ;;  %v238_v44 = vmul.f32 %v228_v41, %v7525_v21 }
 0x19c   :  { %v7535_v27 = vpop.permute.xlu0 %249 }
 0x19d   :  { %v7537_v28 = vpop.permute.xlu1 %318  ;;  %v255_v54 = vsel %vm253_vm5, %v7523_v20, %v7535_v27  ;;  %v254_v20 = vsel %vm253_vm5, %v7535_v27, %v7527_v22  ;;  %v142_v22 = vadd.f32 %v138_v23, %v7508_v33 }
 0x19e   :  { %v272_v63 = vmul.f32 %v264_v58, %v255_v54  ;;  %v273_v58 = vmul.f32 %v265_v61, %v254_v20  ;;  %v378_v61 = vrot.slane %v7451_v9, 4 }
 0x1a0   :  { %v7539_v29 = vpop.permute.xlu0 %303  ;;  %v293_v23 = vrot.slane %v273_v58, %v7334_v7  ;;  %v481_v58 = vrot.slane %v7453_v10, 4 }
 0x1a1   :  { %v7541_v30 = vpop.permute.xlu1 %389 }
 0x1a2   :  { %9455 = vst [vmem:[#allocation12_spill] sm:$0xff] %v7541_v30  ;;  %v122_v30 = vrot.slane %v110_v50, %v7334_v7  ;;  %v140_v50 = vadd.f32 %v136_v38, %v7508_v33  ;;  %v191_v38 = vrot.slane %v171_v0, %v7334_v7  ;;  %v270_v0 = vmul.f32 %v262_v53, %v257_v46 }
 0x1a3   :  { %v239_v53 = vmul.f32 %v232_v57, %v7525_v21 }
 0x1a4   :  { %v7546_v32 = vpop.permute.xlu0 %316  ;;  %v135_v6 = vmul.f32 %v122_v30, %v7486_v47  ;;  %v216_v30 = vmul.f32 %v209_v36, %v7433_v49  ;;  %v141_v47 = vadd.f32 %v137_v45, %v7508_v33  ;;  %v195_v27 = vmul.f32 %v191_v38, %v7492_v52 }
 0x1a5   :  { %v7549_v34 = vpop.permute.xlu1 %361  ;;  %v197_v36 = vadd.f32 %v193_v24, %v140_v50  ;;  %v285_v45 = vrot.slane %v271_v48, %v7334_v7  ;;  %v237_v52 = vmul.f32 %v224_v18, %v7525_v21  ;;  %v281_v4 = vrot.slane %v270_v0, %v7334_v7 }
 0x1a6   :  { %v139_v49 = vadd.f32 %v135_v6, %v7508_v33  ;;  %v236_v60 = vrot.slane %v216_v30, %v7334_v7  ;;  %v198_v51 = vadd.f32 %v194_v15, %v141_v47  ;;  %v289_v6 = vrot.slane %v272_v63, %v7334_v7 }
 0x1a7   :  { %v199_v50 = vadd.f32 %v195_v27, %v142_v22  ;;  %v242_v46 = vadd.f32 %v238_v44, %v197_v36  ;;  %v295_v30 = vmul.f32 %v285_v45, %v7531_v25  ;;  %v325_v41 = vsel %vm322_vm6, %v7533_v26, %v7546_v32 }
 0x1a8   :  { %v7554_v39 = vpop.permute.xlu0 %320  ;;  %v196_v33 = vadd.f32 %v192_v55, %v139_v49  ;;  %v240_v54 = vmul.f32 %v236_v60, %v7525_v21  ;;  %v478_v48 = vrot.slane %v7455_v11, 4  ;;  %v243_v20 = vadd.f32 %v239_v53, %v198_v51 }
 0x1a9   :  { %v7557_v43 = vpop.permute.xlu1 %365  ;;  %v296_v21 = vmul.f32 %v289_v6, %v7531_v25  ;;  %v326_v47 = vsel %vm322_vm6, %v7554_v39, %v7533_v26  ;;  %v479_v15 = vrot.slane %v7445_v3, 4  ;;  %v294_v63 = vmul.f32 %v281_v4, %v7531_v25 }
 0x1aa   :  { %v241_v57 = vadd.f32 %v237_v52, %v196_v33  ;;  %v324_v49 = vsel %vm322_vm6, %v7546_v32, %v7537_v28  ;;  %v480_v18 = vrot.slane %v7457_v13, 4  ;;  %v244_v55 = vadd.f32 %v240_v54, %v199_v50 }
 0x1ab   :  { %v297_v0 = vmul.f32 %v293_v23, %v7531_v25  ;;  %v327_v22 = vmul.f32 %v325_v41, %v7449_v8  ;;  %v323_v26 = vsel %vm322_vm6, %v7537_v28, %v7554_v39  ;;  %v299_v27 = vadd.f32 %v295_v30, %v242_v46  ;;  %v9456_v8 = vld [vmem:[#allocation11_spill] sm:$0xff] }
 0x1ac   :  { %v7577_v35 = vpop.permute.xlu0 %359  ;;  %v307_v60 = vmul.f32 %v7539_v29, %v7348_v14  ;;  %v330_v32 = vmul.f32 %v326_v47, %v7447_v5  ;;  %v300_v36 = vadd.f32 %v296_v21, %v243_v20  ;;  %v308_v45 = vmul.f32 %v7539_v29, %v7352_v16 }
 0x1ad   :  { %v7585_v62 = vpop.permute.xlu1 %416  ;;  %v328_v25 = vmul.f32 %v324_v49, %v7443_v1  ;;  %v370_v44 = vsel %vm367_vm7, %v7577_v35, %v7549_v34  ;;  %v298_v39 = vadd.f32 %v294_v63, %v241_v57  ;;  %v306_v14 = vmul.f32 %v7539_v29, %v7346_v12 }
 0x1ae   :  { %v329_v51 = vmul.f32 %v323_v26, %v7451_v9  ;;  %v301_v1 = vadd.f32 %v297_v0, %v244_v55  ;;  %v309_v6 = vmul.f32 %v7539_v29, %v7356_v19  ;;  %v338_v33 = vrot.slane %v327_v22, %v7334_v7 }
 0x1af   :  { %v311_v12 = vadd.f32 %v307_v60, %v299_v27  ;;  %v350_v9 = vrot.slane %v330_v32, %v7334_v7  ;;  %v384_v4 = vmul.f32 %v376_v56, %v370_v44  ;;  %v312_v50 = vadd.f32 %v308_v45, %v300_v36  ;;  %v9457_v27 = vld [vmem:[#allocation12_spill] sm:$0xff] }
 0x1b0   :  { %v7613_v59 = vpop.permute.xlu0 %363  ;;  %v342_v19 = vrot.slane %v328_v25, %v7334_v7  ;;  %v310_v54 = vadd.f32 %v306_v14, %v298_v39  ;;  %v346_v23 = vrot.slane %v329_v51, %v7334_v7  ;;  %v351_v56 = vmul.f32 %v338_v33, %v9456_v8 }
 0x1b1   :  { %v7621_v2 = vpop.permute.xlu1 %418  ;;  %v369_v16 = vsel %vm367_vm7, %v7549_v34, %v7613_v59  ;;  %v368_v52 = vsel %vm367_vm7, %v7613_v59, %v7557_v43  ;;  %v371_v34 = vsel %vm367_vm7, %v7557_v43, %v7577_v35  ;;  %v313_v35 = vadd.f32 %v309_v6, %v301_v1 }
 0x1b2   :  { %v385_v29 = vmul.f32 %v377_v37, %v369_v16  ;;  %v427_v59 = vsel %vm424_vm8, %v7585_v62, %v7621_v2  ;;  %v386_v46 = vmul.f32 %v378_v61, %v368_v52  ;;  %v387_v30 = vmul.f32 %v379_v42, %v371_v34 }
 0x1b3   :  { %v354_v20 = vmul.f32 %v350_v9, %v9456_v8  ;;  %v395_v21 = vrot.slane %v384_v4, %v7334_v7  ;;  %v429_v61 = vmul.f32 %v427_v59, %v7455_v11  ;;  %v352_v5 = vmul.f32 %v342_v19, %v9456_v8 }
 0x1b4   :  { %v7654_v17 = vpop.permute.xlu0 %434  ;;  %v399_v42 = vrot.slane %v385_v29, %v7334_v7  ;;  %v353_v63 = vmul.f32 %v346_v23, %v9456_v8  ;;  %v403_v49 = vrot.slane %v386_v46, %v7334_v7  ;;  %v407_v0 = vrot.slane %v387_v30, %v7334_v7 }
 0x1b5   :  { %v7660_v40 = vpop.permute.xlu1 %422  ;;  %v408_v60 = vmul.f32 %v395_v21, %v9457_v27  ;;  %v440_v32 = vrot.slane %v429_v61, %v7334_v7  ;;  %v356_v25 = vadd.f32 %v352_v5, %v311_v12 }
 0x1b6   :  { %v409_v44 = vmul.f32 %v399_v42, %v9457_v27  ;;  %v357_v51 = vadd.f32 %v353_v63, %v312_v50  ;;  %v410_v16 = vmul.f32 %v403_v49, %v9457_v27  ;;  %v411_v1 = vmul.f32 %v407_v0, %v9457_v27 }
 0x1b8   :  { %v421_v38 = vpop.permute.xlu0 %420  ;;  %v413_v52 = vadd.f32 %v409_v44, %v356_v25 }
 0x1b9   :  { %v7682_v24 = vpop.permute.xlu1 %461  ;;  %v426_v43 = vsel %vm424_vm8, %v7621_v2, %v421_v38  ;;  %v425_v37 = vsel %vm424_vm8, %v421_v38, %v7660_v40  ;;  %v428_v2 = vsel %vm424_vm8, %v7660_v40, %v7585_v62  ;;  %v355_v40 = vadd.f32 %v351_v56, %v310_v54 }
 0x1ba   :  { %v430_v57 = vmul.f32 %v426_v43, %v7445_v3  ;;  %v431_v55 = vmul.f32 %v425_v37, %v7457_v13  ;;  %v432_v22 = vmul.f32 %v428_v2, %v7453_v10  ;;  %v453_v3 = vmul.f32 %v440_v32, %v7654_v17 }
 0x1bb   :  { %v412_v33 = vadd.f32 %v408_v60, %v355_v40  ;;  %v414_v13 = vadd.f32 %v410_v16, %v357_v51 }
 0x1bc   :  { %v7715_v28 = vpop.permute.xlu0 %491  ;;  %v444_v39 = vrot.slane %v430_v57, %v7334_v7 }
 0x1bd   :  { %v464_v53 = vpop.permute.xlu1 %463 }
 0x1be   :  { %v472_v38 = vsel %vm469_vm9, %v7682_v24, %v464_v53  ;;  %v454_v12 = vmul.f32 %v444_v39, %v7654_v17 }
 0x1bf   :  { %v486_v36 = vmul.f32 %v478_v48, %v472_v38  ;;  %v358_v48 = vadd.f32 %v354_v20, %v313_v35 }
 0x1c0   :  { %v466_v41 = vpop.permute.xlu0 %465  ;;  %v458_v29 = vadd.f32 %v454_v12, %v413_v52 }
 0x1c1   :  { %v468_v47 = vpop.permute.xlu1 %467  ;;  %v471_v62 = vsel %vm469_vm9, %v464_v53, %v466_v41  ;;  %v448_v53 = vrot.slane %v431_v55, %v7334_v7  ;;  %v415_v4 = vadd.f32 %v411_v1, %v358_v48 }
 0x1c2   :  { %v470_v26 = vsel %vm469_vm9, %v466_v41, %v468_v47  ;;  %v473_v45 = vsel %vm469_vm9, %v468_v47, %v7682_v24  ;;  %v487_v14 = vmul.f32 %v479_v15, %v471_v62  ;;  %v452_v24 = vrot.slane %v432_v22, %v7334_v7 }
 0x1c3   :  { %v488_v11 = vmul.f32 %v480_v18, %v470_v26  ;;  %v489_v6 = vmul.f32 %v481_v58, %v473_v45  ;;  %v497_v15 = vrot.slane %v486_v36, %v7334_v7  ;;  %v455_v18 = vmul.f32 %v448_v53, %v7654_v17 }
 0x1c4   :  { %v501_v9 = vrot.slane %v487_v14, %v7334_v7  ;;  %v456_v50 = vmul.f32 %v452_v24, %v7654_v17  ;;  %v457_v58 = vadd.f32 %v453_v3, %v412_v33 }
 0x1c5   :  { %v505_v34 = vrot.slane %v488_v11, %v7334_v7  ;;  %v509_v10 = vrot.slane %v489_v6, %v7334_v7  ;;  %v510_v19 = vmul.f32 %v497_v15, %v7715_v28  ;;  %v459_v54 = vadd.f32 %v455_v18, %v414_v13 }
 0x1c6   :  { %v511_v59 = vmul.f32 %v501_v9, %v7715_v28  ;;  %v460_v46 = vadd.f32 %v456_v50, %v415_v4 }
 0x1c7   :  { %v512_v23 = vmul.f32 %v505_v34, %v7715_v28  ;;  %v513_v43 = vmul.f32 %v509_v10, %v7715_v28  ;;  %v7806_v35 = vadd.f32 %v510_v19, %v457_v58 }
 0x1c8   :  { %v7808_v8 = vadd.f32 %v511_v59, %v458_v29 }
 0x1c9   :  { %v7810_v17 = vadd.f32 %v512_v23, %v459_v54  ;;  %v7812_v7 = vadd.f32 %v513_v43, %v460_v46  ;;  %v519_v56 = vsel %vm518_vm10, %v7806_v35, -inf }
 0x1ca   :  { %v526_v30 = vsel %vm518_vm10, %v7808_v8, -inf  ;;  %v520_v41 = vrot.slane %v519_v56, 4 }
 0x1cb   :  { %v533_v37 = vsel %vm518_vm10, %v7810_v17, -inf  ;;  %v540_v28 = vsel %vm518_vm10, %v7812_v7, -inf  ;;  %v527_v20 = vrot.slane %v526_v30, 4 }
 0x1cc   :  { %v534_v21 = vrot.slane %v533_v37, 4  ;;  %v541_v61 = vrot.slane %v540_v28, 4  ;;  %v521_v2 = vmax.f32 %v519_v56, %v520_v41 }
 0x1cd   :  { %v528_v47 = vmax.f32 %v526_v30, %v527_v20 }
 0x1ce   :  { %v535_v5 = vmax.f32 %v533_v37, %v534_v21  ;;  %v542_v42 = vmax.f32 %v540_v28, %v541_v61  ;;  %v522_v57 = vrot.slane %v521_v2, 2 }
 0x1cf   :  { %v529_v38 = vrot.slane %v528_v47, 2 }
 0x1d0   :  { %v536_v63 = vrot.slane %v535_v5, 2  ;;  %v543_v49 = vrot.slane %v542_v42, 2  ;;  %v523_v55 = vmax.f32 %v521_v2, %v522_v57 }
 0x1d1   :  { %v530_v62 = vmax.f32 %v528_v47, %v529_v38 }
 0x1d2   :  { %v537_v40 = vmax.f32 %v535_v5, %v536_v63  ;;  %v544_v0 = vmax.f32 %v542_v42, %v543_v49  ;;  %v524_v22 = vrot.slane %v523_v55, 1 }
 0x1d3   :  { %v531_v26 = vrot.slane %v530_v62, 1 }
 0x1d4   :  { %v538_v27 = vrot.slane %v537_v40, 1  ;;  %v545_v60 = vrot.slane %v544_v0, 1  ;;  %v525_v32 = vmax.f32 %v523_v55, %v524_v22  ;;  %v7830_v22 = vpop.permute.xlu0 %615 }
 0x1d5   :  { %v532_v36 = vmax.f32 %v530_v62, %v531_v26 }
 0x1d6   :  { %v539_v45 = vmax.f32 %v537_v40, %v538_v27  ;;  %v546_v25 = vmax.f32 %v544_v0, %v545_v60  ;;  %v547_v44 = vsub.f32 %v7806_v35, %v525_v32 }
 0x1d7   :  { %v548_v39 = vsub.f32 %v7808_v8, %v532_v36 }
 0x1d8   :  { %v549_v14 = vsub.f32 %v7810_v17, %v539_v45  ;;  %v550_v51 = vsub.f32 %v7812_v7, %v546_v25  ;;  %v551_v16 = vmul.f32 1.442695, %v547_v44 }
 0x1d9   :  { %v553_v53 = vmul.f32 1.442695, %v548_v39 }
 0x1da   :  { %v555_v11 = vmul.f32 1.442695, %v549_v14  ;;  %v557_v48 = vmul.f32 1.442695, %v550_v51  ;;  %6908 = vpow2.f32 %v551_v16 }
 0x1db   :  { %6910 = vpow2.f32 %v553_v53 }
 0x1dc   :  { %6912 = vpow2.f32 %v555_v11 }
 0x1dd   :  { %6914 = vpow2.f32 %v557_v48 }
 0x1e4   :  { %v6909_v1 = vpop.eup %6908 }
 0x1e5   :  { %v6911_v24 = vpop.eup %6910  ;;  %v559_v3 = vsel %vm518_vm10, %v6909_v1, 0.0 }
 0x1e6   :  { %v6913_v6 = vpop.eup %6912  ;;  %v566_v15 = vsel %vm518_vm10, %v6911_v24, 0.0  ;;  %v560_v12 = vrot.slane %v559_v3, 4 }
 0x1e7   :  { %v6915_v33 = vpop.eup %6914  ;;  %v573_v52 = vsel %vm518_vm10, %v6913_v6, 0.0  ;;  %v567_v13 = vrot.slane %v566_v15, 4 }
 0x1e8   :  { %v580_v9 = vsel %vm518_vm10, %v6915_v33, 0.0  ;;  %v574_v18 = vrot.slane %v573_v52, 4  ;;  %v561_v4 = vadd.f32 %v560_v12, %v559_v3 }
 0x1e9   :  { %v581_v34 = vrot.slane %v580_v9, 4  ;;  %v568_v50 = vadd.f32 %v567_v13, %v566_v15 }
 0x1ea   :  { %v575_v10 = vadd.f32 %v574_v18, %v573_v52  ;;  %v562_v19 = vrot.slane %v561_v4, 2 }
 0x1eb   :  { %v582_v58 = vadd.f32 %v581_v34, %v580_v9  ;;  %v569_v29 = vrot.slane %v568_v50, 2 }
 0x1ec   :  { %v576_v59 = vrot.slane %v575_v10, 2  ;;  %v563_v23 = vadd.f32 %v562_v19, %v561_v4 }
 0x1ed   :  { %v583_v54 = vrot.slane %v582_v58, 2  ;;  %v570_v46 = vadd.f32 %v569_v29, %v568_v50 }
 0x1ee   :  { %v577_v43 = vadd.f32 %v576_v59, %v575_v10  ;;  %v564_v30 = vrot.slane %v563_v23, 1 }
 0x1ef   :  { %v584_v56 = vadd.f32 %v583_v54, %v582_v58  ;;  %v571_v37 = vrot.slane %v570_v46, 1 }
 0x1f0   :  { %v578_v41 = vrot.slane %v577_v43, 1  ;;  %v565_v20 = vadd.f32 %v564_v30, %v563_v23 }
 0x1f1   :  { %v585_v28 = vrot.slane %v584_v56, 1  ;;  %v572_v21 = vadd.f32 %v571_v37, %v570_v46 }
 0x1f2   :  { %v579_v61 = vadd.f32 %v578_v41, %v577_v43  ;;  %6916 = vlog2.f32 %v565_v20 }
 0x1f3   :  { %v586_v2 = vadd.f32 %v585_v28, %v584_v56  ;;  %6918 = vlog2.f32 %v572_v21 }
 0x1f4   :  { %6920 = vlog2.f32 %v579_v61 }
 0x1f5   :  { %6922 = vlog2.f32 %v586_v2 }
 0x1fc   :  { %v6917_v47 = vpop.eup %6916 }
 0x1fd   :  { %v6919_v5 = vpop.eup %6918  ;;  %v588_v38 = vmul.f32 0.6931472, %v6917_v47 }
 0x1fe   :  { %v6921_v42 = vpop.eup %6920  ;;  %v590_v63 = vmul.f32 0.6931472, %v6919_v5 }
 0x1ff   :  { %v6923_v57 = vpop.eup %6922  ;;  %v592_v49 = vmul.f32 0.6931472, %v6921_v42  ;;  %v595_v62 = vadd.f32 %v588_v38, %v525_v32 }
 0x200   :  { %v594_v55 = vmul.f32 0.6931472, %v6923_v57  ;;  %v596_v40 = vadd.f32 %v590_v63, %v532_v36 }
 0x201   :  { %v597_v0 = vadd.f32 %v592_v49, %v539_v45  ;;  %v7833_v60 = vsub.f32 %v7806_v35, %v595_v62 }
 0x202   :  { %v598_v26 = vadd.f32 %v594_v55, %v546_v25  ;;  %v7837_v51 = vsub.f32 %v7808_v8, %v596_v40 }
 0x203   :  { %v7840_v16 = vsub.f32 %v7810_v17, %v597_v0 }
 0x204   :  { %v7845_v25 = vsub.f32 %v7812_v7, %v598_v26 }
 0x25f   :  { %v957_v27 = vpop.f32.mrb[4].mxu0 }
 0x260   :  { %v1028_v44 = vpop.f32.mrb[4].mxu1  ;;  %v959_v39 = vpop.f32.mrb[5].mxu0  ;;  %v958_v14 = vadd.f32 %v957_v27, %v7830_v22 }
 0x261   :  { %v960_v32 = vadd.f32 %v959_v39, %v7830_v22  ;;  %v1030_v36 = vpop.f32.mrb[5].mxu1  ;;  %v1029_v45 = vadd.f32 %v1028_v44, %v7830_v22 }
 0x262   :  { %v1031_v35 = vadd.f32 %v1030_v36, %v7830_v22  ;;  %v1033_v53 = vadd.f32 %v958_v14, %v7833_v60 }
 0x263   :  { %v1034_v11 = vadd.f32 %v960_v32, %v7837_v51  ;;  %v1035_v8 = vadd.f32 %v1029_v45, %v7840_v16 }
 0x264   :  { %v1036_v48 = vadd.f32 %v1031_v35, %v7845_v25  ;;  %v1037_v17 = vsel %vm518_vm10, %v1033_v53, -inf }
 0x265   :  { %v1044_v1 = vsel %vm518_vm10, %v1034_v11, -inf  ;;  %v1038_v24 = vrot.slane %v1037_v17, 4  ;;  %v1051_v6 = vsel %vm518_vm10, %v1035_v8, -inf }
 0x266   :  { %v1045_v33 = vrot.slane %v1044_v1, 4  ;;  %v1058_v7 = vsel %vm518_vm10, %v1036_v48, -inf  ;;  %v1052_v3 = vrot.slane %v1051_v6, 4 }
 0x267   :  { %v1059_v15 = vrot.slane %v1058_v7, 4  ;;  %v1039_v52 = vmax.f32 %v1037_v17, %v1038_v24 }
 0x268   :  { %v1046_v12 = vmax.f32 %v1044_v1, %v1045_v33  ;;  %v1053_v9 = vmax.f32 %v1051_v6, %v1052_v3 }
 0x269   :  { %v1060_v13 = vmax.f32 %v1058_v7, %v1059_v15  ;;  %v1040_v18 = vrot.slane %v1039_v52, 2 }
 0x26a   :  { %v1047_v34 = vrot.slane %v1046_v12, 2  ;;  %v1054_v4 = vrot.slane %v1053_v9, 2 }
 0x26b   :  { %v1061_v50 = vrot.slane %v1060_v13, 2  ;;  %v1041_v10 = vmax.f32 %v1039_v52, %v1040_v18 }
 0x26c   :  { %v1048_v58 = vmax.f32 %v1046_v12, %v1047_v34  ;;  %v1055_v19 = vmax.f32 %v1053_v9, %v1054_v4 }
 0x26d   :  { %v1062_v29 = vmax.f32 %v1060_v13, %v1061_v50  ;;  %v1042_v59 = vrot.slane %v1041_v10, 1 }
 0x26e   :  { %v1049_v54 = vrot.slane %v1048_v58, 1  ;;  %v1056_v23 = vrot.slane %v1055_v19, 1 }
 0x26f   :  { %v1063_v46 = vrot.slane %v1062_v29, 1  ;;  %v1043_v43 = vmax.f32 %v1041_v10, %v1042_v59 }
 0x270   :  { %v1050_v56 = vmax.f32 %v1048_v58, %v1049_v54  ;;  %v1057_v30 = vmax.f32 %v1055_v19, %v1056_v23 }
 0x271   :  { %v1064_v37 = vmax.f32 %v1062_v29, %v1063_v46  ;;  %v1065_v41 = vsub.f32 %v1033_v53, %v1043_v43 }
 0x272   :  { %v1066_v28 = vsub.f32 %v1034_v11, %v1050_v56  ;;  %v1067_v20 = vsub.f32 %v1035_v8, %v1057_v30 }
 0x273   :  { %v1068_v21 = vsub.f32 %v1036_v48, %v1064_v37  ;;  %v1069_v61 = vmul.f32 1.442695, %v1065_v41 }
 0x274   :  { %v1071_v2 = vmul.f32 1.442695, %v1066_v28  ;;  %v1073_v47 = vmul.f32 1.442695, %v1067_v20 }
 0x275   :  { %v1075_v5 = vmul.f32 1.442695, %v1068_v21  ;;  %6924 = vpow2.f32 %v1069_v61 }
 0x276   :  { %6926 = vpow2.f32 %v1071_v2 }
 0x277   :  { %6928 = vpow2.f32 %v1075_v5 }
 0x278   :  { %6930 = vpow2.f32 %v1073_v47 }
 0x27f   :  { %v6925_v42 = vpop.eup %6924 }
 0x280   :  { %v6927_v57 = vpop.eup %6926  ;;  %v1077_v38 = vsel %vm518_vm10, %v6925_v42, 0.0 }
 0x281   :  { %v6929_v63 = vpop.eup %6928  ;;  %v1084_v49 = vsel %vm518_vm10, %v6927_v57, 0.0  ;;  %v1078_v55 = vrot.slane %v1077_v38, 4 }
 0x282   :  { %v6931_v62 = vpop.eup %6930  ;;  %v1085_v40 = vrot.slane %v1084_v49, 4  ;;  %v1098_v0 = vsel %vm518_vm10, %v6929_v63, 0.0 }
 0x283   :  { %v1099_v26 = vrot.slane %v1098_v0, 4  ;;  %v1079_v27 = vadd.f32 %v1078_v55, %v1077_v38  ;;  %v1091_v44 = vsel %vm518_vm10, %v6931_v62, 0.0 }
 0x284   :  { %v1086_v39 = vadd.f32 %v1085_v40, %v1084_v49  ;;  %v1092_v14 = vrot.slane %v1091_v44, 4 }
 0x285   :  { %v1100_v32 = vadd.f32 %v1099_v26, %v1098_v0  ;;  %v1080_v36 = vrot.slane %v1079_v27, 2 }
 0x286   :  { %v1087_v45 = vrot.slane %v1086_v39, 2  ;;  %v1093_v35 = vadd.f32 %v1092_v14, %v1091_v44 }
 0x287   :  { %v1101_v53 = vrot.slane %v1100_v32, 2  ;;  %v1081_v11 = vadd.f32 %v1080_v36, %v1079_v27 }
 0x288   :  { %v1088_v8 = vadd.f32 %v1087_v45, %v1086_v39  ;;  %v1094_v48 = vrot.slane %v1093_v35, 2 }
 0x289   :  { %v1102_v17 = vadd.f32 %v1101_v53, %v1100_v32  ;;  %v1082_v1 = vrot.slane %v1081_v11, 1 }
 0x28a   :  { %v1089_v24 = vrot.slane %v1088_v8, 1  ;;  %v1095_v6 = vadd.f32 %v1094_v48, %v1093_v35 }
 0x28b   :  { %v1103_v33 = vrot.slane %v1102_v17, 1  ;;  %v1083_v7 = vadd.f32 %v1082_v1, %v1081_v11 }
 0x28c   :  { %v1090_v3 = vadd.f32 %v1089_v24, %v1088_v8  ;;  %v1096_v15 = vrot.slane %v1095_v6, 1 }
 0x28d   :  { %6932 = vrcp.f32 %v1083_v7  ;;  %v1104_v12 = vadd.f32 %v1103_v33, %v1102_v17 }
 0x28e   :  { %v1097_v52 = vadd.f32 %v1096_v15, %v1095_v6  ;;  %6934 = vrcp.f32 %v1090_v3 }
 0x290   :  { %6936 = vrcp.f32 %v1097_v52 }
 0x291   :  { %6938 = vrcp.f32 %v1104_v12 }
 0x297   :  { %v6933_v9 = vpop.eup %6932 }
 0x298   :  { %v1109_v13 = vmul.f32 %v6933_v9, %v6925_v42  ;;  %v6935_v18 = vpop.eup %6934 }
 0x299   :  { %v1110_v50 = vmul.f32 %v6935_v18, %v6927_v57  ;;  %v7928_v18 = vld [vmem:[#allocation3 + $0x8] sm:$0xff] }
 0x29a   :  { %v6937_v34 = vpop.eup %6936  ;;  %1129 = vrot.lane.b32.xlu1 %v1109_v13, %s7239_s19 }
 0x29b   :  { %v1111_v4 = vmul.f32 %v6937_v34, %v6931_v62  ;;  %v6939_v10 = vpop.eup %6938 }
 0x29c   :  { %v1112_v58 = vmul.f32 %v6939_v10, %v6929_v63 }
 0x29d   :  { %1133 = vrot.lane.b32.xlu0 %v1111_v4, %s7239_s19 }
 0x29e   :  { %1131 = vrot.lane.b32.xlu1 %v1110_v50, %s7239_s19 }
 0x2a1   :  { %1173 = vrot.lane.b32.xlu0 %v1109_v13, %s7242_s21 }
 0x2a2   :  { %1135 = vrot.lane.b32.xlu1 %v1112_v58, %s7239_s19 }
 0x2a5   :  { %1177 = vrot.lane.b32.xlu0 %v1111_v4, %s7242_s21 }
 0x2a6   :  { %1175 = vrot.lane.b32.xlu1 %v1110_v50, %s7242_s21 }
 0x2a9   :  { %1113 = vrot.lane.b32.xlu0 %v1109_v13, %s7240_s20 }
 0x2aa   :  { %1179 = vrot.lane.b32.xlu1 %v1112_v58, %s7242_s21 }
 0x2ad   :  { %1117 = vrot.lane.b32.xlu0 %v1111_v4, %s7240_s20 }
 0x2ae   :  { %1115 = vrot.lane.b32.xlu1 %v1110_v50, %s7240_s20 }
 0x2b1   :  { %1157 = vrot.lane.b32.xlu0 %v1109_v13, %s7243_s22 }
 0x2b2   :  { %1119 = vrot.lane.b32.xlu1 %v1112_v58, %s7240_s20 }
 0x2b5   :  { %1161 = vrot.lane.b32.xlu0 %v1111_v4, %s7243_s22 }
 0x2b6   :  { %1159 = vrot.lane.b32.xlu1 %v1110_v50, %s7243_s22 }
 0x2b9   :  { %1217 = vrot.lane.b32.xlu0 %v1109_v13, %s7244_s1 }
 0x2ba   :  { %1163 = vrot.lane.b32.xlu1 %v1112_v58, %s7243_s22 }
 0x2bd   :  { %1221 = vrot.lane.b32.xlu0 %v1111_v4, %s7244_s1 }
 0x2be   :  { %1219 = vrot.lane.b32.xlu1 %v1110_v50, %s7244_s1 }
 0x2c1   :  { %1261 = vrot.lane.b32.xlu0 %v1109_v13, %s7245_s23 }
 0x2c2   :  { %1223 = vrot.lane.b32.xlu1 %v1112_v58, %s7244_s1 }
 0x2c5   :  { %1265 = vrot.lane.b32.xlu0 %v1111_v4, %s7245_s23 }
 0x2c6   :  { %1263 = vrot.lane.b32.xlu1 %v1110_v50, %s7245_s23 }
 0x2c9   :  { %1201 = vrot.lane.b32.xlu0 %v1109_v13, %s7246_s24 }
 0x2ca   :  { %1267 = vrot.lane.b32.xlu1 %v1112_v58, %s7245_s23 }
 0x2cd   :  { %1205 = vrot.lane.b32.xlu0 %v1111_v4, %s7246_s24 }
 0x2ce   :  { %1203 = vrot.lane.b32.xlu1 %v1110_v50, %s7246_s24 }
 0x2d1   :  { %1245 = vrot.lane.b32.xlu0 %v1109_v13, %s7247_s25 }
 0x2d2   :  { %1207 = vrot.lane.b32.xlu1 %v1112_v58, %s7246_s24 }
 0x2d5   :  { %1249 = vrot.lane.b32.xlu0 %v1111_v4, %s7247_s25  ;;  %v7931_v4 = vld [vmem:[#allocation3 + $0x28] sm:$0xff] }
 0x2d6   :  { %1247 = vrot.lane.b32.xlu1 %v1110_v50, %s7247_s25 }
 0x2da   :  { %1251 = vrot.lane.b32.xlu1 %v1112_v58, %s7247_s25 }
 0x30c   :  { %v1130_v19 = vpop.permute.xlu1 %1129 }
 0x30f   :  { %v1134_v29 = vpop.permute.xlu0 %1133 }
 0x310   :  { %v1132_v59 = vpop.permute.xlu1 %1131 }
 0x311   :  { %v1138_v54 = vsel %vm151_vm3, %v1132_v59, %v1134_v29  ;;  %v1139_v23 = vsel %vm151_vm3, %v1130_v19, %v1132_v59  ;;  %v7934_v59 = vld [vmem:[#allocation3] sm:$0xff] }
 0x312   :  { %v1146_v46 = vrot.slane %v1139_v23, 4  ;;  %v1147_v43 = vrot.slane %v1138_v54, 4 }
 0x313   :  { %v1174_v56 = vpop.permute.xlu0 %1173 }
 0x314   :  { %1154 = vst [vmem:[#allocation2 + $0x8] sm:$0xf0] %v1146_v46  ;;  %1155 = vst [vmem:[#allocation2 + $0x10] sm:$0xf0] %v1147_v43  ;;  %v1136_v30 = vpop.permute.xlu1 %1135 }
 0x315   :  { %v1137_v37 = vsel %vm151_vm3, %v1134_v29, %v1136_v30  ;;  %v1140_v41 = vsel %vm151_vm3, %v1136_v30, %v1130_v19  ;;  %v7941_v30 = vld [vmem:[#allocation3 + $0x18] sm:$0xff] }
 0x316   :  { %v1145_v28 = vrot.slane %v1140_v41, 4  ;;  %v1148_v20 = vrot.slane %v1137_v37, 4  ;;  %v7944_v41 = vld [vmem:[#allocation3 + $0x30] sm:$0xff] }
 0x317   :  { %v1178_v21 = vpop.permute.xlu0 %1177 }
 0x318   :  { %1153 = vst [vmem:[#allocation2] sm:$0xf0] %v1145_v28  ;;  %1156 = vst [vmem:[#allocation2 + $0x18] sm:$0xf0] %v1148_v20  ;;  %v1176_v61 = vpop.permute.xlu1 %1175 }
 0x319   :  { %v1182_v2 = vsel %vm253_vm5, %v1176_v61, %v1178_v21  ;;  %v1183_v47 = vsel %vm253_vm5, %v1174_v56, %v1176_v61  ;;  %v7947_v61 = vld [vmem:[#allocation3 + $0x20] sm:$0xff] }
 0x31a   :  { %v1190_v5 = vrot.slane %v1183_v47, 4  ;;  %v1191_v42 = vrot.slane %v1182_v2, 4  ;;  %v7950_v47 = vld [vmem:[#allocation3 + $0x38] sm:$0xff] }
 0x31b   :  { %v1114_v57 = vpop.permute.xlu0 %1113 }
 0x31c   :  { %1198 = vst [vmem:[#allocation2 + $0x28] sm:$0xf0] %v1190_v5  ;;  %1199 = vst [vmem:[#allocation2 + $0x30] sm:$0xf0] %v1191_v42  ;;  %v1180_v38 = vpop.permute.xlu1 %1179 }
 0x31d   :  { %v1181_v63 = vsel %vm253_vm5, %v1178_v21, %v1180_v38  ;;  %v1184_v49 = vsel %vm253_vm5, %v1180_v38, %v1174_v56 }
 0x31e   :  { %v1189_v55 = vrot.slane %v1184_v49, 4  ;;  %v1192_v62 = vrot.slane %v1181_v63, 4 }
 0x31f   :  { %v1118_v40 = vpop.permute.xlu0 %1117 }
 0x320   :  { %1197 = vst [vmem:[#allocation2 + $0x20] sm:$0xf0] %v1189_v55  ;;  %1200 = vst [vmem:[#allocation2 + $0x38] sm:$0xf0] %v1192_v62  ;;  %v1116_v0 = vpop.permute.xlu1 %1115 }
 0x321   :  { %v1122_v26 = vsel %vm105_vm2, %v1116_v0, %v1118_v40  ;;  %v1123_v27 = vsel %vm105_vm2, %v1114_v57, %v1116_v0 }
 0x322   :  { %1126 = vst [vmem:[#allocation2 + $0x8] sm:$0xf] %v1123_v27  ;;  %1127 = vst [vmem:[#allocation2 + $0x10] sm:$0xf] %v1122_v26 }
 0x323   :  { %v1158_v44 = vpop.permute.xlu0 %1157 }
 0x324   :  { %v1120_v39 = vpop.permute.xlu1 %1119 }
 0x325   :  { %v1121_v14 = vsel %vm105_vm2, %v1118_v40, %v1120_v39  ;;  %v1124_v32 = vsel %vm105_vm2, %v1120_v39, %v1114_v57  ;;  %v7953_v57 = vld [vmem:[#allocation3 + $0x10] sm:$0xff] }
 0x326   :  { %1125 = vst [vmem:[#allocation2] sm:$0xf] %v1124_v32  ;;  %1128 = vst [vmem:[#allocation2 + $0x18] sm:$0xf] %v1121_v14 }
 0x327   :  { %v1162_v36 = vpop.permute.xlu0 %1161 }
 0x328   :  { %v1160_v45 = vpop.permute.xlu1 %1159 }
 0x329   :  { %v1166_v35 = vsel %vm208_vm4, %v1160_v45, %v1162_v36  ;;  %v1167_v53 = vsel %vm208_vm4, %v1158_v44, %v1160_v45  ;;  %v1290_v1 = vld [vmem:[#allocation2 + $0x8] sm:$0xff]  ;;  %v1291_v58 = vld [vmem:[#allocation2 + $0x10] sm:$0xff] }
 0x32a   :  { %1170 = vst [vmem:[#allocation2 + $0x28] sm:$0xf] %v1167_v53  ;;  %1171 = vst [vmem:[#allocation2 + $0x30] sm:$0xf] %v1166_v35  ;;  %v1306_v34 = vmul.f32 %v7928_v18, %v1290_v1  ;;  %v1307_v38 = vmul.f32 %v7953_v57, %v1291_v58 }
 0x32b   :  { %v1218_v11 = vpop.permute.xlu0 %1217 }
 0x32c   :  { %v1164_v8 = vpop.permute.xlu1 %1163 }
 0x32d   :  { %v1165_v48 = vsel %vm208_vm4, %v1162_v36, %v1164_v8  ;;  %v1168_v17 = vsel %vm208_vm4, %v1164_v8, %v1158_v44  ;;  %v1289_v33 = vld [vmem:[#allocation2] sm:$0xff]  ;;  %v1292_v52 = vld [vmem:[#allocation2 + $0x18] sm:$0xff] }
 0x32e   :  { %1169 = vst [vmem:[#allocation2 + $0x20] sm:$0xf] %v1168_v17  ;;  %1172 = vst [vmem:[#allocation2 + $0x38] sm:$0xf] %v1165_v48  ;;  %v1305_v54 = vmul.f32 %v7934_v59, %v1289_v33  ;;  %v1308_v37 = vmul.f32 %v7941_v30, %v1292_v52 }
 0x32f   :  { %v1222_v24 = vpop.permute.xlu0 %1221 }
 0x330   :  { %v1220_v6 = vpop.permute.xlu1 %1219 }
 0x331   :  { %v1294_v7 = vld [vmem:[#allocation2 + $0x28] sm:$0xff]  ;;  %v1226_v3 = vsel %vm367_vm7, %v1220_v6, %v1222_v24  ;;  %v1227_v15 = vsel %vm367_vm7, %v1218_v11, %v1220_v6  ;;  %v1295_v12 = vld [vmem:[#allocation2 + $0x30] sm:$0xff] }
 0x332   :  { %v1233_v9 = vrot.slane %v1227_v15, 4  ;;  %v1234_v13 = vrot.slane %v1226_v3, 4  ;;  %v1310_v50 = vmul.f32 %v7931_v4, %v1294_v7  ;;  %v1311_v28 = vmul.f32 %v7944_v41, %v1295_v12 }
 0x333   :  { %v1262_v10 = vpop.permute.xlu0 %1261 }
 0x334   :  { %1241 = vst [vmem:[#allocation2 + $0x40] sm:$0xf0] %v1233_v9  ;;  %1242 = vst [vmem:[#allocation2 + $0x48] sm:$0xf0] %v1234_v13  ;;  %v1224_v19 = vpop.permute.xlu1 %1223  ;;  %v6658_v29 = vpack.c.bf16 %v1310_v50, %v1306_v34  ;;  %v6668_v0 = vpack.c.bf16 %v1311_v28, %v1307_v38  ;;  %v7995_v38 = vld [vmem:[#allocation3 + $0x78] sm:$0xff] }
 0x335   :  { %v1293_v23 = vld [vmem:[#allocation2 + $0x20] sm:$0xff]  ;;  %v1296_v46 = vld [vmem:[#allocation2 + $0x38] sm:$0xff]  ;;  %v1225_v43 = vsel %vm367_vm7, %v1222_v24, %v1224_v19  ;;  %v1228_v56 = vsel %vm367_vm7, %v1224_v19, %v1218_v11  ;;  %v7983_v19 = vld [vmem:[#allocation3 + $0x68] sm:$0xff] }
 0x336   :  { %v1235_v20 = vrot.slane %v1225_v43, 4  ;;  %v1236_v21 = vrot.slane %v1228_v56, 4  ;;  %6659 = vmatprep.subr.bf16.mxu0 %v6658_v29  ;;  %v1309_v2 = vmul.f32 %v7947_v61, %v1293_v23  ;;  %v1312_v5 = vmul.f32 %v7950_v47, %v1296_v46  ;;  %v7989_v46 = vld [vmem:[#allocation3 + $0x60] sm:$0xff] }
 0x337   :  { %v1266_v42 = vpop.permute.xlu0 %1265 }
 0x338   :  { %1243 = vst [vmem:[#allocation2 + $0x50] sm:$0xf0] %v1235_v20  ;;  %1244 = vst [vmem:[#allocation2 + $0x58] sm:$0xf0] %v1236_v21  ;;  %v1264_v63 = vpop.permute.xlu1 %1263  ;;  %v6660_v49 = vpack.c.bf16 %v1309_v2, %v1305_v54  ;;  %v6666_v55 = vpack.c.bf16 %v1312_v5, %v1308_v37  ;;  %v7986_v54 = vld [vmem:[#allocation3 + $0x40] sm:$0xff]  ;;  %v7992_v5 = vld [vmem:[#allocation3 + $0x58] sm:$0xff] }
 0x339   :  { %v1270_v62 = vsel %vm469_vm9, %v1264_v63, %v1266_v42  ;;  %v1271_v40 = vsel %vm469_vm9, %v1262_v10, %v1264_v63 }
 0x33a   :  { %v1277_v26 = vrot.slane %v1271_v40, 4  ;;  %v1278_v27 = vrot.slane %v1270_v62, 4  ;;  %6661 = vmatpush1.bf16.msra.mxu0 %v6660_v49  ;;  %6667 = vmatprep.subr.bf16.mxu1 %v6666_v55  ;;  %v7998_v49 = vld [vmem:[#allocation3 + $0x50] sm:$0xff] }
 0x33b   :  { %v1202_v44 = vpop.permute.xlu0 %1201  ;;  %6669 = vmatpush1.bf16.msra.mxu1 %v6668_v0  ;;  %v8001_v62 = vld [vmem:[#allocation3 + $0x70] sm:$0xff] }
 0x33c   :  { %1285 = vst [vmem:[#allocation2 + $0x60] sm:$0xf0] %v1277_v26  ;;  %1286 = vst [vmem:[#allocation2 + $0x68] sm:$0xf0] %v1278_v27  ;;  %v1268_v39 = vpop.permute.xlu1 %1267  ;;  %v8007_v27 = vld [vmem:[%s9439_s4] sm:$0xff] }
 0x33d   :  { %v1269_v14 = vsel %vm469_vm9, %v1266_v42, %v1268_v39  ;;  %v1272_v32 = vsel %vm469_vm9, %v1268_v39, %v1262_v10  ;;  %v7980_v10 = vld [vmem:[#allocation3 + $0x48] sm:$0xff] }
 0x33e   :  { %v1279_v36 = vrot.slane %v1269_v14, 4  ;;  %v1280_v45 = vrot.slane %v1272_v32, 4  ;;  %v8015_v39 = vld [vmem:[%s9439_s4 + $0x8] sm:$0xff]  ;;  %v9459_v32 = vld [vmem:[#allocation10_spill] sm:$0xff] }
 0x33f   :  { %v1206_v35 = vpop.permute.xlu0 %1205 }
 0x340   :  { %1287 = vst [vmem:[#allocation2 + $0x70] sm:$0xf0] %v1279_v36  ;;  %1288 = vst [vmem:[#allocation2 + $0x78] sm:$0xf0] %v1280_v45  ;;  %v1204_v53 = vpop.permute.xlu1 %1203 }
 0x341   :  { %v1210_v11 = vsel %vm322_vm6, %v1204_v53, %v1206_v35  ;;  %v1211_v8 = vsel %vm322_vm6, %v1202_v44, %v1204_v53 }
 0x342   :  { %1213 = vst [vmem:[#allocation2 + $0x40] sm:$0xf] %v1211_v8  ;;  %1214 = vst [vmem:[#allocation2 + $0x48] sm:$0xf] %v1210_v11 }
 0x343   :  { %v1246_v48 = vpop.permute.xlu0 %1245 }
 0x344   :  { %v1208_v17 = vpop.permute.xlu1 %1207 }
 0x345   :  { %v1209_v1 = vsel %vm322_vm6, %v1206_v35, %v1208_v17  ;;  %v1212_v24 = vsel %vm322_vm6, %v1208_v17, %v1202_v44  ;;  %v9458_v44 = vmov 0.0  }
 0x346   :  { %1215 = vst [vmem:[#allocation2 + $0x50] sm:$0xf] %v1209_v1  ;;  %1216 = vst [vmem:[#allocation2 + $0x58] sm:$0xf] %v1212_v24 }
 0x347   :  { %v1250_v6 = vpop.permute.xlu0 %1249 }
 0x348   :  { %v1248_v33 = vpop.permute.xlu1 %1247 }
 0x349   :  { %v1254_v7 = vsel %vm424_vm8, %v1248_v33, %v1250_v6  ;;  %v1255_v3 = vsel %vm424_vm8, %v1246_v48, %v1248_v33  ;;  %v1297_v9 = vld [vmem:[#allocation2 + $0x40] sm:$0xff]  ;;  %v1298_v13 = vld [vmem:[#allocation2 + $0x48] sm:$0xff] }
 0x34a   :  { %1257 = vst [vmem:[#allocation2 + $0x60] sm:$0xf] %v1255_v3  ;;  %1258 = vst [vmem:[#allocation2 + $0x68] sm:$0xf] %v1254_v7  ;;  %v1314_v58 = vmul.f32 %v7980_v10, %v1298_v13  ;;  %v1313_v23 = vmul.f32 %v7986_v54, %v1297_v9 }
 0x34c   :  { %v1252_v15 = vpop.permute.xlu1 %1251 }
 0x34d   :  { %v1253_v52 = vsel %vm424_vm8, %v1250_v6, %v1252_v15  ;;  %v1256_v12 = vsel %vm424_vm8, %v1252_v15, %v1246_v48  ;;  %v1299_v56 = vld [vmem:[#allocation2 + $0x50] sm:$0xff]  ;;  %v1300_v37 = vld [vmem:[#allocation2 + $0x58] sm:$0xff] }
 0x34e   :  { %1259 = vst [vmem:[#allocation2 + $0x70] sm:$0xf] %v1253_v52  ;;  %1260 = vst [vmem:[#allocation2 + $0x78] sm:$0xf] %v1256_v12  ;;  %v1316_v42 = vmul.f32 %v7992_v5, %v1300_v37  ;;  %v1315_v55 = vmul.f32 %v7998_v49, %v1299_v56  ;;  %v9460_v48 = vld [vmem:[#allocation9_spill] sm:$0xff] }
 0x351   :  { %v1301_v34 = vld [vmem:[#allocation2 + $0x60] sm:$0xff]  ;;  %v1302_v50 = vld [vmem:[#allocation2 + $0x68] sm:$0xff] }
 0x352   :  { %v1318_v29 = vmul.f32 %v7983_v19, %v1302_v50  ;;  %v1317_v43 = vmul.f32 %v7989_v46, %v1301_v34 }
 0x354   :  { %v6662_v28 = vpack.c.bf16 %v1318_v29, %v1314_v58  ;;  %v6664_v20 = vpack.c.bf16 %v1317_v43, %v1313_v23 }
 0x355   :  { %v1303_v21 = vld [vmem:[#allocation2 + $0x70] sm:$0xff]  ;;  %v1304_v2 = vld [vmem:[#allocation2 + $0x78] sm:$0xff] }
 0x356   :  { %6663 = vmatprep.subr.bf16.mxu0 %v6662_v28  ;;  %v1320_v63 = vmul.f32 %v7995_v38, %v1304_v2  ;;  %v1319_v40 = vmul.f32 %v8001_v62, %v1303_v21 }
 0x357   :  { %6665 = vmatpush1.bf16.msra.mxu0 %v6664_v20 }
 0x358   :  { %v6670_v0 = vpack.c.bf16 %v1320_v63, %v1316_v42  ;;  %v6672_v26 = vpack.c.bf16 %v1319_v40, %v1315_v55 }
 0x35a   :  { %6580 = vmatmul.mubr.msk.f32.vlgmr.msra.gmra.mrb[6].mxu0 %vm710_vm0, %v8007_v27  ;;  %6671 = vmatprep.subr.bf16.mxu1 %v6670_v0 }
 0x35b   :  { %6673 = vmatpush1.bf16.msra.mxu1 %v6672_v26  ;;  %1391 = vmatprep.mubr.f32.mxu0 %v9458_v44  ;;  %v8037_v26 = vld [vmem:[%s9441_s6] sm:$0xf] }
 0x35e   :  { %6581 = vmatmul.mubr.msk.f32.gmra.mrb[8].mxu0 %vm710_vm0, %v8015_v39  ;;  %6582 = vmatmul.mubr.msk.f32.vlgmr.msra.gmra.mrb[6].mxu1 %vm710_vm0, %v8007_v27 }
 0x35f   :  { %1468 = vmatprep.mubr.f32.mxu1 %v9458_v44  ;;  %1555 = vmatprep.mubr.f32.mxu0 %v9458_v44 }
 0x362   :  { %6583 = vmatmul.mubr.msk.f32.gmra.mrb[8].mxu1 %vm710_vm0, %v8015_v39 }
 0x363   :  { %1626 = vmatprep.mubr.f32.mxu1 %v9458_v44 }
 0x42d   :  { %v1387_v14 = vpop.f32.mrb[6].mxu0 }
 0x42e   :  { %v1388_v36 = vadd.f32 %v1387_v14, %v9459_v32  ;;  %v1389_v45 = vpop.f32.mrb[7].mxu0 }
 0x42f   :  { %v1390_v35 = vadd.f32 %v1389_v45, %v9459_v32 }
 0x430   :  { %v1475_v8 = vmul.f32 0.2, %v1388_v36 }
 0x431   :  { %v1393_v53 = vpop.f32.mrb[8].mxu0  ;;  %v1464_v11 = vpop.f32.mrb[6].mxu1  ;;  %v1476_v33 = vmul.f32 0.2, %v1390_v35 }
 0x432   :  { %v1394_v17 = vadd.f32 %v1393_v53, %v9460_v48  ;;  %v1465_v1 = vadd.f32 %v1464_v11, %v9459_v32  ;;  %v1395_v24 = vpop.f32.mrb[9].mxu0  ;;  %v1466_v6 = vpop.f32.mrb[7].mxu1  ;;  %v1483_v9 = vmax.f32 %v1388_v36, %v1475_v8 }
 0x433   :  { %v1396_v7 = vadd.f32 %v1395_v24, %v9460_v48  ;;  %v1467_v3 = vadd.f32 %v1466_v6, %v9459_v32  ;;  %v1484_v29 = vmax.f32 %v1390_v35, %v1476_v33 }
 0x434   :  { %v1479_v15 = vmul.f32 0.2, %v1394_v17  ;;  %v1477_v34 = vmul.f32 0.2, %v1465_v1 }
 0x435   :  { %v1480_v52 = vmul.f32 0.2, %v1396_v7  ;;  %v1470_v12 = vpop.f32.mrb[8].mxu1  ;;  %v1478_v43 = vmul.f32 0.2, %v1467_v3 }
 0x436   :  { %v1487_v13 = vmax.f32 %v1394_v17, %v1479_v15  ;;  %v1471_v50 = vadd.f32 %v1470_v12, %v9460_v48  ;;  %v1472_v58 = vpop.f32.mrb[9].mxu1  ;;  %v1485_v2 = vmax.f32 %v1465_v1, %v1477_v34 }
 0x437   :  { %v1488_v23 = vmax.f32 %v1396_v7, %v1480_v52  ;;  %v1473_v56 = vadd.f32 %v1472_v58, %v9460_v48  ;;  %v1486_v63 = vmax.f32 %v1467_v3, %v1478_v43 }
 0x438   :  { %v6676_v37 = vpack.c.bf16 %v1487_v13, %v1483_v9  ;;  %v1481_v28 = vmul.f32 0.2, %v1471_v50 }
 0x439   :  { %v1482_v20 = vmul.f32 0.2, %v1473_v56  ;;  %v6674_v21 = vpack.c.bf16 %v1488_v23, %v1484_v29 }
 0x43a   :  { %v1489_v42 = vmax.f32 %v1471_v50, %v1481_v28 }
 0x43b   :  { %v1490_v55 = vmax.f32 %v1473_v56, %v1482_v20  ;;  %6675 = vmatprep.subr.bf16.mxu0 %v6674_v21 }
 0x43c   :  { %v6680_v40 = vpack.c.bf16 %v1489_v42, %v1485_v2  ;;  %6677 = vmatpush1.bf16.msra.mxu0 %v6676_v37 }
 0x43d   :  { %v6678_v0 = vpack.c.bf16 %v1490_v55, %v1486_v63 }
 0x43f   :  { %6584 = vmatmul.mubr.msk.f32.vlgmr.msra.gmra.mrb[10].mxu0 %vm887_vm1, %v8037_v26  ;;  %6679 = vmatprep.subr.bf16.mxu1 %v6678_v0 }
 0x440   :  { %6681 = vmatpush1.bf16.msra.mxu1 %v6680_v40  ;;  %1985 = vmatprep.mubr.f32.mxu0 %v9458_v44 }
 0x443   :  { %6585 = vmatmul.mubr.msk.f32.vlgmr.msra.gmra.mrb[10].mxu1 %vm887_vm1, %v8037_v26 }
 0x444   :  { %2062 = vmatprep.mubr.f32.mxu1 %v9458_v44 }
 0x512   :  { %v1557_v14 = vpop.f32.mrb[10].mxu0 }
 0x513   :  { %v1558_v36 = vadd.f32 %v1557_v14, %v7830_v22  ;;  %v1559_v45 = vpop.f32.mrb[11].mxu0 }
 0x514   :  { %v1560_v35 = vadd.f32 %v1559_v45, %v7830_v22 }
 0x515   :  { %v1633_v53 = vadd.f32 %v1558_v36, %v7833_v60 }
 0x516   :  { %v1634_v11 = vadd.f32 %v1560_v35, %v7837_v51  ;;  %v1628_v8 = vpop.f32.mrb[10].mxu1 }
 0x517   :  { %v1637_v17 = vsel %vm518_vm10, %v1633_v53, -inf  ;;  %v1629_v1 = vadd.f32 %v1628_v8, %v7830_v22  ;;  %v1630_v24 = vpop.f32.mrb[11].mxu1 }
 0x518   :  { %v1638_v6 = vrot.slane %v1637_v17, 4  ;;  %v1644_v33 = vsel %vm518_vm10, %v1634_v11, -inf  ;;  %v1631_v7 = vadd.f32 %v1630_v24, %v7830_v22 }
 0x519   :  { %v1645_v3 = vrot.slane %v1644_v33, 4  ;;  %v1635_v15 = vadd.f32 %v1629_v1, %v7840_v16 }
 0x51a   :  { %v1639_v52 = vmax.f32 %v1637_v17, %v1638_v6  ;;  %v1636_v12 = vadd.f32 %v1631_v7, %v7845_v25 }
 0x51b   :  { %v1646_v9 = vmax.f32 %v1644_v33, %v1645_v3  ;;  %v1651_v13 = vsel %vm518_vm10, %v1635_v15, -inf }
 0x51c   :  { %v1640_v34 = vrot.slane %v1639_v52, 2  ;;  %v1652_v50 = vrot.slane %v1651_v13, 4  ;;  %v1658_v58 = vsel %vm518_vm10, %v1636_v12, -inf }
 0x51d   :  { %v1647_v29 = vrot.slane %v1646_v9, 2  ;;  %v1659_v23 = vrot.slane %v1658_v58, 4 }
 0x51e   :  { %v1641_v43 = vmax.f32 %v1639_v52, %v1640_v34  ;;  %v1653_v56 = vmax.f32 %v1651_v13, %v1652_v50 }
 0x51f   :  { %v1648_v37 = vmax.f32 %v1646_v9, %v1647_v29  ;;  %v1660_v28 = vmax.f32 %v1658_v58, %v1659_v23 }
 0x520   :  { %v1642_v20 = vrot.slane %v1641_v43, 1  ;;  %v1654_v21 = vrot.slane %v1653_v56, 2 }
 0x521   :  { %v1649_v2 = vrot.slane %v1648_v37, 1  ;;  %v1661_v42 = vrot.slane %v1660_v28, 2 }
 0x522   :  { %v1643_v63 = vmax.f32 %v1641_v43, %v1642_v20  ;;  %v1655_v55 = vmax.f32 %v1653_v56, %v1654_v21 }
 0x523   :  { %v1650_v40 = vmax.f32 %v1648_v37, %v1649_v2  ;;  %v1662_v0 = vmax.f32 %v1660_v28, %v1661_v42 }
 0x524   :  { %v1665_v14 = vsub.f32 %v1633_v53, %v1643_v63  ;;  %v1656_v36 = vrot.slane %v1655_v55, 1 }
 0x525   :  { %v1666_v45 = vsub.f32 %v1634_v11, %v1650_v40  ;;  %v1663_v35 = vrot.slane %v1662_v0, 1 }
 0x526   :  { %v1669_v8 = vmul.f32 1.442695, %v1665_v14  ;;  %v1657_v17 = vmax.f32 %v1655_v55, %v1656_v36 }
 0x527   :  { %v1671_v1 = vmul.f32 1.442695, %v1666_v45  ;;  %v1664_v24 = vmax.f32 %v1662_v0, %v1663_v35 }
 0x528   :  { %6940 = vpow2.f32 %v1669_v8  ;;  %v1667_v6 = vsub.f32 %v1635_v15, %v1657_v17 }
 0x529   :  { %6942 = vpow2.f32 %v1671_v1  ;;  %v1668_v33 = vsub.f32 %v1636_v12, %v1664_v24 }
 0x52a   :  { %v1673_v7 = vmul.f32 1.442695, %v1667_v6 }
 0x52b   :  { %v1675_v3 = vmul.f32 1.442695, %v1668_v33 }
 0x52c   :  { %6944 = vpow2.f32 %v1673_v7 }
 0x52d   :  { %6946 = vpow2.f32 %v1675_v3 }
 0x532   :  { %v6941_v52 = vpop.eup %6940 }
 0x533   :  { %v6943_v9 = vpop.eup %6942  ;;  %v1677_v13 = vsel %vm518_vm10, %v6941_v52, 0.0 }
 0x534   :  { %v1678_v53 = vrot.slane %v1677_v13, 4  ;;  %v1684_v11 = vsel %vm518_vm10, %v6943_v9, 0.0 }
 0x535   :  { %v1685_v34 = vrot.slane %v1684_v11, 4 }
 0x536   :  { %v6945_v50 = vpop.eup %6944  ;;  %v1679_v58 = vadd.f32 %v1678_v53, %v1677_v13 }
 0x537   :  { %v6947_v29 = vpop.eup %6946  ;;  %v1686_v23 = vadd.f32 %v1685_v34, %v1684_v11  ;;  %v1691_v15 = vsel %vm518_vm10, %v6945_v50, 0.0 }
 0x538   :  { %v1680_v43 = vrot.slane %v1679_v58, 2  ;;  %v1692_v12 = vrot.slane %v1691_v15, 4  ;;  %v1698_v56 = vsel %vm518_vm10, %v6947_v29, 0.0 }
 0x539   :  { %v1687_v37 = vrot.slane %v1686_v23, 2  ;;  %v1699_v28 = vrot.slane %v1698_v56, 4 }
 0x53a   :  { %v1681_v20 = vadd.f32 %v1680_v43, %v1679_v58  ;;  %v1693_v21 = vadd.f32 %v1692_v12, %v1691_v15 }
 0x53b   :  { %v1688_v2 = vadd.f32 %v1687_v37, %v1686_v23  ;;  %v1700_v42 = vadd.f32 %v1699_v28, %v1698_v56 }
 0x53c   :  { %v1682_v63 = vrot.slane %v1681_v20, 1  ;;  %v1694_v55 = vrot.slane %v1693_v21, 2 }
 0x53d   :  { %v1689_v40 = vrot.slane %v1688_v2, 1  ;;  %v1701_v0 = vrot.slane %v1700_v42, 2 }
 0x53e   :  { %v1683_v14 = vadd.f32 %v1682_v63, %v1681_v20  ;;  %v1695_v36 = vadd.f32 %v1694_v55, %v1693_v21 }
 0x53f   :  { %v1690_v45 = vadd.f32 %v1689_v40, %v1688_v2  ;;  %v1702_v35 = vadd.f32 %v1701_v0, %v1700_v42 }
 0x540   :  { %6948 = vrcp.f32 %v1683_v14  ;;  %v1696_v8 = vrot.slane %v1695_v36, 1 }
 0x541   :  { %6950 = vrcp.f32 %v1690_v45  ;;  %v1703_v17 = vrot.slane %v1702_v35, 1 }
 0x542   :  { %v1697_v1 = vadd.f32 %v1696_v8, %v1695_v36 }
 0x543   :  { %v1704_v24 = vadd.f32 %v1703_v17, %v1702_v35 }
 0x544   :  { %6952 = vrcp.f32 %v1697_v1 }
 0x545   :  { %6954 = vrcp.f32 %v1704_v24 }
 0x54a   :  { %v6949_v6 = vpop.eup %6948 }
 0x54b   :  { %v6951_v33 = vpop.eup %6950  ;;  %v1709_v7 = vmul.f32 %v6949_v6, %v6941_v52 }
 0x54c   :  { %v1710_v3 = vmul.f32 %v6951_v33, %v6943_v9 }
 0x54d   :  { %1729 = vrot.lane.b32.xlu0 %v1709_v7, %s7239_s19 }
 0x54e   :  { %v6953_v13 = vpop.eup %6952  ;;  %1731 = vrot.lane.b32.xlu1 %v1710_v3, %s7239_s19 }
 0x54f   :  { %v6955_v53 = vpop.eup %6954  ;;  %v1711_v11 = vmul.f32 %v6953_v13, %v6945_v50 }
 0x550   :  { %v1712_v34 = vmul.f32 %v6955_v53, %v6947_v29 }
 0x551   :  { %1733 = vrot.lane.b32.xlu0 %v1711_v11, %s7239_s19 }
 0x552   :  { %1735 = vrot.lane.b32.xlu1 %v1712_v34, %s7239_s19 }
 0x555   :  { %1773 = vrot.lane.b32.xlu0 %v1709_v7, %s7242_s21 }
 0x556   :  { %1775 = vrot.lane.b32.xlu1 %v1710_v3, %s7242_s21 }
 0x559   :  { %1777 = vrot.lane.b32.xlu0 %v1711_v11, %s7242_s21 }
 0x55a   :  { %1779 = vrot.lane.b32.xlu1 %v1712_v34, %s7242_s21 }
 0x55d   :  { %1713 = vrot.lane.b32.xlu0 %v1709_v7, %s7240_s20 }
 0x55e   :  { %1715 = vrot.lane.b32.xlu1 %v1710_v3, %s7240_s20 }
 0x561   :  { %1717 = vrot.lane.b32.xlu0 %v1711_v11, %s7240_s20 }
 0x562   :  { %1719 = vrot.lane.b32.xlu1 %v1712_v34, %s7240_s20 }
 0x565   :  { %1757 = vrot.lane.b32.xlu0 %v1709_v7, %s7243_s22 }
 0x566   :  { %1759 = vrot.lane.b32.xlu1 %v1710_v3, %s7243_s22 }
 0x569   :  { %1761 = vrot.lane.b32.xlu0 %v1711_v11, %s7243_s22 }
 0x56a   :  { %1763 = vrot.lane.b32.xlu1 %v1712_v34, %s7243_s22 }
 0x56d   :  { %1817 = vrot.lane.b32.xlu0 %v1709_v7, %s7244_s1 }
 0x56e   :  { %1819 = vrot.lane.b32.xlu1 %v1710_v3, %s7244_s1 }
 0x571   :  { %1821 = vrot.lane.b32.xlu0 %v1711_v11, %s7244_s1 }
 0x572   :  { %1823 = vrot.lane.b32.xlu1 %v1712_v34, %s7244_s1 }
 0x575   :  { %1861 = vrot.lane.b32.xlu0 %v1709_v7, %s7245_s23 }
 0x576   :  { %1863 = vrot.lane.b32.xlu1 %v1710_v3, %s7245_s23 }
 0x579   :  { %1865 = vrot.lane.b32.xlu0 %v1711_v11, %s7245_s23 }
 0x57a   :  { %1867 = vrot.lane.b32.xlu1 %v1712_v34, %s7245_s23 }
 0x57d   :  { %1801 = vrot.lane.b32.xlu0 %v1709_v7, %s7246_s24 }
 0x57e   :  { %1803 = vrot.lane.b32.xlu1 %v1710_v3, %s7246_s24 }
 0x581   :  { %1805 = vrot.lane.b32.xlu0 %v1711_v11, %s7246_s24 }
 0x582   :  { %1807 = vrot.lane.b32.xlu1 %v1712_v34, %s7246_s24 }
 0x585   :  { %1845 = vrot.lane.b32.xlu0 %v1709_v7, %s7247_s25 }
 0x586   :  { %1847 = vrot.lane.b32.xlu1 %v1710_v3, %s7247_s25 }
 0x589   :  { %1849 = vrot.lane.b32.xlu0 %v1711_v11, %s7247_s25 }
 0x58a   :  { %1851 = vrot.lane.b32.xlu1 %v1712_v34, %s7247_s25 }
 0x5bf   :  { %v1730_v52 = vpop.permute.xlu0 %1729 }
 0x5c0   :  { %v1732_v9 = vpop.permute.xlu1 %1731 }
 0x5c1   :  { %v1739_v50 = vsel %vm151_vm3, %v1730_v52, %v1732_v9 }
 0x5c2   :  { %v1746_v58 = vrot.slane %v1739_v50, 4 }
 0x5c3   :  { %v1734_v29 = vpop.permute.xlu0 %1733 }
 0x5c4   :  { %1754 = vst [vmem:[#allocation2 + $0x8] sm:$0xf0] %v1746_v58  ;;  %v1738_v23 = vsel %vm151_vm3, %v1732_v9, %v1734_v29  ;;  %v1736_v15 = vpop.permute.xlu1 %1735 }
 0x5c5   :  { %v1747_v43 = vrot.slane %v1738_v23, 4  ;;  %v1737_v12 = vsel %vm151_vm3, %v1734_v29, %v1736_v15  ;;  %v1740_v56 = vsel %vm151_vm3, %v1736_v15, %v1730_v52 }
 0x5c6   :  { %v1745_v37 = vrot.slane %v1740_v56, 4  ;;  %v1748_v28 = vrot.slane %v1737_v12, 4 }
 0x5c7   :  { %1755 = vst [vmem:[#allocation2 + $0x10] sm:$0xf0] %v1747_v43  ;;  %v1774_v20 = vpop.permute.xlu0 %1773 }
 0x5c8   :  { %1753 = vst [vmem:[#allocation2] sm:$0xf0] %v1745_v37  ;;  %1756 = vst [vmem:[#allocation2 + $0x18] sm:$0xf0] %v1748_v28  ;;  %v1776_v21 = vpop.permute.xlu1 %1775 }
 0x5c9   :  { %v1783_v2 = vsel %vm253_vm5, %v1774_v20, %v1776_v21 }
 0x5ca   :  { %v1790_v42 = vrot.slane %v1783_v2, 4 }
 0x5cb   :  { %v1778_v63 = vpop.permute.xlu0 %1777 }
 0x5cc   :  { %1798 = vst [vmem:[#allocation2 + $0x28] sm:$0xf0] %v1790_v42  ;;  %v1782_v55 = vsel %vm253_vm5, %v1776_v21, %v1778_v63  ;;  %v1780_v40 = vpop.permute.xlu1 %1779 }
 0x5cd   :  { %v1791_v0 = vrot.slane %v1782_v55, 4  ;;  %v1781_v14 = vsel %vm253_vm5, %v1778_v63, %v1780_v40  ;;  %v1784_v36 = vsel %vm253_vm5, %v1780_v40, %v1774_v20 }
 0x5ce   :  { %v1789_v45 = vrot.slane %v1784_v36, 4  ;;  %v1792_v35 = vrot.slane %v1781_v14, 4 }
 0x5cf   :  { %1799 = vst [vmem:[#allocation2 + $0x30] sm:$0xf0] %v1791_v0  ;;  %v1714_v8 = vpop.permute.xlu0 %1713 }
 0x5d0   :  { %1797 = vst [vmem:[#allocation2 + $0x20] sm:$0xf0] %v1789_v45  ;;  %1800 = vst [vmem:[#allocation2 + $0x38] sm:$0xf0] %v1792_v35  ;;  %v1716_v17 = vpop.permute.xlu1 %1715 }
 0x5d1   :  { %v1723_v1 = vsel %vm105_vm2, %v1714_v8, %v1716_v17 }
 0x5d2   :  { %1726 = vst [vmem:[#allocation2 + $0x8] sm:$0xf] %v1723_v1 }
 0x5d3   :  { %v1718_v24 = vpop.permute.xlu0 %1717 }
 0x5d4   :  { %v1722_v6 = vsel %vm105_vm2, %v1716_v17, %v1718_v24  ;;  %v1720_v33 = vpop.permute.xlu1 %1719 }
 0x5d5   :  { %1727 = vst [vmem:[#allocation2 + $0x10] sm:$0xf] %v1722_v6  ;;  %v1721_v7 = vsel %vm105_vm2, %v1718_v24, %v1720_v33  ;;  %v1724_v3 = vsel %vm105_vm2, %v1720_v33, %v1714_v8 }
 0x5d6   :  { %1725 = vst [vmem:[#allocation2] sm:$0xf] %v1724_v3  ;;  %1728 = vst [vmem:[#allocation2 + $0x18] sm:$0xf] %v1721_v7 }
 0x5d7   :  { %v1758_v13 = vpop.permute.xlu0 %1757 }
 0x5d8   :  { %v1760_v53 = vpop.permute.xlu1 %1759 }
 0x5d9   :  { %v1767_v11 = vsel %vm208_vm4, %v1758_v13, %v1760_v53  ;;  %v1890_v29 = vld [vmem:[#allocation2 + $0x8] sm:$0xff] }
 0x5da   :  { %1770 = vst [vmem:[#allocation2 + $0x28] sm:$0xf] %v1767_v11  ;;  %v1906_v20 = vmul.f32 %v7928_v18, %v1890_v29 }
 0x5db   :  { %v1762_v34 = vpop.permute.xlu0 %1761 }
 0x5dc   :  { %v1766_v52 = vsel %vm208_vm4, %v1760_v53, %v1762_v34  ;;  %v1764_v9 = vpop.permute.xlu1 %1763  ;;  %v1891_v42 = vld [vmem:[#allocation2 + $0x10] sm:$0xff] }
 0x5dd   :  { %1771 = vst [vmem:[#allocation2 + $0x30] sm:$0xf] %v1766_v52  ;;  %v1765_v50 = vsel %vm208_vm4, %v1762_v34, %v1764_v9  ;;  %v1768_v58 = vsel %vm208_vm4, %v1764_v9, %v1758_v13  ;;  %v1889_v43 = vld [vmem:[#allocation2] sm:$0xff]  ;;  %v1892_v12 = vld [vmem:[#allocation2 + $0x18] sm:$0xff]  ;;  %v1907_v33 = vmul.f32 %v7953_v57, %v1891_v42 }
 0x5de   :  { %1769 = vst [vmem:[#allocation2 + $0x20] sm:$0xf] %v1768_v58  ;;  %1772 = vst [vmem:[#allocation2 + $0x38] sm:$0xf] %v1765_v50  ;;  %v1905_v14 = vmul.f32 %v7934_v59, %v1889_v43  ;;  %v1908_v36 = vmul.f32 %v7941_v30, %v1892_v12 }
 0x5df   :  { %v1818_v23 = vpop.permute.xlu0 %1817 }
 0x5e0   :  { %v1820_v15 = vpop.permute.xlu1 %1819 }
 0x5e1   :  { %v1894_v56 = vld [vmem:[#allocation2 + $0x28] sm:$0xff]  ;;  %v1827_v37 = vsel %vm367_vm7, %v1818_v23, %v1820_v15 }
 0x5e2   :  { %v1833_v28 = vrot.slane %v1827_v37, 4  ;;  %v1910_v21 = vmul.f32 %v7931_v4, %v1894_v56 }
 0x5e3   :  { %v1822_v2 = vpop.permute.xlu0 %1821 }
 0x5e4   :  { %v1895_v63 = vld [vmem:[#allocation2 + $0x30] sm:$0xff]  ;;  %1841 = vst [vmem:[#allocation2 + $0x40] sm:$0xf0] %v1833_v28  ;;  %v1826_v55 = vsel %vm367_vm7, %v1820_v15, %v1822_v2  ;;  %v1824_v40 = vpop.permute.xlu1 %1823  ;;  %v6682_v0 = vpack.c.bf16 %v1910_v21, %v1906_v20 }
 0x5e5   :  { %v1893_v45 = vld [vmem:[#allocation2 + $0x20] sm:$0xff]  ;;  %v1896_v35 = vld [vmem:[#allocation2 + $0x38] sm:$0xff]  ;;  %v1834_v8 = vrot.slane %v1826_v55, 4  ;;  %v1825_v18 = vsel %vm367_vm7, %v1822_v2, %v1824_v40  ;;  %v1828_v4 = vsel %vm367_vm7, %v1824_v40, %v1818_v23  ;;  %v1911_v17 = vmul.f32 %v7944_v41, %v1895_v63 }
 0x5e6   :  { %v1835_v1 = vrot.slane %v1825_v18, 4  ;;  %v1836_v24 = vrot.slane %v1828_v4, 4  ;;  %6683 = vmatprep.subr.bf16.mxu0 %v6682_v0  ;;  %v1909_v6 = vmul.f32 %v7947_v61, %v1893_v45  ;;  %v1912_v59 = vmul.f32 %v7950_v47, %v1896_v35 }
 0x5e7   :  { %1842 = vst [vmem:[#allocation2 + $0x48] sm:$0xf0] %v1834_v8  ;;  %v1862_v30 = vpop.permute.xlu0 %1861  ;;  %v6692_v41 = vpack.c.bf16 %v1911_v17, %v1907_v33 }
 0x5e8   :  { %1843 = vst [vmem:[#allocation2 + $0x50] sm:$0xf0] %v1835_v1  ;;  %1844 = vst [vmem:[#allocation2 + $0x58] sm:$0xf0] %v1836_v24  ;;  %v1864_v7 = vpop.permute.xlu1 %1863  ;;  %v6684_v3 = vpack.c.bf16 %v1909_v6, %v1905_v14  ;;  %v6690_v13 = vpack.c.bf16 %v1912_v59, %v1908_v36 }
 0x5e9   :  { %v1871_v53 = vsel %vm469_vm9, %v1862_v30, %v1864_v7 }
 0x5ea   :  { %v1877_v11 = vrot.slane %v1871_v53, 4  ;;  %6685 = vmatpush1.bf16.msra.mxu0 %v6684_v3  ;;  %6691 = vmatprep.subr.bf16.mxu1 %v6690_v13 }
 0x5eb   :  { %v1866_v34 = vpop.permute.xlu0 %1865  ;;  %6693 = vmatpush1.bf16.msra.mxu1 %v6692_v41 }
 0x5ec   :  { %1885 = vst [vmem:[#allocation2 + $0x60] sm:$0xf0] %v1877_v11  ;;  %v1870_v61 = vsel %vm469_vm9, %v1864_v7, %v1866_v34  ;;  %v1868_v47 = vpop.permute.xlu1 %1867 }
 0x5ed   :  { %v1878_v57 = vrot.slane %v1870_v61, 4  ;;  %v1869_v52 = vsel %vm469_vm9, %v1866_v34, %v1868_v47  ;;  %v1872_v9 = vsel %vm469_vm9, %v1868_v47, %v1862_v30 }
 0x5ee   :  { %v1879_v50 = vrot.slane %v1869_v52, 4  ;;  %v1880_v58 = vrot.slane %v1872_v9, 4 }
 0x5ef   :  { %1886 = vst [vmem:[#allocation2 + $0x68] sm:$0xf0] %v1878_v57  ;;  %v1802_v29 = vpop.permute.xlu0 %1801 }
 0x5f0   :  { %1887 = vst [vmem:[#allocation2 + $0x70] sm:$0xf0] %v1879_v50  ;;  %1888 = vst [vmem:[#allocation2 + $0x78] sm:$0xf0] %v1880_v58  ;;  %v1804_v23 = vpop.permute.xlu1 %1803 }
 0x5f1   :  { %v1811_v15 = vsel %vm322_vm6, %v1802_v29, %v1804_v23 }
 0x5f2   :  { %1813 = vst [vmem:[#allocation2 + $0x40] sm:$0xf] %v1811_v15 }
 0x5f3   :  { %v1806_v43 = vpop.permute.xlu0 %1805 }
 0x5f4   :  { %v1810_v12 = vsel %vm322_vm6, %v1804_v23, %v1806_v43  ;;  %v1808_v56 = vpop.permute.xlu1 %1807 }
 0x5f5   :  { %1814 = vst [vmem:[#allocation2 + $0x48] sm:$0xf] %v1810_v12  ;;  %v1809_v37 = vsel %vm322_vm6, %v1806_v43, %v1808_v56  ;;  %v1812_v28 = vsel %vm322_vm6, %v1808_v56, %v1802_v29 }
 0x5f6   :  { %1815 = vst [vmem:[#allocation2 + $0x50] sm:$0xf] %v1809_v37  ;;  %1816 = vst [vmem:[#allocation2 + $0x58] sm:$0xf] %v1812_v28 }
 0x5f7   :  { %v1846_v20 = vpop.permute.xlu0 %1845 }
 0x5f8   :  { %v1848_v21 = vpop.permute.xlu1 %1847 }
 0x5f9   :  { %v1855_v2 = vsel %vm424_vm8, %v1846_v20, %v1848_v21  ;;  %v1897_v36 = vld [vmem:[#allocation2 + $0x40] sm:$0xff] }
 0x5fa   :  { %1857 = vst [vmem:[#allocation2 + $0x60] sm:$0xf] %v1855_v2  ;;  %v1913_v59 = vmul.f32 %v7986_v54, %v1897_v36 }
 0x5fb   :  { %v1850_v42 = vpop.permute.xlu0 %1849 }
 0x5fc   :  { %v1854_v63 = vsel %vm424_vm8, %v1848_v21, %v1850_v42  ;;  %v1852_v55 = vpop.permute.xlu1 %1851  ;;  %v1898_v45 = vld [vmem:[#allocation2 + $0x48] sm:$0xff] }
 0x5fd   :  { %1858 = vst [vmem:[#allocation2 + $0x68] sm:$0xf] %v1854_v63  ;;  %v1853_v40 = vsel %vm424_vm8, %v1850_v42, %v1852_v55  ;;  %v1856_v0 = vsel %vm424_vm8, %v1852_v55, %v1846_v20  ;;  %v1899_v35 = vld [vmem:[#allocation2 + $0x50] sm:$0xff]  ;;  %v1900_v8 = vld [vmem:[#allocation2 + $0x58] sm:$0xff]  ;;  %v1914_v24 = vmul.f32 %v7980_v10, %v1898_v45 }
 0x5fe   :  { %1859 = vst [vmem:[#allocation2 + $0x70] sm:$0xf] %v1853_v40  ;;  %1860 = vst [vmem:[#allocation2 + $0x78] sm:$0xf] %v1856_v0  ;;  %v1916_v30 = vmul.f32 %v7992_v5, %v1900_v8  ;;  %v1915_v7 = vmul.f32 %v7998_v49, %v1899_v35 }
 0x601   :  { %v1901_v14 = vld [vmem:[#allocation2 + $0x60] sm:$0xff] }
 0x602   :  { %v1917_v4 = vmul.f32 %v7989_v46, %v1901_v14 }
 0x604   :  { %v1902_v18 = vld [vmem:[#allocation2 + $0x68] sm:$0xff]  ;;  %v6688_v53 = vpack.c.bf16 %v1917_v4, %v1913_v59 }
 0x605   :  { %v1903_v17 = vld [vmem:[#allocation2 + $0x70] sm:$0xff]  ;;  %v1904_v1 = vld [vmem:[#allocation2 + $0x78] sm:$0xff]  ;;  %v1918_v6 = vmul.f32 %v7983_v19, %v1902_v18 }
 0x606   :  { %v1920_v33 = vmul.f32 %v7995_v38, %v1904_v1  ;;  %v1919_v3 = vmul.f32 %v8001_v62, %v1903_v17 }
 0x607   :  { %v6686_v13 = vpack.c.bf16 %v1918_v6, %v1914_v24 }
 0x608   :  { %v6694_v41 = vpack.c.bf16 %v1920_v33, %v1916_v30  ;;  %v6696_v46 = vpack.c.bf16 %v1919_v3, %v1915_v7 }
 0x609   :  { %6687 = vmatprep.subr.bf16.mxu0 %v6686_v13 }
 0x60a   :  { %6689 = vmatpush1.bf16.msra.mxu0 %v6688_v53  ;;  %6695 = vmatprep.subr.bf16.mxu1 %v6694_v41 }
 0x60b   :  { %6697 = vmatpush1.bf16.msra.mxu1 %v6696_v46 }
 0x60d   :  { %6586 = vmatmul.mubr.msk.f32.vlgmr.msra.gmra.mrb[12].mxu0 %vm710_vm0, %v8007_v27 }
 0x60e   :  { %6588 = vmatmul.mubr.msk.f32.vlgmr.msra.gmra.mrb[12].mxu1 %vm710_vm0, %v8007_v27  ;;  %1991 = vmatprep.mubr.f32.mxu0 %v9458_v44 }
 0x60f   :  { %2068 = vmatprep.mubr.f32.mxu1 %v9458_v44 }
 0x611   :  { %6587 = vmatmul.mubr.msk.f32.gmra.mrb[14].mxu0 %vm710_vm0, %v8015_v39 }
 0x612   :  { %6589 = vmatmul.mubr.msk.f32.gmra.mrb[14].mxu1 %vm710_vm0, %v8015_v39  ;;  %2155 = vmatprep.mubr.f32.mxu0 %v9458_v44 }
 0x613   :  { %2226 = vmatprep.mubr.f32.mxu1 %v9458_v44 }
 0x6e0   :  { %v1987_v10 = vpop.f32.mrb[12].mxu0 }
 0x6e1   :  { %v1988_v19 = vadd.f32 %v1987_v10, %v9459_v32  ;;  %v1989_v54 = vpop.f32.mrb[13].mxu0  ;;  %v2064_v5 = vpop.f32.mrb[12].mxu1 }
 0x6e2   :  { %v1990_v38 = vadd.f32 %v1989_v54, %v9459_v32  ;;  %v2065_v49 = vadd.f32 %v2064_v5, %v9459_v32  ;;  %v2066_v62 = vpop.f32.mrb[13].mxu1 }
 0x6e3   :  { %v2067_v27 = vadd.f32 %v2066_v62, %v9459_v32  ;;  %v2075_v34 = vmul.f32 0.2, %v1988_v19 }
 0x6e4   :  { %v1993_v11 = vpop.f32.mrb[14].mxu0  ;;  %v2076_v57 = vmul.f32 0.2, %v1990_v38  ;;  %v2077_v52 = vmul.f32 0.2, %v2065_v49 }
 0x6e5   :  { %v1994_v39 = vadd.f32 %v1993_v11, %v9460_v48  ;;  %v1995_v61 = vpop.f32.mrb[15].mxu0  ;;  %v2070_v47 = vpop.f32.mrb[14].mxu1  ;;  %v2078_v29 = vmul.f32 0.2, %v2067_v27  ;;  %v2083_v56 = vmax.f32 %v1988_v19, %v2075_v34 }
 0x6e6   :  { %v1996_v9 = vadd.f32 %v1995_v61, %v9460_v48  ;;  %v2071_v50 = vadd.f32 %v2070_v47, %v9460_v48  ;;  %v2072_v58 = vpop.f32.mrb[15].mxu1  ;;  %v2084_v20 = vmax.f32 %v1990_v38, %v2076_v57  ;;  %v2085_v21 = vmax.f32 %v2065_v49, %v2077_v52 }
 0x6e7   :  { %v2079_v23 = vmul.f32 0.2, %v1994_v39  ;;  %v2073_v15 = vadd.f32 %v2072_v58, %v9460_v48  ;;  %v2086_v63 = vmax.f32 %v2067_v27, %v2078_v29 }
 0x6e8   :  { %v2080_v43 = vmul.f32 0.2, %v1996_v9  ;;  %v2081_v12 = vmul.f32 0.2, %v2071_v50 }
 0x6e9   :  { %v2087_v37 = vmax.f32 %v1994_v39, %v2079_v23  ;;  %v2082_v28 = vmul.f32 0.2, %v2073_v15 }
 0x6ea   :  { %v2088_v2 = vmax.f32 %v1996_v9, %v2080_v43  ;;  %v2089_v42 = vmax.f32 %v2071_v50, %v2081_v12 }
 0x6eb   :  { %v6700_v55 = vpack.c.bf16 %v2087_v37, %v2083_v56  ;;  %v2090_v40 = vmax.f32 %v2073_v15, %v2082_v28 }
 0x6ec   :  { %v6704_v0 = vpack.c.bf16 %v2089_v42, %v2085_v21  ;;  %v6698_v14 = vpack.c.bf16 %v2088_v2, %v2084_v20 }
 0x6ed   :  { %v6702_v36 = vpack.c.bf16 %v2090_v40, %v2086_v63 }
 0x6ee   :  { %6699 = vmatprep.subr.bf16.mxu0 %v6698_v14 }
 0x6ef   :  { %6701 = vmatpush1.bf16.msra.mxu0 %v6700_v55  ;;  %6703 = vmatprep.subr.bf16.mxu1 %v6702_v36 }
 0x6f0   :  { %6705 = vmatpush1.bf16.msra.mxu1 %v6704_v0 }
 0x6f2   :  { %6590 = vmatmul.mubr.msk.f32.vlgmr.msra.gmra.mrb[16].mxu0 %vm887_vm1, %v8037_v26 }
 0x6f3   :  { %6591 = vmatmul.mubr.msk.f32.vlgmr.msra.gmra.mrb[16].mxu1 %vm887_vm1, %v8037_v26  ;;  %2585 = vmatprep.mubr.f32.mxu0 %v9458_v44 }
 0x6f4   :  { %2662 = vmatprep.mubr.f32.mxu1 %v9458_v44 }
 0x7c5   :  { %v2157_v45 = vpop.f32.mrb[16].mxu0 }
 0x7c6   :  { %v2158_v35 = vadd.f32 %v2157_v45, %v7830_v22  ;;  %v2159_v8 = vpop.f32.mrb[17].mxu0  ;;  %v2228_v18 = vpop.f32.mrb[16].mxu1 }
 0x7c7   :  { %v2160_v4 = vadd.f32 %v2159_v8, %v7830_v22  ;;  %v2229_v17 = vadd.f32 %v2228_v18, %v7830_v22  ;;  %v2230_v1 = vpop.f32.mrb[17].mxu1 }
 0x7c8   :  { %v2233_v24 = vadd.f32 %v2158_v35, %v7833_v60  ;;  %v2231_v6 = vadd.f32 %v2230_v1, %v7830_v22 }
 0x7c9   :  { %v2234_v26 = vadd.f32 %v2160_v4, %v7837_v51  ;;  %v2235_v59 = vadd.f32 %v2229_v17, %v7840_v16 }
 0x7ca   :  { %v2237_v30 = vsel %vm518_vm10, %v2233_v24, -inf  ;;  %v2236_v33 = vadd.f32 %v2231_v6, %v7845_v25 }
 0x7cb   :  { %v2238_v7 = vrot.slane %v2237_v30, 4  ;;  %v2244_v3 = vsel %vm518_vm10, %v2234_v26, -inf  ;;  %v2251_v13 = vsel %vm518_vm10, %v2235_v59, -inf }
 0x7cc   :  { %v2245_v53 = vrot.slane %v2244_v3, 4  ;;  %v2252_v41 = vrot.slane %v2251_v13, 4  ;;  %v2258_v46 = vsel %vm518_vm10, %v2236_v33, -inf }
 0x7cd   :  { %v2239_v10 = vmax.f32 %v2237_v30, %v2238_v7  ;;  %v2259_v19 = vrot.slane %v2258_v46, 4 }
 0x7ce   :  { %v2246_v54 = vmax.f32 %v2244_v3, %v2245_v53  ;;  %v2253_v5 = vmax.f32 %v2251_v13, %v2252_v41 }
 0x7cf   :  { %v2240_v38 = vrot.slane %v2239_v10, 2  ;;  %v2260_v49 = vmax.f32 %v2258_v46, %v2259_v19 }
 0x7d0   :  { %v2247_v62 = vrot.slane %v2246_v54, 2  ;;  %v2254_v27 = vrot.slane %v2253_v5, 2 }
 0x7d1   :  { %v2241_v11 = vmax.f32 %v2239_v10, %v2240_v38  ;;  %v2261_v34 = vrot.slane %v2260_v49, 2 }
 0x7d2   :  { %v2248_v39 = vmax.f32 %v2246_v54, %v2247_v62  ;;  %v2255_v61 = vmax.f32 %v2253_v5, %v2254_v27 }
 0x7d3   :  { %v2242_v47 = vrot.slane %v2241_v11, 1  ;;  %v2262_v57 = vmax.f32 %v2260_v49, %v2261_v34 }
 0x7d4   :  { %v2249_v52 = vrot.slane %v2248_v39, 1  ;;  %v2256_v9 = vrot.slane %v2255_v61, 1 }
 0x7d5   :  { %v2243_v50 = vmax.f32 %v2241_v11, %v2242_v47  ;;  %v2263_v58 = vrot.slane %v2262_v57, 1 }
 0x7d6   :  { %v2250_v29 = vmax.f32 %v2248_v39, %v2249_v52  ;;  %v2257_v23 = vmax.f32 %v2255_v61, %v2256_v9 }
 0x7d7   :  { %v2265_v15 = vsub.f32 %v2233_v24, %v2243_v50  ;;  %v2264_v43 = vmax.f32 %v2262_v57, %v2263_v58 }
 0x7d8   :  { %v2266_v12 = vsub.f32 %v2234_v26, %v2250_v29  ;;  %v2267_v56 = vsub.f32 %v2235_v59, %v2257_v23 }
 0x7d9   :  { %v2269_v37 = vmul.f32 1.442695, %v2265_v15  ;;  %v2268_v28 = vsub.f32 %v2236_v33, %v2264_v43 }
 0x7da   :  { %v2271_v20 = vmul.f32 1.442695, %v2266_v12  ;;  %v2273_v21 = vmul.f32 1.442695, %v2267_v56 }
 0x7db   :  { %6956 = vpow2.f32 %v2269_v37  ;;  %v2275_v2 = vmul.f32 1.442695, %v2268_v28 }
 0x7dc   :  { %6958 = vpow2.f32 %v2271_v20 }
 0x7dd   :  { %6960 = vpow2.f32 %v2273_v21 }
 0x7de   :  { %6962 = vpow2.f32 %v2275_v2 }
 0x7e5   :  { %v6957_v42 = vpop.eup %6956 }
 0x7e6   :  { %v6959_v63 = vpop.eup %6958  ;;  %v2277_v55 = vsel %vm518_vm10, %v6957_v42, 0.0 }
 0x7e7   :  { %v6961_v40 = vpop.eup %6960  ;;  %v2278_v0 = vrot.slane %v2277_v55, 4  ;;  %v2284_v14 = vsel %vm518_vm10, %v6959_v63, 0.0 }
 0x7e8   :  { %v6963_v36 = vpop.eup %6962  ;;  %v2285_v45 = vrot.slane %v2284_v14, 4  ;;  %v2291_v35 = vsel %vm518_vm10, %v6961_v40, 0.0 }
 0x7e9   :  { %v2279_v8 = vadd.f32 %v2278_v0, %v2277_v55  ;;  %v2292_v18 = vrot.slane %v2291_v35, 4  ;;  %v2298_v4 = vsel %vm518_vm10, %v6963_v36, 0.0 }
 0x7ea   :  { %v2286_v17 = vadd.f32 %v2285_v45, %v2284_v14  ;;  %v2299_v1 = vrot.slane %v2298_v4, 4 }
 0x7eb   :  { %v2280_v24 = vrot.slane %v2279_v8, 2  ;;  %v2293_v6 = vadd.f32 %v2292_v18, %v2291_v35 }
 0x7ec   :  { %v2287_v26 = vrot.slane %v2286_v17, 2  ;;  %v2300_v59 = vadd.f32 %v2299_v1, %v2298_v4 }
 0x7ed   :  { %v2281_v30 = vadd.f32 %v2280_v24, %v2279_v8  ;;  %v2294_v33 = vrot.slane %v2293_v6, 2 }
 0x7ee   :  { %v2288_v7 = vadd.f32 %v2287_v26, %v2286_v17  ;;  %v2301_v3 = vrot.slane %v2300_v59, 2 }
 0x7ef   :  { %v2282_v13 = vrot.slane %v2281_v30, 1  ;;  %v2295_v53 = vadd.f32 %v2294_v33, %v2293_v6 }
 0x7f0   :  { %v2289_v41 = vrot.slane %v2288_v7, 1  ;;  %v2302_v46 = vadd.f32 %v2301_v3, %v2300_v59 }
 0x7f1   :  { %v2283_v10 = vadd.f32 %v2282_v13, %v2281_v30  ;;  %v2296_v19 = vrot.slane %v2295_v53, 1 }
 0x7f2   :  { %v2290_v54 = vadd.f32 %v2289_v41, %v2288_v7  ;;  %v2303_v5 = vrot.slane %v2302_v46, 1 }
 0x7f3   :  { %6964 = vrcp.f32 %v2283_v10  ;;  %v2297_v38 = vadd.f32 %v2296_v19, %v2295_v53 }
 0x7f4   :  { %6966 = vrcp.f32 %v2290_v54  ;;  %v2304_v49 = vadd.f32 %v2303_v5, %v2302_v46 }
 0x7f5   :  { %6968 = vrcp.f32 %v2297_v38 }
 0x7f6   :  { %6970 = vrcp.f32 %v2304_v49 }
 0x7fd   :  { %v6965_v62 = vpop.eup %6964 }
 0x7fe   :  { %v6967_v27 = vpop.eup %6966  ;;  %v2309_v11 = vmul.f32 %v6965_v62, %v6957_v42 }
 0x7ff   :  { %v6969_v34 = vpop.eup %6968  ;;  %v2310_v39 = vmul.f32 %v6967_v27, %v6959_v63  ;;  %v8281_v27 = vld [vmem:[#allocation3 + $0x8] sm:$0xff] }
 0x800   :  { %v6971_v61 = vpop.eup %6970  ;;  %2329 = vrot.lane.b32.xlu0 %v2309_v11, %s7239_s19  ;;  %v2311_v47 = vmul.f32 %v6969_v34, %v6961_v40  ;;  %v8284_v34 = vld [vmem:[#allocation3 + $0x28] sm:$0xff] }
 0x801   :  { %2331 = vrot.lane.b32.xlu1 %v2310_v39, %s7239_s19  ;;  %v2312_v57 = vmul.f32 %v6971_v61, %v6963_v36 }
 0x804   :  { %2333 = vrot.lane.b32.xlu0 %v2311_v47, %s7239_s19 }
 0x805   :  { %2335 = vrot.lane.b32.xlu1 %v2312_v57, %s7239_s19 }
 0x808   :  { %2373 = vrot.lane.b32.xlu0 %v2309_v11, %s7242_s21 }
 0x809   :  { %2375 = vrot.lane.b32.xlu1 %v2310_v39, %s7242_s21 }
 0x80c   :  { %2377 = vrot.lane.b32.xlu0 %v2311_v47, %s7242_s21 }
 0x80d   :  { %2379 = vrot.lane.b32.xlu1 %v2312_v57, %s7242_s21 }
 0x810   :  { %2313 = vrot.lane.b32.xlu0 %v2309_v11, %s7240_s20 }
 0x811   :  { %2315 = vrot.lane.b32.xlu1 %v2310_v39, %s7240_s20 }
 0x814   :  { %2317 = vrot.lane.b32.xlu0 %v2311_v47, %s7240_s20 }
 0x815   :  { %2319 = vrot.lane.b32.xlu1 %v2312_v57, %s7240_s20 }
 0x818   :  { %2357 = vrot.lane.b32.xlu0 %v2309_v11, %s7243_s22 }
 0x819   :  { %2359 = vrot.lane.b32.xlu1 %v2310_v39, %s7243_s22 }
 0x81c   :  { %2361 = vrot.lane.b32.xlu0 %v2311_v47, %s7243_s22 }
 0x81d   :  { %2363 = vrot.lane.b32.xlu1 %v2312_v57, %s7243_s22 }
 0x820   :  { %2417 = vrot.lane.b32.xlu0 %v2309_v11, %s7244_s1 }
 0x821   :  { %2419 = vrot.lane.b32.xlu1 %v2310_v39, %s7244_s1 }
 0x824   :  { %2421 = vrot.lane.b32.xlu0 %v2311_v47, %s7244_s1 }
 0x825   :  { %2423 = vrot.lane.b32.xlu1 %v2312_v57, %s7244_s1 }
 0x828   :  { %2461 = vrot.lane.b32.xlu0 %v2309_v11, %s7245_s23 }
 0x829   :  { %2463 = vrot.lane.b32.xlu1 %v2310_v39, %s7245_s23 }
 0x82c   :  { %2465 = vrot.lane.b32.xlu0 %v2311_v47, %s7245_s23 }
 0x82d   :  { %2467 = vrot.lane.b32.xlu1 %v2312_v57, %s7245_s23 }
 0x830   :  { %2401 = vrot.lane.b32.xlu0 %v2309_v11, %s7246_s24 }
 0x831   :  { %2403 = vrot.lane.b32.xlu1 %v2310_v39, %s7246_s24 }
 0x834   :  { %2405 = vrot.lane.b32.xlu0 %v2311_v47, %s7246_s24 }
 0x835   :  { %2407 = vrot.lane.b32.xlu1 %v2312_v57, %s7246_s24 }
 0x838   :  { %2445 = vrot.lane.b32.xlu0 %v2309_v11, %s7247_s25 }
 0x839   :  { %2447 = vrot.lane.b32.xlu1 %v2310_v39, %s7247_s25 }
 0x83c   :  { %2449 = vrot.lane.b32.xlu0 %v2311_v47, %s7247_s25 }
 0x83d   :  { %2451 = vrot.lane.b32.xlu1 %v2312_v57, %s7247_s25 }
 0x872   :  { %v2330_v52 = vpop.permute.xlu0 %2329 }
 0x873   :  { %v2332_v9 = vpop.permute.xlu1 %2331 }
 0x874   :  { %v2339_v50 = vsel %vm151_vm3, %v2330_v52, %v2332_v9 }
 0x875   :  { %v2346_v58 = vrot.slane %v2339_v50, 4 }
 0x876   :  { %v2334_v29 = vpop.permute.xlu0 %2333 }
 0x877   :  { %2354 = vst [vmem:[#allocation2 + $0x8] sm:$0xf0] %v2346_v58  ;;  %v2338_v23 = vsel %vm151_vm3, %v2332_v9, %v2334_v29  ;;  %v2336_v15 = vpop.permute.xlu1 %2335  ;;  %v8289_v58 = vld [vmem:[#allocation3] sm:$0xff] }
 0x878   :  { %v2347_v43 = vrot.slane %v2338_v23, 4  ;;  %v2337_v12 = vsel %vm151_vm3, %v2334_v29, %v2336_v15  ;;  %v2340_v56 = vsel %vm151_vm3, %v2336_v15, %v2330_v52  ;;  %v8292_v23 = vld [vmem:[#allocation3 + $0x18] sm:$0xff] }
 0x879   :  { %v2345_v37 = vrot.slane %v2340_v56, 4  ;;  %v2348_v28 = vrot.slane %v2337_v12, 4 }
 0x87a   :  { %2355 = vst [vmem:[#allocation2 + $0x10] sm:$0xf0] %v2347_v43  ;;  %v2374_v20 = vpop.permute.xlu0 %2373 }
 0x87b   :  { %2353 = vst [vmem:[#allocation2] sm:$0xf0] %v2345_v37  ;;  %2356 = vst [vmem:[#allocation2 + $0x18] sm:$0xf0] %v2348_v28  ;;  %v2376_v21 = vpop.permute.xlu1 %2375 }
 0x87c   :  { %v2383_v2 = vsel %vm253_vm5, %v2374_v20, %v2376_v21 }
 0x87d   :  { %v2390_v42 = vrot.slane %v2383_v2, 4 }
 0x87e   :  { %v2378_v63 = vpop.permute.xlu0 %2377 }
 0x87f   :  { %2398 = vst [vmem:[#allocation2 + $0x28] sm:$0xf0] %v2390_v42  ;;  %v2382_v55 = vsel %vm253_vm5, %v2376_v21, %v2378_v63  ;;  %v2380_v40 = vpop.permute.xlu1 %2379 }
 0x880   :  { %v2391_v0 = vrot.slane %v2382_v55, 4  ;;  %v2381_v14 = vsel %vm253_vm5, %v2378_v63, %v2380_v40  ;;  %v2384_v36 = vsel %vm253_vm5, %v2380_v40, %v2374_v20  ;;  %v8299_v20 = vld [vmem:[#allocation3 + $0x30] sm:$0xff]  ;;  %v8302_v63 = vld [vmem:[#allocation3 + $0x20] sm:$0xff]  ;;  %v8305_v40 = vld [vmem:[#allocation3 + $0x38] sm:$0xff] }
 0x881   :  { %v2389_v45 = vrot.slane %v2384_v36, 4  ;;  %v2392_v35 = vrot.slane %v2381_v14, 4  ;;  %v8308_v36 = vld [vmem:[#allocation3 + $0x10] sm:$0xff] }
 0x882   :  { %2399 = vst [vmem:[#allocation2 + $0x30] sm:$0xf0] %v2391_v0  ;;  %v2314_v8 = vpop.permute.xlu0 %2313 }
 0x883   :  { %2397 = vst [vmem:[#allocation2 + $0x20] sm:$0xf0] %v2389_v45  ;;  %2400 = vst [vmem:[#allocation2 + $0x38] sm:$0xf0] %v2392_v35  ;;  %v2316_v18 = vpop.permute.xlu1 %2315 }
 0x884   :  { %v2323_v4 = vsel %vm105_vm2, %v2314_v8, %v2316_v18 }
 0x885   :  { %2326 = vst [vmem:[#allocation2 + $0x8] sm:$0xf] %v2323_v4 }
 0x886   :  { %v2318_v17 = vpop.permute.xlu0 %2317 }
 0x887   :  { %v2322_v1 = vsel %vm105_vm2, %v2316_v18, %v2318_v17  ;;  %v2320_v24 = vpop.permute.xlu1 %2319 }
 0x888   :  { %2327 = vst [vmem:[#allocation2 + $0x10] sm:$0xf] %v2322_v1  ;;  %v2321_v6 = vsel %vm105_vm2, %v2318_v17, %v2320_v24  ;;  %v2324_v26 = vsel %vm105_vm2, %v2320_v24, %v2314_v8 }
 0x889   :  { %2325 = vst [vmem:[#allocation2] sm:$0xf] %v2324_v26  ;;  %2328 = vst [vmem:[#allocation2 + $0x18] sm:$0xf] %v2321_v6 }
 0x88a   :  { %v2358_v59 = vpop.permute.xlu0 %2357 }
 0x88b   :  { %v2360_v30 = vpop.permute.xlu1 %2359 }
 0x88c   :  { %v2367_v33 = vsel %vm208_vm4, %v2358_v59, %v2360_v30  ;;  %v2490_v46 = vld [vmem:[#allocation2 + $0x8] sm:$0xff] }
 0x88d   :  { %2370 = vst [vmem:[#allocation2 + $0x28] sm:$0xf] %v2367_v33  ;;  %v2506_v11 = vmul.f32 %v8281_v27, %v2490_v46 }
 0x88e   :  { %v2362_v7 = vpop.permute.xlu0 %2361 }
 0x88f   :  { %v2366_v3 = vsel %vm208_vm4, %v2360_v30, %v2362_v7  ;;  %v2364_v13 = vpop.permute.xlu1 %2363  ;;  %v2491_v47 = vld [vmem:[#allocation2 + $0x10] sm:$0xff] }
 0x890   :  { %2371 = vst [vmem:[#allocation2 + $0x30] sm:$0xf] %v2366_v3  ;;  %v2365_v53 = vsel %vm208_vm4, %v2362_v7, %v2364_v13  ;;  %v2368_v41 = vsel %vm208_vm4, %v2364_v13, %v2358_v59  ;;  %v2489_v54 = vld [vmem:[#allocation2] sm:$0xff]  ;;  %v2492_v5 = vld [vmem:[#allocation2 + $0x18] sm:$0xff]  ;;  %v2507_v45 = vmul.f32 %v8308_v36, %v2491_v47 }
 0x891   :  { %2369 = vst [vmem:[#allocation2 + $0x20] sm:$0xf] %v2368_v41  ;;  %2372 = vst [vmem:[#allocation2 + $0x38] sm:$0xf] %v2365_v53  ;;  %v2505_v29 = vmul.f32 %v8289_v58, %v2489_v54  ;;  %v2508_v15 = vmul.f32 %v8292_v23, %v2492_v5 }
 0x892   :  { %v2418_v10 = vpop.permute.xlu0 %2417 }
 0x893   :  { %v2420_v19 = vpop.permute.xlu1 %2419 }
 0x894   :  { %v2494_v38 = vld [vmem:[#allocation2 + $0x28] sm:$0xff]  ;;  %v2427_v49 = vsel %vm367_vm7, %v2418_v10, %v2420_v19 }
 0x895   :  { %v2433_v62 = vrot.slane %v2427_v49, 4  ;;  %v2510_v39 = vmul.f32 %v8284_v34, %v2494_v38 }
 0x896   :  { %v2422_v61 = vpop.permute.xlu0 %2421 }
 0x897   :  { %v2495_v57 = vld [vmem:[#allocation2 + $0x30] sm:$0xff]  ;;  %2441 = vst [vmem:[#allocation2 + $0x40] sm:$0xf0] %v2433_v62  ;;  %v2426_v52 = vsel %vm367_vm7, %v2420_v19, %v2422_v61  ;;  %v2424_v9 = vpop.permute.xlu1 %2423  ;;  %v6706_v50 = vpack.c.bf16 %v2510_v39, %v2506_v11 }
 0x898   :  { %v2493_v43 = vld [vmem:[#allocation2 + $0x20] sm:$0xff]  ;;  %v2496_v12 = vld [vmem:[#allocation2 + $0x38] sm:$0xff]  ;;  %v2434_v56 = vrot.slane %v2426_v52, 4  ;;  %v2425_v37 = vsel %vm367_vm7, %v2422_v61, %v2424_v9  ;;  %v2428_v28 = vsel %vm367_vm7, %v2424_v9, %v2418_v10  ;;  %v2511_v21 = vmul.f32 %v8299_v20, %v2495_v57 }
 0x899   :  { %v2435_v2 = vrot.slane %v2425_v37, 4  ;;  %v2436_v42 = vrot.slane %v2428_v28, 4  ;;  %6707 = vmatprep.subr.bf16.mxu0 %v6706_v50  ;;  %v2509_v55 = vmul.f32 %v8302_v63, %v2493_v43  ;;  %v2512_v0 = vmul.f32 %v8305_v40, %v2496_v12  ;;  %v8335_v12 = vld [vmem:[#allocation3 + $0x60] sm:$0xff] }
 0x89a   :  { %2442 = vst [vmem:[#allocation2 + $0x48] sm:$0xf0] %v2434_v56  ;;  %v2462_v14 = vpop.permute.xlu0 %2461  ;;  %v6716_v17 = vpack.c.bf16 %v2511_v21, %v2507_v45  ;;  %v8338_v21 = vld [vmem:[#allocation3 + $0x48] sm:$0xff]  ;;  %v8347_v45 = vld [vmem:[#allocation3 + $0x58] sm:$0xff] }
 0x89b   :  { %2443 = vst [vmem:[#allocation2 + $0x50] sm:$0xf0] %v2435_v2  ;;  %2444 = vst [vmem:[#allocation2 + $0x58] sm:$0xf0] %v2436_v42  ;;  %v2464_v35 = vpop.permute.xlu1 %2463  ;;  %v6708_v8 = vpack.c.bf16 %v2509_v55, %v2505_v29  ;;  %v6714_v18 = vpack.c.bf16 %v2512_v0, %v2508_v15  ;;  %v8341_v42 = vld [vmem:[#allocation3 + $0x68] sm:$0xff]  ;;  %v8344_v0 = vld [vmem:[#allocation3 + $0x40] sm:$0xff] }
 0x89c   :  { %v2471_v4 = vsel %vm469_vm9, %v2462_v14, %v2464_v35 }
 0x89d   :  { %v2477_v1 = vrot.slane %v2471_v4, 4  ;;  %6709 = vmatpush1.bf16.msra.mxu0 %v6708_v8  ;;  %6715 = vmatprep.subr.bf16.mxu1 %v6714_v18  ;;  %v8350_v8 = vld [vmem:[#allocation3 + $0x78] sm:$0xff]  ;;  %v8353_v4 = vld [vmem:[#allocation3 + $0x50] sm:$0xff] }
 0x89e   :  { %v2466_v24 = vpop.permute.xlu0 %2465  ;;  %6717 = vmatpush1.bf16.msra.mxu1 %v6716_v17 }
 0x89f   :  { %2485 = vst [vmem:[#allocation2 + $0x60] sm:$0xf0] %v2477_v1  ;;  %v2470_v6 = vsel %vm469_vm9, %v2464_v35, %v2466_v24  ;;  %v2468_v26 = vpop.permute.xlu1 %2467  ;;  %v8356_v1 = vld [vmem:[#allocation3 + $0x70] sm:$0xff] }
 0x8a0   :  { %v2478_v59 = vrot.slane %v2470_v6, 4  ;;  %v2469_v30 = vsel %vm469_vm9, %v2466_v24, %v2468_v26  ;;  %v2472_v33 = vsel %vm469_vm9, %v2468_v26, %v2462_v14 }
 0x8a1   :  { %v2479_v7 = vrot.slane %v2469_v30, 4  ;;  %v2480_v3 = vrot.slane %v2472_v33, 4  ;;  %v8362_v33 = vld [vmem:[%s9439_s4] sm:$0xff] }
 0x8a2   :  { %2486 = vst [vmem:[#allocation2 + $0x68] sm:$0xf0] %v2478_v59  ;;  %v2402_v13 = vpop.permute.xlu0 %2401 }
 0x8a3   :  { %2487 = vst [vmem:[#allocation2 + $0x70] sm:$0xf0] %v2479_v7  ;;  %2488 = vst [vmem:[#allocation2 + $0x78] sm:$0xf0] %v2480_v3  ;;  %v2404_v53 = vpop.permute.xlu1 %2403  ;;  %v8373_v7 = vld [vmem:[%s9439_s4 + $0x8] sm:$0xff] }
 0x8a4   :  { %v2411_v41 = vsel %vm322_vm6, %v2402_v13, %v2404_v53 }
 0x8a5   :  { %2413 = vst [vmem:[#allocation2 + $0x40] sm:$0xf] %v2411_v41 }
 0x8a6   :  { %v2406_v46 = vpop.permute.xlu0 %2405 }
 0x8a7   :  { %v2410_v10 = vsel %vm322_vm6, %v2404_v53, %v2406_v46  ;;  %v2408_v19 = vpop.permute.xlu1 %2407 }
 0x8a8   :  { %2414 = vst [vmem:[#allocation2 + $0x48] sm:$0xf] %v2410_v10  ;;  %v2409_v54 = vsel %vm322_vm6, %v2406_v46, %v2408_v19  ;;  %v2412_v5 = vsel %vm322_vm6, %v2408_v19, %v2402_v13 }
 0x8a9   :  { %2415 = vst [vmem:[#allocation2 + $0x50] sm:$0xf] %v2409_v54  ;;  %2416 = vst [vmem:[#allocation2 + $0x58] sm:$0xf] %v2412_v5 }
 0x8aa   :  { %v2446_v38 = vpop.permute.xlu0 %2445 }
 0x8ab   :  { %v2448_v49 = vpop.permute.xlu1 %2447 }
 0x8ac   :  { %v2455_v62 = vsel %vm424_vm8, %v2446_v38, %v2448_v49  ;;  %v2497_v9 = vld [vmem:[#allocation2 + $0x40] sm:$0xff] }
 0x8ad   :  { %2457 = vst [vmem:[#allocation2 + $0x60] sm:$0xf] %v2455_v62  ;;  %v2513_v14 = vmul.f32 %v8344_v0, %v2497_v9 }
 0x8ae   :  { %v2450_v11 = vpop.permute.xlu0 %2449 }
 0x8af   :  { %v2454_v39 = vsel %vm424_vm8, %v2448_v49, %v2450_v11  ;;  %v2452_v61 = vpop.permute.xlu1 %2451  ;;  %v2498_v50 = vld [vmem:[#allocation2 + $0x48] sm:$0xff] }
 0x8b0   :  { %2458 = vst [vmem:[#allocation2 + $0x68] sm:$0xf] %v2454_v39  ;;  %v2453_v47 = vsel %vm424_vm8, %v2450_v11, %v2452_v61  ;;  %v2456_v57 = vsel %vm424_vm8, %v2452_v61, %v2446_v38  ;;  %v2499_v29 = vld [vmem:[#allocation2 + $0x50] sm:$0xff]  ;;  %v2500_v15 = vld [vmem:[#allocation2 + $0x58] sm:$0xff]  ;;  %v2514_v2 = vmul.f32 %v8338_v21, %v2498_v50 }
 0x8b1   :  { %2459 = vst [vmem:[#allocation2 + $0x70] sm:$0xf] %v2453_v47  ;;  %2460 = vst [vmem:[#allocation2 + $0x78] sm:$0xf] %v2456_v57  ;;  %v2516_v35 = vmul.f32 %v8347_v45, %v2500_v15  ;;  %v2515_v17 = vmul.f32 %v8353_v4, %v2499_v29 }
 0x8b4   :  { %v2501_v52 = vld [vmem:[#allocation2 + $0x60] sm:$0xff] }
 0x8b5   :  { %v2517_v56 = vmul.f32 %v8335_v12, %v2501_v52 }
 0x8b7   :  { %v2502_v43 = vld [vmem:[#allocation2 + $0x68] sm:$0xff]  ;;  %v6712_v26 = vpack.c.bf16 %v2517_v56, %v2513_v14 }
 0x8b8   :  { %v2503_v37 = vld [vmem:[#allocation2 + $0x70] sm:$0xff]  ;;  %v2504_v28 = vld [vmem:[#allocation2 + $0x78] sm:$0xff]  ;;  %v2518_v55 = vmul.f32 %v8341_v42, %v2502_v43 }
 0x8b9   :  { %v2520_v18 = vmul.f32 %v8350_v8, %v2504_v28  ;;  %v2519_v24 = vmul.f32 %v8356_v1, %v2503_v37 }
 0x8ba   :  { %v6710_v6 = vpack.c.bf16 %v2518_v55, %v2514_v2 }
 0x8bb   :  { %v6718_v59 = vpack.c.bf16 %v2520_v18, %v2516_v35  ;;  %v6720_v30 = vpack.c.bf16 %v2519_v24, %v2515_v17 }
 0x8bc   :  { %6711 = vmatprep.subr.bf16.mxu0 %v6710_v6 }
 0x8bd   :  { %6713 = vmatpush1.bf16.msra.mxu0 %v6712_v26  ;;  %6719 = vmatprep.subr.bf16.mxu1 %v6718_v59 }
 0x8be   :  { %6721 = vmatpush1.bf16.msra.mxu1 %v6720_v30  ;;  %v8392_v30 = vld [vmem:[%s9441_s6] sm:$0xf] }
 0x8c0   :  { %6592 = vmatmul.mubr.msk.f32.vlgmr.msra.gmra.mrb[18].mxu0 %vm710_vm0, %v8362_v33 }
 0x8c1   :  { %6594 = vmatmul.mubr.msk.f32.vlgmr.msra.gmra.mrb[18].mxu1 %vm710_vm0, %v8362_v33  ;;  %2591 = vmatprep.mubr.f32.mxu0 %v9458_v44 }
 0x8c2   :  { %2668 = vmatprep.mubr.f32.mxu1 %v9458_v44 }
 0x8c4   :  { %6593 = vmatmul.mubr.msk.f32.gmra.mrb[20].mxu0 %vm710_vm0, %v8373_v7 }
 0x8c5   :  { %6595 = vmatmul.mubr.msk.f32.gmra.mrb[20].mxu1 %vm710_vm0, %v8373_v7  ;;  %2755 = vmatprep.mubr.f32.mxu0 %v9458_v44 }
 0x8c6   :  { %2826 = vmatprep.mubr.f32.mxu1 %v9458_v44 }
 0x993   :  { %v2587_v3 = vpop.f32.mrb[18].mxu0 }
 0x994   :  { %v2588_v13 = vadd.f32 %v2587_v3, %v9459_v32  ;;  %v2589_v53 = vpop.f32.mrb[19].mxu0  ;;  %v2664_v41 = vpop.f32.mrb[18].mxu1 }
 0x995   :  { %v2590_v46 = vadd.f32 %v2589_v53, %v9459_v32  ;;  %v2665_v10 = vadd.f32 %v2664_v41, %v9459_v32  ;;  %v2666_v19 = vpop.f32.mrb[19].mxu1 }
 0x996   :  { %v2667_v54 = vadd.f32 %v2666_v19, %v9459_v32  ;;  %v2675_v38 = vmul.f32 0.2, %v2588_v13 }
 0x997   :  { %v2593_v5 = vpop.f32.mrb[20].mxu0  ;;  %v2676_v39 = vmul.f32 0.2, %v2590_v46  ;;  %v2677_v61 = vmul.f32 0.2, %v2665_v10 }
 0x998   :  { %v2594_v49 = vadd.f32 %v2593_v5, %v9460_v48  ;;  %v2595_v62 = vpop.f32.mrb[21].mxu0  ;;  %v2670_v11 = vpop.f32.mrb[20].mxu1  ;;  %v2678_v9 = vmul.f32 0.2, %v2667_v54  ;;  %v2683_v56 = vmax.f32 %v2588_v13, %v2675_v38 }
 0x999   :  { %v2596_v47 = vadd.f32 %v2595_v62, %v9460_v48  ;;  %v2671_v57 = vadd.f32 %v2670_v11, %v9460_v48  ;;  %v2672_v52 = vpop.f32.mrb[21].mxu1  ;;  %v2684_v2 = vmax.f32 %v2590_v46, %v2676_v39  ;;  %v2685_v55 = vmax.f32 %v2665_v10, %v2677_v61 }
 0x99a   :  { %v2679_v50 = vmul.f32 0.2, %v2594_v49  ;;  %v2673_v29 = vadd.f32 %v2672_v52, %v9460_v48  ;;  %v2686_v18 = vmax.f32 %v2667_v54, %v2678_v9 }
 0x99b   :  { %v2680_v15 = vmul.f32 0.2, %v2596_v47  ;;  %v2681_v43 = vmul.f32 0.2, %v2671_v57 }
 0x99c   :  { %v2687_v37 = vmax.f32 %v2594_v49, %v2679_v50  ;;  %v2682_v28 = vmul.f32 0.2, %v2673_v29 }
 0x99d   :  { %v2688_v14 = vmax.f32 %v2596_v47, %v2680_v15  ;;  %v2689_v35 = vmax.f32 %v2671_v57, %v2681_v43 }
 0x99e   :  { %v6724_v17 = vpack.c.bf16 %v2687_v37, %v2683_v56  ;;  %v2690_v24 = vmax.f32 %v2673_v29, %v2682_v28 }
 0x99f   :  { %v6728_v6 = vpack.c.bf16 %v2689_v35, %v2685_v55  ;;  %v6722_v26 = vpack.c.bf16 %v2688_v14, %v2684_v2 }
 0x9a0   :  { %v6726_v59 = vpack.c.bf16 %v2690_v24, %v2686_v18 }
 0x9a1   :  { %6723 = vmatprep.subr.bf16.mxu0 %v6722_v26 }
 0x9a2   :  { %6725 = vmatpush1.bf16.msra.mxu0 %v6724_v17  ;;  %6727 = vmatprep.subr.bf16.mxu1 %v6726_v59 }
 0x9a3   :  { %6729 = vmatpush1.bf16.msra.mxu1 %v6728_v6 }
 0x9a5   :  { %6596 = vmatmul.mubr.msk.f32.vlgmr.msra.gmra.mrb[22].mxu0 %vm887_vm1, %v8392_v30 }
 0x9a6   :  { %6597 = vmatmul.mubr.msk.f32.vlgmr.msra.gmra.mrb[22].mxu1 %vm887_vm1, %v8392_v30  ;;  %3185 = vmatprep.mubr.f32.mxu0 %v9458_v44 }
 0x9a7   :  { %3262 = vmatprep.mubr.f32.mxu1 %v9458_v44 }
 0xa78   :  { %v2757_v3 = vpop.f32.mrb[22].mxu0 }
 0xa79   :  { %v2758_v13 = vadd.f32 %v2757_v3, %v7830_v22  ;;  %v2759_v53 = vpop.f32.mrb[23].mxu0  ;;  %v2828_v41 = vpop.f32.mrb[22].mxu1 }
 0xa7a   :  { %v2760_v46 = vadd.f32 %v2759_v53, %v7830_v22  ;;  %v2829_v10 = vadd.f32 %v2828_v41, %v7830_v22  ;;  %v2830_v19 = vpop.f32.mrb[23].mxu1 }
 0xa7b   :  { %v2833_v54 = vadd.f32 %v2758_v13, %v7833_v60  ;;  %v2831_v5 = vadd.f32 %v2830_v19, %v7830_v22 }
 0xa7c   :  { %v2834_v38 = vadd.f32 %v2760_v46, %v7837_v51  ;;  %v2835_v49 = vadd.f32 %v2829_v10, %v7840_v16 }
 0xa7d   :  { %v2837_v62 = vsel %vm518_vm10, %v2833_v54, -inf  ;;  %v2836_v11 = vadd.f32 %v2831_v5, %v7845_v25 }
 0xa7e   :  { %v2838_v39 = vrot.slane %v2837_v62, 4  ;;  %v2844_v61 = vsel %vm518_vm10, %v2834_v38, -inf  ;;  %v2851_v47 = vsel %vm518_vm10, %v2835_v49, -inf }
 0xa7f   :  { %v2845_v57 = vrot.slane %v2844_v61, 4  ;;  %v2852_v52 = vrot.slane %v2851_v47, 4  ;;  %v2858_v9 = vsel %vm518_vm10, %v2836_v11, -inf }
 0xa80   :  { %v2839_v50 = vmax.f32 %v2837_v62, %v2838_v39  ;;  %v2859_v29 = vrot.slane %v2858_v9, 4 }
 0xa81   :  { %v2846_v15 = vmax.f32 %v2844_v61, %v2845_v57  ;;  %v2853_v43 = vmax.f32 %v2851_v47, %v2852_v52 }
 0xa82   :  { %v2840_v56 = vrot.slane %v2839_v50, 2  ;;  %v2860_v37 = vmax.f32 %v2858_v9, %v2859_v29 }
 0xa83   :  { %v2847_v28 = vrot.slane %v2846_v15, 2  ;;  %v2854_v2 = vrot.slane %v2853_v43, 2 }
 0xa84   :  { %v2841_v55 = vmax.f32 %v2839_v50, %v2840_v56  ;;  %v2861_v14 = vrot.slane %v2860_v37, 2 }
 0xa85   :  { %v2848_v35 = vmax.f32 %v2846_v15, %v2847_v28  ;;  %v2855_v18 = vmax.f32 %v2853_v43, %v2854_v2 }
 0xa86   :  { %v2842_v17 = vrot.slane %v2841_v55, 1  ;;  %v2862_v24 = vmax.f32 %v2860_v37, %v2861_v14 }
 0xa87   :  { %v2849_v6 = vrot.slane %v2848_v35, 1  ;;  %v2856_v26 = vrot.slane %v2855_v18, 1 }
 0xa88   :  { %v2843_v59 = vmax.f32 %v2841_v55, %v2842_v17  ;;  %v2863_v3 = vrot.slane %v2862_v24, 1 }
 0xa89   :  { %v2850_v13 = vmax.f32 %v2848_v35, %v2849_v6  ;;  %v2857_v53 = vmax.f32 %v2855_v18, %v2856_v26 }
 0xa8a   :  { %v2865_v41 = vsub.f32 %v2833_v54, %v2843_v59  ;;  %v2864_v46 = vmax.f32 %v2862_v24, %v2863_v3 }
 0xa8b   :  { %v2866_v10 = vsub.f32 %v2834_v38, %v2850_v13  ;;  %v2867_v19 = vsub.f32 %v2835_v49, %v2857_v53 }
 0xa8c   :  { %v2869_v5 = vmul.f32 1.442695, %v2865_v41  ;;  %v2868_v62 = vsub.f32 %v2836_v11, %v2864_v46 }
 0xa8d   :  { %v2871_v39 = vmul.f32 1.442695, %v2866_v10  ;;  %v2873_v61 = vmul.f32 1.442695, %v2867_v19 }
 0xa8e   :  { %6972 = vpow2.f32 %v2869_v5  ;;  %v2875_v47 = vmul.f32 1.442695, %v2868_v62 }
 0xa8f   :  { %6974 = vpow2.f32 %v2871_v39 }
 0xa90   :  { %6976 = vpow2.f32 %v2873_v61 }
 0xa91   :  { %6978 = vpow2.f32 %v2875_v47 }
 0xa98   :  { %v6973_v57 = vpop.eup %6972 }
 0xa99   :  { %v6975_v52 = vpop.eup %6974  ;;  %v2877_v9 = vsel %vm518_vm10, %v6973_v57, 0.0 }
 0xa9a   :  { %v6977_v50 = vpop.eup %6976  ;;  %v2878_v29 = vrot.slane %v2877_v9, 4  ;;  %v2884_v54 = vsel %vm518_vm10, %v6975_v52, 0.0 }
 0xa9b   :  { %v6979_v15 = vpop.eup %6978  ;;  %v2885_v38 = vrot.slane %v2884_v54, 4  ;;  %v2891_v49 = vsel %vm518_vm10, %v6977_v50, 0.0 }
 0xa9c   :  { %v2879_v11 = vadd.f32 %v2878_v29, %v2877_v9  ;;  %v2892_v43 = vrot.slane %v2891_v49, 4  ;;  %v2898_v56 = vsel %vm518_vm10, %v6979_v15, 0.0 }
 0xa9d   :  { %v2886_v37 = vadd.f32 %v2885_v38, %v2884_v54  ;;  %v2899_v28 = vrot.slane %v2898_v56, 4 }
 0xa9e   :  { %v2880_v2 = vrot.slane %v2879_v11, 2  ;;  %v2893_v55 = vadd.f32 %v2892_v43, %v2891_v49 }
 0xa9f   :  { %v2887_v14 = vrot.slane %v2886_v37, 2  ;;  %v2900_v35 = vadd.f32 %v2899_v28, %v2898_v56 }
 0xaa0   :  { %v2881_v18 = vadd.f32 %v2880_v2, %v2879_v11  ;;  %v2894_v17 = vrot.slane %v2893_v55, 2 }
 0xaa1   :  { %v2888_v24 = vadd.f32 %v2887_v14, %v2886_v37  ;;  %v2901_v6 = vrot.slane %v2900_v35, 2 }
 0xaa2   :  { %v2882_v26 = vrot.slane %v2881_v18, 1  ;;  %v2895_v59 = vadd.f32 %v2894_v17, %v2893_v55 }
 0xaa3   :  { %v2889_v3 = vrot.slane %v2888_v24, 1  ;;  %v2902_v13 = vadd.f32 %v2901_v6, %v2900_v35 }
 0xaa4   :  { %v2883_v53 = vadd.f32 %v2882_v26, %v2881_v18  ;;  %v2896_v41 = vrot.slane %v2895_v59, 1 }
 0xaa5   :  { %v2890_v46 = vadd.f32 %v2889_v3, %v2888_v24  ;;  %v2903_v10 = vrot.slane %v2902_v13, 1 }
 0xaa6   :  { %6980 = vrcp.f32 %v2883_v53  ;;  %v2897_v19 = vadd.f32 %v2896_v41, %v2895_v59 }
 0xaa7   :  { %6982 = vrcp.f32 %v2890_v46  ;;  %v2904_v5 = vadd.f32 %v2903_v10, %v2902_v13 }
 0xaa8   :  { %6984 = vrcp.f32 %v2897_v19 }
 0xaa9   :  { %6986 = vrcp.f32 %v2904_v5 }
 0xab0   :  { %v6981_v62 = vpop.eup %6980 }
 0xab1   :  { %v6983_v39 = vpop.eup %6982  ;;  %v2909_v61 = vmul.f32 %v6981_v62, %v6973_v57 }
 0xab2   :  { %v6985_v47 = vpop.eup %6984  ;;  %v2910_v9 = vmul.f32 %v6983_v39, %v6975_v52 }
 0xab3   :  { %v6987_v29 = vpop.eup %6986  ;;  %2929 = vrot.lane.b32.xlu0 %v2909_v61, %s7239_s19  ;;  %v2911_v54 = vmul.f32 %v6985_v47, %v6977_v50 }
 0xab4   :  { %2931 = vrot.lane.b32.xlu1 %v2910_v9, %s7239_s19  ;;  %v2912_v38 = vmul.f32 %v6987_v29, %v6979_v15 }
 0xab7   :  { %2933 = vrot.lane.b32.xlu0 %v2911_v54, %s7239_s19 }
 0xab8   :  { %2935 = vrot.lane.b32.xlu1 %v2912_v38, %s7239_s19 }
 0xabb   :  { %2973 = vrot.lane.b32.xlu0 %v2909_v61, %s7242_s21 }
 0xabc   :  { %2975 = vrot.lane.b32.xlu1 %v2910_v9, %s7242_s21 }
 0xabf   :  { %2977 = vrot.lane.b32.xlu0 %v2911_v54, %s7242_s21 }
 0xac0   :  { %2979 = vrot.lane.b32.xlu1 %v2912_v38, %s7242_s21 }
 0xac3   :  { %2913 = vrot.lane.b32.xlu0 %v2909_v61, %s7240_s20 }
 0xac4   :  { %2915 = vrot.lane.b32.xlu1 %v2910_v9, %s7240_s20 }
 0xac7   :  { %2917 = vrot.lane.b32.xlu0 %v2911_v54, %s7240_s20 }
 0xac8   :  { %2919 = vrot.lane.b32.xlu1 %v2912_v38, %s7240_s20 }
 0xacb   :  { %2957 = vrot.lane.b32.xlu0 %v2909_v61, %s7243_s22 }
 0xacc   :  { %2959 = vrot.lane.b32.xlu1 %v2910_v9, %s7243_s22 }
 0xacf   :  { %2961 = vrot.lane.b32.xlu0 %v2911_v54, %s7243_s22 }
 0xad0   :  { %2963 = vrot.lane.b32.xlu1 %v2912_v38, %s7243_s22 }
 0xad3   :  { %3017 = vrot.lane.b32.xlu0 %v2909_v61, %s7244_s1 }
 0xad4   :  { %3019 = vrot.lane.b32.xlu1 %v2910_v9, %s7244_s1 }
 0xad7   :  { %3021 = vrot.lane.b32.xlu0 %v2911_v54, %s7244_s1 }
 0xad8   :  { %3023 = vrot.lane.b32.xlu1 %v2912_v38, %s7244_s1 }
 0xadb   :  { %3061 = vrot.lane.b32.xlu0 %v2909_v61, %s7245_s23 }
 0xadc   :  { %3063 = vrot.lane.b32.xlu1 %v2910_v9, %s7245_s23 }
 0xadf   :  { %3065 = vrot.lane.b32.xlu0 %v2911_v54, %s7245_s23 }
 0xae0   :  { %3067 = vrot.lane.b32.xlu1 %v2912_v38, %s7245_s23 }
 0xae3   :  { %3001 = vrot.lane.b32.xlu0 %v2909_v61, %s7246_s24 }
 0xae4   :  { %3003 = vrot.lane.b32.xlu1 %v2910_v9, %s7246_s24 }
 0xae7   :  { %3005 = vrot.lane.b32.xlu0 %v2911_v54, %s7246_s24 }
 0xae8   :  { %3007 = vrot.lane.b32.xlu1 %v2912_v38, %s7246_s24 }
 0xaeb   :  { %3045 = vrot.lane.b32.xlu0 %v2909_v61, %s7247_s25 }
 0xaec   :  { %3047 = vrot.lane.b32.xlu1 %v2910_v9, %s7247_s25 }
 0xaef   :  { %3049 = vrot.lane.b32.xlu0 %v2911_v54, %s7247_s25 }
 0xaf0   :  { %3051 = vrot.lane.b32.xlu1 %v2912_v38, %s7247_s25 }
 0xb25   :  { %v2930_v57 = vpop.permute.xlu0 %2929 }
 0xb26   :  { %v2932_v52 = vpop.permute.xlu1 %2931 }
 0xb27   :  { %v2939_v50 = vsel %vm151_vm3, %v2930_v57, %v2932_v52 }
 0xb28   :  { %v2946_v15 = vrot.slane %v2939_v50, 4 }
 0xb29   :  { %v2934_v49 = vpop.permute.xlu0 %2933 }
 0xb2a   :  { %2954 = vst [vmem:[#allocation2 + $0x8] sm:$0xf0] %v2946_v15  ;;  %v2938_v11 = vsel %vm151_vm3, %v2932_v52, %v2934_v49  ;;  %v2936_v43 = vpop.permute.xlu1 %2935 }
 0xb2b   :  { %v2947_v56 = vrot.slane %v2938_v11, 4  ;;  %v2937_v37 = vsel %vm151_vm3, %v2934_v49, %v2936_v43  ;;  %v2940_v28 = vsel %vm151_vm3, %v2936_v43, %v2930_v57 }
 0xb2c   :  { %v2945_v2 = vrot.slane %v2940_v28, 4  ;;  %v2948_v55 = vrot.slane %v2937_v37, 4 }
 0xb2d   :  { %2955 = vst [vmem:[#allocation2 + $0x10] sm:$0xf0] %v2947_v56  ;;  %v2974_v14 = vpop.permute.xlu0 %2973 }
 0xb2e   :  { %2953 = vst [vmem:[#allocation2] sm:$0xf0] %v2945_v2  ;;  %2956 = vst [vmem:[#allocation2 + $0x18] sm:$0xf0] %v2948_v55  ;;  %v2976_v35 = vpop.permute.xlu1 %2975 }
 0xb2f   :  { %v2983_v18 = vsel %vm253_vm5, %v2974_v14, %v2976_v35 }
 0xb30   :  { %v2990_v17 = vrot.slane %v2983_v18, 4 }
 0xb31   :  { %v2978_v24 = vpop.permute.xlu0 %2977 }
 0xb32   :  { %2998 = vst [vmem:[#allocation2 + $0x28] sm:$0xf0] %v2990_v17  ;;  %v2982_v6 = vsel %vm253_vm5, %v2976_v35, %v2978_v24  ;;  %v2980_v26 = vpop.permute.xlu1 %2979 }
 0xb33   :  { %v2991_v59 = vrot.slane %v2982_v6, 4  ;;  %v2981_v3 = vsel %vm253_vm5, %v2978_v24, %v2980_v26  ;;  %v2984_v13 = vsel %vm253_vm5, %v2980_v26, %v2974_v14 }
 0xb34   :  { %v2989_v53 = vrot.slane %v2984_v13, 4  ;;  %v2992_v41 = vrot.slane %v2981_v3, 4 }
 0xb35   :  { %2999 = vst [vmem:[#allocation2 + $0x30] sm:$0xf0] %v2991_v59  ;;  %v2914_v46 = vpop.permute.xlu0 %2913 }
 0xb36   :  { %2997 = vst [vmem:[#allocation2 + $0x20] sm:$0xf0] %v2989_v53  ;;  %3000 = vst [vmem:[#allocation2 + $0x38] sm:$0xf0] %v2992_v41  ;;  %v2916_v10 = vpop.permute.xlu1 %2915 }
 0xb37   :  { %v2923_v19 = vsel %vm105_vm2, %v2914_v46, %v2916_v10 }
 0xb38   :  { %2926 = vst [vmem:[#allocation2 + $0x8] sm:$0xf] %v2923_v19 }
 0xb39   :  { %v2918_v5 = vpop.permute.xlu0 %2917 }
 0xb3a   :  { %v2922_v62 = vsel %vm105_vm2, %v2916_v10, %v2918_v5  ;;  %v2920_v39 = vpop.permute.xlu1 %2919 }
 0xb3b   :  { %2927 = vst [vmem:[#allocation2 + $0x10] sm:$0xf] %v2922_v62  ;;  %v2921_v61 = vsel %vm105_vm2, %v2918_v5, %v2920_v39  ;;  %v2924_v47 = vsel %vm105_vm2, %v2920_v39, %v2914_v46 }
 0xb3c   :  { %2925 = vst [vmem:[#allocation2] sm:$0xf] %v2924_v47  ;;  %2928 = vst [vmem:[#allocation2 + $0x18] sm:$0xf] %v2921_v61 }
 0xb3d   :  { %v2958_v9 = vpop.permute.xlu0 %2957 }
 0xb3e   :  { %v2960_v29 = vpop.permute.xlu1 %2959 }
 0xb3f   :  { %v2967_v54 = vsel %vm208_vm4, %v2958_v9, %v2960_v29  ;;  %v3090_v11 = vld [vmem:[#allocation2 + $0x8] sm:$0xff] }
 0xb40   :  { %2970 = vst [vmem:[#allocation2 + $0x28] sm:$0xf] %v2967_v54  ;;  %v3106_v14 = vmul.f32 %v8281_v27, %v3090_v11 }
 0xb41   :  { %v2962_v38 = vpop.permute.xlu0 %2961 }
 0xb42   :  { %v2966_v57 = vsel %vm208_vm4, %v2960_v29, %v2962_v38  ;;  %v2964_v52 = vpop.permute.xlu1 %2963  ;;  %v3091_v3 = vld [vmem:[#allocation2 + $0x10] sm:$0xff] }
 0xb43   :  { %2971 = vst [vmem:[#allocation2 + $0x30] sm:$0xf] %v2966_v57  ;;  %v2965_v50 = vsel %vm208_vm4, %v2962_v38, %v2964_v52  ;;  %v2968_v15 = vsel %vm208_vm4, %v2964_v52, %v2958_v9  ;;  %v3089_v28 = vld [vmem:[#allocation2] sm:$0xff]  ;;  %v3092_v2 = vld [vmem:[#allocation2 + $0x18] sm:$0xff]  ;;  %v3107_v39 = vmul.f32 %v8308_v36, %v3091_v3 }
 0xb44   :  { %2969 = vst [vmem:[#allocation2 + $0x20] sm:$0xf] %v2968_v15  ;;  %2972 = vst [vmem:[#allocation2 + $0x38] sm:$0xf] %v2965_v50  ;;  %v3105_v26 = vmul.f32 %v8289_v58, %v3089_v28  ;;  %v3108_v59 = vmul.f32 %v8292_v23, %v3092_v2 }
 0xb45   :  { %v3018_v49 = vpop.permute.xlu0 %3017 }
 0xb46   :  { %v3020_v43 = vpop.permute.xlu1 %3019 }
 0xb47   :  { %v3027_v56 = vsel %vm367_vm7, %v3018_v49, %v3020_v43  ;;  %v3094_v37 = vld [vmem:[#allocation2 + $0x28] sm:$0xff] }
 0xb48   :  { %v3033_v55 = vrot.slane %v3027_v56, 4  ;;  %v3110_v35 = vmul.f32 %v8284_v34, %v3094_v37 }
 0xb49   :  { %v3022_v18 = vpop.permute.xlu0 %3021 }
 0xb4a   :  { %3041 = vst [vmem:[#allocation2 + $0x40] sm:$0xf0] %v3033_v55  ;;  %v3026_v17 = vsel %vm367_vm7, %v3020_v43, %v3022_v18  ;;  %v3024_v24 = vpop.permute.xlu1 %3023  ;;  %v6730_v6 = vpack.c.bf16 %v3110_v35, %v3106_v14  ;;  %v3095_v13 = vld [vmem:[#allocation2 + $0x30] sm:$0xff] }
 0xb4b   :  { %v3034_v53 = vrot.slane %v3026_v17, 4  ;;  %v3025_v41 = vsel %vm367_vm7, %v3022_v18, %v3024_v24  ;;  %v3028_v27 = vsel %vm367_vm7, %v3024_v24, %v3018_v49  ;;  %v3093_v34 = vld [vmem:[#allocation2 + $0x20] sm:$0xff]  ;;  %v3096_v46 = vld [vmem:[#allocation2 + $0x38] sm:$0xff]  ;;  %v3111_v10 = vmul.f32 %v8299_v20, %v3095_v13 }
 0xb4c   :  { %v3035_v19 = vrot.slane %v3025_v41, 4  ;;  %v3036_v5 = vrot.slane %v3028_v27, 4  ;;  %6731 = vmatprep.subr.bf16.mxu0 %v6730_v6  ;;  %v3109_v58 = vmul.f32 %v8302_v63, %v3093_v34  ;;  %v3112_v23 = vmul.f32 %v8305_v40, %v3096_v46 }
 0xb4d   :  { %3042 = vst [vmem:[#allocation2 + $0x48] sm:$0xf0] %v3034_v53  ;;  %v3062_v62 = vpop.permute.xlu0 %3061  ;;  %v6740_v20 = vpack.c.bf16 %v3111_v10, %v3107_v39 }
 0xb4e   :  { %3043 = vst [vmem:[#allocation2 + $0x50] sm:$0xf0] %v3035_v19  ;;  %3044 = vst [vmem:[#allocation2 + $0x58] sm:$0xf0] %v3036_v5  ;;  %v3064_v61 = vpop.permute.xlu1 %3063  ;;  %v6732_v47 = vpack.c.bf16 %v3109_v58, %v3105_v26  ;;  %v6738_v9 = vpack.c.bf16 %v3112_v23, %v3108_v59 }
 0xb4f   :  { %v3071_v29 = vsel %vm469_vm9, %v3062_v62, %v3064_v61 }
 0xb50   :  { %v3077_v54 = vrot.slane %v3071_v29, 4  ;;  %6733 = vmatpush1.bf16.msra.mxu0 %v6732_v47  ;;  %6739 = vmatprep.subr.bf16.mxu1 %v6738_v9 }
 0xb51   :  { %v3066_v38 = vpop.permute.xlu0 %3065  ;;  %6741 = vmatpush1.bf16.msra.mxu1 %v6740_v20 }
 0xb52   :  { %3085 = vst [vmem:[#allocation2 + $0x60] sm:$0xf0] %v3077_v54  ;;  %v3070_v63 = vsel %vm469_vm9, %v3064_v61, %v3066_v38  ;;  %v3068_v40 = vpop.permute.xlu1 %3067 }
 0xb53   :  { %v3078_v36 = vrot.slane %v3070_v63, 4  ;;  %v3069_v57 = vsel %vm469_vm9, %v3066_v38, %v3068_v40  ;;  %v3072_v52 = vsel %vm469_vm9, %v3068_v40, %v3062_v62 }
 0xb54   :  { %v3079_v50 = vrot.slane %v3069_v57, 4  ;;  %v3080_v15 = vrot.slane %v3072_v52, 4 }
 0xb55   :  { %3086 = vst [vmem:[#allocation2 + $0x68] sm:$0xf0] %v3078_v36  ;;  %v3002_v49 = vpop.permute.xlu0 %3001 }
 0xb56   :  { %3087 = vst [vmem:[#allocation2 + $0x70] sm:$0xf0] %v3079_v50  ;;  %3088 = vst [vmem:[#allocation2 + $0x78] sm:$0xf0] %v3080_v15  ;;  %v3004_v11 = vpop.permute.xlu1 %3003 }
 0xb57   :  { %v3011_v43 = vsel %vm322_vm6, %v3002_v49, %v3004_v11 }
 0xb58   :  { %3013 = vst [vmem:[#allocation2 + $0x40] sm:$0xf] %v3011_v43 }
 0xb59   :  { %v3006_v56 = vpop.permute.xlu0 %3005 }
 0xb5a   :  { %v3010_v37 = vsel %vm322_vm6, %v3004_v11, %v3006_v56  ;;  %v3008_v28 = vpop.permute.xlu1 %3007 }
 0xb5b   :  { %3014 = vst [vmem:[#allocation2 + $0x48] sm:$0xf] %v3010_v37  ;;  %v3009_v2 = vsel %vm322_vm6, %v3006_v56, %v3008_v28  ;;  %v3012_v55 = vsel %vm322_vm6, %v3008_v28, %v3002_v49 }
 0xb5c   :  { %3015 = vst [vmem:[#allocation2 + $0x50] sm:$0xf] %v3009_v2  ;;  %3016 = vst [vmem:[#allocation2 + $0x58] sm:$0xf] %v3012_v55 }
 0xb5d   :  { %v3046_v14 = vpop.permute.xlu0 %3045 }
 0xb5e   :  { %v3048_v35 = vpop.permute.xlu1 %3047 }
 0xb5f   :  { %v3055_v18 = vsel %vm424_vm8, %v3046_v14, %v3048_v35  ;;  %v3097_v53 = vld [vmem:[#allocation2 + $0x40] sm:$0xff] }
 0xb60   :  { %3057 = vst [vmem:[#allocation2 + $0x60] sm:$0xf] %v3055_v18  ;;  %v3113_v5 = vmul.f32 %v8344_v0, %v3097_v53 }
 0xb61   :  { %v3050_v17 = vpop.permute.xlu0 %3049 }
 0xb62   :  { %v3054_v24 = vsel %vm424_vm8, %v3048_v35, %v3050_v17  ;;  %v3052_v6 = vpop.permute.xlu1 %3051  ;;  %v3098_v13 = vld [vmem:[#allocation2 + $0x48] sm:$0xff] }
 0xb63   :  { %3058 = vst [vmem:[#allocation2 + $0x68] sm:$0xf] %v3054_v24  ;;  %v3053_v26 = vsel %vm424_vm8, %v3050_v17, %v3052_v6  ;;  %v3056_v59 = vsel %vm424_vm8, %v3052_v6, %v3046_v14  ;;  %v3100_v41 = vld [vmem:[#allocation2 + $0x58] sm:$0xff]  ;;  %v3099_v27 = vld [vmem:[#allocation2 + $0x50] sm:$0xff]  ;;  %v3114_v10 = vmul.f32 %v8338_v21, %v3098_v13 }
 0xb64   :  { %3059 = vst [vmem:[#allocation2 + $0x70] sm:$0xf] %v3053_v26  ;;  %3060 = vst [vmem:[#allocation2 + $0x78] sm:$0xf] %v3056_v59  ;;  %v3116_v62 = vmul.f32 %v8347_v45, %v3100_v41  ;;  %v3115_v61 = vmul.f32 %v8353_v4, %v3099_v27 }
 0xb67   :  { %v3101_v3 = vld [vmem:[#allocation2 + $0x60] sm:$0xff] }
 0xb68   :  { %v3117_v46 = vmul.f32 %v8335_v12, %v3101_v3 }
 0xb6a   :  { %v3102_v34 = vld [vmem:[#allocation2 + $0x68] sm:$0xff]  ;;  %v6736_v29 = vpack.c.bf16 %v3117_v46, %v3113_v5 }
 0xb6b   :  { %v3118_v19 = vmul.f32 %v8341_v42, %v3102_v34  ;;  %v3104_v58 = vld [vmem:[#allocation2 + $0x78] sm:$0xff]  ;;  %v3103_v23 = vld [vmem:[#allocation2 + $0x70] sm:$0xff] }
 0xb6c   :  { %v3120_v39 = vmul.f32 %v8350_v8, %v3104_v58  ;;  %v3119_v47 = vmul.f32 %v8356_v1, %v3103_v23 }
 0xb6d   :  { %v6734_v9 = vpack.c.bf16 %v3118_v19, %v3114_v10 }
 0xb6e   :  { %v6742_v20 = vpack.c.bf16 %v3120_v39, %v3116_v62  ;;  %v6744_v12 = vpack.c.bf16 %v3119_v47, %v3115_v61 }
 0xb6f   :  { %6735 = vmatprep.subr.bf16.mxu0 %v6734_v9 }
 0xb70   :  { %6737 = vmatpush1.bf16.msra.mxu0 %v6736_v29  ;;  %6743 = vmatprep.subr.bf16.mxu1 %v6742_v20 }
 0xb71   :  { %6745 = vmatpush1.bf16.msra.mxu1 %v6744_v12 }
 0xb73   :  { %6598 = vmatmul.mubr.msk.f32.vlgmr.msra.gmra.mrb[24].mxu0 %vm710_vm0, %v8362_v33 }
 0xb74   :  { %6600 = vmatmul.mubr.msk.f32.vlgmr.msra.gmra.mrb[24].mxu1 %vm710_vm0, %v8362_v33  ;;  %3191 = vmatprep.mubr.f32.mxu0 %v9458_v44 }
 0xb75   :  { %3268 = vmatprep.mubr.f32.mxu1 %v9458_v44 }
 0xb77   :  { %6599 = vmatmul.mubr.msk.f32.gmra.mrb[26].mxu0 %vm710_vm0, %v8373_v7 }
 0xb78   :  { %6601 = vmatmul.mubr.msk.f32.gmra.mrb[26].mxu1 %vm710_vm0, %v8373_v7  ;;  %3355 = vmatprep.mubr.f32.mxu0 %v9458_v44 }
 0xb79   :  { %3426 = vmatprep.mubr.f32.mxu1 %v9458_v44 }
 0xc46   :  { %v3187_v21 = vpop.f32.mrb[24].mxu0 }
 0xc47   :  { %v3188_v42 = vadd.f32 %v3187_v21, %v9459_v32  ;;  %v3189_v0 = vpop.f32.mrb[25].mxu0  ;;  %v3264_v45 = vpop.f32.mrb[24].mxu1 }
 0xc48   :  { %v3190_v8 = vadd.f32 %v3189_v0, %v9459_v32  ;;  %v3265_v4 = vadd.f32 %v3264_v45, %v9459_v32  ;;  %v3266_v1 = vpop.f32.mrb[25].mxu1 }
 0xc49   :  { %v3267_v33 = vadd.f32 %v3266_v1, %v9459_v32  ;;  %v3275_v38 = vmul.f32 0.2, %v3188_v42 }
 0xc4a   :  { %v3193_v54 = vpop.f32.mrb[26].mxu0  ;;  %v3276_v36 = vmul.f32 0.2, %v3190_v8  ;;  %v3277_v57 = vmul.f32 0.2, %v3265_v4 }
 0xc4b   :  { %v3194_v7 = vadd.f32 %v3193_v54, %v9460_v48  ;;  %v3195_v63 = vpop.f32.mrb[27].mxu0  ;;  %v3270_v40 = vpop.f32.mrb[26].mxu1  ;;  %v3278_v49 = vmul.f32 0.2, %v3267_v33  ;;  %v3283_v28 = vmax.f32 %v3188_v42, %v3275_v38 }
 0xc4c   :  { %v3196_v52 = vadd.f32 %v3195_v63, %v9460_v48  ;;  %v3271_v50 = vadd.f32 %v3270_v40, %v9460_v48  ;;  %v3272_v15 = vpop.f32.mrb[27].mxu1  ;;  %v3284_v14 = vmax.f32 %v3190_v8, %v3276_v36  ;;  %v3285_v35 = vmax.f32 %v3265_v4, %v3277_v57 }
 0xc4d   :  { %v3279_v11 = vmul.f32 0.2, %v3194_v7  ;;  %v3273_v43 = vadd.f32 %v3272_v15, %v9460_v48  ;;  %v3286_v24 = vmax.f32 %v3267_v33, %v3278_v49 }
 0xc4e   :  { %v3280_v56 = vmul.f32 0.2, %v3196_v52  ;;  %v3281_v37 = vmul.f32 0.2, %v3271_v50 }
 0xc4f   :  { %v3287_v2 = vmax.f32 %v3194_v7, %v3279_v11  ;;  %v3282_v55 = vmul.f32 0.2, %v3273_v43 }
 0xc50   :  { %v3288_v18 = vmax.f32 %v3196_v52, %v3280_v56  ;;  %v3289_v17 = vmax.f32 %v3271_v50, %v3281_v37 }
 0xc51   :  { %v6748_v6 = vpack.c.bf16 %v3287_v2, %v3283_v28  ;;  %v3290_v26 = vmax.f32 %v3273_v43, %v3282_v55 }
 0xc52   :  { %v6752_v59 = vpack.c.bf16 %v3289_v17, %v3285_v35  ;;  %v6746_v3 = vpack.c.bf16 %v3288_v18, %v3284_v14 }
 0xc53   :  { %v6750_v13 = vpack.c.bf16 %v3290_v26, %v3286_v24 }
 0xc54   :  { %6747 = vmatprep.subr.bf16.mxu0 %v6746_v3 }
 0xc55   :  { %6749 = vmatpush1.bf16.msra.mxu0 %v6748_v6  ;;  %6751 = vmatprep.subr.bf16.mxu1 %v6750_v13 }
 0xc56   :  { %6753 = vmatpush1.bf16.msra.mxu1 %v6752_v59 }
 0xc58   :  { %6602 = vmatmul.mubr.msk.f32.vlgmr.msra.gmra.mrb[28].mxu0 %vm887_vm1, %v8392_v30 }
 0xc59   :  { %6603 = vmatmul.mubr.msk.f32.vlgmr.msra.gmra.mrb[28].mxu1 %vm887_vm1, %v8392_v30  ;;  %3785 = vmatprep.mubr.f32.mxu0 %v9458_v44 }
 0xc5a   :  { %3862 = vmatprep.mubr.f32.mxu1 %v9458_v44 }
 0xd2b   :  { %v3357_v53 = vpop.f32.mrb[28].mxu0 }
 0xd2c   :  { %v3358_v41 = vadd.f32 %v3357_v53, %v7830_v22  ;;  %v3359_v27 = vpop.f32.mrb[29].mxu0  ;;  %v3428_v34 = vpop.f32.mrb[28].mxu1 }
 0xd2d   :  { %v3360_v46 = vadd.f32 %v3359_v27, %v7830_v22  ;;  %v3429_v10 = vadd.f32 %v3428_v34, %v7830_v22  ;;  %v3430_v19 = vpop.f32.mrb[29].mxu1 }
 0xd2e   :  { %v3433_v5 = vadd.f32 %v3358_v41, %v7833_v60  ;;  %v3431_v58 = vadd.f32 %v3430_v19, %v7830_v22 }
 0xd2f   :  { %v3434_v30 = vadd.f32 %v3360_v46, %v7837_v51  ;;  %v3435_v23 = vadd.f32 %v3429_v10, %v7840_v16 }
 0xd30   :  { %v3437_v62 = vsel %vm518_vm10, %v3433_v5, -inf  ;;  %v3436_v39 = vadd.f32 %v3431_v58, %v7845_v25 }
 0xd31   :  { %v3438_v61 = vrot.slane %v3437_v62, 4  ;;  %v3444_v47 = vsel %vm518_vm10, %v3434_v30, -inf  ;;  %v3451_v9 = vsel %vm518_vm10, %v3435_v23, -inf }
 0xd32   :  { %v3445_v29 = vrot.slane %v3444_v47, 4  ;;  %v3452_v20 = vrot.slane %v3451_v9, 4  ;;  %v3458_v12 = vsel %vm518_vm10, %v3436_v39, -inf }
 0xd33   :  { %v3439_v21 = vmax.f32 %v3437_v62, %v3438_v61  ;;  %v3459_v42 = vrot.slane %v3458_v12, 4 }
 0xd34   :  { %v3446_v0 = vmax.f32 %v3444_v47, %v3445_v29  ;;  %v3453_v45 = vmax.f32 %v3451_v9, %v3452_v20 }
 0xd35   :  { %v3440_v8 = vrot.slane %v3439_v21, 2  ;;  %v3460_v4 = vmax.f32 %v3458_v12, %v3459_v42 }
 0xd36   :  { %v3447_v1 = vrot.slane %v3446_v0, 2  ;;  %v3454_v33 = vrot.slane %v3453_v45, 2 }
 0xd37   :  { %v3441_v54 = vmax.f32 %v3439_v21, %v3440_v8  ;;  %v3461_v38 = vrot.slane %v3460_v4, 2 }
 0xd38   :  { %v3448_v7 = vmax.f32 %v3446_v0, %v3447_v1  ;;  %v3455_v63 = vmax.f32 %v3453_v45, %v3454_v33 }
 0xd39   :  { %v3442_v40 = vrot.slane %v3441_v54, 1  ;;  %v3462_v36 = vmax.f32 %v3460_v4, %v3461_v38 }
 0xd3a   :  { %v3449_v57 = vrot.slane %v3448_v7, 1  ;;  %v3456_v52 = vrot.slane %v3455_v63, 1 }
 0xd3b   :  { %v3443_v50 = vmax.f32 %v3441_v54, %v3442_v40  ;;  %v3463_v15 = vrot.slane %v3462_v36, 1 }
 0xd3c   :  { %v3450_v49 = vmax.f32 %v3448_v7, %v3449_v57  ;;  %v3457_v11 = vmax.f32 %v3455_v63, %v3456_v52 }
 0xd3d   :  { %v3465_v43 = vsub.f32 %v3433_v5, %v3443_v50  ;;  %v3464_v56 = vmax.f32 %v3462_v36, %v3463_v15 }
 0xd3e   :  { %v3466_v37 = vsub.f32 %v3434_v30, %v3450_v49  ;;  %v3467_v28 = vsub.f32 %v3435_v23, %v3457_v11 }
 0xd3f   :  { %v3469_v2 = vmul.f32 1.442695, %v3465_v43  ;;  %v3468_v55 = vsub.f32 %v3436_v39, %v3464_v56 }
 0xd40   :  { %v3471_v14 = vmul.f32 1.442695, %v3466_v37  ;;  %v3473_v35 = vmul.f32 1.442695, %v3467_v28 }
 0xd41   :  { %6988 = vpow2.f32 %v3469_v2  ;;  %v3475_v18 = vmul.f32 1.442695, %v3468_v55 }
 0xd42   :  { %6990 = vpow2.f32 %v3471_v14 }
 0xd43   :  { %6992 = vpow2.f32 %v3473_v35 }
 0xd44   :  { %6994 = vpow2.f32 %v3475_v18 }
 0xd4b   :  { %v6989_v17 = vpop.eup %6988 }
 0xd4c   :  { %v6991_v24 = vpop.eup %6990  ;;  %v3477_v6 = vsel %vm518_vm10, %v6989_v17, 0.0 }
 0xd4d   :  { %v6993_v26 = vpop.eup %6992  ;;  %v3478_v59 = vrot.slane %v3477_v6, 4  ;;  %v3484_v3 = vsel %vm518_vm10, %v6991_v24, 0.0 }
 0xd4e   :  { %v6995_v13 = vpop.eup %6994  ;;  %v3485_v53 = vrot.slane %v3484_v3, 4  ;;  %v3491_v41 = vsel %vm518_vm10, %v6993_v26, 0.0 }
 0xd4f   :  { %v3479_v27 = vadd.f32 %v3478_v59, %v3477_v6  ;;  %v3492_v34 = vrot.slane %v3491_v41, 4  ;;  %v3498_v46 = vsel %vm518_vm10, %v6995_v13, 0.0 }
 0xd50   :  { %v3486_v10 = vadd.f32 %v3485_v53, %v3484_v3  ;;  %v3499_v19 = vrot.slane %v3498_v46, 4 }
 0xd51   :  { %v3480_v5 = vrot.slane %v3479_v27, 2  ;;  %v3493_v58 = vadd.f32 %v3492_v34, %v3491_v41 }
 0xd52   :  { %v3487_v30 = vrot.slane %v3486_v10, 2  ;;  %v3500_v23 = vadd.f32 %v3499_v19, %v3498_v46 }
 0xd53   :  { %v3481_v62 = vadd.f32 %v3480_v5, %v3479_v27  ;;  %v3494_v39 = vrot.slane %v3493_v58, 2 }
 0xd54   :  { %v3488_v61 = vadd.f32 %v3487_v30, %v3486_v10  ;;  %v3501_v47 = vrot.slane %v3500_v23, 2 }
 0xd55   :  { %v3482_v9 = vrot.slane %v3481_v62, 1  ;;  %v3495_v29 = vadd.f32 %v3494_v39, %v3493_v58 }
 0xd56   :  { %v3489_v20 = vrot.slane %v3488_v61, 1  ;;  %v3502_v12 = vadd.f32 %v3501_v47, %v3500_v23 }
 0xd57   :  { %v3483_v21 = vadd.f32 %v3482_v9, %v3481_v62  ;;  %v3496_v42 = vrot.slane %v3495_v29, 1 }
 0xd58   :  { %v3490_v0 = vadd.f32 %v3489_v20, %v3488_v61  ;;  %v3503_v45 = vrot.slane %v3502_v12, 1 }
 0xd59   :  { %6996 = vrcp.f32 %v3483_v21  ;;  %v3497_v8 = vadd.f32 %v3496_v42, %v3495_v29 }
 0xd5a   :  { %6998 = vrcp.f32 %v3490_v0  ;;  %v3504_v4 = vadd.f32 %v3503_v45, %v3502_v12 }
 0xd5b   :  { %7000 = vrcp.f32 %v3497_v8 }
 0xd5c   :  { %7002 = vrcp.f32 %v3504_v4 }
 0xd63   :  { %v6997_v1 = vpop.eup %6996 }
 0xd64   :  { %v6999_v33 = vpop.eup %6998  ;;  %v3509_v54 = vmul.f32 %v6997_v1, %v6989_v17 }
 0xd65   :  { %v7001_v38 = vpop.eup %7000  ;;  %v3510_v7 = vmul.f32 %v6999_v33, %v6991_v24  ;;  %v8636_v33 = vld [vmem:[#allocation3 + $0x8] sm:$0xff] }
 0xd66   :  { %v7003_v63 = vpop.eup %7002  ;;  %3529 = vrot.lane.b32.xlu0 %v3509_v54, %s7239_s19  ;;  %v3511_v40 = vmul.f32 %v7001_v38, %v6993_v26  ;;  %v8639_v38 = vld [vmem:[#allocation3 + $0x28] sm:$0xff] }
 0xd67   :  { %3531 = vrot.lane.b32.xlu1 %v3510_v7, %s7239_s19  ;;  %v3512_v36 = vmul.f32 %v7003_v63, %v6995_v13 }
 0xd6a   :  { %3533 = vrot.lane.b32.xlu0 %v3511_v40, %s7239_s19 }
 0xd6b   :  { %3535 = vrot.lane.b32.xlu1 %v3512_v36, %s7239_s19 }
 0xd6e   :  { %3573 = vrot.lane.b32.xlu0 %v3509_v54, %s7242_s21 }
 0xd6f   :  { %3575 = vrot.lane.b32.xlu1 %v3510_v7, %s7242_s21 }
 0xd72   :  { %3577 = vrot.lane.b32.xlu0 %v3511_v40, %s7242_s21 }
 0xd73   :  { %3579 = vrot.lane.b32.xlu1 %v3512_v36, %s7242_s21 }
 0xd76   :  { %3513 = vrot.lane.b32.xlu0 %v3509_v54, %s7240_s20 }
 0xd77   :  { %3515 = vrot.lane.b32.xlu1 %v3510_v7, %s7240_s20 }
 0xd7a   :  { %3517 = vrot.lane.b32.xlu0 %v3511_v40, %s7240_s20 }
 0xd7b   :  { %3519 = vrot.lane.b32.xlu1 %v3512_v36, %s7240_s20 }
 0xd7e   :  { %3557 = vrot.lane.b32.xlu0 %v3509_v54, %s7243_s22 }
 0xd7f   :  { %3559 = vrot.lane.b32.xlu1 %v3510_v7, %s7243_s22 }
 0xd82   :  { %3561 = vrot.lane.b32.xlu0 %v3511_v40, %s7243_s22 }
 0xd83   :  { %3563 = vrot.lane.b32.xlu1 %v3512_v36, %s7243_s22 }
 0xd86   :  { %3617 = vrot.lane.b32.xlu0 %v3509_v54, %s7244_s1 }
 0xd87   :  { %3619 = vrot.lane.b32.xlu1 %v3510_v7, %s7244_s1 }
 0xd8a   :  { %3621 = vrot.lane.b32.xlu0 %v3511_v40, %s7244_s1 }
 0xd8b   :  { %3623 = vrot.lane.b32.xlu1 %v3512_v36, %s7244_s1 }
 0xd8e   :  { %3661 = vrot.lane.b32.xlu0 %v3509_v54, %s7245_s23 }
 0xd8f   :  { %3663 = vrot.lane.b32.xlu1 %v3510_v7, %s7245_s23 }
 0xd92   :  { %3665 = vrot.lane.b32.xlu0 %v3511_v40, %s7245_s23 }
 0xd93   :  { %3667 = vrot.lane.b32.xlu1 %v3512_v36, %s7245_s23 }
 0xd96   :  { %3601 = vrot.lane.b32.xlu0 %v3509_v54, %s7246_s24 }
 0xd97   :  { %3603 = vrot.lane.b32.xlu1 %v3510_v7, %s7246_s24 }
 0xd9a   :  { %3605 = vrot.lane.b32.xlu0 %v3511_v40, %s7246_s24 }
 0xd9b   :  { %3607 = vrot.lane.b32.xlu1 %v3512_v36, %s7246_s24 }
 0xd9e   :  { %3645 = vrot.lane.b32.xlu0 %v3509_v54, %s7247_s25 }
 0xd9f   :  { %3647 = vrot.lane.b32.xlu1 %v3510_v7, %s7247_s25 }
 0xda2   :  { %3649 = vrot.lane.b32.xlu0 %v3511_v40, %s7247_s25 }
 0xda3   :  { %3651 = vrot.lane.b32.xlu1 %v3512_v36, %s7247_s25 }
 0xdd8   :  { %v3530_v57 = vpop.permute.xlu0 %3529 }
 0xdd9   :  { %v3532_v52 = vpop.permute.xlu1 %3531 }
 0xdda   :  { %v3539_v50 = vsel %vm151_vm3, %v3530_v57, %v3532_v52 }
 0xddb   :  { %v3546_v15 = vrot.slane %v3539_v50, 4 }
 0xddc   :  { %v3534_v49 = vpop.permute.xlu0 %3533 }
 0xddd   :  { %3554 = vst [vmem:[#allocation2 + $0x8] sm:$0xf0] %v3546_v15  ;;  %v3538_v11 = vsel %vm151_vm3, %v3532_v52, %v3534_v49  ;;  %v3536_v43 = vpop.permute.xlu1 %3535  ;;  %v8644_v52 = vld [vmem:[#allocation3] sm:$0xff]  ;;  %v8647_v15 = vld [vmem:[#allocation3 + $0x18] sm:$0xff] }
 0xdde   :  { %v3547_v56 = vrot.slane %v3538_v11, 4  ;;  %v3537_v37 = vsel %vm151_vm3, %v3534_v49, %v3536_v43  ;;  %v3540_v28 = vsel %vm151_vm3, %v3536_v43, %v3530_v57 }
 0xddf   :  { %v3545_v2 = vrot.slane %v3540_v28, 4  ;;  %v3548_v55 = vrot.slane %v3537_v37, 4 }
 0xde0   :  { %3555 = vst [vmem:[#allocation2 + $0x10] sm:$0xf0] %v3547_v56  ;;  %v3574_v14 = vpop.permute.xlu0 %3573 }
 0xde1   :  { %3553 = vst [vmem:[#allocation2] sm:$0xf0] %v3545_v2  ;;  %3556 = vst [vmem:[#allocation2 + $0x18] sm:$0xf0] %v3548_v55  ;;  %v3576_v35 = vpop.permute.xlu1 %3575 }
 0xde2   :  { %v3583_v18 = vsel %vm253_vm5, %v3574_v14, %v3576_v35 }
 0xde3   :  { %v3590_v17 = vrot.slane %v3583_v18, 4 }
 0xde4   :  { %v3578_v24 = vpop.permute.xlu0 %3577 }
 0xde5   :  { %3598 = vst [vmem:[#allocation2 + $0x28] sm:$0xf0] %v3590_v17  ;;  %v3582_v6 = vsel %vm253_vm5, %v3576_v35, %v3578_v24  ;;  %v3580_v26 = vpop.permute.xlu1 %3579 }
 0xde6   :  { %v3591_v59 = vrot.slane %v3582_v6, 4  ;;  %v3581_v3 = vsel %vm253_vm5, %v3578_v24, %v3580_v26  ;;  %v3584_v13 = vsel %vm253_vm5, %v3580_v26, %v3574_v14  ;;  %v8654_v14 = vld [vmem:[#allocation3 + $0x30] sm:$0xff]  ;;  %v8657_v24 = vld [vmem:[#allocation3 + $0x20] sm:$0xff]  ;;  %v8660_v26 = vld [vmem:[#allocation3 + $0x38] sm:$0xff] }
 0xde7   :  { %v3589_v53 = vrot.slane %v3584_v13, 4  ;;  %v3592_v41 = vrot.slane %v3581_v3, 4  ;;  %v8663_v13 = vld [vmem:[#allocation3 + $0x10] sm:$0xff] }
 0xde8   :  { %3599 = vst [vmem:[#allocation2 + $0x30] sm:$0xf0] %v3591_v59  ;;  %v3514_v27 = vpop.permute.xlu0 %3513 }
 0xde9   :  { %3597 = vst [vmem:[#allocation2 + $0x20] sm:$0xf0] %v3589_v53  ;;  %3600 = vst [vmem:[#allocation2 + $0x38] sm:$0xf0] %v3592_v41  ;;  %v3516_v34 = vpop.permute.xlu1 %3515 }
 0xdea   :  { %v3523_v46 = vsel %vm105_vm2, %v3514_v27, %v3516_v34 }
 0xdeb   :  { %3526 = vst [vmem:[#allocation2 + $0x8] sm:$0xf] %v3523_v46 }
 0xdec   :  { %v3518_v10 = vpop.permute.xlu0 %3517 }
 0xded   :  { %v3522_v19 = vsel %vm105_vm2, %v3516_v34, %v3518_v10  ;;  %v3520_v5 = vpop.permute.xlu1 %3519 }
 0xdee   :  { %3527 = vst [vmem:[#allocation2 + $0x10] sm:$0xf] %v3522_v19  ;;  %v3521_v58 = vsel %vm105_vm2, %v3518_v10, %v3520_v5  ;;  %v3524_v30 = vsel %vm105_vm2, %v3520_v5, %v3514_v27 }
 0xdef   :  { %3525 = vst [vmem:[#allocation2] sm:$0xf] %v3524_v30  ;;  %3528 = vst [vmem:[#allocation2 + $0x18] sm:$0xf] %v3521_v58 }
 0xdf0   :  { %v3558_v23 = vpop.permute.xlu0 %3557 }
 0xdf1   :  { %v3560_v62 = vpop.permute.xlu1 %3559 }
 0xdf2   :  { %v3567_v39 = vsel %vm208_vm4, %v3558_v23, %v3560_v62  ;;  %v3690_v21 = vld [vmem:[#allocation2 + $0x8] sm:$0xff] }
 0xdf3   :  { %3570 = vst [vmem:[#allocation2 + $0x28] sm:$0xf] %v3567_v39  ;;  %v3706_v54 = vmul.f32 %v8636_v33, %v3690_v21 }
 0xdf4   :  { %v3562_v61 = vpop.permute.xlu0 %3561 }
 0xdf5   :  { %v3566_v47 = vsel %vm208_vm4, %v3560_v62, %v3562_v61  ;;  %v3564_v9 = vpop.permute.xlu1 %3563  ;;  %v3691_v11 = vld [vmem:[#allocation2 + $0x10] sm:$0xff] }
 0xdf6   :  { %3571 = vst [vmem:[#allocation2 + $0x30] sm:$0xf] %v3566_v47  ;;  %v3565_v29 = vsel %vm208_vm4, %v3562_v61, %v3564_v9  ;;  %v3568_v20 = vsel %vm208_vm4, %v3564_v9, %v3558_v23  ;;  %v3689_v8 = vld [vmem:[#allocation2] sm:$0xff]  ;;  %v3692_v4 = vld [vmem:[#allocation2 + $0x18] sm:$0xff]  ;;  %v3707_v53 = vmul.f32 %v8663_v13, %v3691_v11 }
 0xdf7   :  { %3569 = vst [vmem:[#allocation2 + $0x20] sm:$0xf] %v3568_v20  ;;  %3572 = vst [vmem:[#allocation2 + $0x38] sm:$0xf] %v3565_v29  ;;  %v3705_v50 = vmul.f32 %v8644_v52, %v3689_v8  ;;  %v3708_v49 = vmul.f32 %v8647_v15, %v3692_v4 }
 0xdf8   :  { %v3618_v12 = vpop.permute.xlu0 %3617 }
 0xdf9   :  { %v3620_v42 = vpop.permute.xlu1 %3619 }
 0xdfa   :  { %v3627_v0 = vsel %vm367_vm7, %v3618_v12, %v3620_v42  ;;  %v3694_v45 = vld [vmem:[#allocation2 + $0x28] sm:$0xff] }
 0xdfb   :  { %v3633_v1 = vrot.slane %v3627_v0, 4  ;;  %v3710_v7 = vmul.f32 %v8639_v38, %v3694_v45 }
 0xdfc   :  { %v3622_v63 = vpop.permute.xlu0 %3621 }
 0xdfd   :  { %3641 = vst [vmem:[#allocation2 + $0x40] sm:$0xf0] %v3633_v1  ;;  %v3626_v40 = vsel %vm367_vm7, %v3620_v42, %v3622_v63  ;;  %v3624_v36 = vpop.permute.xlu1 %3623  ;;  %v6754_v57 = vpack.c.bf16 %v3710_v7, %v3706_v54  ;;  %v3695_v43 = vld [vmem:[#allocation2 + $0x30] sm:$0xff] }
 0xdfe   :  { %v3634_v56 = vrot.slane %v3626_v40, 4  ;;  %v3625_v37 = vsel %vm367_vm7, %v3622_v63, %v3624_v36  ;;  %v3628_v28 = vsel %vm367_vm7, %v3624_v36, %v3618_v12  ;;  %v3693_v2 = vld [vmem:[#allocation2 + $0x20] sm:$0xff]  ;;  %v3696_v55 = vld [vmem:[#allocation2 + $0x38] sm:$0xff]  ;;  %v3711_v35 = vmul.f32 %v8654_v14, %v3695_v43 }
 0xdff   :  { %v3635_v18 = vrot.slane %v3625_v37, 4  ;;  %v3636_v17 = vrot.slane %v3628_v28, 4  ;;  %6755 = vmatprep.subr.bf16.mxu0 %v6754_v57  ;;  %v3709_v6 = vmul.f32 %v8657_v24, %v3693_v2  ;;  %v3712_v59 = vmul.f32 %v8660_v26, %v3696_v55  ;;  %v8690_v37 = vld [vmem:[#allocation3 + $0x60] sm:$0xff]  ;;  %v8693_v2 = vld [vmem:[#allocation3 + $0x48] sm:$0xff] }
 0xe00   :  { %3642 = vst [vmem:[#allocation2 + $0x48] sm:$0xf0] %v3634_v56  ;;  %v3662_v3 = vpop.permute.xlu0 %3661  ;;  %v6764_v10 = vpack.c.bf16 %v3711_v35, %v3707_v53  ;;  %v8696_v35 = vld [vmem:[#allocation3 + $0x68] sm:$0xff]  ;;  %v8702_v53 = vld [vmem:[#allocation3 + $0x58] sm:$0xff] }
 0xe01   :  { %3643 = vst [vmem:[#allocation2 + $0x50] sm:$0xf0] %v3635_v18  ;;  %3644 = vst [vmem:[#allocation2 + $0x58] sm:$0xf0] %v3636_v17  ;;  %v3664_v41 = vpop.permute.xlu1 %3663  ;;  %v6756_v27 = vpack.c.bf16 %v3709_v6, %v3705_v50  ;;  %v6762_v34 = vpack.c.bf16 %v3712_v59, %v3708_v49  ;;  %v8699_v17 = vld [vmem:[#allocation3 + $0x40] sm:$0xff] }
 0xe02   :  { %v3671_v46 = vsel %vm469_vm9, %v3662_v3, %v3664_v41 }
 0xe03   :  { %v3677_v19 = vrot.slane %v3671_v46, 4  ;;  %6757 = vmatpush1.bf16.msra.mxu0 %v6756_v27  ;;  %6763 = vmatprep.subr.bf16.mxu1 %v6762_v34  ;;  %v8705_v27 = vld [vmem:[#allocation3 + $0x78] sm:$0xff]  ;;  %v8708_v46 = vld [vmem:[#allocation3 + $0x50] sm:$0xff] }
 0xe04   :  { %v3666_v5 = vpop.permute.xlu0 %3665  ;;  %6765 = vmatpush1.bf16.msra.mxu1 %v6764_v10 }
 0xe05   :  { %3685 = vst [vmem:[#allocation2 + $0x60] sm:$0xf0] %v3677_v19  ;;  %v3670_v58 = vsel %vm469_vm9, %v3664_v41, %v3666_v5  ;;  %v3668_v30 = vpop.permute.xlu1 %3667  ;;  %v8711_v19 = vld [vmem:[#allocation3 + $0x70] sm:$0xff] }
 0xe06   :  { %v3678_v23 = vrot.slane %v3670_v58, 4  ;;  %v3669_v62 = vsel %vm469_vm9, %v3666_v5, %v3668_v30  ;;  %v3672_v39 = vsel %vm469_vm9, %v3668_v30, %v3662_v3 }
 0xe07   :  { %v3679_v61 = vrot.slane %v3669_v62, 4  ;;  %v3680_v47 = vrot.slane %v3672_v39, 4  ;;  %v8717_v39 = vld [vmem:[%s9439_s4] sm:$0xff] }
 0xe08   :  { %3686 = vst [vmem:[#allocation2 + $0x68] sm:$0xf0] %v3678_v23  ;;  %v3602_v9 = vpop.permute.xlu0 %3601 }
 0xe09   :  { %3687 = vst [vmem:[#allocation2 + $0x70] sm:$0xf0] %v3679_v61  ;;  %3688 = vst [vmem:[#allocation2 + $0x78] sm:$0xf0] %v3680_v47  ;;  %v3604_v29 = vpop.permute.xlu1 %3603  ;;  %v8728_v61 = vld [vmem:[%s9439_s4 + $0x8] sm:$0xff] }
 0xe0a   :  { %v3611_v20 = vsel %vm322_vm6, %v3602_v9, %v3604_v29 }
 0xe0b   :  { %3613 = vst [vmem:[#allocation2 + $0x40] sm:$0xf] %v3611_v20 }
 0xe0c   :  { %v3606_v12 = vpop.permute.xlu0 %3605 }
 0xe0d   :  { %v3610_v21 = vsel %vm322_vm6, %v3604_v29, %v3606_v12  ;;  %v3608_v42 = vpop.permute.xlu1 %3607 }
 0xe0e   :  { %3614 = vst [vmem:[#allocation2 + $0x48] sm:$0xf] %v3610_v21  ;;  %v3609_v0 = vsel %vm322_vm6, %v3606_v12, %v3608_v42  ;;  %v3612_v45 = vsel %vm322_vm6, %v3608_v42, %v3602_v9 }
 0xe0f   :  { %3615 = vst [vmem:[#allocation2 + $0x50] sm:$0xf] %v3609_v0  ;;  %3616 = vst [vmem:[#allocation2 + $0x58] sm:$0xf] %v3612_v45 }
 0xe10   :  { %v3646_v8 = vpop.permute.xlu0 %3645 }
 0xe11   :  { %v3648_v4 = vpop.permute.xlu1 %3647 }
 0xe12   :  { %v3655_v1 = vsel %vm424_vm8, %v3646_v8, %v3648_v4  ;;  %v3697_v49 = vld [vmem:[#allocation2 + $0x40] sm:$0xff] }
 0xe13   :  { %3657 = vst [vmem:[#allocation2 + $0x60] sm:$0xf] %v3655_v1  ;;  %v3713_v6 = vmul.f32 %v8699_v17, %v3697_v49 }
 0xe14   :  { %v3650_v54 = vpop.permute.xlu0 %3649 }
 0xe15   :  { %v3654_v7 = vsel %vm424_vm8, %v3648_v4, %v3650_v54  ;;  %v3652_v63 = vpop.permute.xlu1 %3651  ;;  %v3698_v50 = vld [vmem:[#allocation2 + $0x48] sm:$0xff] }
 0xe16   :  { %3658 = vst [vmem:[#allocation2 + $0x68] sm:$0xf] %v3654_v7  ;;  %v3653_v40 = vsel %vm424_vm8, %v3650_v54, %v3652_v63  ;;  %v3656_v36 = vsel %vm424_vm8, %v3652_v63, %v3646_v8  ;;  %v3700_v11 = vld [vmem:[#allocation2 + $0x58] sm:$0xff]  ;;  %v3699_v43 = vld [vmem:[#allocation2 + $0x50] sm:$0xff]  ;;  %v3714_v55 = vmul.f32 %v8693_v2, %v3698_v50 }
 0xe17   :  { %3659 = vst [vmem:[#allocation2 + $0x70] sm:$0xf] %v3653_v40  ;;  %3660 = vst [vmem:[#allocation2 + $0x78] sm:$0xf] %v3656_v36  ;;  %v3716_v41 = vmul.f32 %v8702_v53, %v3700_v11  ;;  %v3715_v10 = vmul.f32 %v8708_v46, %v3699_v43 }
 0xe1a   :  { %v3701_v57 = vld [vmem:[#allocation2 + $0x60] sm:$0xff] }
 0xe1b   :  { %v3717_v28 = vmul.f32 %v8690_v37, %v3701_v57 }
 0xe1d   :  { %v3702_v56 = vld [vmem:[#allocation2 + $0x68] sm:$0xff]  ;;  %v6760_v30 = vpack.c.bf16 %v3717_v28, %v3713_v6 }
 0xe1e   :  { %v3718_v18 = vmul.f32 %v8696_v35, %v3702_v56  ;;  %v3704_v59 = vld [vmem:[#allocation2 + $0x78] sm:$0xff]  ;;  %v3703_v3 = vld [vmem:[#allocation2 + $0x70] sm:$0xff] }
 0xe1f   :  { %v3720_v34 = vmul.f32 %v8705_v27, %v3704_v59  ;;  %v3719_v5 = vmul.f32 %v8711_v19, %v3703_v3 }
 0xe20   :  { %v6758_v58 = vpack.c.bf16 %v3718_v18, %v3714_v55 }
 0xe21   :  { %v6766_v23 = vpack.c.bf16 %v3720_v34, %v3716_v41  ;;  %v6768_v62 = vpack.c.bf16 %v3719_v5, %v3715_v10 }
 0xe22   :  { %6759 = vmatprep.subr.bf16.mxu0 %v6758_v58 }
 0xe23   :  { %6761 = vmatpush1.bf16.msra.mxu0 %v6760_v30  ;;  %6767 = vmatprep.subr.bf16.mxu1 %v6766_v23 }
 0xe24   :  { %6769 = vmatpush1.bf16.msra.mxu1 %v6768_v62  ;;  %v8747_v62 = vld [vmem:[%s9441_s6] sm:$0xf] }
 0xe26   :  { %6604 = vmatmul.mubr.msk.f32.vlgmr.msra.gmra.mrb[30].mxu0 %vm710_vm0, %v8717_v39 }
 0xe27   :  { %6606 = vmatmul.mubr.msk.f32.vlgmr.msra.gmra.mrb[30].mxu1 %vm710_vm0, %v8717_v39  ;;  %3791 = vmatprep.mubr.f32.mxu0 %v9458_v44 }
 0xe28   :  { %3868 = vmatprep.mubr.f32.mxu1 %v9458_v44 }
 0xe2a   :  { %6605 = vmatmul.mubr.msk.f32.gmra.mrb[32].mxu0 %vm710_vm0, %v8728_v61 }
 0xe2b   :  { %6607 = vmatmul.mubr.msk.f32.gmra.mrb[32].mxu1 %vm710_vm0, %v8728_v61  ;;  %3955 = vmatprep.mubr.f32.mxu0 %v9458_v44 }
 0xe2c   :  { %4026 = vmatprep.mubr.f32.mxu1 %v9458_v44 }
 0xef9   :  { %v3787_v47 = vpop.f32.mrb[30].mxu0 }
 0xefa   :  { %v3788_v9 = vadd.f32 %v3787_v47, %v9459_v32  ;;  %v3789_v29 = vpop.f32.mrb[31].mxu0  ;;  %v3864_v20 = vpop.f32.mrb[30].mxu1 }
 0xefb   :  { %v3790_v12 = vadd.f32 %v3789_v29, %v9459_v32  ;;  %v3865_v21 = vadd.f32 %v3864_v20, %v9459_v32  ;;  %v3866_v42 = vpop.f32.mrb[31].mxu1 }
 0xefc   :  { %v3867_v0 = vadd.f32 %v3866_v42, %v9459_v32  ;;  %v3875_v8 = vmul.f32 0.2, %v3788_v9 }
 0xefd   :  { %v3793_v45 = vpop.f32.mrb[32].mxu0  ;;  %v3876_v7 = vmul.f32 0.2, %v3790_v12  ;;  %v3877_v63 = vmul.f32 0.2, %v3865_v21 }
 0xefe   :  { %v3794_v4 = vadd.f32 %v3793_v45, %v9460_v48  ;;  %v3795_v1 = vpop.f32.mrb[33].mxu0  ;;  %v3870_v54 = vpop.f32.mrb[32].mxu1  ;;  %v3878_v50 = vmul.f32 0.2, %v3867_v0  ;;  %v3883_v28 = vmax.f32 %v3788_v9, %v3875_v8 }
 0xeff   :  { %v3796_v40 = vadd.f32 %v3795_v1, %v9460_v48  ;;  %v3871_v36 = vadd.f32 %v3870_v54, %v9460_v48  ;;  %v3872_v57 = vpop.f32.mrb[33].mxu1  ;;  %v3884_v6 = vmax.f32 %v3790_v12, %v3876_v7  ;;  %v3885_v59 = vmax.f32 %v3865_v21, %v3877_v63 }
 0xf00   :  { %v3879_v49 = vmul.f32 0.2, %v3794_v4  ;;  %v3873_v11 = vadd.f32 %v3872_v57, %v9460_v48  ;;  %v3886_v34 = vmax.f32 %v3867_v0, %v3878_v50 }
 0xf01   :  { %v3880_v43 = vmul.f32 0.2, %v3796_v40  ;;  %v3881_v56 = vmul.f32 0.2, %v3871_v36 }
 0xf02   :  { %v3887_v55 = vmax.f32 %v3794_v4, %v3879_v49  ;;  %v3882_v18 = vmul.f32 0.2, %v3873_v11 }
 0xf03   :  { %v3888_v3 = vmax.f32 %v3796_v40, %v3880_v43  ;;  %v3889_v41 = vmax.f32 %v3871_v36, %v3881_v56 }
 0xf04   :  { %v6772_v10 = vpack.c.bf16 %v3887_v55, %v3883_v28  ;;  %v3890_v5 = vmax.f32 %v3873_v11, %v3882_v18 }
 0xf05   :  { %v6776_v58 = vpack.c.bf16 %v3889_v41, %v3885_v59  ;;  %v6770_v30 = vpack.c.bf16 %v3888_v3, %v3884_v6 }
 0xf06   :  { %v6774_v23 = vpack.c.bf16 %v3890_v5, %v3886_v34 }
 0xf07   :  { %6771 = vmatprep.subr.bf16.mxu0 %v6770_v30 }
 0xf08   :  { %6773 = vmatpush1.bf16.msra.mxu0 %v6772_v10  ;;  %6775 = vmatprep.subr.bf16.mxu1 %v6774_v23 }
 0xf09   :  { %6777 = vmatpush1.bf16.msra.mxu1 %v6776_v58 }
 0xf0b   :  { %6608 = vmatmul.mubr.msk.f32.vlgmr.msra.gmra.mrb[34].mxu0 %vm887_vm1, %v8747_v62 }
 0xf0c   :  { %6609 = vmatmul.mubr.msk.f32.vlgmr.msra.gmra.mrb[34].mxu1 %vm887_vm1, %v8747_v62  ;;  %4385 = vmatprep.mubr.f32.mxu0 %v9458_v44 }
 0xf0d   :  { %4462 = vmatprep.mubr.f32.mxu1 %v9458_v44 }
 0xfde   :  { %v3957_v47 = vpop.f32.mrb[34].mxu0 }
 0xfdf   :  { %v3958_v9 = vadd.f32 %v3957_v47, %v7830_v22  ;;  %v3959_v29 = vpop.f32.mrb[35].mxu0  ;;  %v4028_v20 = vpop.f32.mrb[34].mxu1 }
 0xfe0   :  { %v3960_v12 = vadd.f32 %v3959_v29, %v7830_v22  ;;  %v4029_v21 = vadd.f32 %v4028_v20, %v7830_v22  ;;  %v4030_v42 = vpop.f32.mrb[35].mxu1 }
 0xfe1   :  { %v4033_v0 = vadd.f32 %v3958_v9, %v7833_v60  ;;  %v4031_v45 = vadd.f32 %v4030_v42, %v7830_v22 }
 0xfe2   :  { %v4034_v8 = vadd.f32 %v3960_v12, %v7837_v51  ;;  %v4035_v4 = vadd.f32 %v4029_v21, %v7840_v16 }
 0xfe3   :  { %v4037_v1 = vsel %vm518_vm10, %v4033_v0, -inf  ;;  %v4036_v54 = vadd.f32 %v4031_v45, %v7845_v25 }
 0xfe4   :  { %v4038_v7 = vrot.slane %v4037_v1, 4  ;;  %v4044_v63 = vsel %vm518_vm10, %v4034_v8, -inf  ;;  %v4051_v40 = vsel %vm518_vm10, %v4035_v4, -inf }
 0xfe5   :  { %v4045_v36 = vrot.slane %v4044_v63, 4  ;;  %v4052_v57 = vrot.slane %v4051_v40, 4  ;;  %v4058_v50 = vsel %vm518_vm10, %v4036_v54, -inf }
 0xfe6   :  { %v4039_v49 = vmax.f32 %v4037_v1, %v4038_v7  ;;  %v4059_v11 = vrot.slane %v4058_v50, 4 }
 0xfe7   :  { %v4046_v43 = vmax.f32 %v4044_v63, %v4045_v36  ;;  %v4053_v56 = vmax.f32 %v4051_v40, %v4052_v57 }
 0xfe8   :  { %v4040_v28 = vrot.slane %v4039_v49, 2  ;;  %v4060_v55 = vmax.f32 %v4058_v50, %v4059_v11 }
 0xfe9   :  { %v4047_v18 = vrot.slane %v4046_v43, 2  ;;  %v4054_v6 = vrot.slane %v4053_v56, 2 }
 0xfea   :  { %v4041_v59 = vmax.f32 %v4039_v49, %v4040_v28  ;;  %v4061_v3 = vrot.slane %v4060_v55, 2 }
 0xfeb   :  { %v4048_v41 = vmax.f32 %v4046_v43, %v4047_v18  ;;  %v4055_v34 = vmax.f32 %v4053_v56, %v4054_v6 }
 0xfec   :  { %v4042_v10 = vrot.slane %v4041_v59, 1  ;;  %v4062_v5 = vmax.f32 %v4060_v55, %v4061_v3 }
 0xfed   :  { %v4049_v58 = vrot.slane %v4048_v41, 1  ;;  %v4056_v30 = vrot.slane %v4055_v34, 1 }
 0xfee   :  { %v4043_v23 = vmax.f32 %v4041_v59, %v4042_v10  ;;  %v4063_v47 = vrot.slane %v4062_v5, 1 }
 0xfef   :  { %v4050_v9 = vmax.f32 %v4048_v41, %v4049_v58  ;;  %v4057_v29 = vmax.f32 %v4055_v34, %v4056_v30 }
 0xff0   :  { %v4065_v20 = vsub.f32 %v4033_v0, %v4043_v23  ;;  %v4064_v12 = vmax.f32 %v4062_v5, %v4063_v47 }
 0xff1   :  { %v4066_v21 = vsub.f32 %v4034_v8, %v4050_v9  ;;  %v4067_v42 = vsub.f32 %v4035_v4, %v4057_v29 }
 0xff2   :  { %v4069_v45 = vmul.f32 1.442695, %v4065_v20  ;;  %v4068_v1 = vsub.f32 %v4036_v54, %v4064_v12 }
 0xff3   :  { %v4071_v7 = vmul.f32 1.442695, %v4066_v21  ;;  %v4073_v63 = vmul.f32 1.442695, %v4067_v42 }
 0xff4   :  { %7004 = vpow2.f32 %v4069_v45  ;;  %v4075_v40 = vmul.f32 1.442695, %v4068_v1 }
 0xff5   :  { %7006 = vpow2.f32 %v4071_v7 }
 0xff6   :  { %7008 = vpow2.f32 %v4073_v63 }
 0xff7   :  { %7010 = vpow2.f32 %v4075_v40 }
 0xffe   :  { %v7005_v36 = vpop.eup %7004 }
 0xfff   :  { %v7007_v57 = vpop.eup %7006  ;;  %v4077_v50 = vsel %vm518_vm10, %v7005_v36, 0.0 }
0x1000   :  { %v7009_v49 = vpop.eup %7008  ;;  %v4078_v11 = vrot.slane %v4077_v50, 4  ;;  %v4084_v0 = vsel %vm518_vm10, %v7007_v57, 0.0 }
0x1001   :  { %v7011_v43 = vpop.eup %7010  ;;  %v4085_v8 = vrot.slane %v4084_v0, 4  ;;  %v4091_v4 = vsel %vm518_vm10, %v7009_v49, 0.0 }
0x1002   :  { %v4079_v54 = vadd.f32 %v4078_v11, %v4077_v50  ;;  %v4092_v56 = vrot.slane %v4091_v4, 4  ;;  %v4098_v28 = vsel %vm518_vm10, %v7011_v43, 0.0 }
0x1003   :  { %v4086_v55 = vadd.f32 %v4085_v8, %v4084_v0  ;;  %v4099_v18 = vrot.slane %v4098_v28, 4 }
0x1004   :  { %v4080_v6 = vrot.slane %v4079_v54, 2  ;;  %v4093_v59 = vadd.f32 %v4092_v56, %v4091_v4 }
0x1005   :  { %v4087_v3 = vrot.slane %v4086_v55, 2  ;;  %v4100_v41 = vadd.f32 %v4099_v18, %v4098_v28 }
0x1006   :  { %v4081_v34 = vadd.f32 %v4080_v6, %v4079_v54  ;;  %v4094_v10 = vrot.slane %v4093_v59, 2 }
0x1007   :  { %v4088_v5 = vadd.f32 %v4087_v3, %v4086_v55  ;;  %v4101_v58 = vrot.slane %v4100_v41, 2 }
0x1008   :  { %v4082_v30 = vrot.slane %v4081_v34, 1  ;;  %v4095_v23 = vadd.f32 %v4094_v10, %v4093_v59 }
0x1009   :  { %v4089_v47 = vrot.slane %v4088_v5, 1  ;;  %v4102_v9 = vadd.f32 %v4101_v58, %v4100_v41 }
0x100a   :  { %v4083_v29 = vadd.f32 %v4082_v30, %v4081_v34  ;;  %v4096_v20 = vrot.slane %v4095_v23, 1 }
0x100b   :  { %v4090_v12 = vadd.f32 %v4089_v47, %v4088_v5  ;;  %v4103_v21 = vrot.slane %v4102_v9, 1 }
0x100c   :  { %7012 = vrcp.f32 %v4083_v29  ;;  %v4097_v42 = vadd.f32 %v4096_v20, %v4095_v23 }
0x100d   :  { %7014 = vrcp.f32 %v4090_v12  ;;  %v4104_v45 = vadd.f32 %v4103_v21, %v4102_v9 }
0x100e   :  { %7016 = vrcp.f32 %v4097_v42 }
0x100f   :  { %7018 = vrcp.f32 %v4104_v45 }
0x1016   :  { %v7013_v1 = vpop.eup %7012 }
0x1017   :  { %v7015_v7 = vpop.eup %7014  ;;  %v4109_v63 = vmul.f32 %v7013_v1, %v7005_v36 }
0x1018   :  { %v7017_v40 = vpop.eup %7016  ;;  %v4110_v50 = vmul.f32 %v7015_v7, %v7007_v57 }
0x1019   :  { %v7019_v11 = vpop.eup %7018  ;;  %4129 = vrot.lane.b32.xlu0 %v4109_v63, %s7239_s19  ;;  %v4111_v0 = vmul.f32 %v7017_v40, %v7009_v49 }
0x101a   :  { %4131 = vrot.lane.b32.xlu1 %v4110_v50, %s7239_s19  ;;  %v4112_v8 = vmul.f32 %v7019_v11, %v7011_v43 }
0x101d   :  { %4133 = vrot.lane.b32.xlu0 %v4111_v0, %s7239_s19 }
0x101e   :  { %4135 = vrot.lane.b32.xlu1 %v4112_v8, %s7239_s19 }
0x1021   :  { %4173 = vrot.lane.b32.xlu0 %v4109_v63, %s7242_s21 }
0x1022   :  { %4175 = vrot.lane.b32.xlu1 %v4110_v50, %s7242_s21 }
0x1025   :  { %4177 = vrot.lane.b32.xlu0 %v4111_v0, %s7242_s21 }
0x1026   :  { %4179 = vrot.lane.b32.xlu1 %v4112_v8, %s7242_s21 }
0x1029   :  { %4113 = vrot.lane.b32.xlu0 %v4109_v63, %s7240_s20 }
0x102a   :  { %4115 = vrot.lane.b32.xlu1 %v4110_v50, %s7240_s20 }
0x102d   :  { %4117 = vrot.lane.b32.xlu0 %v4111_v0, %s7240_s20 }
0x102e   :  { %4119 = vrot.lane.b32.xlu1 %v4112_v8, %s7240_s20 }
0x1031   :  { %4157 = vrot.lane.b32.xlu0 %v4109_v63, %s7243_s22 }
0x1032   :  { %4159 = vrot.lane.b32.xlu1 %v4110_v50, %s7243_s22 }
0x1035   :  { %4161 = vrot.lane.b32.xlu0 %v4111_v0, %s7243_s22 }
0x1036   :  { %4163 = vrot.lane.b32.xlu1 %v4112_v8, %s7243_s22 }
0x1039   :  { %4217 = vrot.lane.b32.xlu0 %v4109_v63, %s7244_s1 }
0x103a   :  { %4219 = vrot.lane.b32.xlu1 %v4110_v50, %s7244_s1 }
0x103d   :  { %4221 = vrot.lane.b32.xlu0 %v4111_v0, %s7244_s1 }
0x103e   :  { %4223 = vrot.lane.b32.xlu1 %v4112_v8, %s7244_s1 }
0x1041   :  { %4261 = vrot.lane.b32.xlu0 %v4109_v63, %s7245_s23 }
0x1042   :  { %4263 = vrot.lane.b32.xlu1 %v4110_v50, %s7245_s23 }
0x1045   :  { %4265 = vrot.lane.b32.xlu0 %v4111_v0, %s7245_s23 }
0x1046   :  { %4267 = vrot.lane.b32.xlu1 %v4112_v8, %s7245_s23 }
0x1049   :  { %4201 = vrot.lane.b32.xlu0 %v4109_v63, %s7246_s24 }
0x104a   :  { %4203 = vrot.lane.b32.xlu1 %v4110_v50, %s7246_s24 }
0x104d   :  { %4205 = vrot.lane.b32.xlu0 %v4111_v0, %s7246_s24 }
0x104e   :  { %4207 = vrot.lane.b32.xlu1 %v4112_v8, %s7246_s24 }
0x1051   :  { %4245 = vrot.lane.b32.xlu0 %v4109_v63, %s7247_s25 }
0x1052   :  { %4247 = vrot.lane.b32.xlu1 %v4110_v50, %s7247_s25 }
0x1055   :  { %4249 = vrot.lane.b32.xlu0 %v4111_v0, %s7247_s25 }
0x1056   :  { %4251 = vrot.lane.b32.xlu1 %v4112_v8, %s7247_s25 }
0x108b   :  { %v4130_v36 = vpop.permute.xlu0 %4129 }
0x108c   :  { %v4132_v57 = vpop.permute.xlu1 %4131 }
0x108d   :  { %v4139_v49 = vsel %vm151_vm3, %v4130_v36, %v4132_v57 }
0x108e   :  { %v4146_v43 = vrot.slane %v4139_v49, 4 }
0x108f   :  { %v4134_v4 = vpop.permute.xlu0 %4133 }
0x1090   :  { %4154 = vst [vmem:[#allocation2 + $0x8] sm:$0xf0] %v4146_v43  ;;  %v4138_v54 = vsel %vm151_vm3, %v4132_v57, %v4134_v4  ;;  %v4136_v56 = vpop.permute.xlu1 %4135 }
0x1091   :  { %v4147_v28 = vrot.slane %v4138_v54, 4  ;;  %v4137_v55 = vsel %vm151_vm3, %v4134_v4, %v4136_v56  ;;  %v4140_v18 = vsel %vm151_vm3, %v4136_v56, %v4130_v36 }
0x1092   :  { %v4145_v6 = vrot.slane %v4140_v18, 4  ;;  %v4148_v59 = vrot.slane %v4137_v55, 4 }
0x1093   :  { %4155 = vst [vmem:[#allocation2 + $0x10] sm:$0xf0] %v4147_v28  ;;  %v4174_v3 = vpop.permute.xlu0 %4173 }
0x1094   :  { %4153 = vst [vmem:[#allocation2] sm:$0xf0] %v4145_v6  ;;  %4156 = vst [vmem:[#allocation2 + $0x18] sm:$0xf0] %v4148_v59  ;;  %v4176_v41 = vpop.permute.xlu1 %4175 }
0x1095   :  { %v4183_v34 = vsel %vm253_vm5, %v4174_v3, %v4176_v41 }
0x1096   :  { %v4190_v10 = vrot.slane %v4183_v34, 4 }
0x1097   :  { %v4178_v5 = vpop.permute.xlu0 %4177 }
0x1098   :  { %4198 = vst [vmem:[#allocation2 + $0x28] sm:$0xf0] %v4190_v10  ;;  %v4182_v58 = vsel %vm253_vm5, %v4176_v41, %v4178_v5  ;;  %v4180_v30 = vpop.permute.xlu1 %4179 }
0x1099   :  { %v4191_v23 = vrot.slane %v4182_v58, 4  ;;  %v4181_v47 = vsel %vm253_vm5, %v4178_v5, %v4180_v30  ;;  %v4184_v9 = vsel %vm253_vm5, %v4180_v30, %v4174_v3 }
0x109a   :  { %v4189_v29 = vrot.slane %v4184_v9, 4  ;;  %v4192_v20 = vrot.slane %v4181_v47, 4 }
0x109b   :  { %4199 = vst [vmem:[#allocation2 + $0x30] sm:$0xf0] %v4191_v23  ;;  %v4114_v12 = vpop.permute.xlu0 %4113 }
0x109c   :  { %4197 = vst [vmem:[#allocation2 + $0x20] sm:$0xf0] %v4189_v29  ;;  %4200 = vst [vmem:[#allocation2 + $0x38] sm:$0xf0] %v4192_v20  ;;  %v4116_v21 = vpop.permute.xlu1 %4115 }
0x109d   :  { %v4123_v42 = vsel %vm105_vm2, %v4114_v12, %v4116_v21 }
0x109e   :  { %4126 = vst [vmem:[#allocation2 + $0x8] sm:$0xf] %v4123_v42 }
0x109f   :  { %v4118_v45 = vpop.permute.xlu0 %4117 }
0x10a0   :  { %v4122_v1 = vsel %vm105_vm2, %v4116_v21, %v4118_v45  ;;  %v4120_v7 = vpop.permute.xlu1 %4119 }
0x10a1   :  { %4127 = vst [vmem:[#allocation2 + $0x10] sm:$0xf] %v4122_v1  ;;  %v4121_v63 = vsel %vm105_vm2, %v4118_v45, %v4120_v7  ;;  %v4124_v40 = vsel %vm105_vm2, %v4120_v7, %v4114_v12 }
0x10a2   :  { %4125 = vst [vmem:[#allocation2] sm:$0xf] %v4124_v40  ;;  %4128 = vst [vmem:[#allocation2 + $0x18] sm:$0xf] %v4121_v63 }
0x10a3   :  { %v4158_v50 = vpop.permute.xlu0 %4157 }
0x10a4   :  { %v4160_v11 = vpop.permute.xlu1 %4159 }
0x10a5   :  { %v4167_v0 = vsel %vm208_vm4, %v4158_v50, %v4160_v11  ;;  %v4290_v54 = vld [vmem:[#allocation2 + $0x8] sm:$0xff] }
0x10a6   :  { %4170 = vst [vmem:[#allocation2 + $0x28] sm:$0xf] %v4167_v0  ;;  %v4306_v3 = vmul.f32 %v8636_v33, %v4290_v54 }
0x10a7   :  { %v4162_v8 = vpop.permute.xlu0 %4161 }
0x10a8   :  { %v4166_v36 = vsel %vm208_vm4, %v4160_v11, %v4162_v8  ;;  %v4164_v57 = vpop.permute.xlu1 %4163  ;;  %v4291_v47 = vld [vmem:[#allocation2 + $0x10] sm:$0xff] }
0x10a9   :  { %4171 = vst [vmem:[#allocation2 + $0x30] sm:$0xf] %v4166_v36  ;;  %v4165_v49 = vsel %vm208_vm4, %v4162_v8, %v4164_v57  ;;  %v4168_v43 = vsel %vm208_vm4, %v4164_v57, %v4158_v50  ;;  %v4289_v18 = vld [vmem:[#allocation2] sm:$0xff]  ;;  %v4292_v6 = vld [vmem:[#allocation2 + $0x18] sm:$0xff]  ;;  %v4307_v7 = vmul.f32 %v8663_v13, %v4291_v47 }
0x10aa   :  { %4169 = vst [vmem:[#allocation2 + $0x20] sm:$0xf] %v4168_v43  ;;  %4172 = vst [vmem:[#allocation2 + $0x38] sm:$0xf] %v4165_v49  ;;  %v4305_v30 = vmul.f32 %v8644_v52, %v4289_v18  ;;  %v4308_v23 = vmul.f32 %v8647_v15, %v4292_v6 }
0x10ab   :  { %v4218_v4 = vpop.permute.xlu0 %4217 }
0x10ac   :  { %v4220_v56 = vpop.permute.xlu1 %4219 }
0x10ad   :  { %v4227_v28 = vsel %vm367_vm7, %v4218_v4, %v4220_v56  ;;  %v4294_v55 = vld [vmem:[#allocation2 + $0x28] sm:$0xff] }
0x10ae   :  { %v4233_v59 = vrot.slane %v4227_v28, 4  ;;  %v4310_v41 = vmul.f32 %v8639_v38, %v4294_v55 }
0x10af   :  { %v4222_v34 = vpop.permute.xlu0 %4221 }
0x10b0   :  { %4241 = vst [vmem:[#allocation2 + $0x40] sm:$0xf0] %v4233_v59  ;;  %v4226_v10 = vsel %vm367_vm7, %v4220_v56, %v4222_v34  ;;  %v4224_v5 = vpop.permute.xlu1 %4223  ;;  %v6778_v58 = vpack.c.bf16 %v4310_v41, %v4306_v3  ;;  %v4295_v9 = vld [vmem:[#allocation2 + $0x30] sm:$0xff] }
0x10b1   :  { %v4234_v29 = vrot.slane %v4226_v10, 4  ;;  %v4225_v20 = vsel %vm367_vm7, %v4222_v34, %v4224_v5  ;;  %v4228_v33 = vsel %vm367_vm7, %v4224_v5, %v4218_v4  ;;  %v4293_v38 = vld [vmem:[#allocation2 + $0x20] sm:$0xff]  ;;  %v4296_v12 = vld [vmem:[#allocation2 + $0x38] sm:$0xff]  ;;  %v4311_v21 = vmul.f32 %v8654_v14, %v4295_v9 }
0x10b2   :  { %v4235_v42 = vrot.slane %v4225_v20, 4  ;;  %v4236_v45 = vrot.slane %v4228_v33, 4  ;;  %6779 = vmatprep.subr.bf16.mxu0 %v6778_v58  ;;  %v4309_v52 = vmul.f32 %v8657_v24, %v4293_v38  ;;  %v4312_v15 = vmul.f32 %v8660_v26, %v4296_v12 }
0x10b3   :  { %4242 = vst [vmem:[#allocation2 + $0x48] sm:$0xf0] %v4234_v29  ;;  %v4262_v1 = vpop.permute.xlu0 %4261  ;;  %v6788_v14 = vpack.c.bf16 %v4311_v21, %v4307_v7 }
0x10b4   :  { %4243 = vst [vmem:[#allocation2 + $0x50] sm:$0xf0] %v4235_v42  ;;  %4244 = vst [vmem:[#allocation2 + $0x58] sm:$0xf0] %v4236_v45  ;;  %v4264_v63 = vpop.permute.xlu1 %4263  ;;  %v6780_v40 = vpack.c.bf16 %v4309_v52, %v4305_v30  ;;  %v6786_v50 = vpack.c.bf16 %v4312_v15, %v4308_v23 }
0x10b5   :  { %v4271_v11 = vsel %vm469_vm9, %v4262_v1, %v4264_v63 }
0x10b6   :  { %v4277_v0 = vrot.slane %v4271_v11, 4  ;;  %6781 = vmatpush1.bf16.msra.mxu0 %v6780_v40  ;;  %6787 = vmatprep.subr.bf16.mxu1 %v6786_v50 }
0x10b7   :  { %v4266_v8 = vpop.permute.xlu0 %4265  ;;  %6789 = vmatpush1.bf16.msra.mxu1 %v6788_v14 }
0x10b8   :  { %4285 = vst [vmem:[#allocation2 + $0x60] sm:$0xf0] %v4277_v0  ;;  %v4270_v24 = vsel %vm469_vm9, %v4264_v63, %v4266_v8  ;;  %v4268_v26 = vpop.permute.xlu1 %4267 }
0x10b9   :  { %v4278_v13 = vrot.slane %v4270_v24, 4  ;;  %v4269_v36 = vsel %vm469_vm9, %v4266_v8, %v4268_v26  ;;  %v4272_v57 = vsel %vm469_vm9, %v4268_v26, %v4262_v1 }
0x10ba   :  { %v4279_v49 = vrot.slane %v4269_v36, 4  ;;  %v4280_v43 = vrot.slane %v4272_v57, 4 }
0x10bb   :  { %4286 = vst [vmem:[#allocation2 + $0x68] sm:$0xf0] %v4278_v13  ;;  %v4202_v4 = vpop.permute.xlu0 %4201 }
0x10bc   :  { %4287 = vst [vmem:[#allocation2 + $0x70] sm:$0xf0] %v4279_v49  ;;  %4288 = vst [vmem:[#allocation2 + $0x78] sm:$0xf0] %v4280_v43  ;;  %v4204_v54 = vpop.permute.xlu1 %4203 }
0x10bd   :  { %v4211_v56 = vsel %vm322_vm6, %v4202_v4, %v4204_v54 }
0x10be   :  { %4213 = vst [vmem:[#allocation2 + $0x40] sm:$0xf] %v4211_v56 }
0x10bf   :  { %v4206_v28 = vpop.permute.xlu0 %4205 }
0x10c0   :  { %v4210_v55 = vsel %vm322_vm6, %v4204_v54, %v4206_v28  ;;  %v4208_v18 = vpop.permute.xlu1 %4207 }
0x10c1   :  { %4214 = vst [vmem:[#allocation2 + $0x48] sm:$0xf] %v4210_v55  ;;  %v4209_v6 = vsel %vm322_vm6, %v4206_v28, %v4208_v18  ;;  %v4212_v59 = vsel %vm322_vm6, %v4208_v18, %v4202_v4 }
0x10c2   :  { %4215 = vst [vmem:[#allocation2 + $0x50] sm:$0xf] %v4209_v6  ;;  %4216 = vst [vmem:[#allocation2 + $0x58] sm:$0xf] %v4212_v59 }
0x10c3   :  { %v4246_v3 = vpop.permute.xlu0 %4245 }
0x10c4   :  { %v4248_v41 = vpop.permute.xlu1 %4247 }
0x10c5   :  { %v4255_v34 = vsel %vm424_vm8, %v4246_v3, %v4248_v41  ;;  %v4297_v29 = vld [vmem:[#allocation2 + $0x40] sm:$0xff] }
0x10c6   :  { %4257 = vst [vmem:[#allocation2 + $0x60] sm:$0xf] %v4255_v34  ;;  %v4313_v45 = vmul.f32 %v8699_v17, %v4297_v29 }
0x10c7   :  { %v4250_v10 = vpop.permute.xlu0 %4249 }
0x10c8   :  { %v4254_v5 = vsel %vm424_vm8, %v4248_v41, %v4250_v10  ;;  %v4252_v58 = vpop.permute.xlu1 %4251  ;;  %v4298_v9 = vld [vmem:[#allocation2 + $0x48] sm:$0xff] }
0x10c9   :  { %4258 = vst [vmem:[#allocation2 + $0x68] sm:$0xf] %v4254_v5  ;;  %v4253_v30 = vsel %vm424_vm8, %v4250_v10, %v4252_v58  ;;  %v4256_v23 = vsel %vm424_vm8, %v4252_v58, %v4246_v3  ;;  %v4300_v20 = vld [vmem:[#allocation2 + $0x58] sm:$0xff]  ;;  %v4299_v33 = vld [vmem:[#allocation2 + $0x50] sm:$0xff]  ;;  %v4314_v21 = vmul.f32 %v8693_v2, %v4298_v9 }
0x10ca   :  { %4259 = vst [vmem:[#allocation2 + $0x70] sm:$0xf] %v4253_v30  ;;  %4260 = vst [vmem:[#allocation2 + $0x78] sm:$0xf] %v4256_v23  ;;  %v4316_v1 = vmul.f32 %v8702_v53, %v4300_v20  ;;  %v4315_v63 = vmul.f32 %v8708_v46, %v4299_v33 }
0x10cd   :  { %v4301_v47 = vld [vmem:[#allocation2 + $0x60] sm:$0xff] }
0x10ce   :  { %v4317_v12 = vmul.f32 %v8690_v37, %v4301_v47 }
0x10d0   :  { %v4302_v38 = vld [vmem:[#allocation2 + $0x68] sm:$0xff]  ;;  %v6784_v11 = vpack.c.bf16 %v4317_v12, %v4313_v45 }
0x10d1   :  { %v4318_v42 = vmul.f32 %v8696_v35, %v4302_v38  ;;  %v4304_v52 = vld [vmem:[#allocation2 + $0x78] sm:$0xff]  ;;  %v4303_v15 = vld [vmem:[#allocation2 + $0x70] sm:$0xff] }
0x10d2   :  { %v4320_v7 = vmul.f32 %v8705_v27, %v4304_v52  ;;  %v4319_v40 = vmul.f32 %v8711_v19, %v4303_v15 }
0x10d3   :  { %v6782_v50 = vpack.c.bf16 %v4318_v42, %v4314_v21 }
0x10d4   :  { %v6790_v14 = vpack.c.bf16 %v4320_v7, %v4316_v1  ;;  %v6792_v37 = vpack.c.bf16 %v4319_v40, %v4315_v63 }
0x10d5   :  { %6783 = vmatprep.subr.bf16.mxu0 %v6782_v50 }
0x10d6   :  { %6785 = vmatpush1.bf16.msra.mxu0 %v6784_v11  ;;  %6791 = vmatprep.subr.bf16.mxu1 %v6790_v14 }
0x10d7   :  { %6793 = vmatpush1.bf16.msra.mxu1 %v6792_v37 }
0x10d9   :  { %6610 = vmatmul.mubr.msk.f32.vlgmr.msra.gmra.mrb[36].mxu0 %vm710_vm0, %v8717_v39 }
0x10da   :  { %6612 = vmatmul.mubr.msk.f32.vlgmr.msra.gmra.mrb[36].mxu1 %vm710_vm0, %v8717_v39  ;;  %4391 = vmatprep.mubr.f32.mxu0 %v9458_v44 }
0x10db   :  { %4468 = vmatprep.mubr.f32.mxu1 %v9458_v44 }
0x10dd   :  { %6611 = vmatmul.mubr.msk.f32.gmra.mrb[38].mxu0 %vm710_vm0, %v8728_v61 }
0x10de   :  { %6613 = vmatmul.mubr.msk.f32.gmra.mrb[38].mxu1 %vm710_vm0, %v8728_v61  ;;  %4555 = vmatprep.mubr.f32.mxu0 %v9458_v44 }
0x10df   :  { %4626 = vmatprep.mubr.f32.mxu1 %v9458_v44 }
0x11ac   :  { %v4387_v2 = vpop.f32.mrb[36].mxu0 }
0x11ad   :  { %v4388_v35 = vadd.f32 %v4387_v2, %v9459_v32  ;;  %v4389_v17 = vpop.f32.mrb[37].mxu0  ;;  %v4464_v53 = vpop.f32.mrb[36].mxu1 }
0x11ae   :  { %v4390_v27 = vadd.f32 %v4389_v17, %v9459_v32  ;;  %v4465_v46 = vadd.f32 %v4464_v53, %v9459_v32  ;;  %v4466_v19 = vpop.f32.mrb[37].mxu1 }
0x11af   :  { %v4467_v39 = vadd.f32 %v4466_v19, %v9459_v32  ;;  %v4475_v8 = vmul.f32 0.2, %v4388_v35 }
0x11b0   :  { %v4393_v0 = vpop.f32.mrb[38].mxu0  ;;  %v4476_v13 = vmul.f32 0.2, %v4390_v27  ;;  %v4477_v36 = vmul.f32 0.2, %v4465_v46 }
0x11b1   :  { %v4394_v61 = vadd.f32 %v4393_v0, %v9460_v48  ;;  %v4395_v24 = vpop.f32.mrb[39].mxu0  ;;  %v4470_v26 = vpop.f32.mrb[38].mxu1  ;;  %v4478_v4 = vmul.f32 0.2, %v4467_v39  ;;  %v4483_v18 = vmax.f32 %v4388_v35, %v4475_v8 }
0x11b2   :  { %v4396_v57 = vadd.f32 %v4395_v24, %v9460_v48  ;;  %v4471_v49 = vadd.f32 %v4470_v26, %v9460_v48  ;;  %v4472_v43 = vpop.f32.mrb[39].mxu1  ;;  %v4484_v3 = vmax.f32 %v4390_v27, %v4476_v13  ;;  %v4485_v41 = vmax.f32 %v4465_v46, %v4477_v36 }
0x11b3   :  { %v4479_v54 = vmul.f32 0.2, %v4394_v61  ;;  %v4473_v56 = vadd.f32 %v4472_v43, %v9460_v48  ;;  %v4486_v5 = vmax.f32 %v4467_v39, %v4478_v4 }
0x11b4   :  { %v4480_v28 = vmul.f32 0.2, %v4396_v57  ;;  %v4481_v55 = vmul.f32 0.2, %v4471_v49 }
0x11b5   :  { %v4487_v6 = vmax.f32 %v4394_v61, %v4479_v54  ;;  %v4482_v59 = vmul.f32 0.2, %v4473_v56 }
0x11b6   :  { %v4488_v34 = vmax.f32 %v4396_v57, %v4480_v28  ;;  %v4489_v10 = vmax.f32 %v4471_v49, %v4481_v55 }
0x11b7   :  { %v6796_v58 = vpack.c.bf16 %v4487_v6, %v4483_v18  ;;  %v4490_v30 = vmax.f32 %v4473_v56, %v4482_v59 }
0x11b8   :  { %v6800_v23 = vpack.c.bf16 %v4489_v10, %v4485_v41  ;;  %v6794_v47 = vpack.c.bf16 %v4488_v34, %v4484_v3 }
0x11b9   :  { %v6798_v9 = vpack.c.bf16 %v4490_v30, %v4486_v5 }
0x11ba   :  { %6795 = vmatprep.subr.bf16.mxu0 %v6794_v47 }
0x11bb   :  { %6797 = vmatpush1.bf16.msra.mxu0 %v6796_v58  ;;  %6799 = vmatprep.subr.bf16.mxu1 %v6798_v9 }
0x11bc   :  { %6801 = vmatpush1.bf16.msra.mxu1 %v6800_v23 }
0x11be   :  { %6614 = vmatmul.mubr.msk.f32.vlgmr.msra.gmra.mrb[40].mxu0 %vm887_vm1, %v8747_v62 }
0x11bf   :  { %6615 = vmatmul.mubr.msk.f32.vlgmr.msra.gmra.mrb[40].mxu1 %vm887_vm1, %v8747_v62  ;;  %4985 = vmatprep.mubr.f32.mxu0 %v9458_v44 }
0x11c0   :  { %5062 = vmatprep.mubr.f32.mxu1 %v9458_v44 }
0x1291   :  { %v4557_v29 = vpop.f32.mrb[40].mxu0 }
0x1292   :  { %v4558_v20 = vadd.f32 %v4557_v29, %v7830_v22  ;;  %v4559_v33 = vpop.f32.mrb[41].mxu0  ;;  %v4628_v38 = vpop.f32.mrb[40].mxu1 }
0x1293   :  { %v4560_v12 = vadd.f32 %v4559_v33, %v7830_v22  ;;  %v4629_v21 = vadd.f32 %v4628_v38, %v7830_v22  ;;  %v4630_v42 = vpop.f32.mrb[41].mxu1 }
0x1294   :  { %v4633_v45 = vadd.f32 %v4558_v20, %v7833_v60  ;;  %v4631_v52 = vadd.f32 %v4630_v42, %v7830_v22 }
0x1295   :  { %v4634_v62 = vadd.f32 %v4560_v12, %v7837_v51  ;;  %v4635_v15 = vadd.f32 %v4629_v21, %v7840_v16 }
0x1296   :  { %v4637_v1 = vsel %vm518_vm10, %v4633_v45, -inf  ;;  %v4636_v7 = vadd.f32 %v4631_v52, %v7845_v25 }
0x1297   :  { %v4638_v63 = vrot.slane %v4637_v1, 4  ;;  %v4644_v40 = vsel %vm518_vm10, %v4634_v62, -inf  ;;  %v4651_v50 = vsel %vm518_vm10, %v4635_v15, -inf }
0x1298   :  { %v4645_v11 = vrot.slane %v4644_v40, 4  ;;  %v4652_v14 = vrot.slane %v4651_v50, 4  ;;  %v4658_v37 = vsel %vm518_vm10, %v4636_v7, -inf }
0x1299   :  { %v4639_v2 = vmax.f32 %v4637_v1, %v4638_v63  ;;  %v4659_v35 = vrot.slane %v4658_v37, 4 }
0x129a   :  { %v4646_v17 = vmax.f32 %v4644_v40, %v4645_v11  ;;  %v4653_v53 = vmax.f32 %v4651_v50, %v4652_v14 }
0x129b   :  { %v4640_v27 = vrot.slane %v4639_v2, 2  ;;  %v4660_v46 = vmax.f32 %v4658_v37, %v4659_v35 }
0x129c   :  { %v4647_v19 = vrot.slane %v4646_v17, 2  ;;  %v4654_v39 = vrot.slane %v4653_v53, 2 }
0x129d   :  { %v4641_v0 = vmax.f32 %v4639_v2, %v4640_v27  ;;  %v4661_v8 = vrot.slane %v4660_v46, 2 }
0x129e   :  { %v4648_v61 = vmax.f32 %v4646_v17, %v4647_v19  ;;  %v4655_v24 = vmax.f32 %v4653_v53, %v4654_v39 }
0x129f   :  { %v4642_v26 = vrot.slane %v4641_v0, 1  ;;  %v4662_v13 = vmax.f32 %v4660_v46, %v4661_v8 }
0x12a0   :  { %v4649_v36 = vrot.slane %v4648_v61, 1  ;;  %v4656_v57 = vrot.slane %v4655_v24, 1 }
0x12a1   :  { %v4643_v49 = vmax.f32 %v4641_v0, %v4642_v26  ;;  %v4663_v43 = vrot.slane %v4662_v13, 1 }
0x12a2   :  { %v4650_v4 = vmax.f32 %v4648_v61, %v4649_v36  ;;  %v4657_v54 = vmax.f32 %v4655_v24, %v4656_v57 }
0x12a3   :  { %v4665_v56 = vsub.f32 %v4633_v45, %v4643_v49  ;;  %v4664_v28 = vmax.f32 %v4662_v13, %v4663_v43 }
0x12a4   :  { %v4666_v55 = vsub.f32 %v4634_v62, %v4650_v4  ;;  %v4667_v18 = vsub.f32 %v4635_v15, %v4657_v54 }
0x12a5   :  { %v4669_v6 = vmul.f32 1.442695, %v4665_v56  ;;  %v4668_v59 = vsub.f32 %v4636_v7, %v4664_v28 }
0x12a6   :  { %v4671_v3 = vmul.f32 1.442695, %v4666_v55  ;;  %v4673_v41 = vmul.f32 1.442695, %v4667_v18 }
0x12a7   :  { %7020 = vpow2.f32 %v4669_v6  ;;  %v4675_v34 = vmul.f32 1.442695, %v4668_v59 }
0x12a8   :  { %7022 = vpow2.f32 %v4671_v3 }
0x12a9   :  { %7024 = vpow2.f32 %v4673_v41 }
0x12aa   :  { %7026 = vpow2.f32 %v4675_v34 }
0x12b1   :  { %v7021_v10 = vpop.eup %7020 }
0x12b2   :  { %v7023_v5 = vpop.eup %7022  ;;  %v4677_v58 = vsel %vm518_vm10, %v7021_v10, 0.0 }
0x12b3   :  { %v7025_v30 = vpop.eup %7024  ;;  %v4678_v23 = vrot.slane %v4677_v58, 4  ;;  %v4684_v47 = vsel %vm518_vm10, %v7023_v5, 0.0 }
0x12b4   :  { %v7027_v9 = vpop.eup %7026  ;;  %v4685_v29 = vrot.slane %v4684_v47, 4  ;;  %v4691_v20 = vsel %vm518_vm10, %v7025_v30, 0.0 }
0x12b5   :  { %v4679_v33 = vadd.f32 %v4678_v23, %v4677_v58  ;;  %v4692_v38 = vrot.slane %v4691_v20, 4  ;;  %v4698_v12 = vsel %vm518_vm10, %v7027_v9, 0.0 }
0x12b6   :  { %v4686_v21 = vadd.f32 %v4685_v29, %v4684_v47  ;;  %v4699_v42 = vrot.slane %v4698_v12, 4 }
0x12b7   :  { %v4680_v45 = vrot.slane %v4679_v33, 2  ;;  %v4693_v52 = vadd.f32 %v4692_v38, %v4691_v20 }
0x12b8   :  { %v4687_v62 = vrot.slane %v4686_v21, 2  ;;  %v4700_v15 = vadd.f32 %v4699_v42, %v4698_v12 }
0x12b9   :  { %v4681_v1 = vadd.f32 %v4680_v45, %v4679_v33  ;;  %v4694_v7 = vrot.slane %v4693_v52, 2 }
0x12ba   :  { %v4688_v63 = vadd.f32 %v4687_v62, %v4686_v21  ;;  %v4701_v40 = vrot.slane %v4700_v15, 2 }
0x12bb   :  { %v4682_v50 = vrot.slane %v4681_v1, 1  ;;  %v4695_v11 = vadd.f32 %v4694_v7, %v4693_v52 }
0x12bc   :  { %v4689_v14 = vrot.slane %v4688_v63, 1  ;;  %v4702_v37 = vadd.f32 %v4701_v40, %v4700_v15 }
0x12bd   :  { %v4683_v2 = vadd.f32 %v4682_v50, %v4681_v1  ;;  %v4696_v35 = vrot.slane %v4695_v11, 1 }
0x12be   :  { %v4690_v17 = vadd.f32 %v4689_v14, %v4688_v63  ;;  %v4703_v53 = vrot.slane %v4702_v37, 1 }
0x12bf   :  { %7028 = vrcp.f32 %v4683_v2  ;;  %v4697_v27 = vadd.f32 %v4696_v35, %v4695_v11 }
0x12c0   :  { %7030 = vrcp.f32 %v4690_v17  ;;  %v4704_v46 = vadd.f32 %v4703_v53, %v4702_v37 }
0x12c1   :  { %7032 = vrcp.f32 %v4697_v27 }
0x12c2   :  { %7034 = vrcp.f32 %v4704_v46 }
0x12c9   :  { %v7029_v19 = vpop.eup %7028 }
0x12ca   :  { %v7031_v39 = vpop.eup %7030  ;;  %v4709_v0 = vmul.f32 %v7029_v19, %v7021_v10 }
0x12cb   :  { %v7033_v8 = vpop.eup %7032  ;;  %v4710_v61 = vmul.f32 %v7031_v39, %v7023_v5  ;;  %v8991_v39 = vld [vmem:[#allocation3 + $0x8] sm:$0xff] }
0x12cc   :  { %v7035_v24 = vpop.eup %7034  ;;  %4729 = vrot.lane.b32.xlu0 %v4709_v0, %s7239_s19  ;;  %v4711_v26 = vmul.f32 %v7033_v8, %v7025_v30  ;;  %v8994_v8 = vld [vmem:[#allocation3 + $0x28] sm:$0xff] }
0x12cd   :  { %4731 = vrot.lane.b32.xlu1 %v4710_v61, %s7239_s19  ;;  %v4712_v13 = vmul.f32 %v7035_v24, %v7027_v9 }
0x12d0   :  { %4733 = vrot.lane.b32.xlu0 %v4711_v26, %s7239_s19 }
0x12d1   :  { %4735 = vrot.lane.b32.xlu1 %v4712_v13, %s7239_s19 }
0x12d4   :  { %4773 = vrot.lane.b32.xlu0 %v4709_v0, %s7242_s21 }
0x12d5   :  { %4775 = vrot.lane.b32.xlu1 %v4710_v61, %s7242_s21 }
0x12d8   :  { %4777 = vrot.lane.b32.xlu0 %v4711_v26, %s7242_s21 }
0x12d9   :  { %4779 = vrot.lane.b32.xlu1 %v4712_v13, %s7242_s21 }
0x12dc   :  { %4713 = vrot.lane.b32.xlu0 %v4709_v0, %s7240_s20 }
0x12dd   :  { %4715 = vrot.lane.b32.xlu1 %v4710_v61, %s7240_s20 }
0x12e0   :  { %4717 = vrot.lane.b32.xlu0 %v4711_v26, %s7240_s20 }
0x12e1   :  { %4719 = vrot.lane.b32.xlu1 %v4712_v13, %s7240_s20 }
0x12e4   :  { %4757 = vrot.lane.b32.xlu0 %v4709_v0, %s7243_s22 }
0x12e5   :  { %4759 = vrot.lane.b32.xlu1 %v4710_v61, %s7243_s22 }
0x12e8   :  { %4761 = vrot.lane.b32.xlu0 %v4711_v26, %s7243_s22 }
0x12e9   :  { %4763 = vrot.lane.b32.xlu1 %v4712_v13, %s7243_s22 }
0x12ec   :  { %4817 = vrot.lane.b32.xlu0 %v4709_v0, %s7244_s1 }
0x12ed   :  { %4819 = vrot.lane.b32.xlu1 %v4710_v61, %s7244_s1 }
0x12f0   :  { %4821 = vrot.lane.b32.xlu0 %v4711_v26, %s7244_s1 }
0x12f1   :  { %4823 = vrot.lane.b32.xlu1 %v4712_v13, %s7244_s1 }
0x12f4   :  { %4861 = vrot.lane.b32.xlu0 %v4709_v0, %s7245_s23 }
0x12f5   :  { %4863 = vrot.lane.b32.xlu1 %v4710_v61, %s7245_s23 }
0x12f8   :  { %4865 = vrot.lane.b32.xlu0 %v4711_v26, %s7245_s23 }
0x12f9   :  { %4867 = vrot.lane.b32.xlu1 %v4712_v13, %s7245_s23 }
0x12fc   :  { %4801 = vrot.lane.b32.xlu0 %v4709_v0, %s7246_s24 }
0x12fd   :  { %4803 = vrot.lane.b32.xlu1 %v4710_v61, %s7246_s24 }
0x1300   :  { %4805 = vrot.lane.b32.xlu0 %v4711_v26, %s7246_s24 }
0x1301   :  { %4807 = vrot.lane.b32.xlu1 %v4712_v13, %s7246_s24 }
0x1304   :  { %4845 = vrot.lane.b32.xlu0 %v4709_v0, %s7247_s25 }
0x1305   :  { %4847 = vrot.lane.b32.xlu1 %v4710_v61, %s7247_s25 }
0x1308   :  { %4849 = vrot.lane.b32.xlu0 %v4711_v26, %s7247_s25 }
0x1309   :  { %4851 = vrot.lane.b32.xlu1 %v4712_v13, %s7247_s25 }
0x133e   :  { %v4730_v36 = vpop.permute.xlu0 %4729 }
0x133f   :  { %v4732_v57 = vpop.permute.xlu1 %4731 }
0x1340   :  { %v4739_v49 = vsel %vm151_vm3, %v4730_v36, %v4732_v57 }
0x1341   :  { %v4746_v43 = vrot.slane %v4739_v49, 4 }
0x1342   :  { %v4734_v4 = vpop.permute.xlu0 %4733 }
0x1343   :  { %4754 = vst [vmem:[#allocation2 + $0x8] sm:$0xf0] %v4746_v43  ;;  %v4738_v54 = vsel %vm151_vm3, %v4732_v57, %v4734_v4  ;;  %v4736_v56 = vpop.permute.xlu1 %4735  ;;  %v8999_v57 = vld [vmem:[#allocation3] sm:$0xff]  ;;  %v9002_v43 = vld [vmem:[#allocation3 + $0x18] sm:$0xff] }
0x1344   :  { %v4747_v28 = vrot.slane %v4738_v54, 4  ;;  %v4737_v55 = vsel %vm151_vm3, %v4734_v4, %v4736_v56  ;;  %v4740_v18 = vsel %vm151_vm3, %v4736_v56, %v4730_v36 }
0x1345   :  { %v4745_v6 = vrot.slane %v4740_v18, 4  ;;  %v4748_v59 = vrot.slane %v4737_v55, 4 }
0x1346   :  { %4755 = vst [vmem:[#allocation2 + $0x10] sm:$0xf0] %v4747_v28  ;;  %v4774_v3 = vpop.permute.xlu0 %4773 }
0x1347   :  { %4753 = vst [vmem:[#allocation2] sm:$0xf0] %v4745_v6  ;;  %4756 = vst [vmem:[#allocation2 + $0x18] sm:$0xf0] %v4748_v59  ;;  %v4776_v41 = vpop.permute.xlu1 %4775 }
0x1348   :  { %v4783_v34 = vsel %vm253_vm5, %v4774_v3, %v4776_v41 }
0x1349   :  { %v4790_v10 = vrot.slane %v4783_v34, 4 }
0x134a   :  { %v4778_v5 = vpop.permute.xlu0 %4777 }
0x134b   :  { %4798 = vst [vmem:[#allocation2 + $0x28] sm:$0xf0] %v4790_v10  ;;  %v4782_v58 = vsel %vm253_vm5, %v4776_v41, %v4778_v5  ;;  %v4780_v30 = vpop.permute.xlu1 %4779 }
0x134c   :  { %v4791_v23 = vrot.slane %v4782_v58, 4  ;;  %v4781_v47 = vsel %vm253_vm5, %v4778_v5, %v4780_v30  ;;  %v4784_v9 = vsel %vm253_vm5, %v4780_v30, %v4774_v3  ;;  %v9009_v3 = vld [vmem:[#allocation3 + $0x30] sm:$0xff]  ;;  %v9012_v5 = vld [vmem:[#allocation3 + $0x20] sm:$0xff]  ;;  %v9015_v30 = vld [vmem:[#allocation3 + $0x38] sm:$0xff] }
0x134d   :  { %v4789_v29 = vrot.slane %v4784_v9, 4  ;;  %v4792_v20 = vrot.slane %v4781_v47, 4  ;;  %v9018_v9 = vld [vmem:[#allocation3 + $0x10] sm:$0xff] }
0x134e   :  { %4799 = vst [vmem:[#allocation2 + $0x30] sm:$0xf0] %v4791_v23  ;;  %v4714_v33 = vpop.permute.xlu0 %4713 }
0x134f   :  { %4797 = vst [vmem:[#allocation2 + $0x20] sm:$0xf0] %v4789_v29  ;;  %4800 = vst [vmem:[#allocation2 + $0x38] sm:$0xf0] %v4792_v20  ;;  %v4716_v38 = vpop.permute.xlu1 %4715 }
0x1350   :  { %v4723_v12 = vsel %vm105_vm2, %v4714_v33, %v4716_v38 }
0x1351   :  { %4726 = vst [vmem:[#allocation2 + $0x8] sm:$0xf] %v4723_v12 }
0x1352   :  { %v4718_v21 = vpop.permute.xlu0 %4717 }
0x1353   :  { %v4722_v42 = vsel %vm105_vm2, %v4716_v38, %v4718_v21  ;;  %v4720_v45 = vpop.permute.xlu1 %4719 }
0x1354   :  { %4727 = vst [vmem:[#allocation2 + $0x10] sm:$0xf] %v4722_v42  ;;  %v4721_v52 = vsel %vm105_vm2, %v4718_v21, %v4720_v45  ;;  %v4724_v62 = vsel %vm105_vm2, %v4720_v45, %v4714_v33 }
0x1355   :  { %4725 = vst [vmem:[#allocation2] sm:$0xf] %v4724_v62  ;;  %4728 = vst [vmem:[#allocation2 + $0x18] sm:$0xf] %v4721_v52 }
0x1356   :  { %v4758_v15 = vpop.permute.xlu0 %4757 }
0x1357   :  { %v4760_v1 = vpop.permute.xlu1 %4759 }
0x1358   :  { %v4767_v7 = vsel %vm208_vm4, %v4758_v15, %v4760_v1  ;;  %v4890_v2 = vld [vmem:[#allocation2 + $0x8] sm:$0xff] }
0x1359   :  { %4770 = vst [vmem:[#allocation2 + $0x28] sm:$0xf] %v4767_v7  ;;  %v4906_v0 = vmul.f32 %v8991_v39, %v4890_v2 }
0x135a   :  { %v4762_v63 = vpop.permute.xlu0 %4761 }
0x135b   :  { %v4766_v40 = vsel %vm208_vm4, %v4760_v1, %v4762_v63  ;;  %v4764_v50 = vpop.permute.xlu1 %4763  ;;  %v4891_v54 = vld [vmem:[#allocation2 + $0x10] sm:$0xff] }
0x135c   :  { %4771 = vst [vmem:[#allocation2 + $0x30] sm:$0xf] %v4766_v40  ;;  %v4765_v11 = vsel %vm208_vm4, %v4762_v63, %v4764_v50  ;;  %v4768_v14 = vsel %vm208_vm4, %v4764_v50, %v4758_v15  ;;  %v4889_v27 = vld [vmem:[#allocation2] sm:$0xff]  ;;  %v4892_v46 = vld [vmem:[#allocation2 + $0x18] sm:$0xff]  ;;  %v4907_v29 = vmul.f32 %v9018_v9, %v4891_v54 }
0x135d   :  { %4769 = vst [vmem:[#allocation2 + $0x20] sm:$0xf] %v4768_v14  ;;  %4772 = vst [vmem:[#allocation2 + $0x38] sm:$0xf] %v4765_v11  ;;  %v4905_v49 = vmul.f32 %v8999_v57, %v4889_v27  ;;  %v4908_v4 = vmul.f32 %v9002_v43, %v4892_v46 }
0x135e   :  { %v4818_v37 = vpop.permute.xlu0 %4817 }
0x135f   :  { %v4820_v35 = vpop.permute.xlu1 %4819 }
0x1360   :  { %v4827_v17 = vsel %vm367_vm7, %v4818_v37, %v4820_v35  ;;  %v4894_v53 = vld [vmem:[#allocation2 + $0x28] sm:$0xff] }
0x1361   :  { %v4833_v19 = vrot.slane %v4827_v17, 4  ;;  %v4910_v61 = vmul.f32 %v8994_v8, %v4894_v53 }
0x1362   :  { %v4822_v24 = vpop.permute.xlu0 %4821 }
0x1363   :  { %4841 = vst [vmem:[#allocation2 + $0x40] sm:$0xf0] %v4833_v19  ;;  %v4826_v26 = vsel %vm367_vm7, %v4820_v35, %v4822_v24  ;;  %v4824_v13 = vpop.permute.xlu1 %4823  ;;  %v6802_v36 = vpack.c.bf16 %v4910_v61, %v4906_v0  ;;  %v4895_v56 = vld [vmem:[#allocation2 + $0x30] sm:$0xff] }
0x1364   :  { %v4834_v28 = vrot.slane %v4826_v26, 4  ;;  %v4825_v55 = vsel %vm367_vm7, %v4822_v24, %v4824_v13  ;;  %v4828_v18 = vsel %vm367_vm7, %v4824_v13, %v4818_v37  ;;  %v4893_v6 = vld [vmem:[#allocation2 + $0x20] sm:$0xff]  ;;  %v4896_v59 = vld [vmem:[#allocation2 + $0x38] sm:$0xff]  ;;  %v4911_v41 = vmul.f32 %v9009_v3, %v4895_v56 }
0x1365   :  { %v4835_v34 = vrot.slane %v4825_v55, 4  ;;  %v4836_v10 = vrot.slane %v4828_v18, 4  ;;  %6803 = vmatprep.subr.bf16.mxu0 %v6802_v36  ;;  %v4909_v58 = vmul.f32 %v9012_v5, %v4893_v6  ;;  %v4912_v23 = vmul.f32 %v9015_v30, %v4896_v59  ;;  %v9045_v55 = vld [vmem:[#allocation3 + $0x60] sm:$0xff]  ;;  %v9048_v6 = vld [vmem:[#allocation3 + $0x48] sm:$0xff] }
0x1366   :  { %4842 = vst [vmem:[#allocation2 + $0x48] sm:$0xf0] %v4834_v28  ;;  %v4862_v47 = vpop.permute.xlu0 %4861  ;;  %v6812_v21 = vpack.c.bf16 %v4911_v41, %v4907_v29  ;;  %v9051_v41 = vld [vmem:[#allocation3 + $0x68] sm:$0xff]  ;;  %v9057_v29 = vld [vmem:[#allocation3 + $0x58] sm:$0xff] }
0x1367   :  { %4843 = vst [vmem:[#allocation2 + $0x50] sm:$0xf0] %v4835_v34  ;;  %4844 = vst [vmem:[#allocation2 + $0x58] sm:$0xf0] %v4836_v10  ;;  %v4864_v20 = vpop.permute.xlu1 %4863  ;;  %v6804_v33 = vpack.c.bf16 %v4909_v58, %v4905_v49  ;;  %v6810_v38 = vpack.c.bf16 %v4912_v23, %v4908_v4  ;;  %v9054_v10 = vld [vmem:[#allocation3 + $0x40] sm:$0xff] }
0x1368   :  { %v4871_v12 = vsel %vm469_vm9, %v4862_v47, %v4864_v20 }
0x1369   :  { %v4877_v42 = vrot.slane %v4871_v12, 4  ;;  %6805 = vmatpush1.bf16.msra.mxu0 %v6804_v33  ;;  %6811 = vmatprep.subr.bf16.mxu1 %v6810_v38  ;;  %v9060_v33 = vld [vmem:[#allocation3 + $0x78] sm:$0xff]  ;;  %v9063_v12 = vld [vmem:[#allocation3 + $0x50] sm:$0xff] }
0x136a   :  { %v4866_v45 = vpop.permute.xlu0 %4865  ;;  %6813 = vmatpush1.bf16.msra.mxu1 %v6812_v21 }
0x136b   :  { %4885 = vst [vmem:[#allocation2 + $0x60] sm:$0xf0] %v4877_v42  ;;  %v4870_v52 = vsel %vm469_vm9, %v4864_v20, %v4866_v45  ;;  %v4868_v62 = vpop.permute.xlu1 %4867  ;;  %v9066_v42 = vld [vmem:[#allocation3 + $0x70] sm:$0xff] }
0x136c   :  { %v4878_v15 = vrot.slane %v4870_v52, 4  ;;  %v4869_v1 = vsel %vm469_vm9, %v4866_v45, %v4868_v62  ;;  %v4872_v7 = vsel %vm469_vm9, %v4868_v62, %v4862_v47 }
0x136d   :  { %v4879_v63 = vrot.slane %v4869_v1, 4  ;;  %v4880_v40 = vrot.slane %v4872_v7, 4  ;;  %v9072_v7 = vld [vmem:[%s9439_s4] sm:$0xff] }
0x136e   :  { %4886 = vst [vmem:[#allocation2 + $0x68] sm:$0xf0] %v4878_v15  ;;  %v4802_v50 = vpop.permute.xlu0 %4801 }
0x136f   :  { %4887 = vst [vmem:[#allocation2 + $0x70] sm:$0xf0] %v4879_v63  ;;  %4888 = vst [vmem:[#allocation2 + $0x78] sm:$0xf0] %v4880_v40  ;;  %v4804_v11 = vpop.permute.xlu1 %4803  ;;  %v9083_v63 = vld [vmem:[%s9439_s4 + $0x8] sm:$0xff] }
0x1370   :  { %v4811_v14 = vsel %vm322_vm6, %v4802_v50, %v4804_v11 }
0x1371   :  { %4813 = vst [vmem:[#allocation2 + $0x40] sm:$0xf] %v4811_v14 }
0x1372   :  { %v4806_v37 = vpop.permute.xlu0 %4805 }
0x1373   :  { %v4810_v2 = vsel %vm322_vm6, %v4804_v11, %v4806_v37  ;;  %v4808_v35 = vpop.permute.xlu1 %4807 }
0x1374   :  { %4814 = vst [vmem:[#allocation2 + $0x48] sm:$0xf] %v4810_v2  ;;  %v4809_v17 = vsel %vm322_vm6, %v4806_v37, %v4808_v35  ;;  %v4812_v53 = vsel %vm322_vm6, %v4808_v35, %v4802_v50 }
0x1375   :  { %4815 = vst [vmem:[#allocation2 + $0x50] sm:$0xf] %v4809_v17  ;;  %4816 = vst [vmem:[#allocation2 + $0x58] sm:$0xf] %v4812_v53 }
0x1376   :  { %v4846_v27 = vpop.permute.xlu0 %4845 }
0x1377   :  { %v4848_v46 = vpop.permute.xlu1 %4847 }
0x1378   :  { %v4855_v19 = vsel %vm424_vm8, %v4846_v27, %v4848_v46  ;;  %v4897_v4 = vld [vmem:[#allocation2 + $0x40] sm:$0xff] }
0x1379   :  { %4857 = vst [vmem:[#allocation2 + $0x60] sm:$0xf] %v4855_v19  ;;  %v4913_v58 = vmul.f32 %v9054_v10, %v4897_v4 }
0x137a   :  { %v4850_v0 = vpop.permute.xlu0 %4849 }
0x137b   :  { %v4854_v61 = vsel %vm424_vm8, %v4848_v46, %v4850_v0  ;;  %v4852_v24 = vpop.permute.xlu1 %4851  ;;  %v4898_v49 = vld [vmem:[#allocation2 + $0x48] sm:$0xff] }
0x137c   :  { %4858 = vst [vmem:[#allocation2 + $0x68] sm:$0xf] %v4854_v61  ;;  %v4853_v26 = vsel %vm424_vm8, %v4850_v0, %v4852_v24  ;;  %v4856_v13 = vsel %vm424_vm8, %v4852_v24, %v4846_v27  ;;  %v4900_v54 = vld [vmem:[#allocation2 + $0x58] sm:$0xff]  ;;  %v4899_v56 = vld [vmem:[#allocation2 + $0x50] sm:$0xff]  ;;  %v4914_v59 = vmul.f32 %v9048_v6, %v4898_v49 }
0x137d   :  { %4859 = vst [vmem:[#allocation2 + $0x70] sm:$0xf] %v4853_v26  ;;  %4860 = vst [vmem:[#allocation2 + $0x78] sm:$0xf] %v4856_v13  ;;  %v4916_v20 = vmul.f32 %v9057_v29, %v4900_v54  ;;  %v4915_v21 = vmul.f32 %v9063_v12, %v4899_v56 }
0x1380   :  { %v4901_v36 = vld [vmem:[#allocation2 + $0x60] sm:$0xff] }
0x1381   :  { %v4917_v18 = vmul.f32 %v9045_v55, %v4901_v36 }
0x1383   :  { %v4902_v28 = vld [vmem:[#allocation2 + $0x68] sm:$0xff]  ;;  %v6808_v62 = vpack.c.bf16 %v4917_v18, %v4913_v58 }
0x1384   :  { %v4918_v34 = vmul.f32 %v9051_v41, %v4902_v28  ;;  %v4904_v23 = vld [vmem:[#allocation2 + $0x78] sm:$0xff]  ;;  %v4903_v47 = vld [vmem:[#allocation2 + $0x70] sm:$0xff] }
0x1385   :  { %v4920_v38 = vmul.f32 %v9060_v33, %v4904_v23  ;;  %v4919_v45 = vmul.f32 %v9066_v42, %v4903_v47 }
0x1386   :  { %v6806_v52 = vpack.c.bf16 %v4918_v34, %v4914_v59 }
0x1387   :  { %v6814_v15 = vpack.c.bf16 %v4920_v38, %v4916_v20  ;;  %v6816_v1 = vpack.c.bf16 %v4919_v45, %v4915_v21 }
0x1388   :  { %6807 = vmatprep.subr.bf16.mxu0 %v6806_v52 }
0x1389   :  { %6809 = vmatpush1.bf16.msra.mxu0 %v6808_v62  ;;  %6815 = vmatprep.subr.bf16.mxu1 %v6814_v15 }
0x138a   :  { %6817 = vmatpush1.bf16.msra.mxu1 %v6816_v1  ;;  %v9102_v1 = vld [vmem:[%s9441_s6] sm:$0xf] }
0x138c   :  { %6616 = vmatmul.mubr.msk.f32.vlgmr.msra.gmra.mrb[42].mxu0 %vm710_vm0, %v9072_v7 }
0x138d   :  { %6618 = vmatmul.mubr.msk.f32.vlgmr.msra.gmra.mrb[42].mxu1 %vm710_vm0, %v9072_v7  ;;  %4991 = vmatprep.mubr.f32.mxu0 %v9458_v44 }
0x138e   :  { %5068 = vmatprep.mubr.f32.mxu1 %v9458_v44 }
0x1390   :  { %6617 = vmatmul.mubr.msk.f32.gmra.mrb[44].mxu0 %vm710_vm0, %v9083_v63 }
0x1391   :  { %6619 = vmatmul.mubr.msk.f32.gmra.mrb[44].mxu1 %vm710_vm0, %v9083_v63  ;;  %5155 = vmatprep.mubr.f32.mxu0 %v9458_v44 }
0x1392   :  { %5226 = vmatprep.mubr.f32.mxu1 %v9458_v44 }
0x145f   :  { %v4987_v40 = vpop.f32.mrb[42].mxu0 }
0x1460   :  { %v4988_v50 = vadd.f32 %v4987_v40, %v9459_v32  ;;  %v4989_v11 = vpop.f32.mrb[43].mxu0  ;;  %v5064_v14 = vpop.f32.mrb[42].mxu1 }
0x1461   :  { %v4990_v37 = vadd.f32 %v4989_v11, %v9459_v32  ;;  %v5065_v2 = vadd.f32 %v5064_v14, %v9459_v32  ;;  %v5066_v35 = vpop.f32.mrb[43].mxu1 }
0x1462   :  { %v5067_v17 = vadd.f32 %v5066_v35, %v9459_v32  ;;  %v5075_v27 = vmul.f32 0.2, %v4988_v50 }
0x1463   :  { %v4993_v53 = vpop.f32.mrb[44].mxu0  ;;  %v5076_v61 = vmul.f32 0.2, %v4990_v37  ;;  %v5077_v24 = vmul.f32 0.2, %v5065_v2 }
0x1464   :  { %v4994_v46 = vadd.f32 %v4993_v53, %v9460_v48  ;;  %v4995_v19 = vpop.f32.mrb[45].mxu0  ;;  %v5070_v0 = vpop.f32.mrb[44].mxu1  ;;  %v5078_v49 = vmul.f32 0.2, %v5067_v17  ;;  %v5083_v18 = vmax.f32 %v4988_v50, %v5075_v27 }
0x1465   :  { %v4996_v26 = vadd.f32 %v4995_v19, %v9460_v48  ;;  %v5071_v13 = vadd.f32 %v5070_v0, %v9460_v48  ;;  %v5072_v36 = vpop.f32.mrb[45].mxu1  ;;  %v5084_v58 = vmax.f32 %v4990_v37, %v5076_v61  ;;  %v5085_v23 = vmax.f32 %v5065_v2, %v5077_v24 }
0x1466   :  { %v5079_v4 = vmul.f32 0.2, %v4994_v46  ;;  %v5073_v54 = vadd.f32 %v5072_v36, %v9460_v48  ;;  %v5086_v38 = vmax.f32 %v5067_v17, %v5078_v49 }
0x1467   :  { %v5080_v56 = vmul.f32 0.2, %v4996_v26  ;;  %v5081_v28 = vmul.f32 0.2, %v5071_v13 }
0x1468   :  { %v5087_v59 = vmax.f32 %v4994_v46, %v5079_v4  ;;  %v5082_v34 = vmul.f32 0.2, %v5073_v54 }
0x1469   :  { %v5088_v47 = vmax.f32 %v4996_v26, %v5080_v56  ;;  %v5089_v20 = vmax.f32 %v5071_v13, %v5081_v28 }
0x146a   :  { %v6820_v21 = vpack.c.bf16 %v5087_v59, %v5083_v18  ;;  %v5090_v45 = vmax.f32 %v5073_v54, %v5082_v34 }
0x146b   :  { %v6824_v52 = vpack.c.bf16 %v5089_v20, %v5085_v23  ;;  %v6818_v62 = vpack.c.bf16 %v5088_v47, %v5084_v58 }
0x146c   :  { %v6822_v15 = vpack.c.bf16 %v5090_v45, %v5086_v38 }
0x146d   :  { %6819 = vmatprep.subr.bf16.mxu0 %v6818_v62 }
0x146e   :  { %6821 = vmatpush1.bf16.msra.mxu0 %v6820_v21  ;;  %6823 = vmatprep.subr.bf16.mxu1 %v6822_v15 }
0x146f   :  { %6825 = vmatpush1.bf16.msra.mxu1 %v6824_v52 }
0x1471   :  { %6620 = vmatmul.mubr.msk.f32.vlgmr.msra.gmra.mrb[46].mxu0 %vm887_vm1, %v9102_v1 }
0x1472   :  { %6621 = vmatmul.mubr.msk.f32.vlgmr.msra.gmra.mrb[46].mxu1 %vm887_vm1, %v9102_v1  ;;  %5585 = vmatprep.mubr.f32.mxu0 %v9458_v44 }
0x1473   :  { %5662 = vmatprep.mubr.f32.mxu1 %v9458_v44 }
0x1544   :  { %v5157_v40 = vpop.f32.mrb[46].mxu0 }
0x1545   :  { %v5158_v50 = vadd.f32 %v5157_v40, %v7830_v22  ;;  %v5159_v11 = vpop.f32.mrb[47].mxu0  ;;  %v5228_v14 = vpop.f32.mrb[46].mxu1 }
0x1546   :  { %v5160_v37 = vadd.f32 %v5159_v11, %v7830_v22  ;;  %v5229_v2 = vadd.f32 %v5228_v14, %v7830_v22  ;;  %v5230_v35 = vpop.f32.mrb[47].mxu1 }
0x1547   :  { %v5233_v17 = vadd.f32 %v5158_v50, %v7833_v60  ;;  %v5231_v53 = vadd.f32 %v5230_v35, %v7830_v22 }
0x1548   :  { %v5234_v27 = vadd.f32 %v5160_v37, %v7837_v51  ;;  %v5235_v46 = vadd.f32 %v5229_v2, %v7840_v16 }
0x1549   :  { %v5237_v19 = vsel %vm518_vm10, %v5233_v17, -inf  ;;  %v5236_v0 = vadd.f32 %v5231_v53, %v7845_v25 }
0x154a   :  { %v5238_v61 = vrot.slane %v5237_v19, 4  ;;  %v5244_v24 = vsel %vm518_vm10, %v5234_v27, -inf  ;;  %v5251_v26 = vsel %vm518_vm10, %v5235_v46, -inf }
0x154b   :  { %v5245_v13 = vrot.slane %v5244_v24, 4  ;;  %v5252_v36 = vrot.slane %v5251_v26, 4  ;;  %v5258_v49 = vsel %vm518_vm10, %v5236_v0, -inf }
0x154c   :  { %v5239_v4 = vmax.f32 %v5237_v19, %v5238_v61  ;;  %v5259_v54 = vrot.slane %v5258_v49, 4 }
0x154d   :  { %v5246_v56 = vmax.f32 %v5244_v24, %v5245_v13  ;;  %v5253_v28 = vmax.f32 %v5251_v26, %v5252_v36 }
0x154e   :  { %v5240_v18 = vrot.slane %v5239_v4, 2  ;;  %v5260_v59 = vmax.f32 %v5258_v49, %v5259_v54 }
0x154f   :  { %v5247_v34 = vrot.slane %v5246_v56, 2  ;;  %v5254_v58 = vrot.slane %v5253_v28, 2 }
0x1550   :  { %v5241_v23 = vmax.f32 %v5239_v4, %v5240_v18  ;;  %v5261_v47 = vrot.slane %v5260_v59, 2 }
0x1551   :  { %v5248_v20 = vmax.f32 %v5246_v56, %v5247_v34  ;;  %v5255_v38 = vmax.f32 %v5253_v28, %v5254_v58 }
0x1552   :  { %v5242_v21 = vrot.slane %v5241_v23, 1  ;;  %v5262_v45 = vmax.f32 %v5260_v59, %v5261_v47 }
0x1553   :  { %v5249_v52 = vrot.slane %v5248_v20, 1  ;;  %v5256_v62 = vrot.slane %v5255_v38, 1 }
0x1554   :  { %v5243_v15 = vmax.f32 %v5241_v23, %v5242_v21  ;;  %v5263_v40 = vrot.slane %v5262_v45, 1 }
0x1555   :  { %v5250_v50 = vmax.f32 %v5248_v20, %v5249_v52  ;;  %v5257_v11 = vmax.f32 %v5255_v38, %v5256_v62 }
0x1556   :  { %v5265_v14 = vsub.f32 %v5233_v17, %v5243_v15  ;;  %v5264_v37 = vmax.f32 %v5262_v45, %v5263_v40 }
0x1557   :  { %v5266_v2 = vsub.f32 %v5234_v27, %v5250_v50  ;;  %v5267_v35 = vsub.f32 %v5235_v46, %v5257_v11 }
0x1558   :  { %v5269_v53 = vmul.f32 1.442695, %v5265_v14  ;;  %v5268_v19 = vsub.f32 %v5236_v0, %v5264_v37 }
0x1559   :  { %v5271_v61 = vmul.f32 1.442695, %v5266_v2  ;;  %v5273_v24 = vmul.f32 1.442695, %v5267_v35 }
0x155a   :  { %7036 = vpow2.f32 %v5269_v53  ;;  %v5275_v26 = vmul.f32 1.442695, %v5268_v19 }
0x155b   :  { %7038 = vpow2.f32 %v5271_v61 }
0x155c   :  { %7040 = vpow2.f32 %v5273_v24 }
0x155d   :  { %7042 = vpow2.f32 %v5275_v26 }
0x1564   :  { %v7037_v13 = vpop.eup %7036 }
0x1565   :  { %v7039_v36 = vpop.eup %7038  ;;  %v5277_v49 = vsel %vm518_vm10, %v7037_v13, 0.0 }
0x1566   :  { %v7041_v4 = vpop.eup %7040  ;;  %v5278_v54 = vrot.slane %v5277_v49, 4  ;;  %v5284_v17 = vsel %vm518_vm10, %v7039_v36, 0.0 }
0x1567   :  { %v7043_v56 = vpop.eup %7042  ;;  %v5285_v27 = vrot.slane %v5284_v17, 4  ;;  %v5291_v46 = vsel %vm518_vm10, %v7041_v4, 0.0 }
0x1568   :  { %v5279_v0 = vadd.f32 %v5278_v54, %v5277_v49  ;;  %v5292_v28 = vrot.slane %v5291_v46, 4  ;;  %v5298_v18 = vsel %vm518_vm10, %v7043_v56, 0.0 }
0x1569   :  { %v5286_v59 = vadd.f32 %v5285_v27, %v5284_v17  ;;  %v5299_v34 = vrot.slane %v5298_v18, 4 }
0x156a   :  { %v5280_v58 = vrot.slane %v5279_v0, 2  ;;  %v5293_v23 = vadd.f32 %v5292_v28, %v5291_v46 }
0x156b   :  { %v5287_v47 = vrot.slane %v5286_v59, 2  ;;  %v5300_v20 = vadd.f32 %v5299_v34, %v5298_v18 }
0x156c   :  { %v5281_v38 = vadd.f32 %v5280_v58, %v5279_v0  ;;  %v5294_v21 = vrot.slane %v5293_v23, 2 }
0x156d   :  { %v5288_v45 = vadd.f32 %v5287_v47, %v5286_v59  ;;  %v5301_v52 = vrot.slane %v5300_v20, 2 }
0x156e   :  { %v5282_v62 = vrot.slane %v5281_v38, 1  ;;  %v5295_v15 = vadd.f32 %v5294_v21, %v5293_v23 }
0x156f   :  { %v5289_v40 = vrot.slane %v5288_v45, 1  ;;  %v5302_v50 = vadd.f32 %v5301_v52, %v5300_v20 }
0x1570   :  { %v5283_v11 = vadd.f32 %v5282_v62, %v5281_v38  ;;  %v5296_v14 = vrot.slane %v5295_v15, 1 }
0x1571   :  { %v5290_v37 = vadd.f32 %v5289_v40, %v5288_v45  ;;  %v5303_v2 = vrot.slane %v5302_v50, 1 }
0x1572   :  { %7044 = vrcp.f32 %v5283_v11  ;;  %v5297_v35 = vadd.f32 %v5296_v14, %v5295_v15 }
0x1573   :  { %7046 = vrcp.f32 %v5290_v37  ;;  %v5304_v53 = vadd.f32 %v5303_v2, %v5302_v50 }
0x1574   :  { %7048 = vrcp.f32 %v5297_v35 }
0x1575   :  { %7050 = vrcp.f32 %v5304_v53 }
0x157c   :  { %v7045_v19 = vpop.eup %7044 }
0x157d   :  { %v7047_v61 = vpop.eup %7046  ;;  %v5309_v24 = vmul.f32 %v7045_v19, %v7037_v13 }
0x157e   :  { %v7049_v26 = vpop.eup %7048  ;;  %v5310_v49 = vmul.f32 %v7047_v61, %v7039_v36 }
0x157f   :  { %v7051_v54 = vpop.eup %7050  ;;  %5329 = vrot.lane.b32.xlu0 %v5309_v24, %s7239_s19  ;;  %v5311_v17 = vmul.f32 %v7049_v26, %v7041_v4 }
0x1580   :  { %5331 = vrot.lane.b32.xlu1 %v5310_v49, %s7239_s19  ;;  %v5312_v27 = vmul.f32 %v7051_v54, %v7043_v56 }
0x1583   :  { %5333 = vrot.lane.b32.xlu0 %v5311_v17, %s7239_s19 }
0x1584   :  { %5335 = vrot.lane.b32.xlu1 %v5312_v27, %s7239_s19 }
0x1587   :  { %5373 = vrot.lane.b32.xlu0 %v5309_v24, %s7242_s21 }
0x1588   :  { %5375 = vrot.lane.b32.xlu1 %v5310_v49, %s7242_s21 }
0x158b   :  { %5377 = vrot.lane.b32.xlu0 %v5311_v17, %s7242_s21 }
0x158c   :  { %5379 = vrot.lane.b32.xlu1 %v5312_v27, %s7242_s21 }
0x158f   :  { %5313 = vrot.lane.b32.xlu0 %v5309_v24, %s7240_s20 }
0x1590   :  { %5315 = vrot.lane.b32.xlu1 %v5310_v49, %s7240_s20 }
0x1593   :  { %5317 = vrot.lane.b32.xlu0 %v5311_v17, %s7240_s20 }
0x1594   :  { %5319 = vrot.lane.b32.xlu1 %v5312_v27, %s7240_s20 }
0x1597   :  { %5357 = vrot.lane.b32.xlu0 %v5309_v24, %s7243_s22 }
0x1598   :  { %5359 = vrot.lane.b32.xlu1 %v5310_v49, %s7243_s22 }
0x159b   :  { %5361 = vrot.lane.b32.xlu0 %v5311_v17, %s7243_s22 }
0x159c   :  { %5363 = vrot.lane.b32.xlu1 %v5312_v27, %s7243_s22 }
0x159f   :  { %5417 = vrot.lane.b32.xlu0 %v5309_v24, %s7244_s1 }
0x15a0   :  { %5419 = vrot.lane.b32.xlu1 %v5310_v49, %s7244_s1 }
0x15a3   :  { %5421 = vrot.lane.b32.xlu0 %v5311_v17, %s7244_s1 }
0x15a4   :  { %5423 = vrot.lane.b32.xlu1 %v5312_v27, %s7244_s1 }
0x15a7   :  { %5461 = vrot.lane.b32.xlu0 %v5309_v24, %s7245_s23 }
0x15a8   :  { %5463 = vrot.lane.b32.xlu1 %v5310_v49, %s7245_s23 }
0x15ab   :  { %5465 = vrot.lane.b32.xlu0 %v5311_v17, %s7245_s23 }
0x15ac   :  { %5467 = vrot.lane.b32.xlu1 %v5312_v27, %s7245_s23 }
0x15af   :  { %5401 = vrot.lane.b32.xlu0 %v5309_v24, %s7246_s24 }
0x15b0   :  { %5403 = vrot.lane.b32.xlu1 %v5310_v49, %s7246_s24 }
0x15b3   :  { %5405 = vrot.lane.b32.xlu0 %v5311_v17, %s7246_s24 }
0x15b4   :  { %5407 = vrot.lane.b32.xlu1 %v5312_v27, %s7246_s24 }
0x15b7   :  { %5445 = vrot.lane.b32.xlu0 %v5309_v24, %s7247_s25 }
0x15b8   :  { %5447 = vrot.lane.b32.xlu1 %v5310_v49, %s7247_s25 }
0x15bb   :  { %5449 = vrot.lane.b32.xlu0 %v5311_v17, %s7247_s25 }
0x15bc   :  { %5451 = vrot.lane.b32.xlu1 %v5312_v27, %s7247_s25 }
0x15f1   :  { %v5330_v13 = vpop.permute.xlu0 %5329 }
0x15f2   :  { %v5332_v36 = vpop.permute.xlu1 %5331 }
0x15f3   :  { %v5339_v4 = vsel %vm151_vm3, %v5330_v13, %v5332_v36 }
0x15f4   :  { %v5346_v56 = vrot.slane %v5339_v4, 4 }
0x15f5   :  { %v5334_v46 = vpop.permute.xlu0 %5333 }
0x15f6   :  { %5354 = vst [vmem:[#allocation2 + $0x8] sm:$0xf0] %v5346_v56  ;;  %v5338_v0 = vsel %vm151_vm3, %v5332_v36, %v5334_v46  ;;  %v5336_v28 = vpop.permute.xlu1 %5335 }
0x15f7   :  { %v5347_v18 = vrot.slane %v5338_v0, 4  ;;  %v5337_v59 = vsel %vm151_vm3, %v5334_v46, %v5336_v28  ;;  %v5340_v34 = vsel %vm151_vm3, %v5336_v28, %v5330_v13 }
0x15f8   :  { %v5345_v58 = vrot.slane %v5340_v34, 4  ;;  %v5348_v23 = vrot.slane %v5337_v59, 4 }
0x15f9   :  { %5355 = vst [vmem:[#allocation2 + $0x10] sm:$0xf0] %v5347_v18  ;;  %v5374_v47 = vpop.permute.xlu0 %5373 }
0x15fa   :  { %5353 = vst [vmem:[#allocation2] sm:$0xf0] %v5345_v58  ;;  %5356 = vst [vmem:[#allocation2 + $0x18] sm:$0xf0] %v5348_v23  ;;  %v5376_v20 = vpop.permute.xlu1 %5375 }
0x15fb   :  { %v5383_v38 = vsel %vm253_vm5, %v5374_v47, %v5376_v20 }
0x15fc   :  { %v5390_v21 = vrot.slane %v5383_v38, 4 }
0x15fd   :  { %v5378_v45 = vpop.permute.xlu0 %5377 }
0x15fe   :  { %5398 = vst [vmem:[#allocation2 + $0x28] sm:$0xf0] %v5390_v21  ;;  %v5382_v52 = vsel %vm253_vm5, %v5376_v20, %v5378_v45  ;;  %v5380_v62 = vpop.permute.xlu1 %5379 }
0x15ff   :  { %v5391_v15 = vrot.slane %v5382_v52, 4  ;;  %v5381_v40 = vsel %vm253_vm5, %v5378_v45, %v5380_v62  ;;  %v5384_v50 = vsel %vm253_vm5, %v5380_v62, %v5374_v47 }
0x1600   :  { %v5389_v11 = vrot.slane %v5384_v50, 4  ;;  %v5392_v14 = vrot.slane %v5381_v40, 4 }
0x1601   :  { %5399 = vst [vmem:[#allocation2 + $0x30] sm:$0xf0] %v5391_v15  ;;  %v5314_v37 = vpop.permute.xlu0 %5313 }
0x1602   :  { %5397 = vst [vmem:[#allocation2 + $0x20] sm:$0xf0] %v5389_v11  ;;  %5400 = vst [vmem:[#allocation2 + $0x38] sm:$0xf0] %v5392_v14  ;;  %v5316_v2 = vpop.permute.xlu1 %5315 }
0x1603   :  { %v5323_v35 = vsel %vm105_vm2, %v5314_v37, %v5316_v2 }
0x1604   :  { %5326 = vst [vmem:[#allocation2 + $0x8] sm:$0xf] %v5323_v35 }
0x1605   :  { %v5318_v53 = vpop.permute.xlu0 %5317 }
0x1606   :  { %v5322_v19 = vsel %vm105_vm2, %v5316_v2, %v5318_v53  ;;  %v5320_v61 = vpop.permute.xlu1 %5319 }
0x1607   :  { %5327 = vst [vmem:[#allocation2 + $0x10] sm:$0xf] %v5322_v19  ;;  %v5321_v24 = vsel %vm105_vm2, %v5318_v53, %v5320_v61  ;;  %v5324_v26 = vsel %vm105_vm2, %v5320_v61, %v5314_v37 }
0x1608   :  { %5325 = vst [vmem:[#allocation2] sm:$0xf] %v5324_v26  ;;  %5328 = vst [vmem:[#allocation2 + $0x18] sm:$0xf] %v5321_v24 }
0x1609   :  { %v5358_v49 = vpop.permute.xlu0 %5357 }
0x160a   :  { %v5360_v54 = vpop.permute.xlu1 %5359 }
0x160b   :  { %v5367_v17 = vsel %vm208_vm4, %v5358_v49, %v5360_v54  ;;  %v5490_v0 = vld [vmem:[#allocation2 + $0x8] sm:$0xff] }
0x160c   :  { %5370 = vst [vmem:[#allocation2 + $0x28] sm:$0xf] %v5367_v17  ;;  %v5506_v47 = vmul.f32 %v8991_v39, %v5490_v0 }
0x160d   :  { %v5362_v27 = vpop.permute.xlu0 %5361 }
0x160e   :  { %v5366_v13 = vsel %vm208_vm4, %v5360_v54, %v5362_v27  ;;  %v5364_v36 = vpop.permute.xlu1 %5363  ;;  %v5491_v40 = vld [vmem:[#allocation2 + $0x10] sm:$0xff] }
0x160f   :  { %5371 = vst [vmem:[#allocation2 + $0x30] sm:$0xf] %v5366_v13  ;;  %v5365_v4 = vsel %vm208_vm4, %v5362_v27, %v5364_v36  ;;  %v5368_v56 = vsel %vm208_vm4, %v5364_v36, %v5358_v49  ;;  %v5489_v34 = vld [vmem:[#allocation2] sm:$0xff]  ;;  %v5492_v58 = vld [vmem:[#allocation2 + $0x18] sm:$0xff]  ;;  %v5507_v61 = vmul.f32 %v9018_v9, %v5491_v40 }
0x1610   :  { %5369 = vst [vmem:[#allocation2 + $0x20] sm:$0xf] %v5368_v56  ;;  %5372 = vst [vmem:[#allocation2 + $0x38] sm:$0xf] %v5365_v4  ;;  %v5505_v62 = vmul.f32 %v8999_v57, %v5489_v34  ;;  %v5508_v15 = vmul.f32 %v9002_v43, %v5492_v58 }
0x1611   :  { %v5418_v46 = vpop.permute.xlu0 %5417 }
0x1612   :  { %v5420_v28 = vpop.permute.xlu1 %5419 }
0x1613   :  { %v5427_v18 = vsel %vm367_vm7, %v5418_v46, %v5420_v28  ;;  %v5494_v59 = vld [vmem:[#allocation2 + $0x28] sm:$0xff] }
0x1614   :  { %v5433_v23 = vrot.slane %v5427_v18, 4  ;;  %v5510_v20 = vmul.f32 %v8994_v8, %v5494_v59 }
0x1615   :  { %v5422_v38 = vpop.permute.xlu0 %5421 }
0x1616   :  { %5441 = vst [vmem:[#allocation2 + $0x40] sm:$0xf0] %v5433_v23  ;;  %v5426_v21 = vsel %vm367_vm7, %v5420_v28, %v5422_v38  ;;  %v5424_v45 = vpop.permute.xlu1 %5423  ;;  %v6826_v52 = vpack.c.bf16 %v5510_v20, %v5506_v47  ;;  %v5495_v50 = vld [vmem:[#allocation2 + $0x30] sm:$0xff] }
0x1617   :  { %v5434_v11 = vrot.slane %v5426_v21, 4  ;;  %v5425_v14 = vsel %vm367_vm7, %v5422_v38, %v5424_v45  ;;  %v5428_v39 = vsel %vm367_vm7, %v5424_v45, %v5418_v46  ;;  %v5493_v8 = vld [vmem:[#allocation2 + $0x20] sm:$0xff]  ;;  %v5496_v37 = vld [vmem:[#allocation2 + $0x38] sm:$0xff]  ;;  %v5511_v2 = vmul.f32 %v9009_v3, %v5495_v50 }
0x1618   :  { %v5435_v35 = vrot.slane %v5425_v14, 4  ;;  %v5436_v53 = vrot.slane %v5428_v39, 4  ;;  %6827 = vmatprep.subr.bf16.mxu0 %v6826_v52  ;;  %v5509_v57 = vmul.f32 %v9012_v5, %v5493_v8  ;;  %v5512_v43 = vmul.f32 %v9015_v30, %v5496_v37 }
0x1619   :  { %5442 = vst [vmem:[#allocation2 + $0x48] sm:$0xf0] %v5434_v11  ;;  %v5462_v19 = vpop.permute.xlu0 %5461  ;;  %v6836_v3 = vpack.c.bf16 %v5511_v2, %v5507_v61 }
0x161a   :  { %5443 = vst [vmem:[#allocation2 + $0x50] sm:$0xf0] %v5435_v35  ;;  %5444 = vst [vmem:[#allocation2 + $0x58] sm:$0xf0] %v5436_v53  ;;  %v5464_v24 = vpop.permute.xlu1 %5463  ;;  %v6828_v26 = vpack.c.bf16 %v5509_v57, %v5505_v62  ;;  %v6834_v49 = vpack.c.bf16 %v5512_v43, %v5508_v15 }
0x161b   :  { %v5471_v54 = vsel %vm469_vm9, %v5462_v19, %v5464_v24 }
0x161c   :  { %v5477_v17 = vrot.slane %v5471_v54, 4  ;;  %6829 = vmatpush1.bf16.msra.mxu0 %v6828_v26  ;;  %6835 = vmatprep.subr.bf16.mxu1 %v6834_v49 }
0x161d   :  { %v5466_v27 = vpop.permute.xlu0 %5465  ;;  %6837 = vmatpush1.bf16.msra.mxu1 %v6836_v3 }
0x161e   :  { %5485 = vst [vmem:[#allocation2 + $0x60] sm:$0xf0] %v5477_v17  ;;  %v5470_v5 = vsel %vm469_vm9, %v5464_v24, %v5466_v27  ;;  %v5468_v30 = vpop.permute.xlu1 %5467 }
0x161f   :  { %v5478_v9 = vrot.slane %v5470_v5, 4  ;;  %v5469_v13 = vsel %vm469_vm9, %v5466_v27, %v5468_v30  ;;  %v5472_v36 = vsel %vm469_vm9, %v5468_v30, %v5462_v19 }
0x1620   :  { %v5479_v4 = vrot.slane %v5469_v13, 4  ;;  %v5480_v56 = vrot.slane %v5472_v36, 4 }
0x1621   :  { %5486 = vst [vmem:[#allocation2 + $0x68] sm:$0xf0] %v5478_v9  ;;  %v5402_v46 = vpop.permute.xlu0 %5401 }
0x1622   :  { %5487 = vst [vmem:[#allocation2 + $0x70] sm:$0xf0] %v5479_v4  ;;  %5488 = vst [vmem:[#allocation2 + $0x78] sm:$0xf0] %v5480_v56  ;;  %v5404_v0 = vpop.permute.xlu1 %5403 }
0x1623   :  { %v5411_v28 = vsel %vm322_vm6, %v5402_v46, %v5404_v0 }
0x1624   :  { %5413 = vst [vmem:[#allocation2 + $0x40] sm:$0xf] %v5411_v28 }
0x1625   :  { %v5406_v18 = vpop.permute.xlu0 %5405 }
0x1626   :  { %v5410_v59 = vsel %vm322_vm6, %v5404_v0, %v5406_v18  ;;  %v5408_v34 = vpop.permute.xlu1 %5407 }
0x1627   :  { %5414 = vst [vmem:[#allocation2 + $0x48] sm:$0xf] %v5410_v59  ;;  %v5409_v58 = vsel %vm322_vm6, %v5406_v18, %v5408_v34  ;;  %v5412_v23 = vsel %vm322_vm6, %v5408_v34, %v5402_v46 }
0x1628   :  { %5415 = vst [vmem:[#allocation2 + $0x50] sm:$0xf] %v5409_v58  ;;  %5416 = vst [vmem:[#allocation2 + $0x58] sm:$0xf] %v5412_v23 }
0x1629   :  { %v5446_v47 = vpop.permute.xlu0 %5445 }
0x162a   :  { %v5448_v20 = vpop.permute.xlu1 %5447 }
0x162b   :  { %v5455_v38 = vsel %vm424_vm8, %v5446_v47, %v5448_v20  ;;  %v5497_v11 = vld [vmem:[#allocation2 + $0x40] sm:$0xff] }
0x162c   :  { %5457 = vst [vmem:[#allocation2 + $0x60] sm:$0xf] %v5455_v38  ;;  %v5513_v53 = vmul.f32 %v9054_v10, %v5497_v11 }
0x162d   :  { %v5450_v21 = vpop.permute.xlu0 %5449 }
0x162e   :  { %v5454_v45 = vsel %vm424_vm8, %v5448_v20, %v5450_v21  ;;  %v5452_v52 = vpop.permute.xlu1 %5451  ;;  %v5498_v50 = vld [vmem:[#allocation2 + $0x48] sm:$0xff] }
0x162f   :  { %5458 = vst [vmem:[#allocation2 + $0x68] sm:$0xf] %v5454_v45  ;;  %v5453_v62 = vsel %vm424_vm8, %v5450_v21, %v5452_v52  ;;  %v5456_v15 = vsel %vm424_vm8, %v5452_v52, %v5446_v47  ;;  %v5500_v14 = vld [vmem:[#allocation2 + $0x58] sm:$0xff]  ;;  %v5499_v39 = vld [vmem:[#allocation2 + $0x50] sm:$0xff]  ;;  %v5514_v2 = vmul.f32 %v9048_v6, %v5498_v50 }
0x1630   :  { %5459 = vst [vmem:[#allocation2 + $0x70] sm:$0xf] %v5453_v62  ;;  %5460 = vst [vmem:[#allocation2 + $0x78] sm:$0xf] %v5456_v15  ;;  %v5516_v19 = vmul.f32 %v9057_v29, %v5500_v14  ;;  %v5515_v24 = vmul.f32 %v9063_v12, %v5499_v39 }
0x1633   :  { %v5501_v40 = vld [vmem:[#allocation2 + $0x60] sm:$0xff] }
0x1634   :  { %v5517_v37 = vmul.f32 %v9045_v55, %v5501_v40 }
0x1636   :  { %v5502_v8 = vld [vmem:[#allocation2 + $0x68] sm:$0xff]  ;;  %v6832_v54 = vpack.c.bf16 %v5517_v37, %v5513_v53 }
0x1637   :  { %v5518_v35 = vmul.f32 %v9051_v41, %v5502_v8  ;;  %v5504_v57 = vld [vmem:[#allocation2 + $0x78] sm:$0xff]  ;;  %v5503_v43 = vld [vmem:[#allocation2 + $0x70] sm:$0xff] }
0x1638   :  { %v5520_v61 = vmul.f32 %v9060_v33, %v5504_v57  ;;  %v5519_v26 = vmul.f32 %v9066_v42, %v5503_v43 }
0x1639   :  { %v6830_v49 = vpack.c.bf16 %v5518_v35, %v5514_v2 }
0x163a   :  { %v6838_v3 = vpack.c.bf16 %v5520_v61, %v5516_v19  ;;  %v6840_v55 = vpack.c.bf16 %v5519_v26, %v5515_v24 }
0x163b   :  { %6831 = vmatprep.subr.bf16.mxu0 %v6830_v49 }
0x163c   :  { %6833 = vmatpush1.bf16.msra.mxu0 %v6832_v54  ;;  %6839 = vmatprep.subr.bf16.mxu1 %v6838_v3 }
0x163d   :  { %6841 = vmatpush1.bf16.msra.mxu1 %v6840_v55 }
0x163f   :  { %6622 = vmatmul.mubr.msk.f32.vlgmr.msra.gmra.mrb[48].mxu0 %vm710_vm0, %v9072_v7 }
0x1640   :  { %6624 = vmatmul.mubr.msk.f32.vlgmr.msra.gmra.mrb[48].mxu1 %vm710_vm0, %v9072_v7  ;;  %5591 = vmatprep.mubr.f32.mxu0 %v9458_v44 }
0x1641   :  { %5668 = vmatprep.mubr.f32.mxu1 %v9458_v44 }
0x1643   :  { %6623 = vmatmul.mubr.msk.f32.gmra.mrb[50].mxu0 %vm710_vm0, %v9083_v63 }
0x1644   :  { %6625 = vmatmul.mubr.msk.f32.gmra.mrb[50].mxu1 %vm710_vm0, %v9083_v63  ;;  %5755 = vmatprep.mubr.f32.mxu0 %v9458_v44 }
0x1645   :  { %5826 = vmatprep.mubr.f32.mxu1 %v9458_v44 }
0x1712   :  { %v5587_v6 = vpop.f32.mrb[48].mxu0 }
0x1713   :  { %v5588_v41 = vadd.f32 %v5587_v6, %v9459_v32  ;;  %v5589_v10 = vpop.f32.mrb[49].mxu0  ;;  %v5664_v29 = vpop.f32.mrb[48].mxu1 }
0x1714   :  { %v5590_v33 = vadd.f32 %v5589_v10, %v9459_v32  ;;  %v5665_v12 = vadd.f32 %v5664_v29, %v9459_v32  ;;  %v5666_v42 = vpop.f32.mrb[49].mxu1 }
0x1715   :  { %v5667_v7 = vadd.f32 %v5666_v42, %v9459_v32  ;;  %v5675_v27 = vmul.f32 0.2, %v5588_v41 }
0x1716   :  { %v5593_v17 = vpop.f32.mrb[50].mxu0  ;;  %v5676_v9 = vmul.f32 0.2, %v5590_v33  ;;  %v5677_v13 = vmul.f32 0.2, %v5665_v12 }
0x1717   :  { %v5594_v63 = vadd.f32 %v5593_v17, %v9460_v48  ;;  %v5595_v5 = vpop.f32.mrb[51].mxu0  ;;  %v5670_v30 = vpop.f32.mrb[50].mxu1  ;;  %v5678_v46 = vmul.f32 0.2, %v5667_v7  ;;  %v5683_v34 = vmax.f32 %v5588_v41, %v5675_v27 }
0x1718   :  { %v5596_v36 = vadd.f32 %v5595_v5, %v9460_v48  ;;  %v5671_v4 = vadd.f32 %v5670_v30, %v9460_v48  ;;  %v5672_v56 = vpop.f32.mrb[51].mxu1  ;;  %v5684_v47 = vmax.f32 %v5590_v33, %v5676_v9  ;;  %v5685_v20 = vmax.f32 %v5665_v12, %v5677_v13 }
0x1719   :  { %v5679_v0 = vmul.f32 0.2, %v5594_v63  ;;  %v5673_v28 = vadd.f32 %v5672_v56, %v9460_v48  ;;  %v5686_v45 = vmax.f32 %v5667_v7, %v5678_v46 }
0x171a   :  { %v5680_v18 = vmul.f32 0.2, %v5596_v36  ;;  %v5681_v59 = vmul.f32 0.2, %v5671_v4 }
0x171b   :  { %v5687_v58 = vmax.f32 %v5594_v63, %v5679_v0  ;;  %v5682_v23 = vmul.f32 0.2, %v5673_v28 }
0x171c   :  { %v5688_v38 = vmax.f32 %v5596_v36, %v5680_v18  ;;  %v5689_v21 = vmax.f32 %v5671_v4, %v5681_v59 }
0x171d   :  { %v6844_v52 = vpack.c.bf16 %v5687_v58, %v5683_v34  ;;  %v5690_v62 = vmax.f32 %v5673_v28, %v5682_v23 }
0x171e   :  { %v6848_v15 = vpack.c.bf16 %v5689_v21, %v5685_v20  ;;  %v6842_v40 = vpack.c.bf16 %v5688_v38, %v5684_v47 }
0x171f   :  { %v6846_v50 = vpack.c.bf16 %v5690_v62, %v5686_v45 }
0x1720   :  { %6843 = vmatprep.subr.bf16.mxu0 %v6842_v40 }
0x1721   :  { %6845 = vmatpush1.bf16.msra.mxu0 %v6844_v52  ;;  %6847 = vmatprep.subr.bf16.mxu1 %v6846_v50 }
0x1722   :  { %6849 = vmatpush1.bf16.msra.mxu1 %v6848_v15 }
0x1724   :  { %6626 = vmatmul.mubr.msk.f32.vlgmr.msra.gmra.mrb[52].mxu0 %vm887_vm1, %v9102_v1 }
0x1725   :  { %6627 = vmatmul.mubr.msk.f32.vlgmr.msra.gmra.mrb[52].mxu1 %vm887_vm1, %v9102_v1  ;;  %6185 = vmatprep.mubr.f32.mxu0 %v9458_v44 }
0x1726   :  { %6262 = vmatprep.mubr.f32.mxu1 %v9458_v44 }
0x17f7   :  { %v5757_v11 = vpop.f32.mrb[52].mxu0 }
0x17f8   :  { %v5758_v14 = vadd.f32 %v5757_v11, %v7830_v22  ;;  %v5759_v39 = vpop.f32.mrb[53].mxu0  ;;  %v5828_v8 = vpop.f32.mrb[52].mxu1 }
0x17f9   :  { %v5760_v37 = vadd.f32 %v5759_v39, %v7830_v22  ;;  %v5829_v2 = vadd.f32 %v5828_v8, %v7830_v22  ;;  %v5830_v35 = vpop.f32.mrb[53].mxu1 }
0x17fa   :  { %v5833_v53 = vadd.f32 %v5758_v14, %v7833_v60  ;;  %v5831_v57 = vadd.f32 %v5830_v35, %v7830_v22 }
0x17fb   :  { %v5834_v1 = vadd.f32 %v5760_v37, %v7837_v51  ;;  %v5835_v43 = vadd.f32 %v5829_v2, %v7840_v16 }
0x17fc   :  { %v5837_v19 = vsel %vm518_vm10, %v5833_v53, -inf  ;;  %v5836_v61 = vadd.f32 %v5831_v57, %v7845_v25 }
0x17fd   :  { %v5838_v24 = vrot.slane %v5837_v19, 4  ;;  %v5844_v26 = vsel %vm518_vm10, %v5834_v1, -inf  ;;  %v5851_v49 = vsel %vm518_vm10, %v5835_v43, -inf }
0x17fe   :  { %v5845_v54 = vrot.slane %v5844_v26, 4  ;;  %v5852_v3 = vrot.slane %v5851_v49, 4  ;;  %v5858_v55 = vsel %vm518_vm10, %v5836_v61, -inf }
0x17ff   :  { %v5839_v6 = vmax.f32 %v5837_v19, %v5838_v24  ;;  %v5859_v41 = vrot.slane %v5858_v55, 4 }
0x1800   :  { %v5846_v10 = vmax.f32 %v5844_v26, %v5845_v54  ;;  %v5853_v29 = vmax.f32 %v5851_v49, %v5852_v3 }
0x1801   :  { %v5840_v33 = vrot.slane %v5839_v6, 2  ;;  %v5860_v12 = vmax.f32 %v5858_v55, %v5859_v41 }
0x1802   :  { %v5847_v42 = vrot.slane %v5846_v10, 2  ;;  %v5854_v7 = vrot.slane %v5853_v29, 2 }
0x1803   :  { %v5841_v17 = vmax.f32 %v5839_v6, %v5840_v33  ;;  %v5861_v27 = vrot.slane %v5860_v12, 2 }
0x1804   :  { %v5848_v63 = vmax.f32 %v5846_v10, %v5847_v42  ;;  %v5855_v5 = vmax.f32 %v5853_v29, %v5854_v7 }
0x1805   :  { %v5842_v30 = vrot.slane %v5841_v17, 1  ;;  %v5862_v9 = vmax.f32 %v5860_v12, %v5861_v27 }
0x1806   :  { %v5849_v13 = vrot.slane %v5848_v63, 1  ;;  %v5856_v36 = vrot.slane %v5855_v5, 1 }
0x1807   :  { %v5843_v4 = vmax.f32 %v5841_v17, %v5842_v30  ;;  %v5863_v56 = vrot.slane %v5862_v9, 1 }
0x1808   :  { %v5850_v46 = vmax.f32 %v5848_v63, %v5849_v13  ;;  %v5857_v0 = vmax.f32 %v5855_v5, %v5856_v36 }
0x1809   :  { %v5865_v28 = vsub.f32 %v5833_v53, %v5843_v4  ;;  %v5864_v18 = vmax.f32 %v5862_v9, %v5863_v56 }
0x180a   :  { %v5866_v59 = vsub.f32 %v5834_v1, %v5850_v46  ;;  %v5867_v34 = vsub.f32 %v5835_v43, %v5857_v0 }
0x180b   :  { %v5869_v58 = vmul.f32 1.442695, %v5865_v28  ;;  %v5868_v23 = vsub.f32 %v5836_v61, %v5864_v18 }
0x180c   :  { %v5871_v47 = vmul.f32 1.442695, %v5866_v59  ;;  %v5873_v20 = vmul.f32 1.442695, %v5867_v34 }
0x180d   :  { %7052 = vpow2.f32 %v5869_v58  ;;  %v5875_v38 = vmul.f32 1.442695, %v5868_v23 }
0x180e   :  { %7054 = vpow2.f32 %v5871_v47 }
0x180f   :  { %7056 = vpow2.f32 %v5873_v20 }
0x1810   :  { %7058 = vpow2.f32 %v5875_v38 }
0x1817   :  { %v7053_v21 = vpop.eup %7052 }
0x1818   :  { %v7055_v45 = vpop.eup %7054  ;;  %v5877_v52 = vsel %vm518_vm10, %v7053_v21, 0.0 }
0x1819   :  { %v7057_v62 = vpop.eup %7056  ;;  %v5878_v15 = vrot.slane %v5877_v52, 4  ;;  %v5884_v40 = vsel %vm518_vm10, %v7055_v45, 0.0 }
0x181a   :  { %v7059_v50 = vpop.eup %7058  ;;  %v5885_v11 = vrot.slane %v5884_v40, 4  ;;  %v5891_v14 = vsel %vm518_vm10, %v7057_v62, 0.0 }
0x181b   :  { %v5879_v39 = vadd.f32 %v5878_v15, %v5877_v52  ;;  %v5892_v8 = vrot.slane %v5891_v14, 4  ;;  %v5898_v37 = vsel %vm518_vm10, %v7059_v50, 0.0 }
0x181c   :  { %v5886_v2 = vadd.f32 %v5885_v11, %v5884_v40  ;;  %v5899_v35 = vrot.slane %v5898_v37, 4 }
0x181d   :  { %v5880_v53 = vrot.slane %v5879_v39, 2  ;;  %v5893_v57 = vadd.f32 %v5892_v8, %v5891_v14 }
0x181e   :  { %v5887_v1 = vrot.slane %v5886_v2, 2  ;;  %v5900_v43 = vadd.f32 %v5899_v35, %v5898_v37 }
0x181f   :  { %v5881_v19 = vadd.f32 %v5880_v53, %v5879_v39  ;;  %v5894_v61 = vrot.slane %v5893_v57, 2 }
0x1820   :  { %v5888_v24 = vadd.f32 %v5887_v1, %v5886_v2  ;;  %v5901_v26 = vrot.slane %v5900_v43, 2 }
0x1821   :  { %v5882_v49 = vrot.slane %v5881_v19, 1  ;;  %v5895_v54 = vadd.f32 %v5894_v61, %v5893_v57 }
0x1822   :  { %v5889_v3 = vrot.slane %v5888_v24, 1  ;;  %v5902_v55 = vadd.f32 %v5901_v26, %v5900_v43 }
0x1823   :  { %v5883_v6 = vadd.f32 %v5882_v49, %v5881_v19  ;;  %v5896_v41 = vrot.slane %v5895_v54, 1 }
0x1824   :  { %v5890_v10 = vadd.f32 %v5889_v3, %v5888_v24  ;;  %v5903_v29 = vrot.slane %v5902_v55, 1 }
0x1825   :  { %7060 = vrcp.f32 %v5883_v6  ;;  %v5897_v33 = vadd.f32 %v5896_v41, %v5895_v54 }
0x1826   :  { %7062 = vrcp.f32 %v5890_v10  ;;  %v5904_v12 = vadd.f32 %v5903_v29, %v5902_v55 }
0x1827   :  { %7064 = vrcp.f32 %v5897_v33 }
0x1828   :  { %7066 = vrcp.f32 %v5904_v12 }
0x182f   :  { %v7061_v42 = vpop.eup %7060 }
0x1830   :  { %v7063_v7 = vpop.eup %7062  ;;  %v5909_v17 = vmul.f32 %v7061_v42, %v7053_v21 }
0x1831   :  { %v7065_v27 = vpop.eup %7064  ;;  %v5910_v63 = vmul.f32 %v7063_v7, %v7055_v45  ;;  %v7168_v7 = vld [vmem:[#allocation3 + $0x8] sm:$0xff] }
0x1832   :  { %v7067_v5 = vpop.eup %7066  ;;  %5929 = vrot.lane.b32.xlu0 %v5909_v17, %s7239_s19  ;;  %v5911_v30 = vmul.f32 %v7065_v27, %v7057_v62  ;;  %v7169_v27 = vld [vmem:[#allocation3 + $0x28] sm:$0xff] }
0x1833   :  { %5931 = vrot.lane.b32.xlu1 %v5910_v63, %s7239_s19  ;;  %v5912_v9 = vmul.f32 %v7067_v5, %v7059_v50 }
0x1836   :  { %5933 = vrot.lane.b32.xlu0 %v5911_v30, %s7239_s19 }
0x1837   :  { %5935 = vrot.lane.b32.xlu1 %v5912_v9, %s7239_s19 }
0x183a   :  { %5973 = vrot.lane.b32.xlu0 %v5909_v17, %s7242_s21 }
0x183b   :  { %5975 = vrot.lane.b32.xlu1 %v5910_v63, %s7242_s21 }
0x183e   :  { %5977 = vrot.lane.b32.xlu0 %v5911_v30, %s7242_s21 }
0x183f   :  { %5979 = vrot.lane.b32.xlu1 %v5912_v9, %s7242_s21 }
0x1842   :  { %5913 = vrot.lane.b32.xlu0 %v5909_v17, %s7240_s20 }
0x1843   :  { %5915 = vrot.lane.b32.xlu1 %v5910_v63, %s7240_s20 }
0x1846   :  { %5917 = vrot.lane.b32.xlu0 %v5911_v30, %s7240_s20 }
0x1847   :  { %5919 = vrot.lane.b32.xlu1 %v5912_v9, %s7240_s20 }
0x184a   :  { %5957 = vrot.lane.b32.xlu0 %v5909_v17, %s7243_s22 }
0x184b   :  { %5959 = vrot.lane.b32.xlu1 %v5910_v63, %s7243_s22 }
0x184e   :  { %5961 = vrot.lane.b32.xlu0 %v5911_v30, %s7243_s22 }
0x184f   :  { %5963 = vrot.lane.b32.xlu1 %v5912_v9, %s7243_s22 }
0x1852   :  { %6017 = vrot.lane.b32.xlu0 %v5909_v17, %s7244_s1 }
0x1853   :  { %6019 = vrot.lane.b32.xlu1 %v5910_v63, %s7244_s1 }
0x1856   :  { %6021 = vrot.lane.b32.xlu0 %v5911_v30, %s7244_s1 }
0x1857   :  { %6023 = vrot.lane.b32.xlu1 %v5912_v9, %s7244_s1 }
0x185a   :  { %6061 = vrot.lane.b32.xlu0 %v5909_v17, %s7245_s23 }
0x185b   :  { %6063 = vrot.lane.b32.xlu1 %v5910_v63, %s7245_s23 }
0x185e   :  { %6065 = vrot.lane.b32.xlu0 %v5911_v30, %s7245_s23 }
0x185f   :  { %6067 = vrot.lane.b32.xlu1 %v5912_v9, %s7245_s23 }
0x1862   :  { %6001 = vrot.lane.b32.xlu0 %v5909_v17, %s7246_s24 }
0x1863   :  { %6003 = vrot.lane.b32.xlu1 %v5910_v63, %s7246_s24 }
0x1866   :  { %6005 = vrot.lane.b32.xlu0 %v5911_v30, %s7246_s24 }
0x1867   :  { %6007 = vrot.lane.b32.xlu1 %v5912_v9, %s7246_s24 }
0x186a   :  { %6045 = vrot.lane.b32.xlu0 %v5909_v17, %s7247_s25 }
0x186b   :  { %6047 = vrot.lane.b32.xlu1 %v5910_v63, %s7247_s25 }
0x186e   :  { %6049 = vrot.lane.b32.xlu0 %v5911_v30, %s7247_s25 }
0x186f   :  { %6051 = vrot.lane.b32.xlu1 %v5912_v9, %s7247_s25 }
0x18a4   :  { %v5930_v13 = vpop.permute.xlu0 %5929 }
0x18a5   :  { %v5932_v36 = vpop.permute.xlu1 %5931 }
0x18a6   :  { %v5939_v4 = vsel %vm151_vm3, %v5930_v13, %v5932_v36 }
0x18a7   :  { %v5946_v56 = vrot.slane %v5939_v4, 4 }
0x18a8   :  { %v5934_v46 = vpop.permute.xlu0 %5933 }
0x18a9   :  { %5954 = vst [vmem:[#allocation2 + $0x8] sm:$0xf0] %v5946_v56  ;;  %v5938_v0 = vsel %vm151_vm3, %v5932_v36, %v5934_v46  ;;  %v5936_v28 = vpop.permute.xlu1 %5935  ;;  %v7170_v36 = vld [vmem:[#allocation3] sm:$0xff]  ;;  %v7171_v56 = vld [vmem:[#allocation3 + $0x18] sm:$0xff] }
0x18aa   :  { %v5947_v18 = vrot.slane %v5938_v0, 4  ;;  %v5937_v59 = vsel %vm151_vm3, %v5934_v46, %v5936_v28  ;;  %v5940_v34 = vsel %vm151_vm3, %v5936_v28, %v5930_v13 }
0x18ab   :  { %v5945_v58 = vrot.slane %v5940_v34, 4  ;;  %v5948_v23 = vrot.slane %v5937_v59, 4 }
0x18ac   :  { %5955 = vst [vmem:[#allocation2 + $0x10] sm:$0xf0] %v5947_v18  ;;  %v5974_v47 = vpop.permute.xlu0 %5973 }
0x18ad   :  { %5953 = vst [vmem:[#allocation2] sm:$0xf0] %v5945_v58  ;;  %5956 = vst [vmem:[#allocation2 + $0x18] sm:$0xf0] %v5948_v23  ;;  %v5976_v20 = vpop.permute.xlu1 %5975 }
0x18ae   :  { %v5983_v38 = vsel %vm253_vm5, %v5974_v47, %v5976_v20 }
0x18af   :  { %v5990_v21 = vrot.slane %v5983_v38, 4 }
0x18b0   :  { %v5978_v45 = vpop.permute.xlu0 %5977 }
0x18b1   :  { %5998 = vst [vmem:[#allocation2 + $0x28] sm:$0xf0] %v5990_v21  ;;  %v5982_v52 = vsel %vm253_vm5, %v5976_v20, %v5978_v45  ;;  %v5980_v62 = vpop.permute.xlu1 %5979 }
0x18b2   :  { %v5991_v15 = vrot.slane %v5982_v52, 4  ;;  %v5981_v40 = vsel %vm253_vm5, %v5978_v45, %v5980_v62  ;;  %v5984_v50 = vsel %vm253_vm5, %v5980_v62, %v5974_v47  ;;  %v7172_v47 = vld [vmem:[#allocation3 + $0x30] sm:$0xff]  ;;  %v7173_v45 = vld [vmem:[#allocation3 + $0x20] sm:$0xff]  ;;  %v7174_v62 = vld [vmem:[#allocation3 + $0x38] sm:$0xff] }
0x18b3   :  { %v5989_v11 = vrot.slane %v5984_v50, 4  ;;  %v5992_v14 = vrot.slane %v5981_v40, 4  ;;  %v7175_v50 = vld [vmem:[#allocation3 + $0x10] sm:$0xff] }
0x18b4   :  { %5999 = vst [vmem:[#allocation2 + $0x30] sm:$0xf0] %v5991_v15  ;;  %v5914_v39 = vpop.permute.xlu0 %5913 }
0x18b5   :  { %5997 = vst [vmem:[#allocation2 + $0x20] sm:$0xf0] %v5989_v11  ;;  %6000 = vst [vmem:[#allocation2 + $0x38] sm:$0xf0] %v5992_v14  ;;  %v5916_v8 = vpop.permute.xlu1 %5915 }
0x18b6   :  { %v5923_v37 = vsel %vm105_vm2, %v5914_v39, %v5916_v8 }
0x18b7   :  { %5926 = vst [vmem:[#allocation2 + $0x8] sm:$0xf] %v5923_v37 }
0x18b8   :  { %v5918_v2 = vpop.permute.xlu0 %5917 }
0x18b9   :  { %v5922_v35 = vsel %vm105_vm2, %v5916_v8, %v5918_v2  ;;  %v5920_v53 = vpop.permute.xlu1 %5919 }
0x18ba   :  { %5927 = vst [vmem:[#allocation2 + $0x10] sm:$0xf] %v5922_v35  ;;  %v5921_v57 = vsel %vm105_vm2, %v5918_v2, %v5920_v53  ;;  %v5924_v1 = vsel %vm105_vm2, %v5920_v53, %v5914_v39 }
0x18bb   :  { %5925 = vst [vmem:[#allocation2] sm:$0xf] %v5924_v1  ;;  %5928 = vst [vmem:[#allocation2 + $0x18] sm:$0xf] %v5921_v57 }
0x18bc   :  { %v5958_v43 = vpop.permute.xlu0 %5957 }
0x18bd   :  { %v5960_v19 = vpop.permute.xlu1 %5959 }
0x18be   :  { %v5967_v61 = vsel %vm208_vm4, %v5958_v43, %v5960_v19  ;;  %v6090_v6 = vld [vmem:[#allocation2 + $0x8] sm:$0xff] }
0x18bf   :  { %5970 = vst [vmem:[#allocation2 + $0x28] sm:$0xf] %v5967_v61  ;;  %v6106_v17 = vmul.f32 %v7168_v7, %v6090_v6 }
0x18c0   :  { %v5962_v24 = vpop.permute.xlu0 %5961 }
0x18c1   :  { %v5966_v26 = vsel %vm208_vm4, %v5960_v19, %v5962_v24  ;;  %v5964_v49 = vpop.permute.xlu1 %5963  ;;  %v6091_v0 = vld [vmem:[#allocation2 + $0x10] sm:$0xff] }
0x18c2   :  { %5971 = vst [vmem:[#allocation2 + $0x30] sm:$0xf] %v5966_v26  ;;  %v5965_v54 = vsel %vm208_vm4, %v5962_v24, %v5964_v49  ;;  %v5968_v3 = vsel %vm208_vm4, %v5964_v49, %v5958_v43  ;;  %v6089_v33 = vld [vmem:[#allocation2] sm:$0xff]  ;;  %v6092_v12 = vld [vmem:[#allocation2 + $0x18] sm:$0xff]  ;;  %v6107_v11 = vmul.f32 %v7175_v50, %v6091_v0 }
0x18c3   :  { %5969 = vst [vmem:[#allocation2 + $0x20] sm:$0xf] %v5968_v3  ;;  %5972 = vst [vmem:[#allocation2 + $0x38] sm:$0xf] %v5965_v54  ;;  %v6105_v4 = vmul.f32 %v7170_v36, %v6089_v33  ;;  %v6108_v46 = vmul.f32 %v7171_v56, %v6092_v12 }
0x18c4   :  { %v6018_v55 = vpop.permute.xlu0 %6017 }
0x18c5   :  { %v6020_v41 = vpop.permute.xlu1 %6019 }
0x18c6   :  { %v6027_v10 = vsel %vm367_vm7, %v6018_v55, %v6020_v41  ;;  %v6094_v29 = vld [vmem:[#allocation2 + $0x28] sm:$0xff] }
0x18c7   :  { %v6033_v42 = vrot.slane %v6027_v10, 4  ;;  %v6110_v63 = vmul.f32 %v7169_v27, %v6094_v29 }
0x18c8   :  { %v6022_v5 = vpop.permute.xlu0 %6021 }
0x18c9   :  { %6041 = vst [vmem:[#allocation2 + $0x40] sm:$0xf0] %v6033_v42  ;;  %v6026_v30 = vsel %vm367_vm7, %v6020_v41, %v6022_v5  ;;  %v6024_v9 = vpop.permute.xlu1 %6023  ;;  %v6850_v13 = vpack.c.bf16 %v6110_v63, %v6106_v17  ;;  %v6095_v28 = vld [vmem:[#allocation2 + $0x30] sm:$0xff] }
0x18ca   :  { %v6034_v18 = vrot.slane %v6026_v30, 4  ;;  %v6025_v59 = vsel %vm367_vm7, %v6022_v5, %v6024_v9  ;;  %v6028_v34 = vsel %vm367_vm7, %v6024_v9, %v6018_v55  ;;  %v6093_v58 = vld [vmem:[#allocation2 + $0x20] sm:$0xff]  ;;  %v6096_v23 = vld [vmem:[#allocation2 + $0x38] sm:$0xff]  ;;  %v6111_v20 = vmul.f32 %v7172_v47, %v6095_v28  ;;  %v7177_v28 = vld [vmem:[#allocation3 + $0x48] sm:$0xff] }
0x18cb   :  { %v6035_v38 = vrot.slane %v6025_v59, 4  ;;  %v6036_v21 = vrot.slane %v6028_v34, 4  ;;  %6851 = vmatprep.subr.bf16.mxu0 %v6850_v13  ;;  %v6109_v52 = vmul.f32 %v7173_v45, %v6093_v58  ;;  %v6112_v15 = vmul.f32 %v7174_v62, %v6096_v23  ;;  %v7178_v59 = vld [vmem:[#allocation3 + $0x68] sm:$0xff]  ;;  %v7179_v58 = vld [vmem:[#allocation3 + $0x40] sm:$0xff] }
0x18cc   :  { %6042 = vst [vmem:[#allocation2 + $0x48] sm:$0xf0] %v6034_v18  ;;  %v6062_v40 = vpop.permute.xlu0 %6061  ;;  %v6860_v2 = vpack.c.bf16 %v6111_v20, %v6107_v11 }
0x18cd   :  { %6043 = vst [vmem:[#allocation2 + $0x50] sm:$0xf0] %v6035_v38  ;;  %6044 = vst [vmem:[#allocation2 + $0x58] sm:$0xf0] %v6036_v21  ;;  %v6064_v14 = vpop.permute.xlu1 %6063  ;;  %v6852_v39 = vpack.c.bf16 %v6109_v52, %v6105_v4  ;;  %v6858_v8 = vpack.c.bf16 %v6112_v15, %v6108_v46  ;;  %v7176_v46 = vld [vmem:[#allocation3 + $0x60] sm:$0xff]  ;;  %v7181_v21 = vld [vmem:[#allocation3 + $0x78] sm:$0xff] }
0x18ce   :  { %v6071_v37 = vsel %vm469_vm9, %v6062_v40, %v6064_v14  ;;  %v7182_v52 = vld [vmem:[#allocation3 + $0x50] sm:$0xff] }
0x18cf   :  { %v6077_v35 = vrot.slane %v6071_v37, 4  ;;  %6853 = vmatpush1.bf16.msra.mxu0 %v6852_v39  ;;  %6859 = vmatprep.subr.bf16.mxu1 %v6858_v8  ;;  %v7183_v15 = vld [vmem:[#allocation3 + $0x70] sm:$0xff]  ;;  %v7184_v8 = vld [vmem:[%s9439_s4] sm:$0xff]  ;;  %v7185_v37 = vld [vmem:[%s9439_s4 + $0x8] sm:$0xff] }
0x18d0   :  { %v6066_v53 = vpop.permute.xlu0 %6065  ;;  %6861 = vmatpush1.bf16.msra.mxu1 %v6860_v2 }
0x18d1   :  { %6085 = vst [vmem:[#allocation2 + $0x60] sm:$0xf0] %v6077_v35  ;;  %v6070_v57 = vsel %vm469_vm9, %v6064_v14, %v6066_v53  ;;  %v6068_v1 = vpop.permute.xlu1 %6067 }
0x18d2   :  { %v6078_v43 = vrot.slane %v6070_v57, 4  ;;  %v6069_v19 = vsel %vm469_vm9, %v6066_v53, %v6068_v1  ;;  %v6072_v61 = vsel %vm469_vm9, %v6068_v1, %v6062_v40 }
0x18d3   :  { %v6079_v24 = vrot.slane %v6069_v19, 4  ;;  %v6080_v26 = vrot.slane %v6072_v61, 4 }
0x18d4   :  { %6086 = vst [vmem:[#allocation2 + $0x68] sm:$0xf0] %v6078_v43  ;;  %v6002_v49 = vpop.permute.xlu0 %6001 }
0x18d5   :  { %6087 = vst [vmem:[#allocation2 + $0x70] sm:$0xf0] %v6079_v24  ;;  %6088 = vst [vmem:[#allocation2 + $0x78] sm:$0xf0] %v6080_v26  ;;  %v6004_v54 = vpop.permute.xlu1 %6003 }
0x18d6   :  { %v6011_v3 = vsel %vm322_vm6, %v6002_v49, %v6004_v54 }
0x18d7   :  { %6013 = vst [vmem:[#allocation2 + $0x40] sm:$0xf] %v6011_v3 }
0x18d8   :  { %v6006_v55 = vpop.permute.xlu0 %6005 }
0x18d9   :  { %v6010_v6 = vsel %vm322_vm6, %v6004_v54, %v6006_v55  ;;  %v6008_v41 = vpop.permute.xlu1 %6007 }
0x18da   :  { %6014 = vst [vmem:[#allocation2 + $0x48] sm:$0xf] %v6010_v6  ;;  %v6009_v10 = vsel %vm322_vm6, %v6006_v55, %v6008_v41  ;;  %v6012_v29 = vsel %vm322_vm6, %v6008_v41, %v6002_v49 }
0x18db   :  { %6015 = vst [vmem:[#allocation2 + $0x50] sm:$0xf] %v6009_v10  ;;  %6016 = vst [vmem:[#allocation2 + $0x58] sm:$0xf] %v6012_v29 }
0x18dc   :  { %v6046_v33 = vpop.permute.xlu0 %6045 }
0x18dd   :  { %v6048_v12 = vpop.permute.xlu1 %6047 }
0x18de   :  { %v6055_v42 = vsel %vm424_vm8, %v6046_v33, %v6048_v12  ;;  %v6097_v13 = vld [vmem:[#allocation2 + $0x40] sm:$0xff] }
0x18df   :  { %6057 = vst [vmem:[#allocation2 + $0x60] sm:$0xf] %v6055_v42  ;;  %v6113_v23 = vmul.f32 %v7179_v58, %v6097_v13 }
0x18e0   :  { %v6050_v7 = vpop.permute.xlu0 %6049 }
0x18e1   :  { %v6054_v17 = vsel %vm424_vm8, %v6048_v12, %v6050_v7  ;;  %v6052_v27 = vpop.permute.xlu1 %6051  ;;  %v6098_v9 = vld [vmem:[#allocation2 + $0x48] sm:$0xff] }
0x18e2   :  { %6058 = vst [vmem:[#allocation2 + $0x68] sm:$0xf] %v6054_v17  ;;  %v6053_v63 = vsel %vm424_vm8, %v6050_v7, %v6052_v27  ;;  %v6056_v5 = vsel %vm424_vm8, %v6052_v27, %v6046_v33  ;;  %v6100_v36 = vld [vmem:[#allocation2 + $0x58] sm:$0xff]  ;;  %v6099_v4 = vld [vmem:[#allocation2 + $0x50] sm:$0xff]  ;;  %v6114_v18 = vmul.f32 %v7177_v28, %v6098_v9 }
0x18e3   :  { %6059 = vst [vmem:[#allocation2 + $0x70] sm:$0xf] %v6053_v63  ;;  %6060 = vst [vmem:[#allocation2 + $0x78] sm:$0xf] %v6056_v5  ;;  %v6116_v38 = vmul.f32 %v7180_v31, %v6100_v36  ;;  %v6115_v62 = vmul.f32 %v7182_v52, %v6099_v4 }
0x18e6   :  { %v6101_v30 = vld [vmem:[#allocation2 + $0x60] sm:$0xff] }
0x18e7   :  { %v6117_v0 = vmul.f32 %v7176_v46, %v6101_v30 }
0x18e9   :  { %v6102_v56 = vld [vmem:[#allocation2 + $0x68] sm:$0xff]  ;;  %v6856_v11 = vpack.c.bf16 %v6117_v0, %v6113_v23 }
0x18ea   :  { %v6118_v34 = vmul.f32 %v7178_v59, %v6102_v56  ;;  %v6104_v47 = vld [vmem:[#allocation2 + $0x78] sm:$0xff]  ;;  %v6103_v20 = vld [vmem:[#allocation2 + $0x70] sm:$0xff] }
0x18eb   :  { %v6120_v45 = vmul.f32 %v7181_v21, %v6104_v47  ;;  %v6119_v40 = vmul.f32 %v7183_v15, %v6103_v20 }
0x18ec   :  { %v6854_v50 = vpack.c.bf16 %v6118_v34, %v6114_v18 }
0x18ed   :  { %v6862_v14 = vpack.c.bf16 %v6120_v45, %v6116_v38  ;;  %v6864_v39 = vpack.c.bf16 %v6119_v40, %v6115_v62 }
0x18ee   :  { %6855 = vmatprep.subr.bf16.mxu0 %v6854_v50 }
0x18ef   :  { %6857 = vmatpush1.bf16.msra.mxu0 %v6856_v11  ;;  %6863 = vmatprep.subr.bf16.mxu1 %v6862_v14 }
0x18f0   :  { %6865 = vmatpush1.bf16.msra.mxu1 %v6864_v39 }
0x18f2   :  { %6628 = vmatmul.mubr.msk.f32.vlgmr.msra.gmra.mrb[54].mxu0 %vm710_vm0, %v7184_v8 }
0x18f3   :  { %6630 = vmatmul.mubr.msk.f32.vlgmr.msra.gmra.mrb[54].mxu1 %vm710_vm0, %v7184_v8  ;;  %6191 = vmatprep.mubr.f32.mxu0 %v9458_v44 }
0x18f4   :  { %6268 = vmatprep.mubr.f32.mxu1 %v9458_v44 }
0x18f6   :  { %6629 = vmatmul.mubr.msk.f32.gmra.mrb[56].mxu0 %vm710_vm0, %v7185_v37 }
0x18f7   :  { %6631 = vmatmul.mubr.msk.f32.gmra.mrb[56].mxu1 %vm710_vm0, %v7185_v37  ;;  %6355 = vmatprep.mubr.f32.mxu0 %v9458_v44 }
0x18f8   :  { %6426 = vmatprep.mubr.f32.mxu1 %v9458_v44 }
0x19c5   :  { %v6187_v2 = vpop.f32.mrb[54].mxu0 }
0x19c6   :  { %v6188_v35 = vadd.f32 %v6187_v2, %v9459_v32  ;;  %v6189_v53 = vpop.f32.mrb[55].mxu0  ;;  %v6264_v57 = vpop.f32.mrb[54].mxu1 }
0x19c7   :  { %v6190_v1 = vadd.f32 %v6189_v53, %v9459_v32  ;;  %v6265_v43 = vadd.f32 %v6264_v57, %v9459_v32  ;;  %v6266_v19 = vpop.f32.mrb[55].mxu1 }
0x19c8   :  { %v6267_v61 = vadd.f32 %v6266_v19, %v9459_v32  ;;  %v6275_v26 = vmul.f32 0.2, %v6188_v35 }
0x19c9   :  { %v6193_v24 = vpop.f32.mrb[56].mxu0  ;;  %v6276_v55 = vmul.f32 0.2, %v6190_v1  ;;  %v6277_v44 = vmul.f32 0.2, %v6265_v43 }
0x19ca   :  { %v6194_v49 = vadd.f32 %v6193_v24, %v9460_v48  ;;  %v6195_v54 = vpop.f32.mrb[57].mxu0  ;;  %v6270_v3 = vpop.f32.mrb[56].mxu1  ;;  %v6278_v29 = vmul.f32 0.2, %v6267_v61  ;;  %v6283_v32 = vmax.f32 %v6188_v35, %v6275_v26 }
0x19cb   :  { %v6196_v6 = vadd.f32 %v6195_v54, %v9460_v48  ;;  %v6271_v41 = vadd.f32 %v6270_v3, %v9460_v48  ;;  %v6272_v10 = vpop.f32.mrb[57].mxu1  ;;  %v6284_v63 = vmax.f32 %v6190_v1, %v6276_v55  ;;  %v6285_v5 = vmax.f32 %v6265_v43, %v6277_v44 }
0x19cc   :  { %v6279_v33 = vmul.f32 0.2, %v6194_v49  ;;  %v6273_v12 = vadd.f32 %v6272_v10, %v9460_v48  ;;  %v6286_v13 = vmax.f32 %v6267_v61, %v6278_v29  ;;  %v7186_v48 = vld [vmem:[%s9441_s6] sm:$0xf]  ;;  %s7257_s6 = smov [#allocation6]  }
0x19cd   :  { %v6280_v42 = vmul.f32 0.2, %v6196_v6  ;;  %v6281_v7 = vmul.f32 0.2, %v6271_v41  ;;  %s6565_s23 = sshll.u32 %s7257_s6, 4  ;;  %s6566_s23 = int_to_ptr.vmem [resolvable:$true] %s6565_s23 }
0x19ce   :  { %v6287_v17 = vmax.f32 %v6194_v49, %v6279_v33  ;;  %v6282_v27 = vmul.f32 0.2, %v6273_v12  ;;  %s7209_s24 = scalar_lea.vmem %s6566_s23, 256  ;;  %p7214_p9 = scmp.lt.s32.totalorder %s6566_s23, %s6566_s23 }
0x19cf   :  { %v6288_v30 = vmax.f32 %v6196_v6, %v6280_v42  ;;  %v6289_v9 = vmax.f32 %v6271_v41, %v6281_v7  ;;  %p7210_p8 = scmp.ne.s32.totalorder %s6566_s23, %s7209_s24  ;;  %p7215_p10 = scmp.lt.s32.totalorder %s7209_s24, %s7209_s24 }
0x19d0   :  { %v6868_v36 = vpack.c.bf16 %v6287_v17, %v6283_v32  ;;  %v6290_v4 = vmax.f32 %v6273_v12, %v6282_v27 }
0x19d1   :  { %v6872_v56 = vpack.c.bf16 %v6289_v9, %v6285_v5  ;;  %v6866_v46 = vpack.c.bf16 %v6288_v30, %v6284_v63  ;;  %p7216_p11 = por %p7215_p10, %p7214_p9 }
0x19d2   :  { %v6870_v0 = vpack.c.bf16 %v6290_v4, %v6286_v13 }
0x19d3   :  { %6867 = vmatprep.subr.bf16.mxu0 %v6866_v46  ;;  %p7217_p12 = pnand %p7216_p11, %p7210_p8 }
0x19d4   :  { %6869 = vmatpush1.bf16.msra.mxu0 %v6868_v36  ;;  %6871 = vmatprep.subr.bf16.mxu1 %v6870_v0 }
0x19d5   :  { %6873 = vmatpush1.bf16.msra.mxu1 %v6872_v56 }
0x19d7   :  { %6632 = vmatmul.mubr.msk.f32.vlgmr.msra.gmra.mrb[58].mxu0 %vm887_vm1, %v7186_v48 }
0x19d8   :  { %6633 = vmatmul.mubr.msk.f32.vlgmr.msra.gmra.mrb[58].mxu1 %vm887_vm1, %v7186_v48 }
0x1aaa   :  { %v6357_v28 = vpop.f32.mrb[58].mxu0 }
0x1aab   :  { %v6358_v18 = vadd.f32 %v6357_v28, %v7830_v22  ;;  %v6359_v59 = vpop.f32.mrb[59].mxu0  ;;  %v6428_v34 = vpop.f32.mrb[58].mxu1 }
0x1aac   :  { %v6360_v58 = vadd.f32 %v6359_v59, %v7830_v22  ;;  %v6429_v23 = vadd.f32 %v6428_v34, %v7830_v22  ;;  %v6430_v47 = vpop.f32.mrb[59].mxu1 }
0x1aad   :  { %v6433_v20 = vadd.f32 %v6358_v18, %v7833_v60  ;;  %v6431_v31 = vadd.f32 %v6430_v47, %v7830_v22 }
0x1aae   :  { %v6434_v38 = vadd.f32 %v6360_v58, %v7837_v51  ;;  %v6435_v21 = vadd.f32 %v6429_v23, %v7840_v16 }
0x1aaf   :  { %v6437_v45 = vsel %vm518_vm10, %v6433_v20, -inf  ;;  %v6436_v52 = vadd.f32 %v6431_v31, %v7845_v25 }
0x1ab0   :  { %v6438_v62 = vrot.slane %v6437_v45, 4  ;;  %v6444_v15 = vsel %vm518_vm10, %v6434_v38, -inf  ;;  %v6451_v40 = vsel %vm518_vm10, %v6435_v21, -inf }
0x1ab1   :  { %v6445_v50 = vrot.slane %v6444_v15, 4  ;;  %v6452_v11 = vrot.slane %v6451_v40, 4  ;;  %v6458_v14 = vsel %vm518_vm10, %v6436_v52, -inf }
0x1ab2   :  { %v6439_v60 = vmax.f32 %v6437_v45, %v6438_v62  ;;  %v6459_v39 = vrot.slane %v6458_v14, 4 }
0x1ab3   :  { %v6446_v22 = vmax.f32 %v6444_v15, %v6445_v50  ;;  %v6453_v8 = vmax.f32 %v6451_v40, %v6452_v11 }
0x1ab4   :  { %v6440_v51 = vrot.slane %v6439_v60, 2  ;;  %v6460_v37 = vmax.f32 %v6458_v14, %v6459_v39 }
0x1ab5   :  { %v6447_v16 = vrot.slane %v6446_v22, 2  ;;  %v6454_v2 = vrot.slane %v6453_v8, 2 }
0x1ab6   :  { %v6441_v35 = vmax.f32 %v6439_v60, %v6440_v51  ;;  %v6461_v53 = vrot.slane %v6460_v37, 2 }
0x1ab7   :  { %v6448_v25 = vmax.f32 %v6446_v22, %v6447_v16  ;;  %v6455_v57 = vmax.f32 %v6453_v8, %v6454_v2 }
0x1ab8   :  { %v6442_v1 = vrot.slane %v6441_v35, 1  ;;  %v6462_v43 = vmax.f32 %v6460_v37, %v6461_v53 }
0x1ab9   :  { %v6449_v19 = vrot.slane %v6448_v25, 1  ;;  %v6456_v61 = vrot.slane %v6455_v57, 1 }
0x1aba   :  { %v6443_v24 = vmax.f32 %v6441_v35, %v6442_v1  ;;  %v6463_v26 = vrot.slane %v6462_v43, 1 }
0x1abb   :  { %v6450_v49 = vmax.f32 %v6448_v25, %v6449_v19  ;;  %v6457_v54 = vmax.f32 %v6455_v57, %v6456_v61 }
0x1abc   :  { %v6465_v3 = vsub.f32 %v6433_v20, %v6443_v24  ;;  %v6464_v55 = vmax.f32 %v6462_v43, %v6463_v26 }
0x1abd   :  { %v6466_v44 = vsub.f32 %v6434_v38, %v6450_v49  ;;  %v6467_v6 = vsub.f32 %v6435_v21, %v6457_v54 }
0x1abe   :  { %v6469_v41 = vmul.f32 1.442695, %v6465_v3  ;;  %v6468_v10 = vsub.f32 %v6436_v52, %v6464_v55 }
0x1abf   :  { %v6471_v29 = vmul.f32 1.442695, %v6466_v44  ;;  %v6473_v33 = vmul.f32 1.442695, %v6467_v6 }
0x1ac0   :  { %7068 = vpow2.f32 %v6469_v41  ;;  %v6475_v12 = vmul.f32 1.442695, %v6468_v10 }
0x1ac1   :  { %7070 = vpow2.f32 %v6471_v29 }
0x1ac2   :  { %7072 = vpow2.f32 %v6473_v33 }
0x1ac3   :  { %7074 = vpow2.f32 %v6475_v12 }
0x1aca   :  { %v7069_v42 = vpop.eup %7068 }
0x1acb   :  { %v7071_v7 = vpop.eup %7070  ;;  %v6477_v32 = vsel %vm518_vm10, %v7069_v42, 0.0 }
0x1acc   :  { %v7073_v17 = vpop.eup %7072  ;;  %v6478_v27 = vrot.slane %v6477_v32, 4  ;;  %v6484_v63 = vsel %vm518_vm10, %v7071_v7, 0.0 }
0x1acd   :  { %v7075_v5 = vpop.eup %7074  ;;  %v6485_v30 = vrot.slane %v6484_v63, 4  ;;  %v6491_v9 = vsel %vm518_vm10, %v7073_v17, 0.0 }
0x1ace   :  { %v6479_v13 = vadd.f32 %v6478_v27, %v6477_v32  ;;  %v6492_v36 = vrot.slane %v6491_v9, 4  ;;  %v6498_v4 = vsel %vm518_vm10, %v7075_v5, 0.0 }
0x1acf   :  { %v6486_v56 = vadd.f32 %v6485_v30, %v6484_v63  ;;  %v6499_v46 = vrot.slane %v6498_v4, 4 }
0x1ad0   :  { %v6480_v0 = vrot.slane %v6479_v13, 2  ;;  %v6493_v48 = vadd.f32 %v6492_v36, %v6491_v9 }
0x1ad1   :  { %v6487_v28 = vrot.slane %v6486_v56, 2  ;;  %v6500_v18 = vadd.f32 %v6499_v46, %v6498_v4 }
0x1ad2   :  { %v6481_v59 = vadd.f32 %v6480_v0, %v6479_v13  ;;  %v6494_v34 = vrot.slane %v6493_v48, 2 }
0x1ad3   :  { %v6488_v58 = vadd.f32 %v6487_v28, %v6486_v56  ;;  %v6501_v23 = vrot.slane %v6500_v18, 2 }
0x1ad4   :  { %v6482_v47 = vrot.slane %v6481_v59, 1  ;;  %v6495_v20 = vadd.f32 %v6494_v34, %v6493_v48 }
0x1ad5   :  { %v6489_v31 = vrot.slane %v6488_v58, 1  ;;  %v6502_v38 = vadd.f32 %v6501_v23, %v6500_v18 }
0x1ad6   :  { %v6496_v21 = vrot.slane %v6495_v20, 1  ;;  %v6483_v45 = vadd.f32 %v6482_v47, %v6481_v59 }
0x1ad7   :  { %v6503_v52 = vrot.slane %v6502_v38, 1  ;;  %v6490_v62 = vadd.f32 %v6489_v31, %v6488_v58 }
0x1ad8   :  { %v6497_v15 = vadd.f32 %v6496_v21, %v6495_v20  ;;  %7076 = vrcp.f32 %v6483_v45 }
0x1ad9   :  { %v6504_v40 = vadd.f32 %v6503_v52, %v6502_v38  ;;  %7078 = vrcp.f32 %v6490_v62 }
0x1ada   :  { %7080 = vrcp.f32 %v6497_v15 }
0x1adb   :  { %7082 = vrcp.f32 %v6504_v40 }
0x1ae2   :  { %v7077_v50 = vpop.eup %7076 }
0x1ae3   :  { %v7079_v11 = vpop.eup %7078  ;;  %v6509_v14 = vmul.f32 %v7077_v50, %v7069_v42 }
0x1ae4   :  { %v7081_v60 = vpop.eup %7080  ;;  %v6510_v39 = vmul.f32 %v7079_v11, %v7071_v7 }
0x1ae5   :  { %v7083_v22 = vpop.eup %7082  ;;  %v6511_v8 = vmul.f32 %v7081_v60, %v7073_v17  ;;  %v6513_v51 = vsel %vm518_vm10, %v6509_v14, 0.0 }
0x1ae6   :  { %v6512_v37 = vmul.f32 %v7083_v22, %v7075_v5  ;;  %v6514_v16 = vrot.slane %v6513_v51, 4  ;;  %v6520_v2 = vsel %vm518_vm10, %v6510_v39, 0.0 }
0x1ae7   :  { %v6521_v35 = vrot.slane %v6520_v2, 4  ;;  %v6527_v53 = vsel %vm518_vm10, %v6511_v8, 0.0 }
0x1ae8   :  { %v6515_v25 = vadd.f32 %v6514_v16, %v6513_v51  ;;  %v6528_v57 = vrot.slane %v6527_v53, 4  ;;  %v6534_v1 = vsel %vm518_vm10, %v6512_v37, 0.0 }
0x1ae9   :  { %v6522_v43 = vadd.f32 %v6521_v35, %v6520_v2  ;;  %v6535_v19 = vrot.slane %v6534_v1, 4 }
0x1aea   :  { %v6516_v61 = vrot.slane %v6515_v25, 2  ;;  %v6529_v24 = vadd.f32 %v6528_v57, %v6527_v53 }
0x1aeb   :  { %v6523_v26 = vrot.slane %v6522_v43, 2  ;;  %v6536_v49 = vadd.f32 %v6535_v19, %v6534_v1 }
0x1aec   :  { %v6517_v54 = vadd.f32 %v6516_v61, %v6515_v25  ;;  %v6530_v3 = vrot.slane %v6529_v24, 2 }
0x1aed   :  { %v6524_v55 = vadd.f32 %v6523_v26, %v6522_v43  ;;  %v6537_v44 = vrot.slane %v6536_v49, 2 }
0x1aee   :  { %v6518_v6 = vrot.slane %v6517_v54, 1  ;;  %v6531_v41 = vadd.f32 %v6530_v3, %v6529_v24 }
0x1aef   :  { %v6525_v10 = vrot.slane %v6524_v55, 1  ;;  %v6538_v29 = vadd.f32 %v6537_v44, %v6536_v49 }
0x1af0   :  { %v6519_v33 = vadd.f32 %v6518_v6, %v6517_v54  ;;  %v6532_v12 = vrot.slane %v6531_v41, 1 }
0x1af1   :  { %v6526_v42 = vadd.f32 %v6525_v10, %v6524_v55  ;;  %v6539_v7 = vrot.slane %v6538_v29, 1 }
0x1af2   :  { %v6533_v32 = vadd.f32 %v6532_v12, %v6531_v41  ;;  %7084 = vrcp.f32 %v6519_v33 }
0x1af3   :  { %v6540_v17 = vadd.f32 %v6539_v7, %v6538_v29  ;;  %7086 = vrcp.f32 %v6526_v42 }
0x1af4   :  { %7088 = vrcp.f32 %v6533_v32 }
0x1af5   :  { %7090 = vrcp.f32 %v6540_v17 }
0x1afc   :  { %v7085_v27 = vpop.eup %7084 }
0x1afd   :  { %v7087_v63 = vpop.eup %7086  ;;  %v6542_v5 = vmul.f32 %v7085_v27, %v6509_v14 }
0x1afe   :  { %v7089_v30 = vpop.eup %7088  ;;  %v6544_v9 = vmul.f32 %v7087_v63, %v6510_v39 }
0x1aff   :  { %v7091_v13 = vpop.eup %7090  ;;  %v6546_v36 = vmul.f32 %v7089_v30, %v6511_v8 }
0x1b00   :  { %v6548_v4 = vmul.f32 %v7091_v13, %v6512_v37  ;;  %v6553_v56 = vcombine.low %v6542_v5, %v6544_v9 }
0x1b02   :  { %v6554_v46 = vcombine.low %v6546_v36, %v6548_v4  ;;  %6557 = vst [vmem:[#allocation6] sm:$0xff] %v6553_v56 }
0x1b04   :  { %6558 = vst [vmem:[#allocation6 + $0x8] sm:$0xff] %v6554_v46 }
0x1b05   :  { %7220 = shalt.err (!%p7217_p12)
}
0x1b06   :  { %s7221_s29 = scalar_lea.hbm %s9443_s8, 256 }
0x1b07   :  { %p7222_p13 = scmp.ne.s32.totalorder %s9443_s8, %s7221_s29  ;;  %p7225_p0 = scmp.lt.u32.totalorder %s7221_s29, %s9443_s8 }
0x1b09   :  { %p7227_p1 = pnand %p7225_p0, %p7222_p13 }
0x1b0b   :  { %7230 = shalt.err (!%p7227_p1)
}
0x1b0c   :  { %6568 = dma.vmem_to_hbm [thread:$0]  %s6566_s23, 256, %s9443_s8, [#allocation5]  }
0x1b0d   :  { %7233 = dma.done.wait [#allocation5], 256  }
0x1b0e   :  { %7234 = vsyncadd [#allocation5], 4294967040 }
0x1b0f   :  { %6572 = vsyncpa [#allocation4], 1 }
0x1b10   :  { %6573 = vsyncpa [#allocation5], 1 }

</bundles_post_ra>
